<compile_context>
chip_gen: v5e
topology: v5e:2x2
jax: 0.10.0
libtpu: 0.0.40
codegen_flags: <defaults>
</compile_context>

<pallas_src>
import functools

import numpy as np
import jax
import jax.numpy as jnp
from jax.experimental import pallas as pl
from jax.experimental.pallas import tpu as pltpu


# ----------------------------- small helpers --------------------------------

def _sigmoid(y):
    # Overflow-safe logistic via tanh (EUP).
    return 0.5 * (jnp.tanh(0.5 * y) + 1.0)


def _silu(y):
    return y * _sigmoid(y)


def _bf(x):
    return x.astype(jnp.bfloat16)


def _row(b):
    return b.reshape(1, -1)


def _col(b):
    return b.reshape(-1, 1)


def _block_diag(mats):
    mats = [jnp.asarray(m, jnp.float32) for m in mats]
    rows = sum(m.shape[0] for m in mats)
    cols = sum(m.shape[1] for m in mats)
    out = jnp.zeros((rows, cols), jnp.float32)
    r = c = 0
    for m in mats:
        out = out.at[r:r + m.shape[0], c:c + m.shape[1]].set(m)
        r += m.shape[0]
        c += m.shape[1]
    return out


def _banded_conv_matrix(w, l_in):
    """Fold a Conv1d weight (C_out, C_in, K) into a dense (C_in*L_in, C_out*L_out)
    matrix on channel-major flattened sequences, so the conv is one matmul."""
    c_out, c_in, k = w.shape
    l_out = l_in - k + 1
    sel = np.zeros((k, l_in, l_out), np.float32)
    for kk in range(k):
        for lo in range(l_out):
            sel[kk, lo + kk, lo] = 1.0
    banded = jnp.einsum("oik,klm->ilom", w, jnp.asarray(sel))
    return banded.reshape(c_in * l_in, c_out * l_out)


# ------------------------------ fused kernel --------------------------------

def _make_dnet_kernel(treedef, nb):
    """Fused D_Net forward: all five score branches in one no-grid pallas_call."""

    def kernel(*refs):
        ins = jax.tree_util.tree_unflatten(treedef, refs[:-1])
        out_ref = refs[-1]

        def mm(a, w_ref, b_ref=None):
            y = jnp.dot(a.astype(jnp.bfloat16), w_ref[...],
                        preferred_element_type=jnp.float32)
            return y if b_ref is None else y + b_ref[...]

        def mml(w_ref, a, b_ref):
            return jnp.dot(w_ref[...], a.astype(jnp.bfloat16),
                           preferred_element_type=jnp.float32) + b_ref[...]

        def mmf(a, b):  # f32 structural (0/1) matmuls kept exact
            return jnp.dot(a, b, preferred_element_type=jnp.float32)

        c = ins["c"][...]                                # (nb, dim_c) f32

        # =================== DNet_Core + d_score branch ====================
        # TODO(synk): Cond_Net / Mixer3D / init_weights sources are not in the
        # provided spec; reconstructed as per-axis conditioning MLPs
        # (dim_c->8->16->d) and per-axis Linear->SiLU->Linear mixers
        # (res_conn=False), same reconstruction as the previous version.
        z = ins["z0"][...]                               # (R*nb, A*V), row r*nb+n
        for L in ins["core"]:
            # Six conditioning MLPs fused into one lane-dense block-diag MLP.
            e = _silu(mm(c, L["cw1"], L["cb1"]))
            e = _silu(mm(e, L["cw2"], L["cb2"]))
            e = mm(e, L["cw3"], L["cb3"])                # (nb, 2R+2A+2V)
            eS = mmf(L["S"][...], e)                     # (R*nb, .): row r*nb+n = e[n]
            p_r = jnp.sum(eS * L["maskP"][...], axis=-1, keepdims=True)
            s_r = jnp.sum(eS * L["maskS"][...], axis=-1, keepdims=True)
            pos = p_r + mmf(eS, L["EavP"][...])          # (R*nb, A*V)
            scl = s_r + mmf(eS, L["EavS"][...])
            h = z * (1.0 + scl) + pos                    # z + (pos + z*scale)
            # R-mix: sample-block-diagonal left matmuls (no per-sample loop).
            h = _silu(mml(L["r1w"], h, L["r1b"]))        # (4R*nb, A*V)
            h = mml(L["r2w"], h, L["r2b"])               # (R'*nb, A*V)
            # A-mix / V-mix: Kronecker-expanded right matmuls.
            h = _silu(mm(h, L["a1w"], L["a1b"]))         # (R'*nb, 4A*V)
            h = mm(h, L["a2w"], L["a2b"])                # (R'*nb, A'*V)
            h = _silu(mm(h, L["v1w"], L["v1b"]))         # (R'*nb, A'*4V)
            h = mm(h, L["v2w"], L["v2b"])                # (R'*nb, A'*V')
            z = h

        # d_score head; the (nb, R'*A'*V') flatten is folded into the first
        # matmul (per-r weight blocks, accumulated) -> no slice/concat relayout.
        d = ins["dsc"]
        rp = d["w1"].shape[0]
        y = d["b1"][...]
        for r in range(rp):
            zr = z[r * nb:(r + 1) * nb, :]               # (nb, A'*V')
            y = y + jnp.dot(zr.astype(jnp.bfloat16), d["w1"][r],
                            preferred_element_type=jnp.float32)
        y = _silu(y)
        y = _silu(mm(y, d["w2"], d["b2"]))
        main = _sigmoid(mm(y, d["w3"], d["b3"]))         # (nb, 128) lane-replicated

        # ===================== 3x CR_D_Net (lane-fused) =====================
        cr = ins["cr"]
        z0 = ins["s48"][...] * ins["inv48"][...]         # (nb, R+A+V)
        h = _silu(mm(z0, cr["c1w"], cr["c1b"]))          # banded conv1 (block-diag)
        h = _silu(mm(h, cr["c2w"], cr["c2b"]))           # banded conv2
        h = _silu(mm(h, cr["c3w"], cr["c3b"]))           # banded conv3
        z2 = mm(h, cr["ew"], cr["eb"])                   # (nb, 3*64)
        p = _silu(mm(c, cr["pw1"], cr["pb1"]))
        p = _silu(mm(p, cr["pw2"], cr["pb2"]))
        p = mm(p, cr["pw3"], cr["pb3"])                  # pos emb, 3 branches fused
        s = _silu(mm(c, cr["sw1"], cr["sb1"]))
        s = _silu(mm(s, cr["sw2"], cr["sb2"]))
        s = mm(s, cr["sw3"], cr["sb3"])                  # scale emb
        z3 = p + z2 * (s + 1.0)
        # Per-branch LayerNorm(64) via a block-mean matmul (no reshapes).
        # TODO(synk): LN affine assumed identity (PyTorch default init).
        mu = mmf(z3, cr["bm"][...])
        var = mmf(jnp.square(z3 - mu), cr["bm"][...])
        zn = (z3 - mu) * jax.lax.rsqrt(var + 1e-5)
        t = _silu(mm(zn, cr["h1w"], cr["h1b"]))
        t = _silu(mm(t, cr["h2w"], cr["h2b"]))
        crw = _sigmoid(mm(t, cr["fw"], cr["fb"]))        # (nb, 3*128), lane-replicated

        # ========================= Total_E_D_Net ===========================
        tt = ins["tot"]
        x0 = ins["xtot"][...] * ins["invtot"][...]       # (nb, 1)
        u = _silu(mm(x0, tt["w1x"]) + mm(c, tt["w1c"]) + tt["b1"][...])
        u = _silu(mm(u, tt["w2"], tt["b2"]))
        totw = _sigmoid(mm(u, tt["w3"], tt["b3"]))       # (nb, 128) lane-replicated

        # ====================== lane-dense output slab ======================
        out_ref[0:nb, :] = main
        for g in range(3):
            out_ref[(g + 1) * nb:(g + 2) * nb, :] = crw[:, g * 128:(g + 1) * 128]
        out_ref[4 * nb:5 * nb, :] = totw

    return kernel


# --------------------- host-side one-time weight plumbing -------------------

def _prep_core_layer(layer, nb):
    pos_r, pos_a, pos_v = layer["cond"]["pos"]
    scl_r, scl_a, scl_v = layer["cond"]["scale"]
    mix_r, mix_a, mix_v = layer["mixer"]
    R = pos_r[-1]["w"].shape[1]
    A = pos_a[-1]["w"].shape[1]
    V = pos_v[-1]["w"].shape[1]
    Ap = mix_a[1]["w"].shape[1]
    width = 2 * R + 2 * A + 2 * V

    # Fused conditioning MLP, output lane layout: [pr | sr | pa | pv | sa | sv].
    nets = [pos_r, scl_r, pos_a, pos_v, scl_a, scl_v]
    cw1 = jnp.concatenate([m[0]["w"] for m in nets], axis=1)
    cb1 = jnp.concatenate([m[0]["b"] for m in nets])
    cw2 = _block_diag([m[1]["w"] for m in nets])
    cb2 = jnp.concatenate([m[1]["b"] for m in nets])
    cw3 = _block_diag([m[2]["w"] for m in nets])
    cb3 = jnp.concatenate([m[2]["b"] for m in nets])

    # Structural 0/1 expansion matrices (kept f32).
    S = np.kron(np.ones((R, 1), np.float32), np.eye(nb, dtype=np.float32))
    rows = np.arange(R * nb)
    rr = np.repeat(np.arange(R), nb)
    maskP = np.zeros((R * nb, width), np.float32)
    maskS = np.zeros((R * nb, width), np.float32)
    maskP[rows, rr] = 1.0
    maskS[rows, R + rr] = 1.0
    Ea = np.kron(np.eye(A, dtype=np.float32), np.ones((1, V), np.float32))
    Ev = np.tile(np.eye(V, dtype=np.float32), (1, A))
    EavP = np.zeros((width, A * V), np.float32)
    EavS = np.zeros((width, A * V), np.float32)
    EavP[2 * R:2 * R + A] = Ea
    EavP[2 * R + A:2 * R + A + V] = Ev
    EavS[2 * R + A + V:2 * R + 2 * A + V] = Ea
    EavS[2 * R + 2 * A + V:] = Ev

    eye_n = np.eye(nb, dtype=np.float32)
    eye_v = np.eye(V, dtype=np.float32)
    eye_ap = np.eye(Ap, dtype=np.float32)

    return {
        "cw1": _bf(cw1), "cb1": _row(cb1),
        "cw2": _bf(cw2), "cb2": _row(cb2),
        "cw3": _bf(cw3), "cb3": _row(cb3),
        "S": jnp.asarray(S),
        "maskP": jnp.asarray(maskP), "maskS": jnp.asarray(maskS),
        "EavP": jnp.asarray(EavP), "EavS": jnp.asarray(EavS),
        "r1w": _bf(jnp.kron(mix_r[0]["w"].T, eye_n)),
        "r1b": _col(jnp.repeat(mix_r[0]["b"], nb)),
        "r2w": _bf(jnp.kron(mix_r[1]["w"].T, eye_n)),
        "r2b": _col(jnp.repeat(mix_r[1]["b"], nb)),
        "a1w": _bf(jnp.kron(mix_a[0]["w"], eye_v)),
        "a1b": _row(jnp.repeat(mix_a[0]["b"], V)),
        "a2w": _bf(jnp.kron(mix_a[1]["w"], eye_v)),
        "a2b": _row(jnp.repeat(mix_a[1]["b"], V)),
        "v1w": _bf(jnp.kron(eye_ap, mix_v[0]["w"])),
        "v1b": _row(jnp.tile(mix_v[0]["b"], Ap)),
        "v2w": _bf(jnp.kron(eye_ap, mix_v[1]["w"])),
        "v2b": _row(jnp.tile(mix_v[1]["b"], Ap)),
    }


def prepare_weights(params, nb, dim_xs):
    """One-time weight prep (kron expansion, banded conv folding, block-diag
    fusion, bf16 casting).  Hoisted out of the per-call path."""
    prep = {"core": [_prep_core_layer(l, nb) for l in params["core"]]}

    mix = params["core"][-1]["mixer"]
    r_out = mix[0][1]["w"].shape[1]
    av_out = mix[1][1]["w"].shape[1] * mix[2][1]["w"].shape[1]
    dsc = params["d_score"]
    prep["dsc"] = {
        "w1": _bf(dsc[0]["w"].reshape(r_out, av_out, -1)),
        "b1": _row(dsc[0]["b"]),
        "w2": _bf(dsc[1]["w"]), "b2": _row(dsc[1]["b"]),
        "w3": _bf(jnp.tile(dsc[2]["w"], (1, 128))),
        "b3": jnp.full((1, 128), dsc[2]["b"][0], jnp.float32),
    }

    conv_w = [[], [], []]
    conv_b = [[], [], []]
    enc_w, enc_b = [], []
    pw = [[], [], []]; pb = [[], [], []]
    sw = [[], [], []]; sb = [[], [], []]
    hw = [[], []]; hb = [[], []]
    fw_blk, fb_blk = [], []
    for g, br in enumerate(params["cr"]):
        l_in = dim_xs[g]
        for i, conv in enumerate(br["conv"]):
            l_out = l_in - conv["w"].shape[-1] + 1
            conv_w[i].append(_banded_conv_matrix(conv["w"], l_in))
            conv_b[i].append(jnp.repeat(conv["b"], l_out))
            l_in = l_out
        enc_w.append(br["enc"]["w"])
        enc_b.append(br["enc"]["b"])
        for i in range(3):
            pw[i].append(br["pos"][i]["w"]);   pb[i].append(br["pos"][i]["b"])
            sw[i].append(br["scale"][i]["w"]); sb[i].append(br["scale"][i]["b"])
        hw[0].append(br["score"][0]["w"]); hb[0].append(br["score"][0]["b"])
        hw[1].append(br["score"][1]["w"]); hb[1].append(br["score"][1]["b"])
        fw_blk.append(jnp.tile(br["score"][2]["w"], (1, 128)))
        fb_blk.append(jnp.full((128,), br["score"][2]["b"][0], jnp.float32))
    hid = params["cr"][0]["enc"]["w"].shape[1]
    prep["cr"] = {
        "c1w": _bf(_block_diag(conv_w[0])), "c1b": _row(jnp.concatenate(conv_b[0])),
        "c2w": _bf(_block_diag(conv_w[1])), "c2b": _row(jnp.concatenate(conv_b[1])),
        "c3w": _bf(_block_diag(conv_w[2])), "c3b": _row(jnp.concatenate(conv_b[2])),
        "ew": _bf(_block_diag(enc_w)), "eb": _row(jnp.concatenate(enc_b)),
        "pw1": _bf(jnp.concatenate(pw[0], axis=1)), "pb1": _row(jnp.concatenate(pb[0])),
        "pw2": _bf(_block_diag(pw[1])), "pb2": _row(jnp.concatenate(pb[1])),
        "pw3": _bf(_block_diag(pw[2])), "pb3": _row(jnp.concatenate(pb[2])),
        "sw1": _bf(jnp.concatenate(sw[0], axis=1)), "sb1": _row(jnp.concatenate(sb[0])),
        "sw2": _bf(_block_diag(sw[1])), "sb2": _row(jnp.concatenate(sb[1])),
        "sw3": _bf(_block_diag(sw[2])), "sb3": _row(jnp.concatenate(sb[2])),
        "bm": jnp.asarray(np.kron(np.eye(3, dtype=np.float32),
                                  np.full((hid, hid), 1.0 / hid, np.float32))),
        "h1w": _bf(_block_diag(hw[0])), "h1b": _row(jnp.concatenate(hb[0])),
        "h2w": _bf(_block_diag(hw[1])), "h2b": _row(jnp.concatenate(hb[1])),
        "fw": _bf(_block_diag(fw_blk)), "fb": _row(jnp.concatenate(fb_blk)),
    }

    tp = params["total"]
    prep["tot"] = {
        "w1x": _bf(tp[0]["w"][0:1, :]), "w1c": _bf(tp[0]["w"][1:, :]),
        "b1": _row(tp[0]["b"]),
        "w2": _bf(tp[1]["w"]), "b2": _row(tp[1]["b"]),
        "w3": _bf(jnp.tile(tp[2]["w"], (1, 128))),
        "b3": jnp.full((1, 128), tp[2]["b"][0], jnp.float32),
    }
    return prep


# ------------------------------- forward -------------------------------------

def d_net_forward(prep, x, c, data_scales, moment=1):
    nb, R, A, V = x.shape
    xm = x if moment == 1 else x ** moment
    # Axis sums consumed by the CR / Total branches (wrapper side; removes two
    # transposed copies of x and three in-kernel cross-lane reductions).
    s_r = jnp.sum(xm, axis=(2, 3))
    s_a = jnp.sum(xm, axis=(1, 3))
    s_v = jnp.sum(xm, axis=(1, 2))
    s_cat = jnp.concatenate([s_r, s_a, s_v], axis=1)             # (nb, R+A+V)
    x_tot = jnp.sum(xm, axis=(1, 2, 3)).reshape(nb, 1)
    inv = 1.0 / data_scales                                      # reciprocal, mult in kernel
    inv_row = jnp.concatenate([jnp.full((R,), inv[0], jnp.float32),
                               jnp.full((A,), inv[1], jnp.float32),
                               jnp.full((V,), inv[2], jnp.float32)]).reshape(1, -1)
    inv_tot = inv[3].reshape(1, 1)
    # Core mixer input, rows r*nb+n, lanes a*V+v.
    z0 = jnp.transpose(x, (1, 0, 2, 3)).reshape(R * nb, A * V)

    ins = dict(prep)
    ins.update({"z0": z0, "c": c, "s48": s_cat, "inv48": inv_row,
                "xtot": x_tot, "invtot": inv_tot})
    flat, treedef = jax.tree_util.tree_flatten(ins)
    kernel = _make_dnet_kernel(treedef, nb)
    out = pl.pallas_call(
        kernel,
        out_shape=jax.ShapeDtypeStruct((5 * nb, 128), jnp.float32),
        in_specs=[pl.BlockSpec(memory_space=pltpu.MemorySpace.VMEM)] * len(flat),
        out_specs=pl.BlockSpec(memory_space=pltpu.MemorySpace.VMEM),
    )(*flat)
    # TODO(synk): on v7x, split the independent score branches across the two
    # TensorCores with a parallel grid axis / core_map; single-core here.
    return out[:, :1]                                            # (5*nb, 1)


# ---------------------------- parameter init ---------------------------------
# TODO(synk): init_weights(gain) from the original repo is not provided;
# parameters are initialized deterministically from PRNGKey instead.

class KeyGen:
    def __init__(self, key):
        self.key = key

    def __call__(self):
        self.key, sub = jax.random.split(self.key)
        return sub


def init_linear(kg, fan_in, fan_out):
    w = jax.random.normal(kg(), (fan_in, fan_out), jnp.float32) / np.sqrt(fan_in)
    b = 0.01 * jax.random.normal(kg(), (fan_out,), jnp.float32)
    return {"w": w, "b": b}


def init_mlp(kg, dims):
    return [init_linear(kg, dims[i], dims[i + 1]) for i in range(len(dims) - 1)]


def init_conv1d(kg, c_in, c_out, k=5):
    w = jax.random.normal(kg(), (c_out, c_in, k), jnp.float32) / np.sqrt(c_in * k)
    b = 0.01 * jax.random.normal(kg(), (c_out,), jnp.float32)
    return {"w": w, "b": b}


def init_params(key, dim_r, dim_a, dim_v, dim_c, mlp_ratio):
    kg = KeyGen(key)
    core = []
    for i in range(len(dim_r) - 1):
        core.append({
            "cond": {
                "pos": [init_mlp(kg, [dim_c, 8, 16, d])
                        for d in (dim_r[i], dim_a[i], dim_v[i])],
                "scale": [init_mlp(kg, [dim_c, 8, 16, d])
                          for d in (dim_r[i], dim_a[i], dim_v[i])],
            },
            "mixer": [
                init_mlp(kg, [dim_r[i], dim_r[i] * mlp_ratio, dim_r[i + 1]]),
                init_mlp(kg, [dim_a[i], dim_a[i] * mlp_ratio, dim_a[i + 1]]),
                init_mlp(kg, [dim_v[i], dim_v[i] * mlp_ratio, dim_v[i + 1]]),
            ],
        })
    d_model = dim_r[-1] * dim_a[-1] * dim_v[-1]
    cr = []
    for dim_x in (dim_r[0], dim_a[0], dim_v[0]):
        cr.append({
            "conv": [init_conv1d(kg, 1, 4), init_conv1d(kg, 4, 4), init_conv1d(kg, 4, 4)],
            "enc": init_linear(kg, (dim_x - 4 * 3) * 4, 64),
            "pos": init_mlp(kg, [dim_c, 64, 64, 64]),
            "scale": init_mlp(kg, [dim_c, 64, 64, 64]),
            "score": init_mlp(kg, [64, 64, 64, 1]),
        })
    return {
        "core": core,
        "d_score": init_mlp(kg, [d_model, 256, 256, 1]),
        "cr": cr,
        "total": init_mlp(kg, [dim_c + 1, 128, 128, 1]),
    }


# --------------------------------- main ---------------------------------------

if __name__ == "__main__":
    dim_r, dim_a, dim_v = [16, 8], [16, 8], [16, 8]
    dim_c, mlp_ratio, moment = 4, 4, 1          # cr_gan = 1
    nb = 2

    key = jax.random.PRNGKey(0)
    k_x, k_c, k_p = jax.random.split(key, 3)
    x_in = jax.random.normal(k_x, (nb, dim_r[0], dim_a[0], dim_v[0]), jnp.float32)
    c_in = jax.random.normal(k_c, (nb, dim_c), jnp.float32)
    params = init_params(k_p, dim_r, dim_a, dim_v, dim_c, mlp_ratio)

    # data_scale buffers start at 0 in __init__ (would divide by zero); emulate
    # update_scale_coef() deterministically on the example batch.
    xm = x_in ** moment
    data_scales = jnp.stack([
        jnp.mean(jnp.sum(xm, axis=(2, 3))),
        jnp.mean(jnp.sum(xm, axis=(1, 3))),
        jnp.mean(jnp.sum(xm, axis=(1, 2))),
        jnp.mean(jnp.sum(xm, axis=(1, 2, 3))),
    ])

    # One-time weight/layout plumbing, hoisted out of the per-call path.
    prep = prepare_weights(params, nb, (dim_r[0], dim_a[0], dim_v[0]))

    fwd = jax.jit(functools.partial(d_net_forward, moment=moment))
    out = jax.block_until_ready(fwd(prep, x_in, c_in, data_scales))

    assert out.shape == (5 * nb, 1), out.shape
    assert bool(jnp.all(jnp.isfinite(out)))
    print("KERNEL_OK")
</pallas_src>

<mosaic_0001>
module attributes {stable_mosaic.version = 11 : i64} {
  func.func @kernel(%arg0: memref<2x4xf32, #tpu.memory_space<vmem>>, %arg1: memref<96x256xf32, #tpu.memory_space<vmem>>, %arg2: memref<96x256xf32, #tpu.memory_space<vmem>>, %arg3: memref<32x2xf32, #tpu.memory_space<vmem>>, %arg4: memref<1x1024xf32, #tpu.memory_space<vmem>>, %arg5: memref<256x1024xbf16, #tpu.memory_space<vmem>>, %arg6: memref<1x128xf32, #tpu.memory_space<vmem>>, %arg7: memref<1024x128xbf16, #tpu.memory_space<vmem>>, %arg8: memref<1x48xf32, #tpu.memory_space<vmem>>, %arg9: memref<1x96xf32, #tpu.memory_space<vmem>>, %arg10: memref<1x96xf32, #tpu.memory_space<vmem>>, %arg11: memref<4x48xbf16, #tpu.memory_space<vmem>>, %arg12: memref<48x96xbf16, #tpu.memory_space<vmem>>, %arg13: memref<96x96xbf16, #tpu.memory_space<vmem>>, %arg14: memref<32x96xf32, #tpu.memory_space<vmem>>, %arg15: memref<32x96xf32, #tpu.memory_space<vmem>>, %arg16: memref<128x1xf32, #tpu.memory_space<vmem>>, %arg17: memref<128x32xbf16, #tpu.memory_space<vmem>>, %arg18: memref<16x1xf32, #tpu.memory_space<vmem>>, %arg19: memref<16x128xbf16, #tpu.memory_space<vmem>>, %arg20: memref<1x512xf32, #tpu.memory_space<vmem>>, %arg21: memref<128x512xbf16, #tpu.memory_space<vmem>>, %arg22: memref<1x64xf32, #tpu.memory_space<vmem>>, %arg23: memref<512x64xbf16, #tpu.memory_space<vmem>>, %arg24: memref<192x192xf32, #tpu.memory_space<vmem>>, %arg25: memref<1x144xf32, #tpu.memory_space<vmem>>, %arg26: memref<48x144xbf16, #tpu.memory_space<vmem>>, %arg27: memref<1x96xf32, #tpu.memory_space<vmem>>, %arg28: memref<144x96xbf16, #tpu.memory_space<vmem>>, %arg29: memref<1x48xf32, #tpu.memory_space<vmem>>, %arg30: memref<96x48xbf16, #tpu.memory_space<vmem>>, %arg31: memref<1x192xf32, #tpu.memory_space<vmem>>, %arg32: memref<48x192xbf16, #tpu.memory_space<vmem>>, %arg33: memref<1x384xf32, #tpu.memory_space<vmem>>, %arg34: memref<192x384xbf16, #tpu.memory_space<vmem>>, %arg35: memref<1x192xf32, #tpu.memory_space<vmem>>, %arg36: memref<192x192xbf16, #tpu.memory_space<vmem>>, %arg37: memref<1x192xf32, #tpu.memory_space<vmem>>, %arg38: memref<192x192xbf16, #tpu.memory_space<vmem>>, %arg39: memref<1x192xf32, #tpu.memory_space<vmem>>, %arg40: memref<1x192xf32, #tpu.memory_space<vmem>>, %arg41: memref<1x192xf32, #tpu.memory_space<vmem>>, %arg42: memref<4x192xbf16, #tpu.memory_space<vmem>>, %arg43: memref<192x192xbf16, #tpu.memory_space<vmem>>, %arg44: memref<192x192xbf16, #tpu.memory_space<vmem>>, %arg45: memref<1x192xf32, #tpu.memory_space<vmem>>, %arg46: memref<1x192xf32, #tpu.memory_space<vmem>>, %arg47: memref<1x192xf32, #tpu.memory_space<vmem>>, %arg48: memref<4x192xbf16, #tpu.memory_space<vmem>>, %arg49: memref<192x192xbf16, #tpu.memory_space<vmem>>, %arg50: memref<192x192xbf16, #tpu.memory_space<vmem>>, %arg51: memref<1x256xf32, #tpu.memory_space<vmem>>, %arg52: memref<1x256xf32, #tpu.memory_space<vmem>>, %arg53: memref<1x128xf32, #tpu.memory_space<vmem>>, %arg54: memref<8x64x256xbf16, #tpu.memory_space<vmem>>, %arg55: memref<256x256xbf16, #tpu.memory_space<vmem>>, %arg56: memref<256x128xbf16, #tpu.memory_space<vmem>>, %arg57: memref<1x48xf32, #tpu.memory_space<vmem>>, %arg58: memref<1x1xf32, #tpu.memory_space<vmem>>, %arg59: memref<2x48xf32, #tpu.memory_space<vmem>>, %arg60: memref<1x128xf32, #tpu.memory_space<vmem>>, %arg61: memref<1x128xf32, #tpu.memory_space<vmem>>, %arg62: memref<1x128xf32, #tpu.memory_space<vmem>>, %arg63: memref<4x128xbf16, #tpu.memory_space<vmem>>, %arg64: memref<1x128xbf16, #tpu.memory_space<vmem>>, %arg65: memref<128x128xbf16, #tpu.memory_space<vmem>>, %arg66: memref<128x128xbf16, #tpu.memory_space<vmem>>, %arg67: memref<2x1xf32, #tpu.memory_space<vmem>>, %arg68: memref<32x256xf32, #tpu.memory_space<vmem>>, %arg69: memref<10x128xf32, #tpu.memory_space<vmem>>) attributes {dimension_semantics = [], scalar_prefetch = 0 : i64, scratch_operands = 0 : i64, tpu.core_type = #tpu.core_type<tc>} {
    %c0 = arith.constant 0 : index
    %c0_0 = arith.constant 0 : index
    %0 = vector.load %arg0[%c0, %c0_0] : memref<2x4xf32, #tpu.memory_space<vmem>>, vector<2x4xf32>
    %c0_1 = arith.constant 0 : index
    %c0_2 = arith.constant 0 : index
    %1 = vector.load %arg68[%c0_1, %c0_2] : memref<32x256xf32, #tpu.memory_space<vmem>>, vector<32x256xf32>
    %2 = arith.truncf %0 : vector<2x4xf32> to vector<2x4xbf16>
    %c0_3 = arith.constant 0 : index
    %c0_4 = arith.constant 0 : index
    %3 = vector.load %arg11[%c0_3, %c0_4] : memref<4x48xbf16, #tpu.memory_space<vmem>>, vector<4x48xbf16>
    %cst = arith.constant dense<0.000000e+00> : vector<2x48xf32>
    %4 = tpu.matmul %2, %3, %cst {dimension_numbers = #tpu.dot_dimension_numbers<[1], [0], [0], [1], [0, 0, 1, 1], [], []>} : vector<2x4xbf16>, vector<4x48xbf16>, vector<2x48xf32> -> vector<2x48xf32>
    %c0_5 = arith.constant 0 : index
    %c0_6 = arith.constant 0 : index
    %5 = vector.load %arg8[%c0_5, %c0_6] : memref<1x48xf32, #tpu.memory_space<vmem>>, vector<1x48xf32>
    %6 = vector.broadcast %5 : vector<1x48xf32> to vector<2x48xf32>
    %7 = arith.addf %4, %6 : vector<2x48xf32>
    %cst_7 = arith.constant 5.000000e-01 : f32
    %8 = vector.broadcast %cst_7 : f32 to vector<2x48xf32>
    %9 = arith.mulf %8, %7 : vector<2x48xf32>
    %10 = math.tanh %9 : vector<2x48xf32>
    %cst_8 = arith.constant 1.000000e+00 : f32
    %11 = vector.broadcast %cst_8 : f32 to vector<2x48xf32>
    %12 = arith.addf %10, %11 : vector<2x48xf32>
    %cst_9 = arith.constant 5.000000e-01 : f32
    %13 = vector.broadcast %cst_9 : f32 to vector<2x48xf32>
    %14 = arith.mulf %13, %12 : vector<2x48xf32>
    %15 = arith.mulf %7, %14 : vector<2x48xf32>
    %16 = arith.truncf %15 : vector<2x48xf32> to vector<2x48xbf16>
    %c0_10 = arith.constant 0 : index
    %c0_11 = arith.constant 0 : index
    %17 = vector.load %arg12[%c0_10, %c0_11] : memref<48x96xbf16, #tpu.memory_space<vmem>>, vector<48x96xbf16>
    %cst_12 = arith.constant dense<0.000000e+00> : vector<2x96xf32>
    %18 = tpu.matmul %16, %17, %cst_12 {dimension_numbers = #tpu.dot_dimension_numbers<[1], [0], [0], [1], [0, 0, 1, 1], [], []>} : vector<2x48xbf16>, vector<48x96xbf16>, vector<2x96xf32> -> vector<2x96xf32>
    %c0_13 = arith.constant 0 : index
    %c0_14 = arith.constant 0 : index
    %19 = vector.load %arg9[%c0_13, %c0_14] : memref<1x96xf32, #tpu.memory_space<vmem>>, vector<1x96xf32>
    %20 = vector.broadcast %19 : vector<1x96xf32> to vector<2x96xf32>
    %21 = arith.addf %18, %20 : vector<2x96xf32>
    %cst_15 = arith.constant 5.000000e-01 : f32
    %22 = vector.broadcast %cst_15 : f32 to vector<2x96xf32>
    %23 = arith.mulf %22, %21 : vector<2x96xf32>
    %24 = math.tanh %23 : vector<2x96xf32>
    %cst_16 = arith.constant 1.000000e+00 : f32
    %25 = vector.broadcast %cst_16 : f32 to vector<2x96xf32>
    %26 = arith.addf %24, %25 : vector<2x96xf32>
    %cst_17 = arith.constant 5.000000e-01 : f32
    %27 = vector.broadcast %cst_17 : f32 to vector<2x96xf32>
    %28 = arith.mulf %27, %26 : vector<2x96xf32>
    %29 = arith.mulf %21, %28 : vector<2x96xf32>
    %30 = arith.truncf %29 : vector<2x96xf32> to vector<2x96xbf16>
    %c0_18 = arith.constant 0 : index
    %c0_19 = arith.constant 0 : index
    %31 = vector.load %arg13[%c0_18, %c0_19] : memref<96x96xbf16, #tpu.memory_space<vmem>>, vector<96x96xbf16>
    %cst_20 = arith.constant dense<0.000000e+00> : vector<2x96xf32>
    %32 = tpu.matmul %30, %31, %cst_20 {dimension_numbers = #tpu.dot_dimension_numbers<[1], [0], [0], [1], [0, 0, 1, 1], [], []>} : vector<2x96xbf16>, vector<96x96xbf16>, vector<2x96xf32> -> vector<2x96xf32>
    %c0_21 = arith.constant 0 : index
    %c0_22 = arith.constant 0 : index
    %33 = vector.load %arg10[%c0_21, %c0_22] : memref<1x96xf32, #tpu.memory_space<vmem>>, vector<1x96xf32>
    %34 = vector.broadcast %33 : vector<1x96xf32> to vector<2x96xf32>
    %35 = arith.addf %32, %34 : vector<2x96xf32>
    %c0_23 = arith.constant 0 : index
    %c0_24 = arith.constant 0 : index
    %36 = vector.load %arg3[%c0_23, %c0_24] : memref<32x2xf32, #tpu.memory_space<vmem>>, vector<32x2xf32>
    %cst_25 = arith.constant dense<0.000000e+00> : vector<32x96xf32>
    %37 = tpu.matmul %36, %35, %cst_25 {dimension_numbers = #tpu.dot_dimension_numbers<[1], [0], [0], [1], [0, 0, 1, 1], [], []>} : vector<32x2xf32>, vector<2x96xf32>, vector<32x96xf32> -> vector<32x96xf32>
    %c0_26 = arith.constant 0 : index
    %c0_27 = arith.constant 0 : index
    %38 = vector.load %arg14[%c0_26, %c0_27] : memref<32x96xf32, #tpu.memory_space<vmem>>, vector<32x96xf32>
    %39 = arith.mulf %37, %38 : vector<32x96xf32>
    %cst_28 = arith.constant dense<0.000000e+00> : vector<32xf32>
    %40 = vector.multi_reduction <add>, %39, %cst_28 [1] : vector<32x96xf32> to vector<32xf32>
    %41 = vector.shape_cast %40 : vector<32xf32> to vector<32x1xf32>
    %c0_29 = arith.constant 0 : index
    %c0_30 = arith.constant 0 : index
    %42 = vector.load %arg15[%c0_29, %c0_30] : memref<32x96xf32, #tpu.memory_space<vmem>>, vector<32x96xf32>
    %43 = arith.mulf %37, %42 : vector<32x96xf32>
    %cst_31 = arith.constant dense<0.000000e+00> : vector<32xf32>
    %44 = vector.multi_reduction <add>, %43, %cst_31 [1] : vector<32x96xf32> to vector<32xf32>
    %45 = vector.shape_cast %44 : vector<32xf32> to vector<32x1xf32>
    %c0_32 = arith.constant 0 : index
    %c0_33 = arith.constant 0 : index
    %46 = vector.load %arg1[%c0_32, %c0_33] : memref<96x256xf32, #tpu.memory_space<vmem>>, vector<96x256xf32>
    %cst_34 = arith.constant dense<0.000000e+00> : vector<32x256xf32>
    %47 = tpu.matmul %37, %46, %cst_34 {dimension_numbers = #tpu.dot_dimension_numbers<[1], [0], [0], [1], [0, 0, 1, 1], [], []>} : vector<32x96xf32>, vector<96x256xf32>, vector<32x256xf32> -> vector<32x256xf32>
    %48 = vector.broadcast %41 : vector<32x1xf32> to vector<32x256xf32>
    %49 = arith.addf %48, %47 : vector<32x256xf32>
    %c0_35 = arith.constant 0 : index
    %c0_36 = arith.constant 0 : index
    %50 = vector.load %arg2[%c0_35, %c0_36] : memref<96x256xf32, #tpu.memory_space<vmem>>, vector<96x256xf32>
    %cst_37 = arith.constant dense<0.000000e+00> : vector<32x256xf32>
    %51 = tpu.matmul %37, %50, %cst_37 {dimension_numbers = #tpu.dot_dimension_numbers<[1], [0], [0], [1], [0, 0, 1, 1], [], []>} : vector<32x96xf32>, vector<96x256xf32>, vector<32x256xf32> -> vector<32x256xf32>
    %52 = vector.broadcast %45 : vector<32x1xf32> to vector<32x256xf32>
    %53 = arith.addf %52, %51 : vector<32x256xf32>
    %cst_38 = arith.constant 1.000000e+00 : f32
    %54 = vector.broadcast %cst_38 : f32 to vector<32x256xf32>
    %55 = arith.addf %54, %53 : vector<32x256xf32>
    %56 = arith.mulf %1, %55 : vector<32x256xf32>
    %57 = arith.addf %56, %49 : vector<32x256xf32>
    %c0_39 = arith.constant 0 : index
    %c0_40 = arith.constant 0 : index
    %58 = vector.load %arg17[%c0_39, %c0_40] : memref<128x32xbf16, #tpu.memory_space<vmem>>, vector<128x32xbf16>
    %59 = arith.truncf %57 : vector<32x256xf32> to vector<32x256xbf16>
    %cst_41 = arith.constant dense<0.000000e+00> : vector<128x256xf32>
    %60 = tpu.matmul %58, %59, %cst_41 {dimension_numbers = #tpu.dot_dimension_numbers<[1], [0], [0], [1], [0, 0, 1, 1], [], []>} : vector<128x32xbf16>, vector<32x256xbf16>, vector<128x256xf32> -> vector<128x256xf32>
    %c0_42 = arith.constant 0 : index
    %c0_43 = arith.constant 0 : index
    %61 = vector.load %arg16[%c0_42, %c0_43] : memref<128x1xf32, #tpu.memory_space<vmem>>, vector<128x1xf32>
    %62 = vector.broadcast %61 : vector<128x1xf32> to vector<128x256xf32>
    %63 = arith.addf %60, %62 : vector<128x256xf32>
    %cst_44 = arith.constant 5.000000e-01 : f32
    %64 = vector.broadcast %cst_44 : f32 to vector<128x256xf32>
    %65 = arith.mulf %64, %63 : vector<128x256xf32>
    %66 = math.tanh %65 : vector<128x256xf32>
    %cst_45 = arith.constant 1.000000e+00 : f32
    %67 = vector.broadcast %cst_45 : f32 to vector<128x256xf32>
    %68 = arith.addf %66, %67 : vector<128x256xf32>
    %cst_46 = arith.constant 5.000000e-01 : f32
    %69 = vector.broadcast %cst_46 : f32 to vector<128x256xf32>
    %70 = arith.mulf %69, %68 : vector<128x256xf32>
    %71 = arith.mulf %63, %70 : vector<128x256xf32>
    %c0_47 = arith.constant 0 : index
    %c0_48 = arith.constant 0 : index
    %72 = vector.load %arg19[%c0_47, %c0_48] : memref<16x128xbf16, #tpu.memory_space<vmem>>, vector<16x128xbf16>
    %73 = arith.truncf %71 : vector<128x256xf32> to vector<128x256xbf16>
    %cst_49 = arith.constant dense<0.000000e+00> : vector<16x256xf32>
    %74 = tpu.matmul %72, %73, %cst_49 {dimension_numbers = #tpu.dot_dimension_numbers<[1], [0], [0], [1], [0, 0, 1, 1], [], []>} : vector<16x128xbf16>, vector<128x256xbf16>, vector<16x256xf32> -> vector<16x256xf32>
    %c0_50 = arith.constant 0 : index
    %c0_51 = arith.constant 0 : index
    %75 = vector.load %arg18[%c0_50, %c0_51] : memref<16x1xf32, #tpu.memory_space<vmem>>, vector<16x1xf32>
    %76 = vector.broadcast %75 : vector<16x1xf32> to vector<16x256xf32>
    %77 = arith.addf %74, %76 : vector<16x256xf32>
    %78 = arith.truncf %77 : vector<16x256xf32> to vector<16x256xbf16>
    %c0_52 = arith.constant 0 : index
    %c0_53 = arith.constant 0 : index
    %79 = vector.load %arg5[%c0_52, %c0_53] : memref<256x1024xbf16, #tpu.memory_space<vmem>>, vector<256x1024xbf16>
    %cst_54 = arith.constant dense<0.000000e+00> : vector<16x1024xf32>
    %80 = tpu.matmul %78, %79, %cst_54 {dimension_numbers = #tpu.dot_dimension_numbers<[1], [0], [0], [1], [0, 0, 1, 1], [], []>} : vector<16x256xbf16>, vector<256x1024xbf16>, vector<16x1024xf32> -> vector<16x1024xf32>
    %c0_55 = arith.constant 0 : index
    %c0_56 = arith.constant 0 : index
    %81 = vector.load %arg4[%c0_55, %c0_56] : memref<1x1024xf32, #tpu.memory_space<vmem>>, vector<1x1024xf32>
    %82 = vector.broadcast %81 : vector<1x1024xf32> to vector<16x1024xf32>
    %83 = arith.addf %80, %82 : vector<16x1024xf32>
    %cst_57 = arith.constant 5.000000e-01 : f32
    %84 = vector.broadcast %cst_57 : f32 to vector<16x1024xf32>
    %85 = arith.mulf %84, %83 : vector<16x1024xf32>
    %86 = math.tanh %85 : vector<16x1024xf32>
    %cst_58 = arith.constant 1.000000e+00 : f32
    %87 = vector.broadcast %cst_58 : f32 to vector<16x1024xf32>
    %88 = arith.addf %86, %87 : vector<16x1024xf32>
    %cst_59 = arith.constant 5.000000e-01 : f32
    %89 = vector.broadcast %cst_59 : f32 to vector<16x1024xf32>
    %90 = arith.mulf %89, %88 : vector<16x1024xf32>
    %91 = arith.mulf %83, %90 : vector<16x1024xf32>
    %92 = arith.truncf %91 : vector<16x1024xf32> to vector<16x1024xbf16>
    %c0_60 = arith.constant 0 : index
    %c0_61 = arith.constant 0 : index
    %93 = vector.load %arg7[%c0_60, %c0_61] : memref<1024x128xbf16, #tpu.memory_space<vmem>>, vector<1024x128xbf16>
    %cst_62 = arith.constant dense<0.000000e+00> : vector<16x128xf32>
    %94 = tpu.matmul %92, %93, %cst_62 {dimension_numbers = #tpu.dot_dimension_numbers<[1], [0], [0], [1], [0, 0, 1, 1], [], []>} : vector<16x1024xbf16>, vector<1024x128xbf16>, vector<16x128xf32> -> vector<16x128xf32>
    %c0_63 = arith.constant 0 : index
    %c0_64 = arith.constant 0 : index
    %95 = vector.load %arg6[%c0_63, %c0_64] : memref<1x128xf32, #tpu.memory_space<vmem>>, vector<1x128xf32>
    %96 = vector.broadcast %95 : vector<1x128xf32> to vector<16x128xf32>
    %97 = arith.addf %94, %96 : vector<16x128xf32>
    %98 = arith.truncf %97 : vector<16x128xf32> to vector<16x128xbf16>
    %c0_65 = arith.constant 0 : index
    %c0_66 = arith.constant 0 : index
    %99 = vector.load %arg21[%c0_65, %c0_66] : memref<128x512xbf16, #tpu.memory_space<vmem>>, vector<128x512xbf16>
    %cst_67 = arith.constant dense<0.000000e+00> : vector<16x512xf32>
    %100 = tpu.matmul %98, %99, %cst_67 {dimension_numbers = #tpu.dot_dimension_numbers<[1], [0], [0], [1], [0, 0, 1, 1], [], []>} : vector<16x128xbf16>, vector<128x512xbf16>, vector<16x512xf32> -> vector<16x512xf32>
    %c0_68 = arith.constant 0 : index
    %c0_69 = arith.constant 0 : index
    %101 = vector.load %arg20[%c0_68, %c0_69] : memref<1x512xf32, #tpu.memory_space<vmem>>, vector<1x512xf32>
    %102 = vector.broadcast %101 : vector<1x512xf32> to vector<16x512xf32>
    %103 = arith.addf %100, %102 : vector<16x512xf32>
    %cst_70 = arith.constant 5.000000e-01 : f32
    %104 = vector.broadcast %cst_70 : f32 to vector<16x512xf32>
    %105 = arith.mulf %104, %103 : vector<16x512xf32>
    %106 = math.tanh %105 : vector<16x512xf32>
    %cst_71 = arith.constant 1.000000e+00 : f32
    %107 = vector.broadcast %cst_71 : f32 to vector<16x512xf32>
    %108 = arith.addf %106, %107 : vector<16x512xf32>
    %cst_72 = arith.constant 5.000000e-01 : f32
    %109 = vector.broadcast %cst_72 : f32 to vector<16x512xf32>
    %110 = arith.mulf %109, %108 : vector<16x512xf32>
    %111 = arith.mulf %103, %110 : vector<16x512xf32>
    %112 = arith.truncf %111 : vector<16x512xf32> to vector<16x512xbf16>
    %c0_73 = arith.constant 0 : index
    %c0_74 = arith.constant 0 : index
    %113 = vector.load %arg23[%c0_73, %c0_74] : memref<512x64xbf16, #tpu.memory_space<vmem>>, vector<512x64xbf16>
    %cst_75 = arith.constant dense<0.000000e+00> : vector<16x64xf32>
    %114 = tpu.matmul %112, %113, %cst_75 {dimension_numbers = #tpu.dot_dimension_numbers<[1], [0], [0], [1], [0, 0, 1, 1], [], []>} : vector<16x512xbf16>, vector<512x64xbf16>, vector<16x64xf32> -> vector<16x64xf32>
    %c0_76 = arith.constant 0 : index
    %c0_77 = arith.constant 0 : index
    %115 = vector.load %arg22[%c0_76, %c0_77] : memref<1x64xf32, #tpu.memory_space<vmem>>, vector<1x64xf32>
    %116 = vector.broadcast %115 : vector<1x64xf32> to vector<16x64xf32>
    %117 = arith.addf %114, %116 : vector<16x64xf32>
    %c0_78 = arith.constant 0 : index
    %c0_79 = arith.constant 0 : index
    %118 = vector.load %arg51[%c0_78, %c0_79] : memref<1x256xf32, #tpu.memory_space<vmem>>, vector<1x256xf32>
    %119 = vector.extract_strided_slice %117 {offsets = [0, 0], sizes = [2, 64], strides = [1, 1]} : vector<16x64xf32> to vector<2x64xf32>
    %120 = arith.truncf %119 : vector<2x64xf32> to vector<2x64xbf16>
    %c0_80 = arith.constant 0 : index
    %c0_81 = arith.constant 0 : index
    %c0_82 = arith.constant 0 : index
    %121 = vector.load %arg54[%c0_80, %c0_81, %c0_82] : memref<8x64x256xbf16, #tpu.memory_space<vmem>>, vector<1x64x256xbf16>
    %122 = vector.shape_cast %121 : vector<1x64x256xbf16> to vector<64x256xbf16>
    %cst_83 = arith.constant dense<0.000000e+00> : vector<2x256xf32>
    %123 = tpu.matmul %120, %122, %cst_83 {dimension_numbers = #tpu.dot_dimension_numbers<[1], [0], [0], [1], [0, 0, 1, 1], [], []>} : vector<2x64xbf16>, vector<64x256xbf16>, vector<2x256xf32> -> vector<2x256xf32>
    %124 = vector.broadcast %118 : vector<1x256xf32> to vector<2x256xf32>
    %125 = arith.addf %124, %123 : vector<2x256xf32>
    %126 = vector.extract_strided_slice %117 {offsets = [2, 0], sizes = [2, 64], strides = [1, 1]} : vector<16x64xf32> to vector<2x64xf32>
    %127 = arith.truncf %126 : vector<2x64xf32> to vector<2x64xbf16>
    %c1 = arith.constant 1 : index
    %c0_84 = arith.constant 0 : index
    %c0_85 = arith.constant 0 : index
    %128 = vector.load %arg54[%c1, %c0_84, %c0_85] : memref<8x64x256xbf16, #tpu.memory_space<vmem>>, vector<1x64x256xbf16>
    %129 = vector.shape_cast %128 : vector<1x64x256xbf16> to vector<64x256xbf16>
    %cst_86 = arith.constant dense<0.000000e+00> : vector<2x256xf32>
    %130 = tpu.matmul %127, %129, %cst_86 {dimension_numbers = #tpu.dot_dimension_numbers<[1], [0], [0], [1], [0, 0, 1, 1], [], []>} : vector<2x64xbf16>, vector<64x256xbf16>, vector<2x256xf32> -> vector<2x256xf32>
    %131 = arith.addf %125, %130 : vector<2x256xf32>
    %132 = vector.extract_strided_slice %117 {offsets = [4, 0], sizes = [2, 64], strides = [1, 1]} : vector<16x64xf32> to vector<2x64xf32>
    %133 = arith.truncf %132 : vector<2x64xf32> to vector<2x64xbf16>
    %c2 = arith.constant 2 : index
    %c0_87 = arith.constant 0 : index
    %c0_88 = arith.constant 0 : index
    %134 = vector.load %arg54[%c2, %c0_87, %c0_88] : memref<8x64x256xbf16, #tpu.memory_space<vmem>>, vector<1x64x256xbf16>
    %135 = vector.shape_cast %134 : vector<1x64x256xbf16> to vector<64x256xbf16>
    %cst_89 = arith.constant dense<0.000000e+00> : vector<2x256xf32>
    %136 = tpu.matmul %133, %135, %cst_89 {dimension_numbers = #tpu.dot_dimension_numbers<[1], [0], [0], [1], [0, 0, 1, 1], [], []>} : vector<2x64xbf16>, vector<64x256xbf16>, vector<2x256xf32> -> vector<2x256xf32>
    %137 = arith.addf %131, %136 : vector<2x256xf32>
    %138 = vector.extract_strided_slice %117 {offsets = [6, 0], sizes = [2, 64], strides = [1, 1]} : vector<16x64xf32> to vector<2x64xf32>
    %139 = arith.truncf %138 : vector<2x64xf32> to vector<2x64xbf16>
    %c3 = arith.constant 3 : index
    %c0_90 = arith.constant 0 : index
    %c0_91 = arith.constant 0 : index
    %140 = vector.load %arg54[%c3, %c0_90, %c0_91] : memref<8x64x256xbf16, #tpu.memory_space<vmem>>, vector<1x64x256xbf16>
    %141 = vector.shape_cast %140 : vector<1x64x256xbf16> to vector<64x256xbf16>
    %cst_92 = arith.constant dense<0.000000e+00> : vector<2x256xf32>
    %142 = tpu.matmul %139, %141, %cst_92 {dimension_numbers = #tpu.dot_dimension_numbers<[1], [0], [0], [1], [0, 0, 1, 1], [], []>} : vector<2x64xbf16>, vector<64x256xbf16>, vector<2x256xf32> -> vector<2x256xf32>
    %143 = arith.addf %137, %142 : vector<2x256xf32>
    %144 = vector.extract_strided_slice %117 {offsets = [8, 0], sizes = [2, 64], strides = [1, 1]} : vector<16x64xf32> to vector<2x64xf32>
    %145 = arith.truncf %144 : vector<2x64xf32> to vector<2x64xbf16>
    %c4 = arith.constant 4 : index
    %c0_93 = arith.constant 0 : index
    %c0_94 = arith.constant 0 : index
    %146 = vector.load %arg54[%c4, %c0_93, %c0_94] : memref<8x64x256xbf16, #tpu.memory_space<vmem>>, vector<1x64x256xbf16>
    %147 = vector.shape_cast %146 : vector<1x64x256xbf16> to vector<64x256xbf16>
    %cst_95 = arith.constant dense<0.000000e+00> : vector<2x256xf32>
    %148 = tpu.matmul %145, %147, %cst_95 {dimension_numbers = #tpu.dot_dimension_numbers<[1], [0], [0], [1], [0, 0, 1, 1], [], []>} : vector<2x64xbf16>, vector<64x256xbf16>, vector<2x256xf32> -> vector<2x256xf32>
    %149 = arith.addf %143, %148 : vector<2x256xf32>
    %150 = vector.extract_strided_slice %117 {offsets = [10, 0], sizes = [2, 64], strides = [1, 1]} : vector<16x64xf32> to vector<2x64xf32>
    %151 = arith.truncf %150 : vector<2x64xf32> to vector<2x64xbf16>
    %c5 = arith.constant 5 : index
    %c0_96 = arith.constant 0 : index
    %c0_97 = arith.constant 0 : index
    %152 = vector.load %arg54[%c5, %c0_96, %c0_97] : memref<8x64x256xbf16, #tpu.memory_space<vmem>>, vector<1x64x256xbf16>
    %153 = vector.shape_cast %152 : vector<1x64x256xbf16> to vector<64x256xbf16>
    %cst_98 = arith.constant dense<0.000000e+00> : vector<2x256xf32>
    %154 = tpu.matmul %151, %153, %cst_98 {dimension_numbers = #tpu.dot_dimension_numbers<[1], [0], [0], [1], [0, 0, 1, 1], [], []>} : vector<2x64xbf16>, vector<64x256xbf16>, vector<2x256xf32> -> vector<2x256xf32>
    %155 = arith.addf %149, %154 : vector<2x256xf32>
    %156 = vector.extract_strided_slice %117 {offsets = [12, 0], sizes = [2, 64], strides = [1, 1]} : vector<16x64xf32> to vector<2x64xf32>
    %157 = arith.truncf %156 : vector<2x64xf32> to vector<2x64xbf16>
    %c6 = arith.constant 6 : index
    %c0_99 = arith.constant 0 : index
    %c0_100 = arith.constant 0 : index
    %158 = vector.load %arg54[%c6, %c0_99, %c0_100] : memref<8x64x256xbf16, #tpu.memory_space<vmem>>, vector<1x64x256xbf16>
    %159 = vector.shape_cast %158 : vector<1x64x256xbf16> to vector<64x256xbf16>
    %cst_101 = arith.constant dense<0.000000e+00> : vector<2x256xf32>
    %160 = tpu.matmul %157, %159, %cst_101 {dimension_numbers = #tpu.dot_dimension_numbers<[1], [0], [0], [1], [0, 0, 1, 1], [], []>} : vector<2x64xbf16>, vector<64x256xbf16>, vector<2x256xf32> -> vector<2x256xf32>
    %161 = arith.addf %155, %160 : vector<2x256xf32>
    %162 = vector.extract_strided_slice %117 {offsets = [14, 0], sizes = [2, 64], strides = [1, 1]} : vector<16x64xf32> to vector<2x64xf32>
    %163 = arith.truncf %162 : vector<2x64xf32> to vector<2x64xbf16>
    %c7 = arith.constant 7 : index
    %c0_102 = arith.constant 0 : index
    %c0_103 = arith.constant 0 : index
    %164 = vector.load %arg54[%c7, %c0_102, %c0_103] : memref<8x64x256xbf16, #tpu.memory_space<vmem>>, vector<1x64x256xbf16>
    %165 = vector.shape_cast %164 : vector<1x64x256xbf16> to vector<64x256xbf16>
    %cst_104 = arith.constant dense<0.000000e+00> : vector<2x256xf32>
    %166 = tpu.matmul %163, %165, %cst_104 {dimension_numbers = #tpu.dot_dimension_numbers<[1], [0], [0], [1], [0, 0, 1, 1], [], []>} : vector<2x64xbf16>, vector<64x256xbf16>, vector<2x256xf32> -> vector<2x256xf32>
    %167 = arith.addf %161, %166 : vector<2x256xf32>
    %cst_105 = arith.constant 5.000000e-01 : f32
    %168 = vector.broadcast %cst_105 : f32 to vector<2x256xf32>
    %169 = arith.mulf %168, %167 : vector<2x256xf32>
    %170 = math.tanh %169 : vector<2x256xf32>
    %cst_106 = arith.constant 1.000000e+00 : f32
    %171 = vector.broadcast %cst_106 : f32 to vector<2x256xf32>
    %172 = arith.addf %170, %171 : vector<2x256xf32>
    %cst_107 = arith.constant 5.000000e-01 : f32
    %173 = vector.broadcast %cst_107 : f32 to vector<2x256xf32>
    %174 = arith.mulf %173, %172 : vector<2x256xf32>
    %175 = arith.mulf %167, %174 : vector<2x256xf32>
    %176 = arith.truncf %175 : vector<2x256xf32> to vector<2x256xbf16>
    %c0_108 = arith.constant 0 : index
    %c0_109 = arith.constant 0 : index
    %177 = vector.load %arg55[%c0_108, %c0_109] : memref<256x256xbf16, #tpu.memory_space<vmem>>, vector<256x256xbf16>
    %cst_110 = arith.constant dense<0.000000e+00> : vector<2x256xf32>
    %178 = tpu.matmul %176, %177, %cst_110 {dimension_numbers = #tpu.dot_dimension_numbers<[1], [0], [0], [1], [0, 0, 1, 1], [], []>} : vector<2x256xbf16>, vector<256x256xbf16>, vector<2x256xf32> -> vector<2x256xf32>
    %c0_111 = arith.constant 0 : index
    %c0_112 = arith.constant 0 : index
    %179 = vector.load %arg52[%c0_111, %c0_112] : memref<1x256xf32, #tpu.memory_space<vmem>>, vector<1x256xf32>
    %180 = vector.broadcast %179 : vector<1x256xf32> to vector<2x256xf32>
    %181 = arith.addf %178, %180 : vector<2x256xf32>
    %cst_113 = arith.constant 5.000000e-01 : f32
    %182 = vector.broadcast %cst_113 : f32 to vector<2x256xf32>
    %183 = arith.mulf %182, %181 : vector<2x256xf32>
    %184 = math.tanh %183 : vector<2x256xf32>
    %cst_114 = arith.constant 1.000000e+00 : f32
    %185 = vector.broadcast %cst_114 : f32 to vector<2x256xf32>
    %186 = arith.addf %184, %185 : vector<2x256xf32>
    %cst_115 = arith.constant 5.000000e-01 : f32
    %187 = vector.broadcast %cst_115 : f32 to vector<2x256xf32>
    %188 = arith.mulf %187, %186 : vector<2x256xf32>
    %189 = arith.mulf %181, %188 : vector<2x256xf32>
    %190 = arith.truncf %189 : vector<2x256xf32> to vector<2x256xbf16>
    %c0_116 = arith.constant 0 : index
    %c0_117 = arith.constant 0 : index
    %191 = vector.load %arg56[%c0_116, %c0_117] : memref<256x128xbf16, #tpu.memory_space<vmem>>, vector<256x128xbf16>
    %cst_118 = arith.constant dense<0.000000e+00> : vector<2x128xf32>
    %192 = tpu.matmul %190, %191, %cst_118 {dimension_numbers = #tpu.dot_dimension_numbers<[1], [0], [0], [1], [0, 0, 1, 1], [], []>} : vector<2x256xbf16>, vector<256x128xbf16>, vector<2x128xf32> -> vector<2x128xf32>
    %c0_119 = arith.constant 0 : index
    %c0_120 = arith.constant 0 : index
    %193 = vector.load %arg53[%c0_119, %c0_120] : memref<1x128xf32, #tpu.memory_space<vmem>>, vector<1x128xf32>
    %194 = vector.broadcast %193 : vector<1x128xf32> to vector<2x128xf32>
    %195 = arith.addf %192, %194 : vector<2x128xf32>
    %cst_121 = arith.constant 5.000000e-01 : f32
    %196 = vector.broadcast %cst_121 : f32 to vector<2x128xf32>
    %197 = arith.mulf %196, %195 : vector<2x128xf32>
    %198 = math.tanh %197 : vector<2x128xf32>
    %cst_122 = arith.constant 1.000000e+00 : f32
    %199 = vector.broadcast %cst_122 : f32 to vector<2x128xf32>
    %200 = arith.addf %198, %199 : vector<2x128xf32>
    %cst_123 = arith.constant 5.000000e-01 : f32
    %201 = vector.broadcast %cst_123 : f32 to vector<2x128xf32>
    %202 = arith.mulf %201, %200 : vector<2x128xf32>
    %c0_124 = arith.constant 0 : index
    %c0_125 = arith.constant 0 : index
    %203 = vector.load %arg59[%c0_124, %c0_125] : memref<2x48xf32, #tpu.memory_space<vmem>>, vector<2x48xf32>
    %c0_126 = arith.constant 0 : index
    %c0_127 = arith.constant 0 : index
    %204 = vector.load %arg57[%c0_126, %c0_127] : memref<1x48xf32, #tpu.memory_space<vmem>>, vector<1x48xf32>
    %205 = vector.broadcast %204 : vector<1x48xf32> to vector<2x48xf32>
    %206 = arith.mulf %203, %205 : vector<2x48xf32>
    %207 = arith.truncf %206 : vector<2x48xf32> to vector<2x48xbf16>
    %c0_128 = arith.constant 0 : index
    %c0_129 = arith.constant 0 : index
    %208 = vector.load %arg26[%c0_128, %c0_129] : memref<48x144xbf16, #tpu.memory_space<vmem>>, vector<48x144xbf16>
    %cst_130 = arith.constant dense<0.000000e+00> : vector<2x144xf32>
    %209 = tpu.matmul %207, %208, %cst_130 {dimension_numbers = #tpu.dot_dimension_numbers<[1], [0], [0], [1], [0, 0, 1, 1], [], []>} : vector<2x48xbf16>, vector<48x144xbf16>, vector<2x144xf32> -> vector<2x144xf32>
    %c0_131 = arith.constant 0 : index
    %c0_132 = arith.constant 0 : index
    %210 = vector.load %arg25[%c0_131, %c0_132] : memref<1x144xf32, #tpu.memory_space<vmem>>, vector<1x144xf32>
    %211 = vector.broadcast %210 : vector<1x144xf32> to vector<2x144xf32>
    %212 = arith.addf %209, %211 : vector<2x144xf32>
    %cst_133 = arith.constant 5.000000e-01 : f32
    %213 = vector.broadcast %cst_133 : f32 to vector<2x144xf32>
    %214 = arith.mulf %213, %212 : vector<2x144xf32>
    %215 = math.tanh %214 : vector<2x144xf32>
    %cst_134 = arith.constant 1.000000e+00 : f32
    %216 = vector.broadcast %cst_134 : f32 to vector<2x144xf32>
    %217 = arith.addf %215, %216 : vector<2x144xf32>
    %cst_135 = arith.constant 5.000000e-01 : f32
    %218 = vector.broadcast %cst_135 : f32 to vector<2x144xf32>
    %219 = arith.mulf %218, %217 : vector<2x144xf32>
    %220 = arith.mulf %212, %219 : vector<2x144xf32>
    %221 = arith.truncf %220 : vector<2x144xf32> to vector<2x144xbf16>
    %c0_136 = arith.constant 0 : index
    %c0_137 = arith.constant 0 : index
    %222 = vector.load %arg28[%c0_136, %c0_137] : memref<144x96xbf16, #tpu.memory_space<vmem>>, vector<144x96xbf16>
    %cst_138 = arith.constant dense<0.000000e+00> : vector<2x96xf32>
    %223 = tpu.matmul %221, %222, %cst_138 {dimension_numbers = #tpu.dot_dimension_numbers<[1], [0], [0], [1], [0, 0, 1, 1], [], []>} : vector<2x144xbf16>, vector<144x96xbf16>, vector<2x96xf32> -> vector<2x96xf32>
    %c0_139 = arith.constant 0 : index
    %c0_140 = arith.constant 0 : index
    %224 = vector.load %arg27[%c0_139, %c0_140] : memref<1x96xf32, #tpu.memory_space<vmem>>, vector<1x96xf32>
    %225 = vector.broadcast %224 : vector<1x96xf32> to vector<2x96xf32>
    %226 = arith.addf %223, %225 : vector<2x96xf32>
    %cst_141 = arith.constant 5.000000e-01 : f32
    %227 = vector.broadcast %cst_141 : f32 to vector<2x96xf32>
    %228 = arith.mulf %227, %226 : vector<2x96xf32>
    %229 = math.tanh %228 : vector<2x96xf32>
    %cst_142 = arith.constant 1.000000e+00 : f32
    %230 = vector.broadcast %cst_142 : f32 to vector<2x96xf32>
    %231 = arith.addf %229, %230 : vector<2x96xf32>
    %cst_143 = arith.constant 5.000000e-01 : f32
    %232 = vector.broadcast %cst_143 : f32 to vector<2x96xf32>
    %233 = arith.mulf %232, %231 : vector<2x96xf32>
    %234 = arith.mulf %226, %233 : vector<2x96xf32>
    %235 = arith.truncf %234 : vector<2x96xf32> to vector<2x96xbf16>
    %c0_144 = arith.constant 0 : index
    %c0_145 = arith.constant 0 : index
    %236 = vector.load %arg30[%c0_144, %c0_145] : memref<96x48xbf16, #tpu.memory_space<vmem>>, vector<96x48xbf16>
    %cst_146 = arith.constant dense<0.000000e+00> : vector<2x48xf32>
    %237 = tpu.matmul %235, %236, %cst_146 {dimension_numbers = #tpu.dot_dimension_numbers<[1], [0], [0], [1], [0, 0, 1, 1], [], []>} : vector<2x96xbf16>, vector<96x48xbf16>, vector<2x48xf32> -> vector<2x48xf32>
    %c0_147 = arith.constant 0 : index
    %c0_148 = arith.constant 0 : index
    %238 = vector.load %arg29[%c0_147, %c0_148] : memref<1x48xf32, #tpu.memory_space<vmem>>, vector<1x48xf32>
    %239 = vector.broadcast %238 : vector<1x48xf32> to vector<2x48xf32>
    %240 = arith.addf %237, %239 : vector<2x48xf32>
    %cst_149 = arith.constant 5.000000e-01 : f32
    %241 = vector.broadcast %cst_149 : f32 to vector<2x48xf32>
    %242 = arith.mulf %241, %240 : vector<2x48xf32>
    %243 = math.tanh %242 : vector<2x48xf32>
    %cst_150 = arith.constant 1.000000e+00 : f32
    %244 = vector.broadcast %cst_150 : f32 to vector<2x48xf32>
    %245 = arith.addf %243, %244 : vector<2x48xf32>
    %cst_151 = arith.constant 5.000000e-01 : f32
    %246 = vector.broadcast %cst_151 : f32 to vector<2x48xf32>
    %247 = arith.mulf %246, %245 : vector<2x48xf32>
    %248 = arith.mulf %240, %247 : vector<2x48xf32>
    %249 = arith.truncf %248 : vector<2x48xf32> to vector<2x48xbf16>
    %c0_152 = arith.constant 0 : index
    %c0_153 = arith.constant 0 : index
    %250 = vector.load %arg32[%c0_152, %c0_153] : memref<48x192xbf16, #tpu.memory_space<vmem>>, vector<48x192xbf16>
    %cst_154 = arith.constant dense<0.000000e+00> : vector<2x192xf32>
    %251 = tpu.matmul %249, %250, %cst_154 {dimension_numbers = #tpu.dot_dimension_numbers<[1], [0], [0], [1], [0, 0, 1, 1], [], []>} : vector<2x48xbf16>, vector<48x192xbf16>, vector<2x192xf32> -> vector<2x192xf32>
    %c0_155 = arith.constant 0 : index
    %c0_156 = arith.constant 0 : index
    %252 = vector.load %arg31[%c0_155, %c0_156] : memref<1x192xf32, #tpu.memory_space<vmem>>, vector<1x192xf32>
    %253 = vector.broadcast %252 : vector<1x192xf32> to vector<2x192xf32>
    %254 = arith.addf %251, %253 : vector<2x192xf32>
    %255 = arith.truncf %0 : vector<2x4xf32> to vector<2x4xbf16>
    %c0_157 = arith.constant 0 : index
    %c0_158 = arith.constant 0 : index
    %256 = vector.load %arg42[%c0_157, %c0_158] : memref<4x192xbf16, #tpu.memory_space<vmem>>, vector<4x192xbf16>
    %cst_159 = arith.constant dense<0.000000e+00> : vector<2x192xf32>
    %257 = tpu.matmul %255, %256, %cst_159 {dimension_numbers = #tpu.dot_dimension_numbers<[1], [0], [0], [1], [0, 0, 1, 1], [], []>} : vector<2x4xbf16>, vector<4x192xbf16>, vector<2x192xf32> -> vector<2x192xf32>
    %c0_160 = arith.constant 0 : index
    %c0_161 = arith.constant 0 : index
    %258 = vector.load %arg39[%c0_160, %c0_161] : memref<1x192xf32, #tpu.memory_space<vmem>>, vector<1x192xf32>
    %259 = vector.broadcast %258 : vector<1x192xf32> to vector<2x192xf32>
    %260 = arith.addf %257, %259 : vector<2x192xf32>
    %cst_162 = arith.constant 5.000000e-01 : f32
    %261 = vector.broadcast %cst_162 : f32 to vector<2x192xf32>
    %262 = arith.mulf %261, %260 : vector<2x192xf32>
    %263 = math.tanh %262 : vector<2x192xf32>
    %cst_163 = arith.constant 1.000000e+00 : f32
    %264 = vector.broadcast %cst_163 : f32 to vector<2x192xf32>
    %265 = arith.addf %263, %264 : vector<2x192xf32>
    %cst_164 = arith.constant 5.000000e-01 : f32
    %266 = vector.broadcast %cst_164 : f32 to vector<2x192xf32>
    %267 = arith.mulf %266, %265 : vector<2x192xf32>
    %268 = arith.mulf %260, %267 : vector<2x192xf32>
    %269 = arith.truncf %268 : vector<2x192xf32> to vector<2x192xbf16>
    %c0_165 = arith.constant 0 : index
    %c0_166 = arith.constant 0 : index
    %270 = vector.load %arg43[%c0_165, %c0_166] : memref<192x192xbf16, #tpu.memory_space<vmem>>, vector<192x192xbf16>
    %cst_167 = arith.constant dense<0.000000e+00> : vector<2x192xf32>
    %271 = tpu.matmul %269, %270, %cst_167 {dimension_numbers = #tpu.dot_dimension_numbers<[1], [0], [0], [1], [0, 0, 1, 1], [], []>} : vector<2x192xbf16>, vector<192x192xbf16>, vector<2x192xf32> -> vector<2x192xf32>
    %c0_168 = arith.constant 0 : index
    %c0_169 = arith.constant 0 : index
    %272 = vector.load %arg40[%c0_168, %c0_169] : memref<1x192xf32, #tpu.memory_space<vmem>>, vector<1x192xf32>
    %273 = vector.broadcast %272 : vector<1x192xf32> to vector<2x192xf32>
    %274 = arith.addf %271, %273 : vector<2x192xf32>
    %cst_170 = arith.constant 5.000000e-01 : f32
    %275 = vector.broadcast %cst_170 : f32 to vector<2x192xf32>
    %276 = arith.mulf %275, %274 : vector<2x192xf32>
    %277 = math.tanh %276 : vector<2x192xf32>
    %cst_171 = arith.constant 1.000000e+00 : f32
    %278 = vector.broadcast %cst_171 : f32 to vector<2x192xf32>
    %279 = arith.addf %277, %278 : vector<2x192xf32>
    %cst_172 = arith.constant 5.000000e-01 : f32
    %280 = vector.broadcast %cst_172 : f32 to vector<2x192xf32>
    %281 = arith.mulf %280, %279 : vector<2x192xf32>
    %282 = arith.mulf %274, %281 : vector<2x192xf32>
    %283 = arith.truncf %282 : vector<2x192xf32> to vector<2x192xbf16>
    %c0_173 = arith.constant 0 : index
    %c0_174 = arith.constant 0 : index
    %284 = vector.load %arg44[%c0_173, %c0_174] : memref<192x192xbf16, #tpu.memory_space<vmem>>, vector<192x192xbf16>
    %cst_175 = arith.constant dense<0.000000e+00> : vector<2x192xf32>
    %285 = tpu.matmul %283, %284, %cst_175 {dimension_numbers = #tpu.dot_dimension_numbers<[1], [0], [0], [1], [0, 0, 1, 1], [], []>} : vector<2x192xbf16>, vector<192x192xbf16>, vector<2x192xf32> -> vector<2x192xf32>
    %c0_176 = arith.constant 0 : index
    %c0_177 = arith.constant 0 : index
    %286 = vector.load %arg41[%c0_176, %c0_177] : memref<1x192xf32, #tpu.memory_space<vmem>>, vector<1x192xf32>
    %287 = vector.broadcast %286 : vector<1x192xf32> to vector<2x192xf32>
    %288 = arith.addf %285, %287 : vector<2x192xf32>
    %289 = arith.truncf %0 : vector<2x4xf32> to vector<2x4xbf16>
    %c0_178 = arith.constant 0 : index
    %c0_179 = arith.constant 0 : index
    %290 = vector.load %arg48[%c0_178, %c0_179] : memref<4x192xbf16, #tpu.memory_space<vmem>>, vector<4x192xbf16>
    %cst_180 = arith.constant dense<0.000000e+00> : vector<2x192xf32>
    %291 = tpu.matmul %289, %290, %cst_180 {dimension_numbers = #tpu.dot_dimension_numbers<[1], [0], [0], [1], [0, 0, 1, 1], [], []>} : vector<2x4xbf16>, vector<4x192xbf16>, vector<2x192xf32> -> vector<2x192xf32>
    %c0_181 = arith.constant 0 : index
    %c0_182 = arith.constant 0 : index
    %292 = vector.load %arg45[%c0_181, %c0_182] : memref<1x192xf32, #tpu.memory_space<vmem>>, vector<1x192xf32>
    %293 = vector.broadcast %292 : vector<1x192xf32> to vector<2x192xf32>
    %294 = arith.addf %291, %293 : vector<2x192xf32>
    %cst_183 = arith.constant 5.000000e-01 : f32
    %295 = vector.broadcast %cst_183 : f32 to vector<2x192xf32>
    %296 = arith.mulf %295, %294 : vector<2x192xf32>
    %297 = math.tanh %296 : vector<2x192xf32>
    %cst_184 = arith.constant 1.000000e+00 : f32
    %298 = vector.broadcast %cst_184 : f32 to vector<2x192xf32>
    %299 = arith.addf %297, %298 : vector<2x192xf32>
    %cst_185 = arith.constant 5.000000e-01 : f32
    %300 = vector.broadcast %cst_185 : f32 to vector<2x192xf32>
    %301 = arith.mulf %300, %299 : vector<2x192xf32>
    %302 = arith.mulf %294, %301 : vector<2x192xf32>
    %303 = arith.truncf %302 : vector<2x192xf32> to vector<2x192xbf16>
    %c0_186 = arith.constant 0 : index
    %c0_187 = arith.constant 0 : index
    %304 = vector.load %arg49[%c0_186, %c0_187] : memref<192x192xbf16, #tpu.memory_space<vmem>>, vector<192x192xbf16>
    %cst_188 = arith.constant dense<0.000000e+00> : vector<2x192xf32>
    %305 = tpu.matmul %303, %304, %cst_188 {dimension_numbers = #tpu.dot_dimension_numbers<[1], [0], [0], [1], [0, 0, 1, 1], [], []>} : vector<2x192xbf16>, vector<192x192xbf16>, vector<2x192xf32> -> vector<2x192xf32>
    %c0_189 = arith.constant 0 : index
    %c0_190 = arith.constant 0 : index
    %306 = vector.load %arg46[%c0_189, %c0_190] : memref<1x192xf32, #tpu.memory_space<vmem>>, vector<1x192xf32>
    %307 = vector.broadcast %306 : vector<1x192xf32> to vector<2x192xf32>
    %308 = arith.addf %305, %307 : vector<2x192xf32>
    %cst_191 = arith.constant 5.000000e-01 : f32
    %309 = vector.broadcast %cst_191 : f32 to vector<2x192xf32>
    %310 = arith.mulf %309, %308 : vector<2x192xf32>
    %311 = math.tanh %310 : vector<2x192xf32>
    %cst_192 = arith.constant 1.000000e+00 : f32
    %312 = vector.broadcast %cst_192 : f32 to vector<2x192xf32>
    %313 = arith.addf %311, %312 : vector<2x192xf32>
    %cst_193 = arith.constant 5.000000e-01 : f32
    %314 = vector.broadcast %cst_193 : f32 to vector<2x192xf32>
    %315 = arith.mulf %314, %313 : vector<2x192xf32>
    %316 = arith.mulf %308, %315 : vector<2x192xf32>
    %317 = arith.truncf %316 : vector<2x192xf32> to vector<2x192xbf16>
    %c0_194 = arith.constant 0 : index
    %c0_195 = arith.constant 0 : index
    %318 = vector.load %arg50[%c0_194, %c0_195] : memref<192x192xbf16, #tpu.memory_space<vmem>>, vector<192x192xbf16>
    %cst_196 = arith.constant dense<0.000000e+00> : vector<2x192xf32>
    %319 = tpu.matmul %317, %318, %cst_196 {dimension_numbers = #tpu.dot_dimension_numbers<[1], [0], [0], [1], [0, 0, 1, 1], [], []>} : vector<2x192xbf16>, vector<192x192xbf16>, vector<2x192xf32> -> vector<2x192xf32>
    %c0_197 = arith.constant 0 : index
    %c0_198 = arith.constant 0 : index
    %320 = vector.load %arg47[%c0_197, %c0_198] : memref<1x192xf32, #tpu.memory_space<vmem>>, vector<1x192xf32>
    %321 = vector.broadcast %320 : vector<1x192xf32> to vector<2x192xf32>
    %322 = arith.addf %319, %321 : vector<2x192xf32>
    %cst_199 = arith.constant 1.000000e+00 : f32
    %323 = vector.broadcast %cst_199 : f32 to vector<2x192xf32>
    %324 = arith.addf %322, %323 : vector<2x192xf32>
    %325 = arith.mulf %254, %324 : vector<2x192xf32>
    %326 = arith.addf %288, %325 : vector<2x192xf32>
    %c0_200 = arith.constant 0 : index
    %c0_201 = arith.constant 0 : index
    %327 = vector.load %arg24[%c0_200, %c0_201] : memref<192x192xf32, #tpu.memory_space<vmem>>, vector<192x192xf32>
    %cst_202 = arith.constant dense<0.000000e+00> : vector<2x192xf32>
    %328 = tpu.matmul %326, %327, %cst_202 {dimension_numbers = #tpu.dot_dimension_numbers<[1], [0], [0], [1], [0, 0, 1, 1], [], []>} : vector<2x192xf32>, vector<192x192xf32>, vector<2x192xf32> -> vector<2x192xf32>
    %329 = arith.subf %326, %328 : vector<2x192xf32>
    %330 = arith.mulf %329, %329 : vector<2x192xf32>
    %c0_203 = arith.constant 0 : index
    %c0_204 = arith.constant 0 : index
    %331 = vector.load %arg24[%c0_203, %c0_204] : memref<192x192xf32, #tpu.memory_space<vmem>>, vector<192x192xf32>
    %cst_205 = arith.constant dense<0.000000e+00> : vector<2x192xf32>
    %332 = tpu.matmul %330, %331, %cst_205 {dimension_numbers = #tpu.dot_dimension_numbers<[1], [0], [0], [1], [0, 0, 1, 1], [], []>} : vector<2x192xf32>, vector<192x192xf32>, vector<2x192xf32> -> vector<2x192xf32>
    %333 = arith.subf %326, %328 : vector<2x192xf32>
    %cst_206 = arith.constant 9.99999974E-6 : f32
    %334 = vector.broadcast %cst_206 : f32 to vector<2x192xf32>
    %335 = arith.addf %332, %334 : vector<2x192xf32>
    %336 = math.rsqrt %335 : vector<2x192xf32>
    %337 = arith.mulf %333, %336 : vector<2x192xf32>
    %338 = arith.truncf %337 : vector<2x192xf32> to vector<2x192xbf16>
    %c0_207 = arith.constant 0 : index
    %c0_208 = arith.constant 0 : index
    %339 = vector.load %arg36[%c0_207, %c0_208] : memref<192x192xbf16, #tpu.memory_space<vmem>>, vector<192x192xbf16>
    %cst_209 = arith.constant dense<0.000000e+00> : vector<2x192xf32>
    %340 = tpu.matmul %338, %339, %cst_209 {dimension_numbers = #tpu.dot_dimension_numbers<[1], [0], [0], [1], [0, 0, 1, 1], [], []>} : vector<2x192xbf16>, vector<192x192xbf16>, vector<2x192xf32> -> vector<2x192xf32>
    %c0_210 = arith.constant 0 : index
    %c0_211 = arith.constant 0 : index
    %341 = vector.load %arg35[%c0_210, %c0_211] : memref<1x192xf32, #tpu.memory_space<vmem>>, vector<1x192xf32>
    %342 = vector.broadcast %341 : vector<1x192xf32> to vector<2x192xf32>
    %343 = arith.addf %340, %342 : vector<2x192xf32>
    %cst_212 = arith.constant 5.000000e-01 : f32
    %344 = vector.broadcast %cst_212 : f32 to vector<2x192xf32>
    %345 = arith.mulf %344, %343 : vector<2x192xf32>
    %346 = math.tanh %345 : vector<2x192xf32>
    %cst_213 = arith.constant 1.000000e+00 : f32
    %347 = vector.broadcast %cst_213 : f32 to vector<2x192xf32>
    %348 = arith.addf %346, %347 : vector<2x192xf32>
    %cst_214 = arith.constant 5.000000e-01 : f32
    %349 = vector.broadcast %cst_214 : f32 to vector<2x192xf32>
    %350 = arith.mulf %349, %348 : vector<2x192xf32>
    %351 = arith.mulf %343, %350 : vector<2x192xf32>
    %352 = arith.truncf %351 : vector<2x192xf32> to vector<2x192xbf16>
    %c0_215 = arith.constant 0 : index
    %c0_216 = arith.constant 0 : index
    %353 = vector.load %arg38[%c0_215, %c0_216] : memref<192x192xbf16, #tpu.memory_space<vmem>>, vector<192x192xbf16>
    %cst_217 = arith.constant dense<0.000000e+00> : vector<2x192xf32>
    %354 = tpu.matmul %352, %353, %cst_217 {dimension_numbers = #tpu.dot_dimension_numbers<[1], [0], [0], [1], [0, 0, 1, 1], [], []>} : vector<2x192xbf16>, vector<192x192xbf16>, vector<2x192xf32> -> vector<2x192xf32>
    %c0_218 = arith.constant 0 : index
    %c0_219 = arith.constant 0 : index
    %355 = vector.load %arg37[%c0_218, %c0_219] : memref<1x192xf32, #tpu.memory_space<vmem>>, vector<1x192xf32>
    %356 = vector.broadcast %355 : vector<1x192xf32> to vector<2x192xf32>
    %357 = arith.addf %354, %356 : vector<2x192xf32>
    %cst_220 = arith.constant 5.000000e-01 : f32
    %358 = vector.broadcast %cst_220 : f32 to vector<2x192xf32>
    %359 = arith.mulf %358, %357 : vector<2x192xf32>
    %360 = math.tanh %359 : vector<2x192xf32>
    %cst_221 = arith.constant 1.000000e+00 : f32
    %361 = vector.broadcast %cst_221 : f32 to vector<2x192xf32>
    %362 = arith.addf %360, %361 : vector<2x192xf32>
    %cst_222 = arith.constant 5.000000e-01 : f32
    %363 = vector.broadcast %cst_222 : f32 to vector<2x192xf32>
    %364 = arith.mulf %363, %362 : vector<2x192xf32>
    %365 = arith.mulf %357, %364 : vector<2x192xf32>
    %366 = arith.truncf %365 : vector<2x192xf32> to vector<2x192xbf16>
    %c0_223 = arith.constant 0 : index
    %c0_224 = arith.constant 0 : index
    %367 = vector.load %arg34[%c0_223, %c0_224] : memref<192x384xbf16, #tpu.memory_space<vmem>>, vector<192x384xbf16>
    %cst_225 = arith.constant dense<0.000000e+00> : vector<2x384xf32>
    %368 = tpu.matmul %366, %367, %cst_225 {dimension_numbers = #tpu.dot_dimension_numbers<[1], [0], [0], [1], [0, 0, 1, 1], [], []>} : vector<2x192xbf16>, vector<192x384xbf16>, vector<2x384xf32> -> vector<2x384xf32>
    %c0_226 = arith.constant 0 : index
    %c0_227 = arith.constant 0 : index
    %369 = vector.load %arg33[%c0_226, %c0_227] : memref<1x384xf32, #tpu.memory_space<vmem>>, vector<1x384xf32>
    %370 = vector.broadcast %369 : vector<1x384xf32> to vector<2x384xf32>
    %371 = arith.addf %368, %370 : vector<2x384xf32>
    %cst_228 = arith.constant 5.000000e-01 : f32
    %372 = vector.broadcast %cst_228 : f32 to vector<2x384xf32>
    %373 = arith.mulf %372, %371 : vector<2x384xf32>
    %374 = math.tanh %373 : vector<2x384xf32>
    %cst_229 = arith.constant 1.000000e+00 : f32
    %375 = vector.broadcast %cst_229 : f32 to vector<2x384xf32>
    %376 = arith.addf %374, %375 : vector<2x384xf32>
    %cst_230 = arith.constant 5.000000e-01 : f32
    %377 = vector.broadcast %cst_230 : f32 to vector<2x384xf32>
    %378 = arith.mulf %377, %376 : vector<2x384xf32>
    %c0_231 = arith.constant 0 : index
    %c0_232 = arith.constant 0 : index
    %379 = vector.load %arg67[%c0_231, %c0_232] : memref<2x1xf32, #tpu.memory_space<vmem>>, vector<2x1xf32>
    %c0_233 = arith.constant 0 : index
    %c0_234 = arith.constant 0 : index
    %380 = vector.load %arg58[%c0_233, %c0_234] : memref<1x1xf32, #tpu.memory_space<vmem>>, vector<1x1xf32>
    %381 = vector.broadcast %380 : vector<1x1xf32> to vector<2x1xf32>
    %382 = arith.mulf %379, %381 : vector<2x1xf32>
    %383 = arith.truncf %382 : vector<2x1xf32> to vector<2x1xbf16>
    %c0_235 = arith.constant 0 : index
    %c0_236 = arith.constant 0 : index
    %384 = vector.load %arg64[%c0_235, %c0_236] : memref<1x128xbf16, #tpu.memory_space<vmem>>, vector<1x128xbf16>
    %cst_237 = arith.constant dense<0.000000e+00> : vector<2x128xf32>
    %385 = tpu.matmul %383, %384, %cst_237 {dimension_numbers = #tpu.dot_dimension_numbers<[1], [0], [0], [1], [0, 0, 1, 1], [], []>} : vector<2x1xbf16>, vector<1x128xbf16>, vector<2x128xf32> -> vector<2x128xf32>
    %386 = arith.truncf %0 : vector<2x4xf32> to vector<2x4xbf16>
    %c0_238 = arith.constant 0 : index
    %c0_239 = arith.constant 0 : index
    %387 = vector.load %arg63[%c0_238, %c0_239] : memref<4x128xbf16, #tpu.memory_space<vmem>>, vector<4x128xbf16>
    %cst_240 = arith.constant dense<0.000000e+00> : vector<2x128xf32>
    %388 = tpu.matmul %386, %387, %cst_240 {dimension_numbers = #tpu.dot_dimension_numbers<[1], [0], [0], [1], [0, 0, 1, 1], [], []>} : vector<2x4xbf16>, vector<4x128xbf16>, vector<2x128xf32> -> vector<2x128xf32>
    %389 = arith.addf %385, %388 : vector<2x128xf32>
    %c0_241 = arith.constant 0 : index
    %c0_242 = arith.constant 0 : index
    %390 = vector.load %arg60[%c0_241, %c0_242] : memref<1x128xf32, #tpu.memory_space<vmem>>, vector<1x128xf32>
    %391 = vector.broadcast %390 : vector<1x128xf32> to vector<2x128xf32>
    %392 = arith.addf %389, %391 : vector<2x128xf32>
    %cst_243 = arith.constant 5.000000e-01 : f32
    %393 = vector.broadcast %cst_243 : f32 to vector<2x128xf32>
    %394 = arith.mulf %393, %392 : vector<2x128xf32>
    %395 = math.tanh %394 : vector<2x128xf32>
    %cst_244 = arith.constant 1.000000e+00 : f32
    %396 = vector.broadcast %cst_244 : f32 to vector<2x128xf32>
    %397 = arith.addf %395, %396 : vector<2x128xf32>
    %cst_245 = arith.constant 5.000000e-01 : f32
    %398 = vector.broadcast %cst_245 : f32 to vector<2x128xf32>
    %399 = arith.mulf %398, %397 : vector<2x128xf32>
    %400 = arith.mulf %392, %399 : vector<2x128xf32>
    %401 = arith.truncf %400 : vector<2x128xf32> to vector<2x128xbf16>
    %c0_246 = arith.constant 0 : index
    %c0_247 = arith.constant 0 : index
    %402 = vector.load %arg65[%c0_246, %c0_247] : memref<128x128xbf16, #tpu.memory_space<vmem>>, vector<128x128xbf16>
    %cst_248 = arith.constant dense<0.000000e+00> : vector<2x128xf32>
    %403 = tpu.matmul %401, %402, %cst_248 {dimension_numbers = #tpu.dot_dimension_numbers<[1], [0], [0], [1], [0, 0, 1, 1], [], []>} : vector<2x128xbf16>, vector<128x128xbf16>, vector<2x128xf32> -> vector<2x128xf32>
    %c0_249 = arith.constant 0 : index
    %c0_250 = arith.constant 0 : index
    %404 = vector.load %arg61[%c0_249, %c0_250] : memref<1x128xf32, #tpu.memory_space<vmem>>, vector<1x128xf32>
    %405 = vector.broadcast %404 : vector<1x128xf32> to vector<2x128xf32>
    %406 = arith.addf %403, %405 : vector<2x128xf32>
    %cst_251 = arith.constant 5.000000e-01 : f32
    %407 = vector.broadcast %cst_251 : f32 to vector<2x128xf32>
    %408 = arith.mulf %407, %406 : vector<2x128xf32>
    %409 = math.tanh %408 : vector<2x128xf32>
    %cst_252 = arith.constant 1.000000e+00 : f32
    %410 = vector.broadcast %cst_252 : f32 to vector<2x128xf32>
    %411 = arith.addf %409, %410 : vector<2x128xf32>
    %cst_253 = arith.constant 5.000000e-01 : f32
    %412 = vector.broadcast %cst_253 : f32 to vector<2x128xf32>
    %413 = arith.mulf %412, %411 : vector<2x128xf32>
    %414 = arith.mulf %406, %413 : vector<2x128xf32>
    %415 = arith.truncf %414 : vector<2x128xf32> to vector<2x128xbf16>
    %c0_254 = arith.constant 0 : index
    %c0_255 = arith.constant 0 : index
    %416 = vector.load %arg66[%c0_254, %c0_255] : memref<128x128xbf16, #tpu.memory_space<vmem>>, vector<128x128xbf16>
    %cst_256 = arith.constant dense<0.000000e+00> : vector<2x128xf32>
    %417 = tpu.matmul %415, %416, %cst_256 {dimension_numbers = #tpu.dot_dimension_numbers<[1], [0], [0], [1], [0, 0, 1, 1], [], []>} : vector<2x128xbf16>, vector<128x128xbf16>, vector<2x128xf32> -> vector<2x128xf32>
    %c0_257 = arith.constant 0 : index
    %c0_258 = arith.constant 0 : index
    %418 = vector.load %arg62[%c0_257, %c0_258] : memref<1x128xf32, #tpu.memory_space<vmem>>, vector<1x128xf32>
    %419 = vector.broadcast %418 : vector<1x128xf32> to vector<2x128xf32>
    %420 = arith.addf %417, %419 : vector<2x128xf32>
    %cst_259 = arith.constant 5.000000e-01 : f32
    %421 = vector.broadcast %cst_259 : f32 to vector<2x128xf32>
    %422 = arith.mulf %421, %420 : vector<2x128xf32>
    %423 = math.tanh %422 : vector<2x128xf32>
    %cst_260 = arith.constant 1.000000e+00 : f32
    %424 = vector.broadcast %cst_260 : f32 to vector<2x128xf32>
    %425 = arith.addf %423, %424 : vector<2x128xf32>
    %cst_261 = arith.constant 5.000000e-01 : f32
    %426 = vector.broadcast %cst_261 : f32 to vector<2x128xf32>
    %427 = arith.mulf %426, %425 : vector<2x128xf32>
    %c0_262 = arith.constant 0 : index
    %c0_263 = arith.constant 0 : index
    %428 = vector.load %arg69[%c0_262, %c0_263] : memref<10x128xf32, #tpu.memory_space<vmem>>, vector<2x128xf32>
    tpu.vector_store %arg69[%c0_262, %c0_263], %202 {strides = array<i32>} : memref<10x128xf32, #tpu.memory_space<vmem>>, vector<2x128xf32>,
    %429 = vector.extract_strided_slice %378 {offsets = [0, 0], sizes = [2, 128], strides = [1, 1]} : vector<2x384xf32> to vector<2x128xf32>
    %c2_264 = arith.constant 2 : index
    %c0_265 = arith.constant 0 : index
    %430 = vector.load %arg69[%c2_264, %c0_265] : memref<10x128xf32, #tpu.memory_space<vmem>>, vector<2x128xf32>
    tpu.vector_store %arg69[%c2_264, %c0_265], %429 {strides = array<i32>} : memref<10x128xf32, #tpu.memory_space<vmem>>, vector<2x128xf32>,
    %431 = vector.extract_strided_slice %378 {offsets = [0, 128], sizes = [2, 128], strides = [1, 1]} : vector<2x384xf32> to vector<2x128xf32>
    %c4_266 = arith.constant 4 : index
    %c0_267 = arith.constant 0 : index
    %432 = vector.load %arg69[%c4_266, %c0_267] : memref<10x128xf32, #tpu.memory_space<vmem>>, vector<2x128xf32>
    tpu.vector_store %arg69[%c4_266, %c0_267], %431 {strides = array<i32>} : memref<10x128xf32, #tpu.memory_space<vmem>>, vector<2x128xf32>,
    %433 = vector.extract_strided_slice %378 {offsets = [0, 256], sizes = [2, 128], strides = [1, 1]} : vector<2x384xf32> to vector<2x128xf32>
    %c6_268 = arith.constant 6 : index
    %c0_269 = arith.constant 0 : index
    %434 = vector.load %arg69[%c6_268, %c0_269] : memref<10x128xf32, #tpu.memory_space<vmem>>, vector<2x128xf32>
    tpu.vector_store %arg69[%c6_268, %c0_269], %433 {strides = array<i32>} : memref<10x128xf32, #tpu.memory_space<vmem>>, vector<2x128xf32>,
    %c8 = arith.constant 8 : index
    %c0_270 = arith.constant 0 : index
    %435 = vector.load %arg69[%c8, %c0_270] : memref<10x128xf32, #tpu.memory_space<vmem>>, vector<2x128xf32>
    tpu.vector_store %arg69[%c8, %c0_270], %427 {strides = array<i32>} : memref<10x128xf32, #tpu.memory_space<vmem>>, vector<2x128xf32>,
    return
  }
}

</mosaic_0001>

<bundles_post_ra>
// kernel: d_net_forward.1
= control target key start
LH: loop header
LB: loop body
LE: loop exit
PB: predicated region body
PF: predicated region fallthrough
CT: control target
= control target key end

     0   :  { %s12439_s6 = smov 1   ;;  %s12440_s10 = smov 2   ;;  %s14282_s0 = inlined_call_operand.smem [shape: u32[70], index: -1, kind: input, shape index: {}] }
   0x1   :  { %s12567_s5 = sld [smem:[%s14282_s0]]   ;;  %s12441_s14 = smov 3  }
   0x2   :  { %s12572_s9 = sld [smem:[%s14282_s0 + %s12439_s6]]   ;;  %s12442_s18 = smov 4  }
   0x3   :  { %s12577_s13 = sld [smem:[%s14282_s0 + %s12440_s10]]   ;;  %s12443_s22 = smov 5  }
   0x4   :  { %s12582_s17 = sld [smem:[%s14282_s0 + %s12441_s14]]   ;;  %s12444_s26 = smov 6  }
   0x5   :  { %s12587_s21 = sld [smem:[%s14282_s0 + %s12442_s18]]   ;;  %s12445_s30 = smov 7  }
   0x6   :  { %s12592_s25 = sld [smem:[%s14282_s0 + %s12443_s22]]   ;;  %s12446_s4 = smov 8  }
   0x7   :  { %14333 = sst [smem:[#allocation89_spill]] %s12567_s5  ;;  %s12447_s10 = smov 9  }
   0x8   :  { %14334 = sst [smem:[#allocation90_spill]] %s12572_s9  ;;  %s12448_s15 = smov 10  }
   0x9   :  { %s12597_s29 = sld [smem:[%s14282_s0 + %s12444_s26]]   ;;  %s12449_s20 = smov 11  }
   0xa   :  { %14335 = sst [smem:[#allocation91_spill]] %s12582_s17  ;;  %s12450_s26 = smov 12  }
   0xb   :  { %14336 = sst [smem:[#allocation92_spill]] %s12587_s21  ;;  %s12451_s1 = smov 13  }
   0xc   :  { %14337 = sst [smem:[#allocation93_spill]] %s12592_s25  ;;  %s12452_s7 = smov 14  }
   0xd   :  { %s12602_s3 = sld [smem:[%s14282_s0 + %s12445_s30]]   ;;  %s12454_s22 = smov 16  }
   0xe   :  { %s12607_s8 = sld [smem:[%s14282_s0 + %s12446_s4]]   ;;  %s12455_s28 = smov 17  }
   0xf   :  { %14338 = sst [smem:[#allocation94_spill]] %s12597_s29  ;;  %s12497_s16 = smov 59  }
  0x10   :  { %s12612_s14 = sld [smem:[%s14282_s0 + %s12447_s10]]   ;;  %s12498_s23 = smov 60  }
  0x11   :  { %s12617_s19 = sld [smem:[%s14282_s0 + %s12448_s15]]   ;;  %s12453_s15 = smov 15  }
  0x12   :  { %s12622_s24 = sld [smem:[%s14282_s0 + %s12449_s20]]   ;;  %s12500_s10 = smov 62  }
  0x13   :  { %14339 = sst [smem:[#allocation95_spill]] %s12602_s3 }
  0x14   :  { %14340 = sst [smem:[#allocation96_spill]] %s12607_s8 }
  0x15   :  { %s12627_s30 = sld [smem:[%s14282_s0 + %s12450_s26]]  }
  0x16   :  { %s12632_s6 = sld [smem:[%s14282_s0 + %s12451_s1]]   ;;  %s12499_s1 = smov 61  }
  0x17   :  { %14341 = sst [smem:[#allocation97_spill]] %s12617_s19 }
  0x18   :  { %s12637_s12 = sld [smem:[%s14282_s0 + %s12452_s7]]   ;;  %s12456_s7 = smov 18  }
  0x19   :  { %s12642_s20 = sld [smem:[%s14282_s0 + %s12453_s15]]   ;;  %s12457_s15 = smov 19  }
  0x1a   :  { %s12647_s27 = sld [smem:[%s14282_s0 + %s12454_s22]]   ;;  %s12458_s22 = smov 20  }
  0x1b   :  { %14342 = sst [smem:[#allocation98_spill]] %s12627_s30 }
  0x1c   :  { %14343 = sst [smem:[#allocation99_spill]] %s12632_s6 }
  0x1d   :  { %s12652_s4 = sld [smem:[%s14282_s0 + %s12455_s28]]   ;;  %s12459_s28 = smov 21  }
  0x1e   :  { %14344 = sst [smem:[#allocation100_spill]] %s12637_s12 }
  0x1f   :  { %14345 = sst [smem:[#allocation101_spill]] %s12642_s20 }
  0x20   :  { %14346 = sst [smem:[#allocation102_spill]] %s12647_s27 }
  0x21   :  { %s12657_s29 = sld [smem:[%s14282_s0 + %s12456_s7]]   ;;  %s12460_s7 = smov 22  }
  0x22   :  { %s12662_s21 = sld [smem:[%s14282_s0 + %s12457_s15]]   ;;  %s12461_s15 = smov 23  }
  0x23   :  { %14347 = sst [smem:[#allocation103_spill]] %s12652_s4 }
  0x24   :  { %s12667_s3 = sld [smem:[%s14282_s0 + %s12458_s22]]   ;;  %s12462_s22 = smov 24  }
  0x25   :  { %s12672_s25 = sld [smem:[%s14282_s0 + %s12459_s28]]   ;;  %s12463_s28 = smov 25  }
  0x26   :  { %s12692_s4 = sld [smem:[%s14282_s0 + %s12463_s28]]   ;;  %s12467_s28 = smov 29  }
  0x27   :  { %14348 = sst [smem:[#allocation104_spill]] %s12657_s29 }
  0x28   :  { %14349 = sst [smem:[#allocation105_spill]] %s12662_s21 }
  0x29   :  { %s12677_s29 = sld [smem:[%s14282_s0 + %s12460_s7]]   ;;  %s12464_s7 = smov 26  }
  0x2a   :  { %14350 = sst [smem:[#allocation106_spill]] %s12667_s3 }
  0x2b   :  { %s12682_s21 = sld [smem:[%s14282_s0 + %s12461_s15]]   ;;  %s12465_s15 = smov 27  }
  0x2c   :  { %s12687_s3 = sld [smem:[%s14282_s0 + %s12462_s22]]   ;;  %s12466_s22 = smov 28  }
  0x2d   :  { %s12697_s27 = sld [smem:[%s14282_s0 + %s12464_s7]]   ;;  %s12468_s7 = smov 30  }
  0x2e   :  { %s12712_s12 = sld [smem:[%s14282_s0 + %s12467_s28]]   ;;  %s12471_s28 = smov 33  }
  0x2f   :  { %14351 = sst [smem:[#allocation107_spill]] %s12677_s29 }
  0x30   :  { %s12717_s17 = sld [smem:[%s14282_s0 + %s12468_s7]]   ;;  %s12472_s7 = smov 34  }
  0x31   :  { %14352 = sst [smem:[#allocation108_spill]] %s12682_s21 }
  0x32   :  { %14353 = sst [smem:[#allocation109_spill]] %s12687_s3 }
  0x33   :  { %14354 = sst [smem:[#allocation110_spill]] %s12697_s27 }
  0x34   :  { %s12702_s21 = sld [smem:[%s14282_s0 + %s12465_s15]]   ;;  %s12469_s15 = smov 31  }
  0x35   :  { %s12707_s3 = sld [smem:[%s14282_s0 + %s12466_s22]]   ;;  %s12470_s22 = smov 32  }
  0x36   :  { %14356 = sst [smem:[#allocation112_spill]] %s12712_s12 }
  0x37   :  { %14357 = sst [smem:[#allocation113_spill]] %s12717_s17 }
  0x38   :  { %s12722_s6 = sld [smem:[%s14282_s0 + %s12469_s15]]   ;;  %s12473_s15 = smov 35  }
  0x39   :  { %s12732_s30 = sld [smem:[%s14282_s0 + %s12471_s28]]   ;;  %s12475_s28 = smov 37  }
  0x3a   :  { %s12737_s17 = sld [smem:[%s14282_s0 + %s12472_s7]]   ;;  %s12476_s7 = smov 38  }
  0x3b   :  { %14355 = sst [smem:[#allocation111_spill]] %s12707_s3 }
  0x3c   :  { %s12727_s3 = sld [smem:[%s14282_s0 + %s12470_s22]]   ;;  %s12474_s22 = smov 36  }
  0x3d   :  { %s12742_s5 = sld [smem:[%s14282_s0 + %s12473_s15]]   ;;  %s12477_s15 = smov 39  }
  0x3e   :  { %s12757_s12 = sld [smem:[%s14282_s0 + %s12476_s7]]   ;;  %s12480_s7 = smov 42  }
  0x3f   :  { %14359 = sst [smem:[#allocation115_spill]] %s12732_s30 }
  0x40   :  { %s12752_s30 = sld [smem:[%s14282_s0 + %s12475_s28]]   ;;  %s12479_s28 = smov 41  }
  0x41   :  { %s12777_s29 = sld [smem:[%s14282_s0 + %s12480_s7]]   ;;  %s12484_s7 = smov 46  }
  0x42   :  { %14358 = sst [smem:[#allocation114_spill]] %s12727_s3 }
  0x43   :  { %14360 = sst [smem:[#allocation116_spill]] %s12742_s5 }
  0x44   :  { %s12747_s3 = sld [smem:[%s14282_s0 + %s12474_s22]]   ;;  %s12478_s22 = smov 40  }
  0x45   :  { %s12762_s5 = sld [smem:[%s14282_s0 + %s12477_s15]]   ;;  %s12481_s15 = smov 43  }
  0x46   :  { %14361 = sst [smem:[#allocation117_spill]] %s12752_s30 }
  0x47   :  { %s12767_s27 = sld [smem:[%s14282_s0 + %s12478_s22]]   ;;  %s12482_s22 = smov 44  }
  0x48   :  { %s12772_s30 = sld [smem:[%s14282_s0 + %s12479_s28]]   ;;  %s12483_s28 = smov 45  }
  0x49   :  { %14364 = sst [smem:[#allocation120_spill]] %s12777_s29 }
  0x4a   :  { %s12787_s20 = sld [smem:[%s14282_s0 + %s12482_s22]]   ;;  %s12486_s22 = smov 48  }
  0x4b   :  { %14362 = sst [smem:[#allocation118_spill]] %s12762_s5 }
  0x4c   :  { %s12782_s5 = sld [smem:[%s14282_s0 + %s12481_s15]]   ;;  %s12485_s15 = smov 47  }
  0x4d   :  { %s12797_s29 = sld [smem:[%s14282_s0 + %s12484_s7]]   ;;  %s12488_s7 = smov 50  }
  0x4e   :  { %14363 = sst [smem:[#allocation119_spill]] %s12772_s30 }
  0x4f   :  { %s12792_s30 = sld [smem:[%s14282_s0 + %s12483_s28]]   ;;  %s12487_s28 = smov 49  }
  0x50   :  { %14365 = sst [smem:[#allocation121_spill]] %s12787_s20 }
  0x51   :  { %s12802_s19 = sld [smem:[%s14282_s0 + %s12485_s15]]   ;;  %s12489_s15 = smov 51  }
  0x52   :  { %s12807_s20 = sld [smem:[%s14282_s0 + %s12486_s22]]   ;;  %s12490_s22 = smov 52  }
  0x53   :  { %14366 = sst [smem:[#allocation122_spill]] %s12797_s29 }
  0x54   :  { %s12812_s8 = sld [smem:[%s14282_s0 + %s12487_s28]]   ;;  %s12491_s28 = smov 53  }
  0x55   :  { %s12817_s29 = sld [smem:[%s14282_s0 + %s12488_s7]]   ;;  %s12492_s7 = smov 54  }
  0x56   :  { %s12822_s9 = sld [smem:[%s14282_s0 + %s12489_s15]]   ;;  %s12493_s15 = smov 55  }
  0x57   :  { %14367 = sst [smem:[#allocation123_spill]] %s12802_s19 }
  0x58   :  { %14368 = sst [smem:[#allocation124_spill]] %s12807_s20 }
  0x59   :  { %s12827_s20 = sld [smem:[%s14282_s0 + %s12490_s22]]   ;;  %s12494_s22 = smov 56  }
  0x5a   :  { %14369 = sst [smem:[#allocation125_spill]] %s12812_s8 }
  0x5b   :  { %14370 = sst [smem:[#allocation126_spill]] %s12817_s29 }
  0x5c   :  { %14371 = sst [smem:[#allocation127_spill]] %s12822_s9 }
  0x5d   :  { %s12832_s8 = sld [smem:[%s14282_s0 + %s12491_s28]]   ;;  %s12495_s28 = smov 57  }
  0x5e   :  { %s12837_s29 = sld [smem:[%s14282_s0 + %s12492_s7]]   ;;  %s12496_s7 = smov 58  }
  0x5f   :  { %14372 = sst [smem:[#allocation128_spill]] %s12827_s20 }
  0x60   :  { %s12842_s9 = sld [smem:[%s14282_s0 + %s12493_s15]]   ;;  %s12505_s15 = smov 67  }
  0x61   :  { %s12847_s20 = sld [smem:[%s14282_s0 + %s12494_s22]]  }
  0x62   :  { %s12875_s19 = sld [smem:[%s14282_s0 + %s12500_s10]]   ;;  %s12504_s10 = smov 66  }
  0x63   :  { %14373 = sst [smem:[#allocation129_spill]] %s12832_s8 }
  0x64   :  { %14374 = sst [smem:[#allocation130_spill]] %s12837_s29 }
  0x65   :  { %s12852_s8 = sld [smem:[%s14282_s0 + %s12495_s28]]  }
  0x66   :  { %14375 = sst [smem:[#allocation131_spill]] %s12842_s9 }
  0x67   :  { %14376 = sst [smem:[#allocation132_spill]] %s12847_s20 }
  0x68   :  { %s7933_s29 = sld [smem:[%s14282_s0 + %s12496_s7]]  }
  0x69   :  { %s12860_s9 = sld [smem:[%s14282_s0 + %s12497_s16]]   ;;  %s12501_s16 = smov 63  }
  0x6a   :  { %s12865_s20 = sld [smem:[%s14282_s0 + %s12498_s23]]   ;;  %s12502_s23 = smov 64  }
  0x6b   :  { %14377 = sst [smem:[#allocation133_spill]] %s12852_s8 }
  0x6c   :  { %s12870_s8 = sld [smem:[%s14282_s0 + %s12499_s1]]   ;;  %s12503_s1 = smov 65  }
  0x6d   :  { %s12890_s7 = sld [smem:[%s14282_s0 + %s12503_s1]]   ;;  %s12507_s1 = smov 69  }
  0x6e   :  { %v144_v0 = vstv %s7933_s29  ;;  %s12506_s29 = smov 68  }
  0x6f   :  { %14378 = sst [smem:[#allocation134_spill]] %s12860_s9  ;;  %145 = vst [vmem:[#allocation2] sm:$0x1] %v144_v0 }
  0x70   :  { %14379 = sst [smem:[#allocation135_spill]] %s12865_s20 }
  0x71   :  { %s12880_s9 = sld [smem:[%s14282_s0 + %s12501_s16]]  }
  0x72   :  { %14380 = sst [smem:[#allocation136_spill]] %s12870_s8 }
  0x73   :  { %s12885_s20 = sld [smem:[%s14282_s0 + %s12502_s23]]  }
  0x74   :  { %14383 = sst [smem:[#allocation139_spill]] %s12890_s7 }
  0x75   :  { %s12895_s16 = sld [smem:[%s14282_s0 + %s12504_s10]]  }
  0x76   :  { %s12900_s23 = sld [smem:[%s14282_s0 + %s12505_s15]]  }
  0x77   :  { %14381 = sst [smem:[#allocation137_spill]] %s12880_s9 }
  0x78   :  { %s12905_s28 = sld [smem:[%s14282_s0 + %s12506_s29]]  }
  0x79   :  { %14382 = sst [smem:[#allocation138_spill]] %s12885_s20 }
  0x7a   :  { %s12910_s20 = sld [smem:[%s14282_s0 + %s12507_s1]]  }
  0x7b   :  { %146 = vsyncpa [#allocation4], 0 }
  0x7c   :  { %147 = vsyncpa [#allocation6], 0 }
  0x7d   :  { %148 = vsyncpa [#allocation9], 0 }
  0x7e   :  { %149 = vsyncpa [#allocation12], 0 }
  0x7f   :  { %150 = vsyncpa [#allocation15], 0 }
  0x80   :  { %151 = vsyncpa [#allocation18], 0 }
  0x81   :  { %152 = vsyncpa [#allocation21], 0 }
  0x82   :  { %153 = vsyncpa [#allocation24], 0 }
  0x83   :  { %154 = vsyncpa [#allocation27], 0 }
  0x84   :  { %155 = vsyncpa [#allocation30], 0 }
  0x85   :  { %156 = vsyncpa [#allocation33], 0 }
  0x86   :  { %157 = vsyncpa [#allocation36], 0 }
  0x87   :  { %158 = vsyncpa [#allocation39], 0 }
  0x88   :  { %159 = vsyncpa [#allocation42], 0 }
  0x89   :  { %160 = vsyncpa [#allocation45], 0 }
  0x8a   :  { %161 = vsyncpa [#allocation48], 0 }
  0x8b   :  { %162 = vsyncpa [#allocation51], 0 }
  0x8c   :  { %163 = vsyncpa [#allocation54], 0 }
  0x8d   :  { %164 = vsyncpa [#allocation57], 0 }
  0x8e   :  { %165 = vsyncpa [#allocation60], 0 }
  0x8f   :  { %166 = vsyncpa [#allocation63], 0 }
  0x90   :  { %167 = vsyncpa [#allocation66], 0  ;;  %s187_s0 = sshll.u32 %s12577_s13, 4  ;;  %s12508_s9 = smov [#allocation5]   ;;  %s188_s0 = int_to_ptr.hbm [resolvable:$true] %s187_s0 }
  0x91   :  { %s189_s8 = sshll.u32 %s12508_s9, 4  ;;  %s222_s7 = sshll.u32 %s12612_s14, 4  ;;  %s190_s8 = int_to_ptr.vmem [resolvable:$true] %s189_s8  ;;  %s223_s7 = int_to_ptr.hbm [resolvable:$true] %s222_s7 }
  0x92   :  { %s11387_s10 = sshra.s32 %s188_s0, 4  ;;  %s11391_s15 = scalar_lea.hbm %s12577_s13, 192  ;;  %s11388_s10 = int_to_ptr.hbm [resolvable:$true] %s11387_s10 }
  0x93   :  { %s11389_s11 = scalar_lea.hbm %s11388_s10, 192  ;;  %p11392_p1 = scmp.lt.s32.totalorder %s11388_s10, %s12577_s13 }
  0x94   :  { %p11390_p0 = scmp.ne.s32.totalorder %s11388_s10, %s11389_s11  ;;  %p11393_p2 = scmp.lt.s32.totalorder %s11391_s15, %s11389_s11 }
  0x96   :  { %p11394_p3 = por %p11393_p2, %p11392_p1 }
  0x98   :  { %p11395_p4 = pnand %p11394_p3, %p11390_p0 }
  0x9a   :  { %11398 = shalt.err (!%p11395_p4)
}
  0x9b   :  { %s12509_s18 = smov 256   ;;  %s12510_s29 = smov 16  }
  0x9c   :  { %195 = dma.hbm_to_vmem [thread:$0]  %s188_s0, 3072, %s190_s8, [#allocation6], %s12509_s18, %s12509_s18, %s12510_s29  }
  0x9d   :  { %s12511_s22 = smov [#allocation8]   ;;  %s244_s1 = sshll.u32 %s12622_s24, 4  ;;  %s245_s1 = int_to_ptr.hbm [resolvable:$true] %s244_s1 }
  0x9e   :  { %s224_s26 = sshll.u32 %s12511_s22, 4  ;;  %s11411_s13 = sshra.s32 %s223_s7, 4  ;;  %s225_s26 = int_to_ptr.vmem [resolvable:$true] %s224_s26  ;;  %s11412_s13 = int_to_ptr.hbm [resolvable:$true] %s11411_s13 }
  0x9f   :  { %s11413_s2 = scalar_lea.hbm %s11412_s13, 1  ;;  %s11415_s9 = scalar_lea.hbm %s12612_s14, 1 }
  0xa0   :  { %p11414_p5 = scmp.ne.s32.totalorder %s11412_s13, %s11413_s2  ;;  %p11416_p6 = scmp.lt.s32.totalorder %s11412_s13, %s12612_s14 }
  0xa1   :  { %p11417_p7 = scmp.lt.s32.totalorder %s11415_s9, %s11413_s2 }
  0xa3   :  { %p11418_p8 = por %p11417_p7, %p11416_p6 }
  0xa5   :  { %p11419_p9 = pnand %p11418_p8, %p11414_p5 }
  0xa7   :  { %11422 = shalt.err (!%p11419_p9)
}
  0xa8   :  { %227 = dma.hbm_to_vmem [thread:$0]  %s223_s7, 16, %s225_s26, [#allocation9]  }
  0xa9   :  { %s283_s0 = sshll.u32 %s12672_s25, 4  ;;  %s12512_s8 = smov [#allocation11]   ;;  %s12923_s0 = int_to_ptr.hbm [resolvable:$true] %s283_s0 }
  0xaa   :  { %s246_s10 = sshll.u32 %s12512_s8, 4  ;;  %s11435_s11 = sshra.s32 %s245_s1, 4  ;;  %s247_s10 = int_to_ptr.vmem [resolvable:$true] %s246_s10  ;;  %s11436_s11 = int_to_ptr.hbm [resolvable:$true] %s11435_s11 }
  0xab   :  { %s11437_s15 = scalar_lea.hbm %s11436_s11, 2  ;;  %s11439_s22 = scalar_lea.hbm %s12622_s24, 2 }
  0xac   :  { %p11438_p10 = scmp.ne.s32.totalorder %s11436_s11, %s11437_s15  ;;  %p11440_p11 = scmp.lt.s32.totalorder %s11436_s11, %s12622_s24 }
  0xad   :  { %p11441_p12 = scmp.lt.s32.totalorder %s11439_s22, %s11437_s15 }
  0xaf   :  { %p11442_p13 = por %p11441_p12, %p11440_p11 }
  0xb1   :  { %p11443_p0 = pnand %p11442_p13, %p11438_p10 }
  0xb3   :  { %11446 = shalt.err (!%p11443_p0)
}
  0xb4   :  { %249 = dma.hbm_to_vmem [thread:$0]  %s245_s1, 32, %s247_s10, [#allocation12]  }
  0xb5   :  { %s12513_s14 = smov [#allocation14]   ;;  %s312_s26 = sshll.u32 %s12692_s4, 4  ;;  %s313_s26 = int_to_ptr.hbm [resolvable:$true] %s312_s26 }
  0xb6   :  { %s285_s7 = sshll.u32 %s12513_s14, 4  ;;  %s11459_s13 = sshra.s32 %s12923_s0, 4  ;;  %s286_s7 = int_to_ptr.vmem [resolvable:$true] %s285_s7  ;;  %s11460_s13 = int_to_ptr.hbm [resolvable:$true] %s11459_s13 }
  0xb7   :  { %s11461_s2 = scalar_lea.hbm %s11460_s13, 256  ;;  %s11463_s9 = scalar_lea.hbm %s12672_s25, 256 }
  0xb8   :  { %p11462_p1 = scmp.ne.s32.totalorder %s11460_s13, %s11461_s2  ;;  %p11464_p2 = scmp.lt.s32.totalorder %s11460_s13, %s12672_s25 }
  0xb9   :  { %p11465_p3 = scmp.lt.s32.totalorder %s11463_s9, %s11461_s2 }
  0xbb   :  { %p11466_p4 = por %p11465_p3, %p11464_p2 }
  0xbd   :  { %p11467_p5 = pnand %p11466_p4, %p11462_p1 }
  0xbf   :  { %11470 = shalt.err (!%p11467_p5)
}
  0xc0   :  { %291 = dma.hbm_to_vmem [thread:$0]  %s12923_s0, 4096, %s286_s7, [#allocation15], %s12509_s18, %s12509_s18, %s12510_s29  }
  0xc1   :  { %s336_s24 = sshll.u32 %s12702_s21, 4  ;;  %s12514_s1 = smov [#allocation17]   ;;  %s337_s24 = int_to_ptr.hbm [resolvable:$true] %s336_s24 }
  0xc2   :  { %s314_s8 = sshll.u32 %s12514_s1, 4  ;;  %s11483_s10 = sshra.s32 %s313_s26, 4  ;;  %s315_s8 = int_to_ptr.vmem [resolvable:$true] %s314_s8  ;;  %s11484_s10 = int_to_ptr.hbm [resolvable:$true] %s11483_s10 }
  0xc3   :  { %s11485_s25 = scalar_lea.hbm %s11484_s10, 2  ;;  %s11487_s11 = scalar_lea.hbm %s12692_s4, 2 }
  0xc4   :  { %p11486_p6 = scmp.ne.s32.totalorder %s11484_s10, %s11485_s25  ;;  %p11488_p7 = scmp.lt.s32.totalorder %s11484_s10, %s12692_s4 }
  0xc5   :  { %p11489_p8 = scmp.lt.s32.totalorder %s11487_s11, %s11485_s25 }
  0xc7   :  { %p11490_p9 = por %p11489_p8, %p11488_p7 }
  0xc9   :  { %p11491_p10 = pnand %p11490_p9, %p11486_p6 }
  0xcb   :  { %11494 = shalt.err (!%p11491_p10)
}
  0xcc   :  { %317 = dma.hbm_to_vmem [thread:$0]  %s313_s26, 32, %s315_s8, [#allocation18]  }
  0xcd   :  { %s12515_s0 = smov [#allocation20]   ;;  %s362_s22 = sshll.u32 %s12722_s6, 4  ;;  %s363_s22 = int_to_ptr.hbm [resolvable:$true] %s362_s22 }
  0xce   :  { %s338_s15 = sshll.u32 %s12515_s0, 4  ;;  %s11507_s14 = sshra.s32 %s337_s24, 4  ;;  %s339_s15 = int_to_ptr.vmem [resolvable:$true] %s338_s15  ;;  %s11508_s14 = int_to_ptr.hbm [resolvable:$true] %s11507_s14 }
  0xcf   :  { %s11509_s7 = scalar_lea.hbm %s11508_s14, 1  ;;  %s11511_s13 = scalar_lea.hbm %s12702_s21, 1 }
  0xd0   :  { %p11510_p11 = scmp.ne.s32.totalorder %s11508_s14, %s11509_s7  ;;  %p11512_p12 = scmp.lt.s32.totalorder %s11508_s14, %s12702_s21 }
  0xd1   :  { %p11513_p13 = scmp.lt.s32.totalorder %s11511_s13, %s11509_s7 }
  0xd3   :  { %p11514_p0 = por %p11513_p13, %p11512_p12 }
  0xd5   :  { %p11515_p1 = pnand %p11514_p0, %p11510_p11 }
  0xd7   :  { %11518 = shalt.err (!%p11515_p1)
}
  0xd8   :  { %341 = dma.hbm_to_vmem [thread:$0]  %s337_s24, 16, %s339_s15, [#allocation21]  }
  0xd9   :  { %s387_s4 = sshll.u32 %s12737_s17, 4  ;;  %s12516_s26 = smov [#allocation23]   ;;  %s12942_s4 = int_to_ptr.hbm [resolvable:$true] %s387_s4 }
  0xda   :  { %s364_s2 = sshll.u32 %s12516_s26, 4  ;;  %s11531_s9 = sshra.s32 %s363_s22, 4  ;;  %s365_s2 = int_to_ptr.vmem [resolvable:$true] %s364_s2  ;;  %s11532_s9 = int_to_ptr.hbm [resolvable:$true] %s11531_s9 }
  0xdb   :  { %s11533_s1 = scalar_lea.hbm %s11532_s9, 2  ;;  %s11535_s8 = scalar_lea.hbm %s12722_s6, 2 }
  0xdc   :  { %p11534_p2 = scmp.ne.s32.totalorder %s11532_s9, %s11533_s1  ;;  %p11536_p3 = scmp.lt.s32.totalorder %s11532_s9, %s12722_s6 }
  0xdd   :  { %p11537_p4 = scmp.lt.s32.totalorder %s11535_s8, %s11533_s1 }
  0xdf   :  { %p11538_p5 = por %p11537_p4, %p11536_p3 }
  0xe1   :  { %p11539_p6 = pnand %p11538_p5, %p11534_p2 }
  0xe3   :  { %11542 = shalt.err (!%p11539_p6)
}
  0xe4   :  { %367 = dma.hbm_to_vmem [thread:$0]  %s363_s22, 32, %s365_s2, [#allocation24]  }
  0xe5   :  { %s12517_s21 = smov [#allocation26]   ;;  %s11555_s10 = sshra.s32 %s12942_s4, 4  ;;  %s11556_s10 = int_to_ptr.hbm [resolvable:$true] %s11555_s10 }
  0xe6   :  { %s389_s24 = sshll.u32 %s12517_s21, 4  ;;  %s11557_s25 = scalar_lea.hbm %s11556_s10, 288  ;;  %s390_s24 = int_to_ptr.vmem [resolvable:$true] %s389_s24 }
  0xe7   :  { %p11558_p7 = scmp.ne.s32.totalorder %s11556_s10, %s11557_s25  ;;  %s11559_s11 = scalar_lea.hbm %s12737_s17, 288 }
  0xe8   :  { %p11560_p8 = scmp.lt.s32.totalorder %s11556_s10, %s12737_s17  ;;  %p11561_p9 = scmp.lt.s32.totalorder %s11559_s11, %s11557_s25 }
  0xea   :  { %p11562_p10 = por %p11561_p9, %p11560_p8 }
  0xec   :  { %p11563_p11 = pnand %p11562_p10, %p11558_p7 }
  0xee   :  { %11566 = shalt.err (!%p11563_p11)
}
  0xef   :  { %s12518_s6 = smov 192   ;;  %s12519_s0 = smov 12  }
  0xf0   :  { %395 = dma.hbm_to_vmem [thread:$0]  %s12942_s4, 4608, %s390_s24, [#allocation27], %s12518_s6, %s12518_s6, %s12519_s0  }
  0xf1   :  { %s411_s15 = sshll.u32 %s12747_s3, 4  ;;  %s12520_s22 = smov [#allocation29]   ;;  %s412_s15 = int_to_ptr.hbm [resolvable:$true] %s411_s15 }
  0xf2   :  { %s413_s14 = sshll.u32 %s12520_s22, 4  ;;  %s435_s7 = sshll.u32 %s12757_s12, 4  ;;  %s414_s14 = int_to_ptr.vmem [resolvable:$true] %s413_s14  ;;  %s436_s7 = int_to_ptr.hbm [resolvable:$true] %s435_s7 }
  0xf3   :  { %s11579_s13 = sshra.s32 %s412_s15, 4  ;;  %s11583_s26 = scalar_lea.hbm %s12747_s3, 192  ;;  %s11580_s13 = int_to_ptr.hbm [resolvable:$true] %s11579_s13 }
  0xf4   :  { %s11581_s17 = scalar_lea.hbm %s11580_s13, 192  ;;  %p11584_p13 = scmp.lt.s32.totalorder %s11580_s13, %s12747_s3 }
  0xf5   :  { %p11582_p12 = scmp.ne.s32.totalorder %s11580_s13, %s11581_s17  ;;  %p11585_p0 = scmp.lt.s32.totalorder %s11583_s26, %s11581_s17 }
  0xf7   :  { %p11586_p1 = por %p11585_p0, %p11584_p13 }
  0xf9   :  { %p11587_p2 = pnand %p11586_p1, %p11582_p12 }
  0xfb   :  { %11590 = shalt.err (!%p11587_p2)
}
  0xfc   :  { %s12521_s2 = smov 128   ;;  %s12522_s4 = smov 8  }
  0xfd   :  { %419 = dma.hbm_to_vmem [thread:$0]  %s412_s15, 3072, %s414_s14, [#allocation30], %s12521_s2, %s12521_s2, %s12522_s4  }
  0xfe   :  { %s12523_s9 = smov [#allocation32]   ;;  %s460_s8 = sshll.u32 %s12767_s27, 4  ;;  %s461_s8 = int_to_ptr.hbm [resolvable:$true] %s460_s8 }
  0xff   :  { %s437_s1 = sshll.u32 %s12523_s9, 4  ;;  %s11603_s3 = sshra.s32 %s436_s7, 4  ;;  %s438_s1 = int_to_ptr.vmem [resolvable:$true] %s437_s1  ;;  %s11604_s3 = int_to_ptr.hbm [resolvable:$true] %s11603_s3 }
 0x100   :  { %s11605_s21 = scalar_lea.hbm %s11604_s3, 192  ;;  %s11607_s24 = scalar_lea.hbm %s12757_s12, 192 }
 0x101   :  { %p11606_p3 = scmp.ne.s32.totalorder %s11604_s3, %s11605_s21  ;;  %p11608_p4 = scmp.lt.s32.totalorder %s11604_s3, %s12757_s12 }
 0x102   :  { %p11609_p5 = scmp.lt.s32.totalorder %s11607_s24, %s11605_s21 }
 0x104   :  { %p11610_p6 = por %p11609_p5, %p11608_p4 }
 0x106   :  { %p11611_p7 = pnand %p11610_p6, %p11606_p3 }
 0x108   :  { %11614 = shalt.err (!%p11611_p7)
}
 0x109   :  { %443 = dma.hbm_to_vmem [thread:$0]  %s436_s7, 3072, %s438_s1, [#allocation33], %s12521_s2, %s12521_s2, %s12522_s4  }
 0x10a   :  { %s483_s10 = sshll.u32 %s12782_s5, 4  ;;  %s12524_s25 = smov [#allocation35]   ;;  %s12964_s10 = int_to_ptr.hbm [resolvable:$true] %s483_s10 }
 0x10b   :  { %s462_s11 = sshll.u32 %s12524_s25, 4  ;;  %s11627_s6 = sshra.s32 %s461_s8, 4  ;;  %s463_s11 = int_to_ptr.vmem [resolvable:$true] %s462_s11  ;;  %s11628_s6 = int_to_ptr.hbm [resolvable:$true] %s11627_s6 }
 0x10c   :  { %s11629_s12 = scalar_lea.hbm %s11628_s6, 2  ;;  %s11631_s0 = scalar_lea.hbm %s12767_s27, 2 }
 0x10d   :  { %p11630_p8 = scmp.ne.s32.totalorder %s11628_s6, %s11629_s12  ;;  %p11632_p9 = scmp.lt.s32.totalorder %s11628_s6, %s12767_s27 }
 0x10e   :  { %p11633_p10 = scmp.lt.s32.totalorder %s11631_s0, %s11629_s12 }
 0x110   :  { %p11634_p11 = por %p11633_p10, %p11632_p9 }
 0x112   :  { %p11635_p12 = pnand %p11634_p11, %p11630_p8 }
 0x114   :  { %11638 = shalt.err (!%p11635_p12)
}
 0x115   :  { %465 = dma.hbm_to_vmem [thread:$0]  %s461_s8, 32, %s463_s11, [#allocation36]  }
 0x116   :  { %s12525_s15 = smov [#allocation38]   ;;  %s510_s14 = sshll.u32 %s12792_s30, 4  ;;  %s511_s14 = int_to_ptr.hbm [resolvable:$true] %s510_s14 }
 0x117   :  { %s485_s22 = sshll.u32 %s12525_s15, 4  ;;  %s11651_s7 = sshra.s32 %s12964_s10, 4  ;;  %s486_s22 = int_to_ptr.vmem [resolvable:$true] %s485_s22  ;;  %s11652_s7 = int_to_ptr.hbm [resolvable:$true] %s11651_s7 }
 0x118   :  { %s11653_s13 = scalar_lea.hbm %s11652_s7, 192  ;;  %s11655_s17 = scalar_lea.hbm %s12782_s5, 192 }
 0x119   :  { %p11654_p13 = scmp.ne.s32.totalorder %s11652_s7, %s11653_s13  ;;  %p11656_p0 = scmp.lt.s32.totalorder %s11652_s7, %s12782_s5 }
 0x11a   :  { %p11657_p1 = scmp.lt.s32.totalorder %s11655_s17, %s11653_s13 }
 0x11c   :  { %p11658_p2 = por %p11657_p1, %p11656_p0 }
 0x11e   :  { %p11659_p3 = pnand %p11658_p2, %p11654_p13 }
 0x120   :  { %11662 = shalt.err (!%p11659_p3)
}
 0x121   :  { %s14384_s27 = sld [smem:[#allocation123_spill]]  ;;  %s12526_s9 = smov [#allocation41]  }
 0x122   :  { %491 = dma.hbm_to_vmem [thread:$0]  %s12964_s10, 3072, %s486_s22, [#allocation39], %s12521_s2, %s12521_s2, %s12522_s4  }
 0x123   :  { %s512_s1 = sshll.u32 %s12526_s9, 4  ;;  %s11675_s8 = sshra.s32 %s511_s14, 4  ;;  %s513_s1 = int_to_ptr.vmem [resolvable:$true] %s512_s1  ;;  %s11676_s8 = int_to_ptr.hbm [resolvable:$true] %s11675_s8 }
 0x124   :  { %s11677_s5 = scalar_lea.hbm %s11676_s8, 2  ;;  %s11679_s3 = scalar_lea.hbm %s12792_s30, 2 }
 0x125   :  { %p11678_p4 = scmp.ne.s32.totalorder %s11676_s8, %s11677_s5  ;;  %p11680_p5 = scmp.lt.s32.totalorder %s11676_s8, %s12792_s30 }
 0x126   :  { %p11681_p6 = scmp.lt.s32.totalorder %s11679_s3, %s11677_s5 }
 0x127   :  { %s532_s26 = sshll.u32 %s14384_s27, 4  ;;  %s533_s26 = int_to_ptr.hbm [resolvable:$true] %s532_s26 }
 0x128   :  { %p11682_p7 = por %p11681_p6, %p11680_p5 }
 0x12a   :  { %p11683_p8 = pnand %p11682_p7, %p11678_p4 }
 0x12c   :  { %11686 = shalt.err (!%p11683_p8)
}
 0x12d   :  { %515 = dma.hbm_to_vmem [thread:$0]  %s511_s14, 32, %s513_s1, [#allocation42]  }
 0x12e   :  { %s14385_s21 = sld [smem:[#allocation125_spill]]  ;;  %s12527_s24 = smov [#allocation44]  }
 0x12f   :  { %s534_s10 = sshll.u32 %s12527_s24, 4  ;;  %s11699_s11 = sshra.s32 %s533_s26, 4  ;;  %s535_s10 = int_to_ptr.vmem [resolvable:$true] %s534_s10  ;;  %s11700_s11 = int_to_ptr.hbm [resolvable:$true] %s11699_s11 }
 0x130   :  { %s11701_s6 = scalar_lea.hbm %s11700_s11, 2  ;;  %s11703_s12 = scalar_lea.hbm %s14384_s27, 2 }
 0x131   :  { %p11702_p9 = scmp.ne.s32.totalorder %s11700_s11, %s11701_s6  ;;  %p11704_p10 = scmp.lt.s32.totalorder %s11700_s11, %s14384_s27 }
 0x132   :  { %p11705_p11 = scmp.lt.s32.totalorder %s11703_s12, %s11701_s6 }
 0x134   :  { %s553_s25 = sshll.u32 %s14385_s21, 4  ;;  %p11706_p12 = por %p11705_p11, %p11704_p10  ;;  %s12980_s25 = int_to_ptr.hbm [resolvable:$true] %s553_s25 }
 0x136   :  { %p11707_p13 = pnand %p11706_p12, %p11702_p9 }
 0x138   :  { %11710 = shalt.err (!%p11707_p13)
}
 0x139   :  { %537 = dma.hbm_to_vmem [thread:$0]  %s533_s26, 32, %s535_s10, [#allocation45]  }
 0x13a   :  { %s14386_s30 = sld [smem:[#allocation127_spill]]  ;;  %s12528_s15 = smov [#allocation47]  }
 0x13b   :  { %s555_s22 = sshll.u32 %s12528_s15, 4  ;;  %s11723_s14 = sshra.s32 %s12980_s25, 4  ;;  %s556_s22 = int_to_ptr.vmem [resolvable:$true] %s555_s22  ;;  %s11724_s14 = int_to_ptr.hbm [resolvable:$true] %s11723_s14 }
 0x13c   :  { %s11725_s7 = scalar_lea.hbm %s11724_s14, 192  ;;  %s11727_s13 = scalar_lea.hbm %s14385_s21, 192 }
 0x13d   :  { %p11726_p0 = scmp.ne.s32.totalorder %s11724_s14, %s11725_s7  ;;  %p11728_p1 = scmp.lt.s32.totalorder %s11724_s14, %s14385_s21 }
 0x13e   :  { %p11729_p2 = scmp.lt.s32.totalorder %s11727_s13, %s11725_s7 }
 0x140   :  { %s580_s0 = sshll.u32 %s14386_s30, 4  ;;  %p11730_p3 = por %p11729_p2, %p11728_p1  ;;  %s581_s0 = int_to_ptr.hbm [resolvable:$true] %s580_s0 }
 0x142   :  { %p11731_p4 = pnand %p11730_p3, %p11726_p0 }
 0x144   :  { %11734 = shalt.err (!%p11731_p4)
}
 0x145   :  { %s14387_s17 = sld [smem:[#allocation129_spill]]  ;;  %s12529_s27 = smov [#allocation50]  }
 0x146   :  { %561 = dma.hbm_to_vmem [thread:$0]  %s12980_s25, 3072, %s556_s22, [#allocation48], %s12521_s2, %s12521_s2, %s12522_s4  }
 0x147   :  { %s582_s26 = sshll.u32 %s12529_s27, 4  ;;  %s11747_s1 = sshra.s32 %s581_s0, 4  ;;  %s583_s26 = int_to_ptr.vmem [resolvable:$true] %s582_s26  ;;  %s11748_s1 = int_to_ptr.hbm [resolvable:$true] %s11747_s1 }
 0x148   :  { %s11749_s8 = scalar_lea.hbm %s11748_s1, 2  ;;  %s11751_s5 = scalar_lea.hbm %s14386_s30, 2 }
 0x149   :  { %p11750_p5 = scmp.ne.s32.totalorder %s11748_s1, %s11749_s8  ;;  %p11752_p6 = scmp.lt.s32.totalorder %s11748_s1, %s14386_s30 }
 0x14a   :  { %p11753_p7 = scmp.lt.s32.totalorder %s11751_s5, %s11749_s8 }
 0x14b   :  { %s602_s9 = sshll.u32 %s14387_s17, 4  ;;  %s603_s9 = int_to_ptr.hbm [resolvable:$true] %s602_s9 }
 0x14c   :  { %p11754_p8 = por %p11753_p7, %p11752_p6 }
 0x14e   :  { %p11755_p9 = pnand %p11754_p8, %p11750_p5 }
 0x150   :  { %11758 = shalt.err (!%p11755_p9)
}
 0x151   :  { %585 = dma.hbm_to_vmem [thread:$0]  %s581_s0, 32, %s583_s26, [#allocation51]  }
 0x152   :  { %s14388_s3 = sld [smem:[#allocation131_spill]]  ;;  %s12530_s24 = smov [#allocation53]  }
 0x153   :  { %s604_s10 = sshll.u32 %s12530_s24, 4  ;;  %s11771_s25 = sshra.s32 %s603_s9, 4  ;;  %s605_s10 = int_to_ptr.vmem [resolvable:$true] %s604_s10  ;;  %s11772_s25 = int_to_ptr.hbm [resolvable:$true] %s11771_s25 }
 0x154   :  { %s11773_s11 = scalar_lea.hbm %s11772_s25, 1  ;;  %s11775_s6 = scalar_lea.hbm %s14387_s17, 1 }
 0x155   :  { %p11774_p10 = scmp.ne.s32.totalorder %s11772_s25, %s11773_s11  ;;  %p11776_p11 = scmp.lt.s32.totalorder %s11772_s25, %s14387_s17 }
 0x156   :  { %p11777_p12 = scmp.lt.s32.totalorder %s11775_s6, %s11773_s11 }
 0x158   :  { %s625_s21 = sshll.u32 %s14388_s3, 4  ;;  %p11778_p13 = por %p11777_p12, %p11776_p11  ;;  %s12996_s21 = int_to_ptr.hbm [resolvable:$true] %s625_s21 }
 0x15a   :  { %p11779_p0 = pnand %p11778_p13, %p11774_p10 }
 0x15c   :  { %11782 = shalt.err (!%p11779_p0)
}
 0x15d   :  { %607 = dma.hbm_to_vmem [thread:$0]  %s603_s9, 16, %s605_s10, [#allocation54]  }
 0x15e   :  { %s14389_s12 = sld [smem:[#allocation135_spill]]  ;;  %s12531_s30 = smov [#allocation56]  }
 0x15f   :  { %s627_s0 = sshll.u32 %s12531_s30, 4  ;;  %s11795_s22 = sshra.s32 %s12996_s21, 4  ;;  %s628_s0 = int_to_ptr.vmem [resolvable:$true] %s627_s0  ;;  %s11796_s22 = int_to_ptr.hbm [resolvable:$true] %s11795_s22 }
 0x160   :  { %s11797_s14 = scalar_lea.hbm %s11796_s22, 256  ;;  %s11799_s7 = scalar_lea.hbm %s14388_s3, 256 }
 0x161   :  { %p11798_p1 = scmp.ne.s32.totalorder %s11796_s22, %s11797_s14  ;;  %p11800_p2 = scmp.lt.s32.totalorder %s11796_s22, %s14388_s3 }
 0x162   :  { %p11801_p3 = scmp.lt.s32.totalorder %s11799_s7, %s11797_s14 }
 0x164   :  { %s658_s15 = sshll.u32 %s14389_s12, 4  ;;  %p11802_p4 = por %p11801_p3, %p11800_p2  ;;  %s659_s15 = int_to_ptr.hbm [resolvable:$true] %s658_s15 }
 0x166   :  { %p11803_p5 = pnand %p11802_p4, %p11798_p1 }
 0x168   :  { %11806 = shalt.err (!%p11803_p5)
}
 0x169   :  { %633 = dma.hbm_to_vmem [thread:$0]  %s12996_s21, 4096, %s628_s0, [#allocation57], %s12521_s2, %s12521_s2, %s12522_s4  }
 0x16a   :  { %s680_s13 = sshll.u32 %s12875_s19, 4  ;;  %s12532_s17 = smov [#allocation59]   ;;  %s681_s13 = int_to_ptr.hbm [resolvable:$true] %s680_s13 }
 0x16b   :  { %s660_s27 = sshll.u32 %s12532_s17, 4  ;;  %s11819_s26 = sshra.s32 %s659_s15, 4  ;;  %s661_s27 = int_to_ptr.vmem [resolvable:$true] %s660_s27  ;;  %s11820_s26 = int_to_ptr.hbm [resolvable:$true] %s11819_s26 }
 0x16c   :  { %s11821_s9 = scalar_lea.hbm %s11820_s26, 1  ;;  %s11823_s1 = scalar_lea.hbm %s14389_s12, 1 }
 0x16d   :  { %p11822_p6 = scmp.ne.s32.totalorder %s11820_s26, %s11821_s9  ;;  %p11824_p7 = scmp.lt.s32.totalorder %s11820_s26, %s14389_s12 }
 0x16e   :  { %p11825_p8 = scmp.lt.s32.totalorder %s11823_s1, %s11821_s9 }
 0x170   :  { %p11826_p9 = por %p11825_p8, %p11824_p7 }
 0x172   :  { %p11827_p10 = pnand %p11826_p9, %p11822_p6 }
 0x174   :  { %11830 = shalt.err (!%p11827_p10)
}
 0x175   :  { %663 = dma.hbm_to_vmem [thread:$0]  %s659_s15, 16, %s661_s27, [#allocation60]  }
 0x176   :  { %s14390_s8 = sld [smem:[#allocation90_spill]]  ;;  %s12533_s5 = smov [#allocation62]  }
 0x177   :  { %s682_s3 = sshll.u32 %s12533_s5, 4  ;;  %s11843_s24 = sshra.s32 %s681_s13, 4  ;;  %s683_s3 = int_to_ptr.vmem [resolvable:$true] %s682_s3  ;;  %s11844_s24 = int_to_ptr.hbm [resolvable:$true] %s11843_s24 }
 0x178   :  { %s11845_s10 = scalar_lea.hbm %s11844_s24, 1  ;;  %s11847_s25 = scalar_lea.hbm %s12875_s19, 1 }
 0x179   :  { %p11846_p11 = scmp.ne.s32.totalorder %s11844_s24, %s11845_s10  ;;  %p11848_p12 = scmp.lt.s32.totalorder %s11844_s24, %s12875_s19 }
 0x17a   :  { %p11849_p13 = scmp.lt.s32.totalorder %s11847_s25, %s11845_s10 }
 0x17c   :  { %s174_s21 = sshll.u32 %s14390_s8, 4  ;;  %p11850_p0 = por %p11849_p13, %p11848_p12  ;;  %s13012_s21 = int_to_ptr.hbm [resolvable:$true] %s174_s21 }
 0x17e   :  { %p11851_p1 = pnand %p11850_p0, %p11846_p11 }
 0x180   :  { %11854 = shalt.err (!%p11851_p1)
}
 0x181   :  { %685 = dma.hbm_to_vmem [thread:$0]  %s681_s13, 16, %s683_s3, [#allocation63]  }
 0x182   :  { %s14391_s11 = sld [smem:[#allocation96_spill]]  ;;  %s12534_s12 = smov [#allocation3]  }
 0x183   :  { %s176_s30 = sshll.u32 %s12534_s12, 4  ;;  %s11867_s0 = sshra.s32 %s13012_s21, 4  ;;  %s177_s30 = int_to_ptr.vmem [resolvable:$true] %s176_s30  ;;  %s11868_s0 = int_to_ptr.hbm [resolvable:$true] %s11867_s0 }
 0x184   :  { %s11869_s15 = scalar_lea.hbm %s11868_s0, 192  ;;  %s11871_s22 = scalar_lea.hbm %s14390_s8, 192 }
 0x185   :  { %p11870_p2 = scmp.ne.s32.totalorder %s11868_s0, %s11869_s15  ;;  %p11872_p3 = scmp.lt.s32.totalorder %s11868_s0, %s14390_s8 }
 0x186   :  { %p11873_p4 = scmp.lt.s32.totalorder %s11871_s22, %s11869_s15 }
 0x188   :  { %s211_s6 = sshll.u32 %s14391_s11, 4  ;;  %p11874_p5 = por %p11873_p4, %p11872_p3  ;;  %s212_s6 = int_to_ptr.hbm [resolvable:$true] %s211_s6 }
 0x18a   :  { %p11875_p6 = pnand %p11874_p5, %p11870_p2 }
 0x18c   :  { %11878 = shalt.err (!%p11875_p6)
}
 0x18d   :  { %s14392_s19 = sld [smem:[#allocation97_spill]]  ;;  %s12535_s14 = smov [#allocation7]  }
 0x18e   :  { %182 = dma.hbm_to_vmem [thread:$0]  %s13012_s21, 3072, %s177_s30, [#allocation4], %s12509_s18, %s12509_s18, %s12510_s29  }
 0x18f   :  { %s213_s7 = sshll.u32 %s12535_s14, 4  ;;  %s11891_s17 = sshra.s32 %s212_s6, 4  ;;  %s214_s7 = int_to_ptr.vmem [resolvable:$true] %s213_s7  ;;  %s11892_s17 = int_to_ptr.hbm [resolvable:$true] %s11891_s17 }
 0x190   :  { %s11893_s27 = scalar_lea.hbm %s11892_s17, 1  ;;  %s11895_s26 = scalar_lea.hbm %s14391_s11, 1 }
 0x191   :  { %p11894_p7 = scmp.ne.s32.totalorder %s11892_s17, %s11893_s27  ;;  %p11896_p8 = scmp.lt.s32.totalorder %s11892_s17, %s14391_s11 }
 0x192   :  { %p11897_p9 = scmp.lt.s32.totalorder %s11895_s26, %s11893_s27 }
 0x193   :  { %s233_s13 = sshll.u32 %s14392_s19, 4  ;;  %s234_s13 = int_to_ptr.hbm [resolvable:$true] %s233_s13 }
 0x194   :  { %p11898_p10 = por %p11897_p9, %p11896_p8 }
 0x196   :  { %p11899_p11 = pnand %p11898_p10, %p11894_p7 }
 0x198   :  { %11902 = shalt.err (!%p11899_p11)
}
 0x199   :  { %216 = dma.hbm_to_vmem [thread:$0]  %s212_s6, 16, %s214_s7, [#allocation6]  }
 0x19a   :  { %s14393_s9 = sld [smem:[#allocation101_spill]]  ;;  %s12536_s29 = smov [#allocation10]  }
 0x19b   :  { %s235_s1 = sshll.u32 %s12536_s29, 4  ;;  %s11915_s8 = sshra.s32 %s234_s13, 4  ;;  %s236_s1 = int_to_ptr.vmem [resolvable:$true] %s235_s1  ;;  %s11916_s8 = int_to_ptr.hbm [resolvable:$true] %s11915_s8 }
 0x19c   :  { %s11917_s5 = scalar_lea.hbm %s11916_s8, 1  ;;  %s11919_s3 = scalar_lea.hbm %s14392_s19, 1 }
 0x19d   :  { %p11918_p12 = scmp.ne.s32.totalorder %s11916_s8, %s11917_s5  ;;  %p11920_p13 = scmp.lt.s32.totalorder %s11916_s8, %s14392_s19 }
 0x19e   :  { %p11921_p0 = scmp.lt.s32.totalorder %s11919_s3, %s11917_s5 }
 0x1a0   :  { %s260_s18 = sshll.u32 %s14393_s9, 4  ;;  %p11922_p1 = por %p11921_p0, %p11920_p13  ;;  %s13028_s18 = int_to_ptr.hbm [resolvable:$true] %s260_s18 }
 0x1a2   :  { %p11923_p2 = pnand %p11922_p1, %p11918_p12 }
 0x1a4   :  { %11926 = shalt.err (!%p11923_p2)
}
 0x1a5   :  { %238 = dma.hbm_to_vmem [thread:$0]  %s234_s13, 16, %s236_s1, [#allocation9]  }
 0x1a6   :  { %s14394_s21 = sld [smem:[#allocation107_spill]]  ;;  %s12537_s24 = smov [#allocation13]  }
 0x1a7   :  { %s262_s10 = sshll.u32 %s12537_s24, 4  ;;  %s11939_s11 = sshra.s32 %s13028_s18, 4  ;;  %s263_s10 = int_to_ptr.vmem [resolvable:$true] %s262_s10  ;;  %s11940_s11 = int_to_ptr.hbm [resolvable:$true] %s11939_s11 }
 0x1a8   :  { %s11941_s6 = scalar_lea.hbm %s11940_s11, 32  ;;  %s11943_s12 = scalar_lea.hbm %s14393_s9, 32 }
 0x1a9   :  { %p11942_p3 = scmp.ne.s32.totalorder %s11940_s11, %s11941_s6  ;;  %p11944_p4 = scmp.lt.s32.totalorder %s11940_s11, %s14393_s9 }
 0x1aa   :  { %p11945_p5 = scmp.lt.s32.totalorder %s11943_s12, %s11941_s6 }
 0x1ac   :  { %s297_s25 = sshll.u32 %s14394_s21, 4  ;;  %p11946_p6 = por %p11945_p5, %p11944_p4  ;;  %s298_s25 = int_to_ptr.hbm [resolvable:$true] %s297_s25 }
 0x1ae   :  { %p11947_p7 = pnand %p11946_p6, %p11942_p3 }
 0x1b0   :  { %11950 = shalt.err (!%p11947_p7)
}
 0x1b1   :  { %s14395_s30 = sld [smem:[#allocation110_spill]]  ;;  %s12538_s15 = smov [#allocation16]  }
 0x1b2   :  { %268 = dma.hbm_to_vmem [thread:$0]  %s13028_s18, 512, %s263_s10, [#allocation12], %s12521_s2, %s12521_s2, %s12522_s4  }
 0x1b3   :  { %s299_s22 = sshll.u32 %s12538_s15, 4  ;;  %s11963_s19 = sshra.s32 %s298_s25, 4  ;;  %s300_s22 = int_to_ptr.vmem [resolvable:$true] %s299_s22  ;;  %s11964_s19 = int_to_ptr.hbm [resolvable:$true] %s11963_s19 }
 0x1b4   :  { %s11965_s14 = scalar_lea.hbm %s11964_s19, 1  ;;  %s11967_s7 = scalar_lea.hbm %s14394_s21, 1 }
 0x1b5   :  { %p11966_p8 = scmp.ne.s32.totalorder %s11964_s19, %s11965_s14  ;;  %p11968_p9 = scmp.lt.s32.totalorder %s11964_s19, %s14394_s21 }
 0x1b6   :  { %p11969_p10 = scmp.lt.s32.totalorder %s11967_s7, %s11965_s14 }
 0x1b7   :  { %s322_s0 = sshll.u32 %s14395_s30, 4  ;;  %s13041_s0 = int_to_ptr.hbm [resolvable:$true] %s322_s0 }
 0x1b8   :  { %p11970_p11 = por %p11969_p10, %p11968_p9 }
 0x1ba   :  { %p11971_p12 = pnand %p11970_p11, %p11966_p8 }
 0x1bc   :  { %11974 = shalt.err (!%p11971_p12)
}
 0x1bd   :  { %302 = dma.hbm_to_vmem [thread:$0]  %s298_s25, 16, %s300_s22, [#allocation15]  }
 0x1be   :  { %s14396_s13 = sld [smem:[#allocation112_spill]]  ;;  %s12539_s17 = smov [#allocation19]  }
 0x1bf   :  { %s324_s27 = sshll.u32 %s12539_s17, 4  ;;  %s11987_s9 = sshra.s32 %s13041_s0, 4  ;;  %s325_s27 = int_to_ptr.vmem [resolvable:$true] %s324_s27  ;;  %s11988_s9 = int_to_ptr.hbm [resolvable:$true] %s11987_s9 }
 0x1c0   :  { %s11989_s18 = scalar_lea.hbm %s11988_s9, 48  ;;  %s11991_s29 = scalar_lea.hbm %s14395_s30, 48 }
 0x1c1   :  { %p11990_p13 = scmp.ne.s32.totalorder %s11988_s9, %s11989_s18  ;;  %p11992_p0 = scmp.lt.s32.totalorder %s11988_s9, %s14395_s30 }
 0x1c2   :  { %p11993_p1 = scmp.lt.s32.totalorder %s11991_s29, %s11989_s18 }
 0x1c4   :  { %s349_s26 = sshll.u32 %s14396_s13, 4  ;;  %p11994_p2 = por %p11993_p1, %p11992_p0  ;;  %s350_s26 = int_to_ptr.hbm [resolvable:$true] %s349_s26 }
 0x1c6   :  { %p11995_p3 = pnand %p11994_p2, %p11990_p13 }
 0x1c8   :  { %11998 = shalt.err (!%p11995_p3)
}
 0x1c9   :  { %s14397_s1 = sld [smem:[#allocation114_spill]]  ;;  %s12540_s5 = smov [#allocation22]  }
 0x1ca   :  { %330 = dma.hbm_to_vmem [thread:$0]  %s13041_s0, 768, %s325_s27, [#allocation18], %s12521_s2, %s12521_s2, %s12522_s4  }
 0x1cb   :  { %s351_s3 = sshll.u32 %s12540_s5, 4  ;;  %s12011_s21 = sshra.s32 %s350_s26, 4  ;;  %s352_s3 = int_to_ptr.vmem [resolvable:$true] %s351_s3  ;;  %s12012_s21 = int_to_ptr.hbm [resolvable:$true] %s12011_s21 }
 0x1cc   :  { %s12013_s24 = scalar_lea.hbm %s12012_s21, 1  ;;  %s12015_s10 = scalar_lea.hbm %s14396_s13, 1 }
 0x1cd   :  { %p12014_p4 = scmp.ne.s32.totalorder %s12012_s21, %s12013_s24  ;;  %p12016_p5 = scmp.lt.s32.totalorder %s12012_s21, %s14396_s13 }
 0x1ce   :  { %p12017_p6 = scmp.lt.s32.totalorder %s12015_s10, %s12013_s24 }
 0x1cf   :  { %s372_s8 = sshll.u32 %s14397_s1, 4  ;;  %s13054_s8 = int_to_ptr.hbm [resolvable:$true] %s372_s8 }
 0x1d0   :  { %p12018_p7 = por %p12017_p6, %p12016_p5 }
 0x1d2   :  { %p12019_p8 = pnand %p12018_p7, %p12014_p4 }
 0x1d4   :  { %12022 = shalt.err (!%p12019_p8)
}
 0x1d5   :  { %354 = dma.hbm_to_vmem [thread:$0]  %s350_s26, 16, %s352_s3, [#allocation21]  }
 0x1d6   :  { %s14398_s25 = sld [smem:[#allocation116_spill]]  ;;  %s12541_s11 = smov [#allocation25]  }
 0x1d7   :  { %s374_s6 = sshll.u32 %s12541_s11, 4  ;;  %s12035_s30 = sshra.s32 %s13054_s8, 4  ;;  %s375_s6 = int_to_ptr.vmem [resolvable:$true] %s374_s6  ;;  %s12036_s30 = int_to_ptr.hbm [resolvable:$true] %s12035_s30 }
 0x1d8   :  { %s12037_s0 = scalar_lea.hbm %s12036_s30, 48  ;;  %s12039_s15 = scalar_lea.hbm %s14397_s1, 48 }
 0x1d9   :  { %p12038_p9 = scmp.ne.s32.totalorder %s12036_s30, %s12037_s0  ;;  %p12040_p10 = scmp.lt.s32.totalorder %s12036_s30, %s14397_s1 }
 0x1da   :  { %p12041_p11 = scmp.lt.s32.totalorder %s12039_s15, %s12037_s0 }
 0x1dc   :  { %s401_s12 = sshll.u32 %s14398_s25, 4  ;;  %p12042_p12 = por %p12041_p11, %p12040_p10  ;;  %s402_s12 = int_to_ptr.hbm [resolvable:$true] %s401_s12 }
 0x1de   :  { %p12043_p13 = pnand %p12042_p12, %p12038_p9 }
 0x1e0   :  { %12046 = shalt.err (!%p12043_p13)
}
 0x1e1   :  { %s14399_s22 = sld [smem:[#allocation117_spill]]  ;;  %s12542_s14 = smov [#allocation28]  }
 0x1e2   :  { %380 = dma.hbm_to_vmem [thread:$0]  %s13054_s8, 768, %s375_s6, [#allocation24], %s12521_s2, %s12521_s2, %s12522_s4  }
 0x1e3   :  { %s403_s7 = sshll.u32 %s12542_s14, 4  ;;  %s12059_s13 = sshra.s32 %s402_s12, 4  ;;  %s404_s7 = int_to_ptr.vmem [resolvable:$true] %s403_s7  ;;  %s12060_s13 = int_to_ptr.hbm [resolvable:$true] %s12059_s13 }
 0x1e4   :  { %s12061_s17 = scalar_lea.hbm %s12060_s13, 2  ;;  %s12063_s27 = scalar_lea.hbm %s14398_s25, 2 }
 0x1e5   :  { %p12062_p0 = scmp.ne.s32.totalorder %s12060_s13, %s12061_s17  ;;  %p12064_p1 = scmp.lt.s32.totalorder %s12060_s13, %s14398_s25 }
 0x1e6   :  { %p12065_p2 = scmp.lt.s32.totalorder %s12063_s27, %s12061_s17 }
 0x1e7   :  { %s425_s19 = sshll.u32 %s14399_s22, 4  ;;  %s426_s19 = int_to_ptr.hbm [resolvable:$true] %s425_s19 }
 0x1e8   :  { %p12066_p3 = por %p12065_p2, %p12064_p1 }
 0x1ea   :  { %p12067_p4 = pnand %p12066_p3, %p12062_p0 }
 0x1ec   :  { %12070 = shalt.err (!%p12067_p4)
}
 0x1ed   :  { %406 = dma.hbm_to_vmem [thread:$0]  %s402_s12, 32, %s404_s7, [#allocation27]  }
 0x1ee   :  { %s14400_s26 = sld [smem:[#allocation118_spill]]  ;;  %s12543_s9 = smov [#allocation31]  }
 0x1ef   :  { %s427_s18 = sshll.u32 %s12543_s9, 4  ;;  %s12083_s1 = sshra.s32 %s426_s19, 4  ;;  %s428_s18 = int_to_ptr.vmem [resolvable:$true] %s427_s18  ;;  %s12084_s1 = int_to_ptr.hbm [resolvable:$true] %s12083_s1 }
 0x1f0   :  { %s12085_s8 = scalar_lea.hbm %s12084_s1, 2  ;;  %s12087_s5 = scalar_lea.hbm %s14399_s22, 2 }
 0x1f1   :  { %p12086_p5 = scmp.ne.s32.totalorder %s12084_s1, %s12085_s8  ;;  %p12088_p6 = scmp.lt.s32.totalorder %s12084_s1, %s14399_s22 }
 0x1f2   :  { %p12089_p7 = scmp.lt.s32.totalorder %s12087_s5, %s12085_s8 }
 0x1f4   :  { %s449_s29 = sshll.u32 %s14400_s26, 4  ;;  %p12090_p8 = por %p12089_p7, %p12088_p6  ;;  %s450_s29 = int_to_ptr.hbm [resolvable:$true] %s449_s29 }
 0x1f6   :  { %p12091_p9 = pnand %p12090_p8, %p12086_p5 }
 0x1f8   :  { %12094 = shalt.err (!%p12091_p9)
}
 0x1f9   :  { %430 = dma.hbm_to_vmem [thread:$0]  %s426_s19, 32, %s428_s18, [#allocation30]  }
 0x1fa   :  { %s14401_s3 = sld [smem:[#allocation119_spill]]  ;;  %s12544_s24 = smov [#allocation34]  }
 0x1fb   :  { %s451_s10 = sshll.u32 %s12544_s24, 4  ;;  %s12107_s25 = sshra.s32 %s450_s29, 4  ;;  %s452_s10 = int_to_ptr.vmem [resolvable:$true] %s451_s10  ;;  %s12108_s25 = int_to_ptr.hbm [resolvable:$true] %s12107_s25 }
 0x1fc   :  { %s12109_s11 = scalar_lea.hbm %s12108_s25, 2  ;;  %s12111_s6 = scalar_lea.hbm %s14400_s26, 2 }
 0x1fd   :  { %p12110_p10 = scmp.ne.s32.totalorder %s12108_s25, %s12109_s11  ;;  %p12112_p11 = scmp.lt.s32.totalorder %s12108_s25, %s14400_s26 }
 0x1fe   :  { %p12113_p12 = scmp.lt.s32.totalorder %s12111_s6, %s12109_s11 }
 0x200   :  { %s471_s21 = sshll.u32 %s14401_s3, 4  ;;  %p12114_p13 = por %p12113_p12, %p12112_p11  ;;  %s472_s21 = int_to_ptr.hbm [resolvable:$true] %s471_s21 }
 0x202   :  { %p12115_p0 = pnand %p12114_p13, %p12110_p10 }
 0x204   :  { %12118 = shalt.err (!%p12115_p0)
}
 0x205   :  { %454 = dma.hbm_to_vmem [thread:$0]  %s450_s29, 32, %s452_s10, [#allocation33]  }
 0x206   :  { %s14402_s12 = sld [smem:[#allocation121_spill]]  ;;  %s12545_s30 = smov [#allocation37]  }
 0x207   :  { %s473_s0 = sshll.u32 %s12545_s30, 4  ;;  %s12131_s22 = sshra.s32 %s472_s21, 4  ;;  %s474_s0 = int_to_ptr.vmem [resolvable:$true] %s473_s0  ;;  %s12132_s22 = int_to_ptr.hbm [resolvable:$true] %s12131_s22 }
 0x208   :  { %s12133_s19 = scalar_lea.hbm %s12132_s22, 2  ;;  %s12135_s14 = scalar_lea.hbm %s14401_s3, 2 }
 0x209   :  { %p12134_p1 = scmp.ne.s32.totalorder %s12132_s22, %s12133_s19  ;;  %p12136_p2 = scmp.lt.s32.totalorder %s12132_s22, %s14401_s3 }
 0x20a   :  { %p12137_p3 = scmp.lt.s32.totalorder %s12135_s14, %s12133_s19 }
 0x20c   :  { %s496_s15 = sshll.u32 %s14402_s12, 4  ;;  %p12138_p4 = por %p12137_p3, %p12136_p2  ;;  %s13076_s15 = int_to_ptr.hbm [resolvable:$true] %s496_s15 }
 0x20e   :  { %p12139_p5 = pnand %p12138_p4, %p12134_p1 }
 0x210   :  { %12142 = shalt.err (!%p12139_p5)
}
 0x211   :  { %476 = dma.hbm_to_vmem [thread:$0]  %s472_s21, 32, %s474_s0, [#allocation36]  }
 0x212   :  { %s14403_s7 = sld [smem:[#allocation122_spill]]  ;;  %s12546_s17 = smov [#allocation40]  }
 0x213   :  { %s498_s27 = sshll.u32 %s12546_s17, 4  ;;  %s12155_s26 = sshra.s32 %s13076_s15, 4  ;;  %s499_s27 = int_to_ptr.vmem [resolvable:$true] %s498_s27  ;;  %s12156_s26 = int_to_ptr.hbm [resolvable:$true] %s12155_s26 }
 0x214   :  { %s12157_s9 = scalar_lea.hbm %s12156_s26, 192  ;;  %s12159_s18 = scalar_lea.hbm %s14402_s12, 192 }
 0x215   :  { %p12158_p6 = scmp.ne.s32.totalorder %s12156_s26, %s12157_s9  ;;  %p12160_p7 = scmp.lt.s32.totalorder %s12156_s26, %s14402_s12 }
 0x216   :  { %p12161_p8 = scmp.lt.s32.totalorder %s12159_s18, %s12157_s9 }
 0x218   :  { %s521_s13 = sshll.u32 %s14403_s7, 4  ;;  %p12162_p9 = por %p12161_p8, %p12160_p7  ;;  %s522_s13 = int_to_ptr.hbm [resolvable:$true] %s521_s13 }
 0x21a   :  { %p12163_p10 = pnand %p12162_p9, %p12158_p6 }
 0x21c   :  { %12166 = shalt.err (!%p12163_p10)
}
 0x21d   :  { %s14404_s29 = sld [smem:[#allocation124_spill]]  ;;  %s12547_s1 = smov [#allocation43]  }
 0x21e   :  { %504 = dma.hbm_to_vmem [thread:$0]  %s13076_s15, 3072, %s499_s27, [#allocation39], %s12521_s2, %s12521_s2, %s12522_s4  }
 0x21f   :  { %s523_s8 = sshll.u32 %s12547_s1, 4  ;;  %s12179_s3 = sshra.s32 %s522_s13, 4  ;;  %s524_s8 = int_to_ptr.vmem [resolvable:$true] %s523_s8  ;;  %s12180_s3 = int_to_ptr.hbm [resolvable:$true] %s12179_s3 }
 0x220   :  { %s12181_s21 = scalar_lea.hbm %s12180_s3, 2  ;;  %s12183_s24 = scalar_lea.hbm %s14403_s7, 2 }
 0x221   :  { %p12182_p11 = scmp.ne.s32.totalorder %s12180_s3, %s12181_s21  ;;  %p12184_p12 = scmp.lt.s32.totalorder %s12180_s3, %s14403_s7 }
 0x222   :  { %p12185_p13 = scmp.lt.s32.totalorder %s12183_s24, %s12181_s21 }
 0x223   :  { %s543_s5 = sshll.u32 %s14404_s29, 4  ;;  %s544_s5 = int_to_ptr.hbm [resolvable:$true] %s543_s5 }
 0x224   :  { %p12186_p0 = por %p12185_p13, %p12184_p12 }
 0x226   :  { %p12187_p1 = pnand %p12186_p0, %p12182_p11 }
 0x228   :  { %12190 = shalt.err (!%p12187_p1)
}
 0x229   :  { %526 = dma.hbm_to_vmem [thread:$0]  %s522_s13, 32, %s524_s8, [#allocation42]  }
 0x22a   :  { %s14405_s10 = sld [smem:[#allocation126_spill]]  ;;  %s12548_s11 = smov [#allocation46]  }
 0x22b   :  { %s545_s6 = sshll.u32 %s12548_s11, 4  ;;  %s12203_s12 = sshra.s32 %s544_s5, 4  ;;  %s546_s6 = int_to_ptr.vmem [resolvable:$true] %s545_s6  ;;  %s12204_s12 = int_to_ptr.hbm [resolvable:$true] %s12203_s12 }
 0x22c   :  { %s12205_s30 = scalar_lea.hbm %s12204_s12, 4  ;;  %s12207_s0 = scalar_lea.hbm %s14404_s29, 4 }
 0x22d   :  { %p12206_p2 = scmp.ne.s32.totalorder %s12204_s12, %s12205_s30  ;;  %p12208_p3 = scmp.lt.s32.totalorder %s12204_s12, %s14404_s29 }
 0x22e   :  { %p12209_p4 = scmp.lt.s32.totalorder %s12207_s0, %s12205_s30 }
 0x230   :  { %s566_s25 = sshll.u32 %s14405_s10, 4  ;;  %p12210_p5 = por %p12209_p4, %p12208_p3  ;;  %s13092_s25 = int_to_ptr.hbm [resolvable:$true] %s566_s25 }
 0x232   :  { %p12211_p6 = pnand %p12210_p5, %p12206_p2 }
 0x234   :  { %12214 = shalt.err (!%p12211_p6)
}
 0x235   :  { %548 = dma.hbm_to_vmem [thread:$0]  %s544_s5, 64, %s546_s6, [#allocation45]  }
 0x236   :  { %s14406_s15 = sld [smem:[#allocation128_spill]]  ;;  %s12549_s22 = smov [#allocation49]  }
 0x237   :  { %s568_s19 = sshll.u32 %s12549_s22, 4  ;;  %s12227_s7 = sshra.s32 %s13092_s25, 4  ;;  %s569_s19 = int_to_ptr.vmem [resolvable:$true] %s568_s19  ;;  %s12228_s7 = int_to_ptr.hbm [resolvable:$true] %s12227_s7 }
 0x238   :  { %s12229_s13 = scalar_lea.hbm %s12228_s7, 192  ;;  %s12231_s17 = scalar_lea.hbm %s14405_s10, 192 }
 0x239   :  { %p12230_p7 = scmp.ne.s32.totalorder %s12228_s7, %s12229_s13  ;;  %p12232_p8 = scmp.lt.s32.totalorder %s12228_s7, %s14405_s10 }
 0x23a   :  { %p12233_p9 = scmp.lt.s32.totalorder %s12231_s17, %s12229_s13 }
 0x23c   :  { %s591_s14 = sshll.u32 %s14406_s15, 4  ;;  %p12234_p10 = por %p12233_p9, %p12232_p8  ;;  %s592_s14 = int_to_ptr.hbm [resolvable:$true] %s591_s14 }
 0x23e   :  { %p12235_p11 = pnand %p12234_p10, %p12230_p7 }
 0x240   :  { %12238 = shalt.err (!%p12235_p11)
}
 0x241   :  { %s14407_s27 = sld [smem:[#allocation130_spill]]  ;;  %s12550_s9 = smov [#allocation52]  }
 0x242   :  { %574 = dma.hbm_to_vmem [thread:$0]  %s13092_s25, 3072, %s569_s19, [#allocation48], %s12521_s2, %s12521_s2, %s12522_s4  }
 0x243   :  { %s593_s18 = sshll.u32 %s12550_s9, 4  ;;  %s12251_s29 = sshra.s32 %s592_s14, 4  ;;  %s594_s18 = int_to_ptr.vmem [resolvable:$true] %s593_s18  ;;  %s12252_s29 = int_to_ptr.hbm [resolvable:$true] %s12251_s29 }
 0x244   :  { %s12253_s1 = scalar_lea.hbm %s12252_s29, 2  ;;  %s12255_s8 = scalar_lea.hbm %s14406_s15, 2 }
 0x245   :  { %p12254_p12 = scmp.ne.s32.totalorder %s12252_s29, %s12253_s1  ;;  %p12256_p13 = scmp.lt.s32.totalorder %s12252_s29, %s14406_s15 }
 0x246   :  { %p12257_p0 = scmp.lt.s32.totalorder %s12255_s8, %s12253_s1 }
 0x247   :  { %s612_s26 = sshll.u32 %s14407_s27, 4  ;;  %s13105_s26 = int_to_ptr.hbm [resolvable:$true] %s612_s26 }
 0x248   :  { %p12258_p1 = por %p12257_p0, %p12256_p13 }
 0x24a   :  { %p12259_p2 = pnand %p12258_p1, %p12254_p12 }
 0x24c   :  { %12262 = shalt.err (!%p12259_p2)
}
 0x24d   :  { %596 = dma.hbm_to_vmem [thread:$0]  %s592_s14, 32, %s594_s18, [#allocation51]  }
 0x24e   :  { %s14408_s5 = sld [smem:[#allocation132_spill]]  ;;  %s12551_s3 = smov [#allocation55]  }
 0x24f   :  { %s614_s21 = sshll.u32 %s12551_s3, 4  ;;  %s12275_s10 = sshra.s32 %s13105_s26, 4  ;;  %s615_s21 = int_to_ptr.vmem [resolvable:$true] %s614_s21  ;;  %s12276_s10 = int_to_ptr.hbm [resolvable:$true] %s12275_s10 }
 0x250   :  { %s12277_s25 = scalar_lea.hbm %s12276_s10, 512  ;;  %s12279_s11 = scalar_lea.hbm %s14407_s27, 512 }
 0x251   :  { %p12278_p3 = scmp.ne.s32.totalorder %s12276_s10, %s12277_s25  ;;  %p12280_p4 = scmp.lt.s32.totalorder %s12276_s10, %s14407_s27 }
 0x252   :  { %p12281_p5 = scmp.lt.s32.totalorder %s12279_s11, %s12277_s25 }
 0x254   :  { %s638_s24 = sshll.u32 %s14408_s5, 4  ;;  %p12282_p6 = por %p12281_p5, %p12280_p4  ;;  %s13110_s24 = int_to_ptr.hbm [resolvable:$true] %s638_s24 }
 0x256   :  { %p12283_p7 = pnand %p12282_p6, %p12278_p3 }
 0x258   :  { %12286 = shalt.err (!%p12283_p7)
}
 0x259   :  { %s14409_s6 = sld [smem:[#allocation136_spill]]  ;;  %s12552_s12 = smov [#allocation58]  }
 0x25a   :  { %620 = dma.hbm_to_vmem [thread:$0]  %s13105_s26, 8192, %s615_s21, [#allocation54], %s12521_s2, %s12521_s2, %s12522_s4  }
 0x25b   :  { %s640_s30 = sshll.u32 %s12552_s12, 4  ;;  %s12299_s15 = sshra.s32 %s13110_s24, 4  ;;  %s641_s30 = int_to_ptr.vmem [resolvable:$true] %s640_s30  ;;  %s12300_s15 = int_to_ptr.hbm [resolvable:$true] %s12299_s15 }
 0x25c   :  { %s12301_s22 = scalar_lea.hbm %s12300_s15, 128  ;;  %s12303_s19 = scalar_lea.hbm %s14408_s5, 128 }
 0x25d   :  { %p12302_p8 = scmp.ne.s32.totalorder %s12300_s15, %s12301_s22  ;;  %p12304_p9 = scmp.lt.s32.totalorder %s12300_s15, %s14408_s5 }
 0x25e   :  { %p12305_p10 = scmp.lt.s32.totalorder %s12303_s19, %s12301_s22 }
 0x25f   :  { %s669_s0 = sshll.u32 %s14409_s6, 4  ;;  %s670_s0 = int_to_ptr.hbm [resolvable:$true] %s669_s0 }
 0x260   :  { %p12306_p11 = por %p12305_p10, %p12304_p9 }
 0x262   :  { %p12307_p12 = pnand %p12306_p11, %p12302_p8 }
 0x264   :  { %12310 = shalt.err (!%p12307_p12)
}
 0x265   :  { %s12553_s14 = smov 64   ;;  %s14410_s7 = sld [smem:[#allocation137_spill]] }
 0x266   :  { %s12554_s2 = smov 4   ;;  %s12555_s4 = smov [#allocation61]  }
 0x267   :  { %646 = dma.hbm_to_vmem [thread:$0]  %s13110_s24, 2048, %s641_s30, [#allocation57], %s12553_s14, %s12553_s14, %s12554_s2  }
 0x268   :  { %s671_s13 = sshll.u32 %s12555_s4, 4  ;;  %s12323_s27 = sshra.s32 %s670_s0, 4  ;;  %s672_s13 = int_to_ptr.vmem [resolvable:$true] %s671_s13  ;;  %s12324_s27 = int_to_ptr.hbm [resolvable:$true] %s12323_s27 }
 0x269   :  { %s12325_s26 = scalar_lea.hbm %s12324_s27, 1  ;;  %s12327_s9 = scalar_lea.hbm %s14409_s6, 1 }
 0x26a   :  { %p12326_p13 = scmp.ne.s32.totalorder %s12324_s27, %s12325_s26  ;;  %p12328_p0 = scmp.lt.s32.totalorder %s12324_s27, %s14409_s6 }
 0x26b   :  { %s691_s17 = sshll.u32 %s14410_s7, 4  ;;  %p12329_p1 = scmp.lt.s32.totalorder %s12327_s9, %s12325_s26  ;;  %s692_s17 = int_to_ptr.hbm [resolvable:$true] %s691_s17 }
 0x26d   :  { %p12330_p2 = por %p12329_p1, %p12328_p0 }
 0x26f   :  { %p12331_p3 = pnand %p12330_p2, %p12326_p13 }
 0x271   :  { %12334 = shalt.err (!%p12331_p3)
}
 0x272   :  { %674 = dma.hbm_to_vmem [thread:$0]  %s670_s0, 16, %s672_s13, [#allocation60]  }
 0x273   :  { %s14411_s18 = sld [smem:[#allocation138_spill]]  ;;  %s12556_s1 = smov [#allocation64]  }
 0x274   :  { %s693_s8 = sshll.u32 %s12556_s1, 4  ;;  %s12347_s5 = sshra.s32 %s692_s17, 4  ;;  %s694_s8 = int_to_ptr.vmem [resolvable:$true] %s693_s8  ;;  %s12348_s5 = int_to_ptr.hbm [resolvable:$true] %s12347_s5 }
 0x275   :  { %s12349_s3 = scalar_lea.hbm %s12348_s5, 2  ;;  %s12351_s21 = scalar_lea.hbm %s14410_s7, 2 }
 0x276   :  { %p12350_p4 = scmp.ne.s32.totalorder %s12348_s5, %s12349_s3  ;;  %p12352_p5 = scmp.lt.s32.totalorder %s12348_s5, %s14410_s7 }
 0x277   :  { %p12353_p6 = scmp.lt.s32.totalorder %s12351_s21, %s12349_s3 }
 0x279   :  { %s702_s29 = sshll.u32 %s14411_s18, 4  ;;  %p12354_p7 = por %p12353_p6, %p12352_p5  ;;  %s703_s29 = int_to_ptr.hbm [resolvable:$true] %s702_s29 }
 0x27b   :  { %p12355_p8 = pnand %p12354_p7, %p12350_p4 }
 0x27d   :  { %12358 = shalt.err (!%p12355_p8)
}
 0x27e   :  { %696 = dma.hbm_to_vmem [thread:$0]  %s692_s17, 32, %s694_s8, [#allocation63]  }
 0x27f   :  { %s12557_s24 = smov [#allocation65]   ;;  %s12371_s25 = sshra.s32 %s703_s29, 4  ;;  %s12372_s25 = int_to_ptr.hbm [resolvable:$true] %s12371_s25 }
 0x280   :  { %s704_s10 = sshll.u32 %s12557_s24, 4  ;;  %s12373_s11 = scalar_lea.hbm %s12372_s25, 1  ;;  %s705_s10 = int_to_ptr.vmem [resolvable:$true] %s704_s10 }
 0x281   :  { %p12374_p9 = scmp.ne.s32.totalorder %s12372_s25, %s12373_s11  ;;  %s12375_s6 = scalar_lea.hbm %s14411_s18, 1 }
 0x282   :  { %p12376_p10 = scmp.lt.s32.totalorder %s12372_s25, %s14411_s18  ;;  %p12377_p11 = scmp.lt.s32.totalorder %s12375_s6, %s12373_s11 }
 0x284   :  { %p12378_p12 = por %p12377_p11, %p12376_p10 }
 0x286   :  { %p12379_p13 = pnand %p12378_p12, %p12374_p9 }
 0x288   :  { %12382 = shalt.err (!%p12379_p13)
}
 0x289   :  { %707 = dma.hbm_to_vmem [thread:$0]  %s703_s29, 16, %s705_s10, [#allocation66]  }
 0x28a   :  { %12395 = dma.done.wait [#allocation4], 3072  }
 0x28b   :  { %12396 = vsyncadd [#allocation4], 4294964224 }
 0x28c   :  { %12397 = dma.done.wait [#allocation6], 3088  }
 0x28d   :  { %12398 = vsyncadd [#allocation6], 4294964208 }
 0x28e   :  { %12399 = dma.done.wait [#allocation9], 32  }
 0x28f   :  { %12400 = vsyncadd [#allocation9], 4294967264 }
 0x290   :  { %12401 = dma.done.wait [#allocation12], 544  }
 0x291   :  { %12402 = vsyncadd [#allocation12], 4294966752 }
 0x292   :  { %12403 = dma.done.wait [#allocation15], 4112  }
 0x293   :  { %12404 = vsyncadd [#allocation15], 4294963184 }
 0x294   :  { %12405 = dma.done.wait [#allocation18], 800  }
 0x295   :  { %12406 = vsyncadd [#allocation18], 4294966496 }
 0x296   :  { %12407 = dma.done.wait [#allocation21], 32  }
 0x297   :  { %12408 = vsyncadd [#allocation21], 4294967264 }
 0x298   :  { %12409 = dma.done.wait [#allocation24], 800  }
 0x299   :  { %12410 = vsyncadd [#allocation24], 4294966496 }
 0x29a   :  { %12411 = dma.done.wait [#allocation27], 4640  }
 0x29b   :  { %12412 = vsyncadd [#allocation27], 4294962656 }
 0x29c   :  { %12413 = dma.done.wait [#allocation30], 3104  }
 0x29d   :  { %12414 = vsyncadd [#allocation30], 4294964192 }
 0x29e   :  { %12415 = dma.done.wait [#allocation33], 3104  }
 0x29f   :  { %12416 = vsyncadd [#allocation33], 4294964192 }
 0x2a0   :  { %12417 = dma.done.wait [#allocation36], 64  }
 0x2a1   :  { %12418 = vsyncadd [#allocation36], 4294967232 }
 0x2a2   :  { %12419 = dma.done.wait [#allocation39], 6144  }
 0x2a3   :  { %12420 = vsyncadd [#allocation39], 4294961152 }
 0x2a4   :  { %12421 = dma.done.wait [#allocation42], 64  }
 0x2a5   :  { %12422 = vsyncadd [#allocation42], 4294967232 }
 0x2a6   :  { %12423 = dma.done.wait [#allocation45], 96  }
 0x2a7   :  { %12424 = vsyncadd [#allocation45], 4294967200 }
 0x2a8   :  { %12425 = dma.done.wait [#allocation48], 6144  }
 0x2a9   :  { %12426 = vsyncadd [#allocation48], 4294961152 }
 0x2aa   :  { %12427 = dma.done.wait [#allocation51], 64  }
 0x2ab   :  { %12428 = vsyncadd [#allocation51], 4294967232 }
 0x2ac   :  { %12429 = dma.done.wait [#allocation54], 8208  }
 0x2ad   :  { %12430 = vsyncadd [#allocation54], 4294959088 }
 0x2ae   :  { %12431 = dma.done.wait [#allocation57], 6144  }
 0x2af   :  { %12432 = vsyncadd [#allocation57], 4294961152 }
 0x2b0   :  { %12433 = dma.done.wait [#allocation60], 32  }
 0x2b1   :  { %12434 = vsyncadd [#allocation60], 4294967264 }
 0x2b2   :  { %12435 = dma.done.wait [#allocation63], 48  }
 0x2b3   :  { %12436 = vsyncadd [#allocation63], 4294967248 }
 0x2b4   :  { %12437 = dma.done.wait [#allocation66], 16  }
 0x2b5   :  { %12438 = vsyncadd [#allocation66], 4294967280  ;;  %s14412_s12 = sld [smem:[#allocation89_spill]]  ;;  %vm904_vm0 = vcmask 1041408   ;;  %v895_v1 = vld [vmem:[#allocation11] sm:$0x3] }
 0x2b6   :  { %s14413_s30 = sld [smem:[#allocation98_spill]]  ;;  %v906_v3 = vsel %vm904_vm0, %v895_v1, 0  ;;  %vm900_vm1 = vcmask 31744   ;;  %v11200_v9 = vld [vmem:[#allocation7] ss:$0 sm:$0xff]  ;;  %vm955_vm2 = vcmask 392192  }
 0x2b7   :  { %s14414_s0 = sld [smem:[#allocation99_spill]]  ;;  %915 = vmatpush.bf16.msra.mxu2 %v906_v3  ;;  %v11201_v24 = vld [vmem:[#allocation8] ss:$0 sm:$0xff]  ;;  %vm1030_vm3 = vcmask 785408   ;;  %v1158_v34 = vld [vmem:[#allocation3 + $0xb0] sm:$0xff]  ;;  %v1261_v37 = vld [vmem:[#allocation5 + $0xb8] sm:$0xff] }
 0x2b8   :  { %v1260_v35 = vld [vmem:[#allocation5 + $0xb0] sm:$0xff]  ;;  %v11202_v36 = vld [vmem:[#allocation10] ss:$0 sm:$0xff]  ;;  %1176 = vmatpush.msra.mxu0 %v1158_v34  ;;  %s14416_s15 = sld [smem:[#allocation91_spill]]  ;;  %v1259_v40 = vld [vmem:[#allocation5 + $0xa8] sm:$0xff]  ;;  %vm1051_vm4 = vcmask 15360  }
 0x2b9   :  { %v1156_v38 = vld [vmem:[#allocation3 + $0xa0] sm:$0xff]  ;;  %v1154_v41 = vld [vmem:[#allocation3 + $0x90] sm:$0xff]  ;;  %v1257_v43 = vld [vmem:[#allocation5 + $0x98] sm:$0xff]  ;;  %s14417_s22 = sld [smem:[#allocation100_spill]]  ;;  %vm1508_vm5 = vcmask 261120   ;;  %vm4252_vm6 = vcmask 523264  }
 0x2ba   :  { %v1258_v39 = vld [vmem:[#allocation5 + $0xa0] sm:$0xff]  ;;  %1177 = vmatpush.msra.mxu0 %v1156_v38  ;;  %v1256_v42 = vld [vmem:[#allocation5 + $0x90] sm:$0xff]  ;;  %v1159_v49 = vld [vmem:[#allocation3 + $0xb8] sm:$0xff]  ;;  %s14418_s19 = sld [smem:[#allocation102_spill]]  ;;  %vm5460_vm7 = vcmask 130048   ;;  %vm7643_vm14 = vcmask 1040384  }
 0x2bb   :  { %v885_v2 = vld [vmem:[%s14412_s12] sm:$0x3]  ;;  %v1152_v45 = vld [vmem:[#allocation3 + $0x80] sm:$0xff]  ;;  %v1255_v50 = vld [vmem:[#allocation5 + $0x88] sm:$0xff]  ;;  %s14419_s14 = sld [smem:[#allocation103_spill]]  ;;  %vm7639_vm15 = vcmask 7168  }
 0x2bc   :  { %v13134_v4 = vpack.c.bf16 %v885_v2, %v885_v2  ;;  %v10470_v5 = vld [vmem:[%s14413_s30 + $0x10] sm:$0xff]  ;;  %v10469_v6 = vld [vmem:[%s14413_s30 + $0x8] sm:$0xff]  ;;  %v10468_v7 = vld [vmem:[%s14413_s30] sm:$0xff]  ;;  %1178 = vmatpush.msra.mxu0 %v1154_v41  ;;  %s14426_s7 = sld [smem:[#allocation93_spill]] }
 0x2bd   :  { %964 = vmatpush.bf16.msra.mxu1 %v10470_v5  ;;  %v10476_v8 = vld [vmem:[%s14414_s0 + $0x28] sm:$0xff]  ;;  %v10475_v19 = vld [vmem:[%s14414_s0 + $0x20] sm:$0xff]  ;;  %v10474_v20 = vld [vmem:[%s14414_s0 + $0x18] sm:$0xff]  ;;  %s14429_s2 = sld [smem:[#allocation105_spill]] }
 0x2be   :  { %14415 = vst [vmem:[#allocation140_spill] sm:$0xff] %v13134_v4  ;;  %7945 = vmatmul.msk.bf16.vlgmr.msra.gmra.mxu2 %vm900_vm1, %v13134_v4  ;;  %v10473_v21 = vld [vmem:[%s14414_s0 + $0x10] sm:$0xff]  ;;  %v10472_v22 = vld [vmem:[%s14414_s0 + $0x8] sm:$0xff]  ;;  %v10471_v23 = vld [vmem:[%s14414_s0] sm:$0xff]  ;;  %1179 = vmatpush.msra.mxu0 %v1152_v45  ;;  %s14433_s4 = sld [smem:[#allocation95_spill]] }
 0x2bf   :  { %1036 = vmatpush.bf16.msrb.mxu2 %v10476_v8  ;;  %v1047_v47 = vld [vmem:[%s14416_s15] sm:$0xff]  ;;  %v1254_v48 = vld [vmem:[#allocation5 + $0x80] sm:$0xff]  ;;  %v1157_v53 = vld [vmem:[#allocation3 + $0xa8] sm:$0xff]  ;;  %s14434_s13 = sld [smem:[#allocation92_spill]] }
 0x2c0   :  { %v1150_v51 = vld [vmem:[#allocation3 + $0x70] sm:$0xff]  ;;  %v1253_v54 = vld [vmem:[#allocation5 + $0x78] sm:$0xff]  ;;  %v1148_v55 = vld [vmem:[#allocation3 + $0x60] sm:$0xff]  ;;  %s14435_s17 = sld [smem:[#allocation108_spill]] }
 0x2c1   :  { %965 = vmatpush.bf16.msra.mxu1 %v10469_v6  ;;  %v1252_v52 = vld [vmem:[#allocation5 + $0x70] sm:$0xff]  ;;  %v1250_v56 = vld [vmem:[#allocation5 + $0x60] sm:$0xff]  ;;  %v1155_v57 = vld [vmem:[#allocation3 + $0x98] sm:$0xff]  ;;  %1180 = vmatpush.msra.mxu0 %v1150_v51  ;;  %s14436_s27 = sld [smem:[#allocation94_spill]] }
 0x2c2   :  { %v1251_v58 = vld [vmem:[#allocation5 + $0x68] sm:$0xff]  ;;  %v1146_v59 = vld [vmem:[#allocation3 + $0x50] sm:$0xff]  ;;  %v1249_v63 = vld [vmem:[#allocation5 + $0x58] sm:$0xff]  ;;  %s14437_s26 = sld [smem:[#allocation106_spill]] }
 0x2c3   :  { %1037 = vmatpush.bf16.msrb.mxu2 %v10475_v19  ;;  %v1248_v60 = vld [vmem:[#allocation5 + $0x50] sm:$0xff]  ;;  %v1153_v62 = vld [vmem:[#allocation3 + $0x88] sm:$0xff]  ;;  %1181 = vmatpush.msra.mxu0 %v1148_v55  ;;  %v1048_v0 = vld [vmem:[%s14416_s15 + $0x8] sm:$0xff]  ;;  %s14438_s9 = sld [smem:[#allocation133_spill]] }
 0x2c4   :  { %v1144_v1 = vld [vmem:[#allocation3 + $0x40] sm:$0xff]  ;;  %v1151_v2 = vld [vmem:[#allocation3 + $0x78] sm:$0xff]  ;;  %v1247_v5 = vld [vmem:[#allocation5 + $0x48] sm:$0xff]  ;;  %s14439_s18 = sld [smem:[#allocation134_spill]] }
 0x2c5   :  { %966 = vmatpush.bf16.msra.mxu1 %v10468_v7  ;;  %1182 = vmatpush.msra.mxu0 %v1146_v59  ;;  %v1246_v3 = vld [vmem:[#allocation5 + $0x40] sm:$0xff]  ;;  %v1142_v6 = vld [vmem:[#allocation3 + $0x30] sm:$0xff]  ;;  %v1149_v7 = vld [vmem:[#allocation3 + $0x68] sm:$0xff]  ;;  %s14440_s29 = sld [smem:[#allocation111_spill]] }
 0x2c6   :  { %v1244_v8 = vld [vmem:[#allocation5 + $0x30] sm:$0xff]  ;;  %v1143_v19 = vld [vmem:[#allocation3 + $0x38] sm:$0xff]  ;;  %v1386_v59 = vld [vmem:[%s14418_s19 + $0x70] sm:$0xff]  ;;  %s14441_s1 = sld [smem:[#allocation113_spill]] }
 0x2c7   :  { %1038 = vmatpush.bf16.msrb.mxu2 %v10474_v20  ;;  %1183 = vmatpush.msra.mxu0 %v1144_v1  ;;  %v1141_v20 = vld [vmem:[#allocation3 + $0x28] sm:$0xff]  ;;  %s14442_s8 = sld [smem:[#allocation120_spill]] }
 0x2c8   :  { %s14444_s5 = sld [smem:[#allocation109_spill]] }
 0x2c9   :  { %1266 = vmatpush.msrb.mxu1 %v1260_v35  ;;  %1184 = vmatpush.msra.mxu0 %v1142_v6  ;;  %v1118_v35 = vld [vmem:[#allocation13 + $0x10] sm:$0xff]  ;;  %v1378_v6 = vld [vmem:[%s14418_s19 + $0x30] sm:$0xff]  ;;  %s14446_s3 = sld [smem:[#allocation139_spill]] }
 0x2ca   :  { %s14447_s21 = sld [smem:[#allocation115_spill]] }
 0x2cb   :  { %1039 = vmatpush.bf16.msrb.mxu2 %v10473_v21  ;;  %1267 = vmatpush.msrb.mxu1 %v1258_v39  ;;  %v1139_v21 = vld [vmem:[#allocation3 + $0x18] sm:$0xff] }
 0x2cd   :  { %1268 = vmatpush.msrb.mxu1 %v1256_v42  ;;  %v1119_v42 = vld [vmem:[#allocation13 + $0x18] sm:$0xff] }
 0x2cf   :  { %1040 = vmatpush.bf16.msrb.mxu2 %v10472_v22  ;;  %1269 = vmatpush.msrb.mxu1 %v1254_v48  ;;  %v1050_v22 = vld [vmem:[%s14416_s15 + $0x18] sm:$0xff] }
 0x2d1   :  { %1270 = vmatpush.msrb.mxu1 %v1252_v52 }
 0x2d3   :  { %1041 = vmatpush.bf16.msrb.mxu2 %v10471_v23  ;;  %1271 = vmatpush.msrb.mxu1 %v1250_v56  ;;  %v1136_v23 = vld [vmem:[#allocation3] sm:$0xff] }
 0x2d5   :  { %1272 = vmatpush.msrb.mxu1 %v1248_v60  ;;  %v1387_v60 = vld [vmem:[%s14418_s19 + $0x78] sm:$0xff] }
 0x2d7   :  { %1295 = vmatpush.msra.mxu2 %v1261_v37  ;;  %1273 = vmatpush.msrb.mxu1 %v1246_v3 }
 0x2d9   :  { %1296 = vmatpush.msra.mxu2 %v1259_v40  ;;  %1274 = vmatpush.msrb.mxu1 %v1244_v8 }
 0x2db   :  { %1297 = vmatpush.msra.mxu2 %v1257_v43  ;;  %v1099_v43 = vld [vmem:[%s14417_s22 + $0x18] sm:$0xff] }
 0x2dd   :  { %1298 = vmatpush.msra.mxu2 %v1255_v50  ;;  %v1097_v50 = vld [vmem:[%s14417_s22 + $0x8] sm:$0xff] }
 0x2df   :  { %1299 = vmatpush.msra.mxu2 %v1253_v54 }
 0x2e1   :  { %1300 = vmatpush.msra.mxu2 %v1251_v58  ;;  %v14325_v58 = vmov 0  }
 0x2e2   :  { %11198 = vset.pattern.permute.xlu0 %v14325_v58  ;;  %11197 = vset.pattern.permute.xlu2 %v14325_v58 }
 0x2e3   :  { %1301 = vmatpush.msra.mxu2 %v1249_v63  ;;  %11199 = vset.pattern.permute.xlu1 %v14325_v58 }
 0x2e5   :  { %1302 = vmatpush.msra.mxu2 %v1247_v5  ;;  %v1385_v5 = vld [vmem:[%s14418_s19 + $0x68] sm:$0xff] }
 0x341   :  { %v917_v10 = vpop.f32.mrf.mxu2 }
 0x342   :  { %v918_v11 = vadd.f32 %v11200_v9, %v917_v10  ;;  %v1245_v9 = vld [vmem:[#allocation5 + $0x38] sm:$0xff]  ;;  %v1140_v10 = vld [vmem:[#allocation3 + $0x20] sm:$0xff] }
 0x343   :  { %1303 = vmatpush.msra.mxu2 %v1245_v9  ;;  %1185 = vmatpush.msra.mxu0 %v1140_v10 }
 0x344   :  { %v921_v12 = vmul.f32 0.5, %v918_v11 }
 0x346   :  { %11213 = vtanh.f32 %v921_v12  ;;  %v1242_v12 = vld [vmem:[#allocation5 + $0x20] sm:$0xff] }
 0x347   :  { %1275 = vmatpush.msrb.mxu1 %v1242_v12 }
 0x349   :  { %v919_v13 = vpop.f32.mrf.mxu2 }
 0x34a   :  { %v1243_v13 = vld [vmem:[#allocation5 + $0x28] sm:$0xff] }
 0x34b   :  { %1304 = vmatpush.msra.mxu2 %v1243_v13 }
 0x34c   :  { %v11214_v14 = vpop.eup %11213 }
 0x34d   :  { %v923_v15 = vadd.f32 1.0, %v11214_v14  ;;  %v1138_v14 = vld [vmem:[#allocation3 + $0x10] sm:$0xff] }
 0x34e   :  { %1186 = vmatpush.msra.mxu0 %v1138_v14  ;;  %v1382_v14 = vld [vmem:[%s14418_s19 + $0x50] sm:$0xff] }
 0x34f   :  { %v924_v16 = vmul.f32 0.5, %v923_v15  ;;  %v1145_v15 = vld [vmem:[#allocation3 + $0x48] sm:$0xff] }
 0x350   :  { %1187 = vmatpush.msra.mxu0 %v1136_v23  ;;  %v890_v23 = vld [vmem:[%s12905_s28 + $0x20] sm:$0xff] }
 0x351   :  { %v925_v17 = vmul.f32 %v924_v16, %v918_v11  ;;  %v1147_v11 = vld [vmem:[#allocation3 + $0x58] sm:$0xff]  ;;  %v1240_v16 = vld [vmem:[#allocation5 + $0x10] sm:$0xff] }
 0x352   :  { %1276 = vmatpush.msrb.mxu1 %v1240_v16  ;;  %v1383_v16 = vld [vmem:[%s14418_s19 + $0x58] sm:$0xff] }
 0x353   :  { %v926_v18 = vpack.c.bf16 %v925_v17, %v925_v17  ;;  %v1049_v17 = vld [vmem:[%s14416_s15 + $0x10] sm:$0xff] }
 0x355   :  { %7958 = vmatmul.msk.bf16.vlgmr.msra.gmra.mxu1 %vm955_vm2, %v926_v18  ;;  %v1241_v18 = vld [vmem:[#allocation5 + $0x18] sm:$0xff] }
 0x356   :  { %1305 = vmatpush.msra.mxu2 %v1241_v18 }
 0x3d2   :  { %v968_v25 = vpop.f32.mrf.mxu1 }
 0x3d3   :  { %v969_v26 = vadd.f32 %v11201_v24, %v968_v25  ;;  %v1137_v24 = vld [vmem:[#allocation3 + $0x8] sm:$0xff]  ;;  %v1238_v25 = vld [vmem:[#allocation5] sm:$0xff] }
 0x3d4   :  { %1277 = vmatpush.msrb.mxu1 %v1238_v25 }
 0x3d5   :  { %v972_v27 = vmul.f32 0.5, %v969_v26 }
 0x3d7   :  { %11215 = vtanh.f32 %v972_v27  ;;  %v1116_v27 = vld [vmem:[#allocation13] sm:$0xff] }
 0x3da   :  { %v970_v28 = vpop.f32.mrf.mxu1 }
 0x3dd   :  { %v11216_v29 = vpop.eup %11215 }
 0x3de   :  { %v974_v30 = vadd.f32 1.0, %v11216_v29 }
 0x3e0   :  { %v975_v31 = vmul.f32 0.5, %v974_v30 }
 0x3e2   :  { %v976_v32 = vmul.f32 %v975_v31, %v969_v26  ;;  %v1239_v26 = vld [vmem:[#allocation5 + $0x8] sm:$0xff]  ;;  %v1117_v31 = vld [vmem:[#allocation13 + $0x8] sm:$0xff] }
 0x3e3   :  { %1306 = vmatpush.msra.mxu2 %v1239_v26 }
 0x3e4   :  { %v977_v33 = vpack.c.bf16 %v976_v32, %v976_v32 }
 0x3e6   :  { %7983 = vmatmul.msk.bf16.vlgmr.msrb.gmra.mxu2 %vm1030_vm3, %v977_v33 }
 0x469   :  { %v1043_v44 = vpop.f32.mrf.mxu2 }
 0x46a   :  { %v1044_v46 = vadd.f32 %v11202_v36, %v1043_v44  ;;  %v1098_v36 = vld [vmem:[%s14417_s22 + $0x10] sm:$0xff] }
 0x46c   :  { %7984 = vmatpush.msk.msra.mxu3 %vm904_vm0, %v1044_v46 }
 0x46d   :  { %7985 = vmatmul.msk.f32.vlgmr.msra.gmra.mxu3 %vm1051_vm4, %v1047_v47 }
 0x46e   :  { %1205 = vmatpush.msrb.mxu3 %v1159_v49  ;;  %v1096_v49 = vld [vmem:[%s14417_s22] sm:$0xff] }
 0x470   :  { %1206 = vmatpush.msrb.mxu3 %v1157_v53 }
 0x471   :  { %v1045_v61 = vpop.f32.mrf.mxu2 }
 0x472   :  { %1207 = vmatpush.msrb.mxu3 %v1155_v57 }
 0x474   :  { %1208 = vmatpush.msrb.mxu3 %v1153_v62 }
 0x475   :  { %7986 = vmatmul.msk.f32.gmra.mxu3 %vm1051_vm4, %v1048_v0 }
 0x476   :  { %1209 = vmatpush.msrb.mxu3 %v1151_v2 }
 0x478   :  { %1210 = vmatpush.msrb.mxu3 %v1149_v7  ;;  %v1384_v7 = vld [vmem:[%s14418_s19 + $0x60] sm:$0xff] }
 0x47a   :  { %1211 = vmatpush.msrb.mxu3 %v1147_v11 }
 0x47c   :  { %1212 = vmatpush.msrb.mxu3 %v1145_v15  ;;  %v1377_v15 = vld [vmem:[%s14418_s19 + $0x28] sm:$0xff] }
 0x47d   :  { %7987 = vmatmul.msk.f32.gmra.mxu3 %vm1051_vm4, %v1049_v17 }
 0x47e   :  { %1213 = vmatpush.msrb.mxu3 %v1143_v19 }
 0x480   :  { %1214 = vmatpush.msrb.mxu3 %v1141_v20 }
 0x482   :  { %1215 = vmatpush.msrb.mxu3 %v1139_v21 }
 0x484   :  { %1216 = vmatpush.msrb.mxu3 %v1137_v24 }
 0x485   :  { %7988 = vmatmul.msk.f32.gmra.mxu3 %vm1051_vm4, %v1050_v22 }
 0x4f0   :  { %v1084_v28 = vpop.f32.mrf.mxu3 }
 0x4f1   :  { %7989 = vmatmul.msk.f32.vlgmr.msra.gmra.mxu0 %vm1030_vm3, %v1084_v28  ;;  %7993 = vmatmul.msk.f32.vlgmr.msrb.gmra.mxu3 %vm1030_vm3, %v1084_v28  ;;  %v1120_v29 = vmul.f32 %v1116_v27, %v1084_v28  ;;  %v1100_v51 = vmul.f32 %v1096_v49, %v1084_v28 }
 0x4f2   :  { %7997 = vmatmul.msk.f32.vlgmr.msrb.gmra.mxu1 %vm1030_vm3, %v1084_v28  ;;  %8001 = vmatmul.msk.f32.vlgmr.msra.gmra.mxu2 %vm1030_vm3, %v1084_v28 }
 0x4f3   :  { %v1124_v30 = vsel %vm1030_vm3, %v1120_v29, 0.0  ;;  %v1104_v53 = vsel %vm1030_vm3, %v1100_v51, 0.0  ;;  %v892_v29 = vld [vmem:[%s12905_s28 + $0x30] sm:$0xff] }
 0x4f4   :  { %1125 = vadd.xlane.f32.xlu2 %v1124_v30 }
 0x4f8   :  { %v1087_v32 = vpop.f32.mrf.mxu3 }
 0x4f9   :  { %7990 = vmatmul.msk.f32.gmra.mxu0 %vm1030_vm3, %v1087_v32  ;;  %7994 = vmatmul.msk.f32.gmra.mxu3 %vm1030_vm3, %v1087_v32  ;;  %v1121_v33 = vmul.f32 %v1117_v31, %v1087_v32  ;;  %v1101_v52 = vmul.f32 %v1097_v50, %v1087_v32 }
 0x4fa   :  { %7998 = vmatmul.msk.f32.gmra.mxu1 %vm1030_vm3, %v1087_v32  ;;  %8002 = vmatmul.msk.f32.gmra.mxu2 %vm1030_vm3, %v1087_v32  ;;  %v886_v32 = vld [vmem:[%s12905_s28] sm:$0xff] }
 0x4fb   :  { %v1127_v34 = vsel %vm1030_vm3, %v1121_v33, 0.0  ;;  %v1107_v54 = vsel %vm1030_vm3, %v1101_v52, 0.0 }
 0x4fc   :  { %1128 = vadd.xlane.f32.xlu2 %v1127_v34 }
 0x500   :  { %v1090_v37 = vpop.f32.mrf.mxu3 }
 0x501   :  { %7991 = vmatmul.msk.f32.gmra.mxu0 %vm1030_vm3, %v1090_v37  ;;  %7995 = vmatmul.msk.f32.gmra.mxu3 %vm1030_vm3, %v1090_v37  ;;  %v1122_v38 = vmul.f32 %v1118_v35, %v1090_v37  ;;  %v1102_v39 = vmul.f32 %v1098_v36, %v1090_v37  ;;  %v1380_v36 = vld [vmem:[%s14418_s19 + $0x40] sm:$0xff] }
 0x502   :  { %7999 = vmatmul.msk.f32.gmra.mxu1 %vm1030_vm3, %v1090_v37  ;;  %8003 = vmatmul.msk.f32.gmra.mxu2 %vm1030_vm3, %v1090_v37  ;;  %v1372_v37 = vld [vmem:[%s14418_s19] sm:$0xff] }
 0x503   :  { %v1130_v40 = vsel %vm1030_vm3, %v1122_v38, 0.0  ;;  %v1110_v41 = vsel %vm1030_vm3, %v1102_v39, 0.0  ;;  %v888_v39 = vld [vmem:[%s12905_s28 + $0x10] sm:$0xff] }
 0x504   :  { %1131 = vadd.xlane.f32.xlu0 %v1130_v40  ;;  %1111 = vadd.xlane.f32.xlu1 %v1110_v41 }
 0x508   :  { %v1093_v44 = vpop.f32.mrf.mxu3 }
 0x509   :  { %7992 = vmatmul.msk.f32.gmra.mxu0 %vm1030_vm3, %v1093_v44  ;;  %7996 = vmatmul.msk.f32.gmra.mxu3 %vm1030_vm3, %v1093_v44  ;;  %v1123_v45 = vmul.f32 %v1119_v42, %v1093_v44  ;;  %v1103_v46 = vmul.f32 %v1099_v43, %v1093_v44  ;;  %v1381_v43 = vld [vmem:[%s14418_s19 + $0x48] sm:$0xff] }
 0x50a   :  { %8000 = vmatmul.msk.f32.gmra.mxu1 %vm1030_vm3, %v1093_v44  ;;  %8004 = vmatmul.msk.f32.gmra.mxu2 %vm1030_vm3, %v1093_v44  ;;  %v891_v44 = vld [vmem:[%s12905_s28 + $0x28] sm:$0xff] }
 0x50b   :  { %v1133_v47 = vsel %vm1030_vm3, %v1123_v45, 0.0  ;;  %v1113_v48 = vsel %vm1030_vm3, %v1103_v46, 0.0 }
 0x50c   :  { %1134 = vadd.xlane.f32.xlu0 %v1133_v47  ;;  %1114 = vadd.xlane.f32.xlu1 %v1113_v48 }
 0x514   :  { %1105 = vadd.xlane.f32.xlu0 %v1104_v53  ;;  %1108 = vadd.xlane.f32.xlu1 %v1107_v54 }
 0x515   :  { %1460 = vperm.xlu2 %11197, %v1386_v59  }
 0x51d   :  { %1455 = vperm.xlu2 %11197, %v1385_v5  }
 0x525   :  { %1440 = vperm.xlu2 %11197, %v1382_v14  }
 0x528   :  { %1465 = vperm.xlu0 %11198, %v1387_v60  }
 0x52d   :  { %1450 = vperm.xlu1 %11199, %v1384_v7   ;;  %1430 = vperm.xlu2 %11197, %v1380_v36  }
 0x530   :  { %1420 = vperm.xlu0 %11198, %v1378_v6   ;;  %v889_v6 = vld [vmem:[%s12905_s28 + $0x18] sm:$0xff] }
 0x535   :  { %1445 = vperm.xlu1 %11199, %v1383_v16  }
 0x538   :  { %1415 = vperm.xlu0 %11198, %v1377_v15   ;;  %v1376_v15 = vld [vmem:[%s14418_s19 + $0x20] sm:$0xff] }
 0x53d   :  { %1435 = vperm.xlu1 %11199, %v1381_v43  }
 0x540   :  { %1390 = vperm.xlu0 %11198, %v1372_v37  }
 0x545   :  { %1410 = vperm.xlu1 %11199, %v1376_v15  }
 0x567   :  { %v1126_v2 = vpop.xlane.xlu2 %1125 }
 0x56e   :  { %v13186_v55 = vpop.f32.mrf.mxu0 }
 0x56f   :  { %v1279_v56 = vpop.f32.mrf.mxu1  ;;  %v1129_v17 = vpop.xlane.xlu2 %1128 }
 0x570   :  { %v1320_v18 = vadd.f32 %v1279_v56, %v1126_v2 }
 0x572   :  { %v1328_v28 = vadd.f32 1.0, %v1320_v18 }
 0x574   :  { %v13188_v57 = vpop.f32.mrf.mxu3  ;;  %v1336_v49 = vmul.f32 %v1328_v28, %v886_v32  ;;  %v10482_v28 = vld [vmem:[%s14419_s14 + $0x28] sm:$0xff] }
 0x575   :  { %v1308_v61 = vpop.f32.mrf.mxu2 }
 0x576   :  { %v1192_v62 = vpop.f32.mrf.mxu0  ;;  %v1321_v38 = vadd.f32 %v1308_v61, %v1126_v2 }
 0x577   :  { %v1282_v63 = vpop.f32.mrf.mxu1  ;;  %v1132_v0 = vpop.xlane.xlu0 %1131 }
 0x578   :  { %v13195_v1 = vpop.xlane.xlu1 %1111  ;;  %v1322_v21 = vadd.f32 %v1282_v63, %v1129_v17  ;;  %v1329_v56 = vadd.f32 1.0, %v1321_v38  ;;  %v893_v63 = vld [vmem:[%s12905_s28 + $0x38] sm:$0xff] }
 0x57a   :  { %v1330_v33 = vadd.f32 1.0, %v1322_v21  ;;  %v10477_v21 = vld [vmem:[%s14419_s14] sm:$0xff] }
 0x57c   :  { %v13197_v3 = vpop.f32.mrf.mxu3  ;;  %v1338_v51 = vmul.f32 %v1330_v33, %v888_v39 }
 0x57d   :  { %v1311_v8 = vpop.f32.mrf.mxu2 }
 0x57e   :  { %v1195_v9 = vpop.f32.mrf.mxu0  ;;  %v1323_v40 = vadd.f32 %v1311_v8, %v1129_v17 }
 0x57f   :  { %v1285_v10 = vpop.f32.mrf.mxu1  ;;  %v1135_v11 = vpop.xlane.xlu0 %1134  ;;  %v1234_v41 = vadd.f32 %v1195_v9, %v13195_v1 }
 0x580   :  { %v13202_v12 = vpop.xlane.xlu1 %1114  ;;  %v1324_v13 = vadd.f32 %v1285_v10, %v1132_v0  ;;  %v1331_v59 = vadd.f32 1.0, %v1323_v40 }
 0x582   :  { %v1332_v22 = vadd.f32 1.0, %v1324_v13  ;;  %v1379_v13 = vld [vmem:[%s14418_s19 + $0x38] sm:$0xff]  ;;  %v1339_v16 = vmul.f32 %v1331_v59, %v889_v6 }
 0x583   :  { %1425 = vperm.xlu2 %11197, %v1379_v13  }
 0x584   :  { %v1224_v19 = vpop.f32.mrf.mxu3  ;;  %v1340_v34 = vmul.f32 %v1332_v22, %v890_v23  ;;  %v1375_v22 = vld [vmem:[%s14418_s19 + $0x18] sm:$0xff]  ;;  %v1373_v23 = vld [vmem:[%s14418_s19 + $0x8] sm:$0xff] }
 0x585   :  { %v1314_v20 = vpop.f32.mrf.mxu2  ;;  %v1235_v7 = vadd.f32 %v1224_v19, %v13195_v1  ;;  %v1374_v19 = vld [vmem:[%s14418_s19 + $0x10] sm:$0xff]  ;;  %1405 = vperm.xlu1 %11199, %v1375_v22  }
 0x586   :  { %v1325_v24 = vadd.f32 %v1314_v20, %v1132_v0  ;;  %v1198_v26 = vpop.f32.mrf.mxu0  ;;  %v1348_v53 = vadd.f32 %v1340_v34, %v1234_v41 }
 0x587   :  { %v1288_v25 = vpop.f32.mrf.mxu1  ;;  %v1106_v30 = vpop.xlane.xlu0 %1105  ;;  %v1236_v45 = vadd.f32 %v1198_v26, %v13202_v12  ;;  %v10480_v26 = vld [vmem:[%s14419_s14 + $0x18] sm:$0xff] }
 0x588   :  { %v1326_v27 = vadd.f32 %v1288_v25, %v1135_v11  ;;  %v1109_v31 = vpop.xlane.xlu1 %1108  ;;  %v1333_v42 = vadd.f32 1.0, %v1325_v24  ;;  %v1230_v47 = vadd.f32 %v13186_v55, %v1106_v30  ;;  %v887_v55 = vld [vmem:[%s12905_s28 + $0x8] sm:$0xff]  ;;  %v1231_v8 = vadd.f32 %v13188_v57, %v1106_v30  ;;  %s14420_s28 = sld [smem:[#allocation104_spill]]  ;;  %v10479_v25 = vld [vmem:[%s14419_s14 + $0x10] sm:$0xff] }
 0x589   :  { %v1232_v48 = vadd.f32 %v1192_v62, %v1109_v31  ;;  %v1233_v9 = vadd.f32 %v13197_v3, %v1109_v31  ;;  %v1337_v14 = vmul.f32 %v1329_v56, %v887_v55  ;;  %v10478_v24 = vld [vmem:[%s14419_s14 + $0x8] sm:$0xff]  ;;  %v10484_v31 = vld [vmem:[%s14419_s14 + $0x38] sm:$0xff] }
 0x58a   :  { %v1334_v35 = vadd.f32 1.0, %v1326_v27  ;;  %v1341_v60 = vmul.f32 %v1333_v42, %v891_v44  ;;  %v1344_v2 = vadd.f32 %v1336_v49, %v1230_v47  ;;  %v10481_v27 = vld [vmem:[%s14419_s14 + $0x20] sm:$0xff]  ;;  %v13266_v44 = vpop.permute.xlu2 %1460 }
 0x58b   :  { %v1346_v5 = vadd.f32 %v1338_v51, %v1232_v48  ;;  %v1345_v1 = vadd.f32 %v1337_v14, %v1231_v8  ;;  %v1347_v57 = vadd.f32 %v1339_v16, %v1233_v9  ;;  %1400 = vperm.xlu2 %11197, %v1374_v19  }
 0x58c   :  { %v1342_v46 = vmul.f32 %v1334_v35, %v892_v29  ;;  %v1227_v61 = vpop.f32.mrf.mxu3  ;;  %v1349_v17 = vadd.f32 %v1341_v60, %v1235_v7  ;;  %v10483_v29 = vld [vmem:[%s14419_s14 + $0x30] sm:$0xff] }
 0x58d   :  { %v1317_v50 = vpop.f32.mrf.mxu2  ;;  %v1237_v10 = vadd.f32 %v1227_v61, %v13202_v12  ;;  %v1368_v20 = vpack.c.bf16 %v1346_v5, %v1344_v2  ;;  %v1369_v12 = vpack.c.bf16 %v1347_v57, %v1345_v1 }
 0x58e   :  { %v1327_v52 = vadd.f32 %v1317_v50, %v1135_v11  ;;  %v1350_v54 = vadd.f32 %v1342_v46, %v1236_v45  ;;  %v1809_v30 = vld [vmem:[%s14420_s28] sm:$0xff]  ;;  %v1810_v32 = vld [vmem:[%s14420_s28 + $0x8] sm:$0xff] }
 0x58f   :  { %1813 = vperm.xlu1 %11199, %v1809_v30   ;;  %1818 = vperm.xlu0 %11198, %v1810_v32  }
 0x590   :  { %v1335_v0 = vadd.f32 1.0, %v1327_v52  ;;  %v1370_v62 = vpack.c.bf16 %v1350_v54, %v1348_v53 }
 0x592   :  { %v1343_v11 = vmul.f32 %v1335_v0, %v893_v63  ;;  %1539 = vmatpush.bf16.msrb.mxu0 %v1370_v62  ;;  %v13272_v47 = vpop.permute.xlu2 %1455 }
 0x593   :  { %1395 = vperm.xlu2 %11197, %v1373_v23  }
 0x594   :  { %v1351_v18 = vadd.f32 %v1343_v11, %v1237_v10 }
 0x596   :  { %1540 = vmatpush.bf16.msrb.mxu0 %v1368_v20  ;;  %v1371_v3 = vpack.c.bf16 %v1351_v18, %v1349_v17 }
 0x598   :  { %1588 = vmatpush.bf16.msra.mxu3 %v1371_v3 }
 0x599   :  { %8037 = vmatmul.msk.bf16.vlgmr.msrb.gmra.mxu0 %vm1508_vm5, %v10477_v21 }
 0x59a   :  { %v13278_v51 = vpop.permute.xlu2 %1440  ;;  %v13284_v54 = vpop.permute.xlu0 %1465 }
 0x59c   :  { %1589 = vmatpush.bf16.msra.mxu3 %v1369_v12 }
 0x59f   :  { %8045 = vmatmul.msk.bf16.vlgmr.msra.gmra.mxu3 %vm1508_vm5, %v10477_v21  ;;  %v13280_v52 = vpop.permute.xlu1 %1450 }
 0x5a2   :  { %v13286_v59 = vpop.permute.xlu2 %1430  ;;  %v13292_v63 = vpop.permute.xlu0 %1420 }
 0x5a7   :  { %v13290_v61 = vpop.permute.xlu1 %1445 }
 0x5a9   :  { %8038 = vmatmul.msk.bf16.gmra.mxu0 %vm1508_vm5, %v10478_v24 }
 0x5aa   :  { %v13300_v6 = vpop.permute.xlu0 %1415 }
 0x5af   :  { %8046 = vmatmul.msk.bf16.gmra.mxu3 %vm1508_vm5, %v10478_v24  ;;  %v13298_v2 = vpop.permute.xlu1 %1435 }
 0x5b2   :  { %v1391_v11 = vpop.permute.xlu0 %1390 }
 0x5b7   :  { %v13304_v10 = vpop.permute.xlu1 %1410 }
 0x5b9   :  { %8039 = vmatmul.msk.bf16.gmra.mxu0 %vm1508_vm5, %v10479_v25 }
 0x5bf   :  { %8047 = vmatmul.msk.bf16.gmra.mxu3 %vm1508_vm5, %v10479_v25 }
 0x5c9   :  { %8040 = vmatmul.msk.bf16.gmra.mxu0 %vm1508_vm5, %v10480_v26 }
 0x5cf   :  { %8048 = vmatmul.msk.bf16.gmra.mxu3 %vm1508_vm5, %v10480_v26 }
 0x5d9   :  { %8041 = vmatmul.msk.bf16.gmra.mxu0 %vm1508_vm5, %v10481_v27 }
 0x5dd   :  { %v13296_v62 = vpop.permute.xlu2 %1425 }
 0x5df   :  { %8049 = vmatmul.msk.bf16.gmra.mxu3 %vm1508_vm5, %v10481_v27 }
 0x5e5   :  { %v1401_v8 = vpop.permute.xlu2 %1400 }
 0x5e9   :  { %8042 = vmatmul.msk.bf16.gmra.mxu0 %vm1508_vm5, %v10482_v28 }
 0x5ed   :  { %v1396_v16 = vpop.permute.xlu2 %1395 }
 0x5ef   :  { %8050 = vmatmul.msk.bf16.gmra.mxu3 %vm1508_vm5, %v10482_v28 }
 0x5f7   :  { %v13313_v20 = vpop.permute.xlu1 %1405 }
 0x5f9   :  { %8043 = vmatmul.msk.bf16.gmra.mxu0 %vm1508_vm5, %v10483_v29 }
 0x5ff   :  { %8051 = vmatmul.msk.bf16.gmra.mxu3 %vm1508_vm5, %v10483_v29 }
 0x609   :  { %8044 = vmatmul.msk.bf16.gmra.mxu0 %vm1508_vm5, %v10484_v31 }
 0x60f   :  { %8052 = vmatmul.msk.bf16.gmra.mxu3 %vm1508_vm5, %v10484_v31 }
 0x616   :  { %v1542_v33 = vpop.f32.mrf.mxu0 }
 0x617   :  { %v13308_v14 = vadd.f32 %v1542_v33, %v1391_v11 }
 0x619   :  { %14421 = vst [vmem:[#allocation141_spill] sm:$0xff] %v13308_v14  ;;  %v1631_v18 = vmul.f32 0.5, %v13308_v14 }
 0x61b   :  { %11217 = vtanh.f32 %v1631_v18 }
 0x61e   :  { %v1544_v34 = vpop.f32.mrf.mxu0 }
 0x61f   :  { %v13317_v1 = vadd.f32 %v1544_v34, %v1396_v16 }
 0x621   :  { %14422 = vst [vmem:[#allocation142_spill] sm:$0xff] %v13317_v1  ;;  %v1633_v22 = vmul.f32 0.5, %v13317_v1  ;;  %v11218_v32 = vpop.eup %11217 }
 0x622   :  { %v13256_v35 = vpop.f32.mrf.mxu3 }
 0x623   :  { %v13346_v33 = vadd.f32 %v13256_v35, %v1391_v11 }
 0x625   :  { %14423 = vst [vmem:[#allocation143_spill] sm:$0xff] %v13346_v33  ;;  %v13364_v18 = vmul.f32 0.5, %v13346_v33 }
 0x626   :  { %v1547_v36 = vpop.f32.mrf.mxu0 }
 0x627   :  { %v13310_v17 = vadd.f32 %v1547_v36, %v1401_v8 }
 0x629   :  { %v1635_v57 = vmul.f32 0.5, %v13310_v17 }
 0x62a   :  { %v13258_v37 = vpop.f32.mrf.mxu3 }
 0x62b   :  { %11219 = vtanh.f32 %v1635_v57  ;;  %v13374_v57 = vadd.f32 %v13258_v37, %v1396_v16 }
 0x62c   :  { %11221 = vtanh.f32 %v1633_v22 }
 0x62d   :  { %14424 = vst [vmem:[#allocation144_spill] sm:$0xff] %v13374_v57 }
 0x62e   :  { %v1549_v38 = vpop.f32.mrf.mxu0 }
 0x62f   :  { %v13321_v3 = vadd.f32 %v1549_v38, %v13313_v20 }
 0x631   :  { %v1637_v25 = vmul.f32 0.5, %v13321_v3 }
 0x632   :  { %v13260_v39 = vpop.f32.mrf.mxu3 }
 0x633   :  { %11223 = vtanh.f32 %v1637_v25 }
 0x636   :  { %v1552_v40 = vpop.f32.mrf.mxu0 }
 0x637   :  { %v13335_v26 = vadd.f32 %v1552_v40, %v13304_v10 }
 0x639   :  { %v1639_v36 = vmul.f32 0.5, %v13335_v26 }
 0x63a   :  { %v13262_v41 = vpop.f32.mrf.mxu3 }
 0x63e   :  { %v1554_v42 = vpop.f32.mrf.mxu0 }
 0x63f   :  { %v13354_v40 = vadd.f32 %v1554_v42, %v13300_v6 }
 0x642   :  { %v13264_v43 = vpop.f32.mrf.mxu3 }
 0x646   :  { %v13268_v45 = vpop.f32.mrf.mxu0 }
 0x647   :  { %v13368_v42 = vadd.f32 %v13268_v45, %v13292_v63 }
 0x64a   :  { %v13270_v46 = vpop.f32.mrf.mxu3 }
 0x64e   :  { %v13274_v48 = vpop.f32.mrf.mxu0 }
 0x652   :  { %v13276_v49 = vpop.f32.mrf.mxu3 }
 0x656   :  { %v1562_v50 = vpop.f32.mrf.mxu0 }
 0x657   :  { %v13351_v38 = vadd.f32 %v1562_v50, %v13286_v59 }
 0x65a   :  { %v13282_v53 = vpop.f32.mrf.mxu3 }
 0x65e   :  { %v1564_v56 = vpop.f32.mrf.mxu0 }
 0x65f   :  { %v13360_v35 = vadd.f32 %v1564_v56, %v13298_v2  ;;  %v13378_v56 = vadd.f32 %v13274_v48, %v13296_v62 }
 0x661   :  { %v1649_v37 = vmul.f32 0.5, %v13360_v35 }
 0x662   :  { %v13288_v60 = vpop.f32.mrf.mxu3 }
 0x666   :  { %v1567_v55 = vpop.f32.mrf.mxu0 }
 0x667   :  { %v13338_v27 = vadd.f32 %v1567_v55, %v13278_v51 }
 0x669   :  { %v1651_v55 = vmul.f32 0.5, %v13338_v27 }
 0x66a   :  { %v13294_v0 = vpop.f32.mrf.mxu3 }
 0x66e   :  { %v1569_v5 = vpop.f32.mrf.mxu0 }
 0x66f   :  { %v13342_v29 = vadd.f32 %v1569_v5, %v13290_v61  ;;  %v11220_v5 = vpop.eup %11219 }
 0x670   :  { %v11222_v22 = vpop.eup %11221  ;;  %v1699_v25 = vadd.f32 1.0, %v11220_v5 }
 0x671   :  { %v1653_v11 = vmul.f32 0.5, %v13342_v29 }
 0x672   :  { %v13302_v7 = vpop.f32.mrf.mxu3 }
 0x673   :  { %v13389_v48 = vadd.f32 %v13302_v7, %v13278_v51  ;;  %v1645_v51 = vmul.f32 0.5, %v13378_v56 }
 0x676   :  { %v1572_v9 = vpop.f32.mrf.mxu0 }
 0x677   :  { %v13324_v12 = vadd.f32 %v1572_v9, %v13280_v52  ;;  %v13357_v9 = vadd.f32 1.0, %v11218_v32  ;;  %v13384_v32 = vadd.f32 %v13260_v39, %v1401_v8  ;;  %v13398_v8 = vadd.f32 1.0, %v11222_v22 }
 0x678   :  { %v1652_v22 = vmul.f32 0.5, %v13389_v48 }
 0x679   :  { %v1655_v30 = vmul.f32 0.5, %v13324_v12  ;;  %14425 = vst [vmem:[#allocation145_spill] sm:$0xff] %v13384_v32 }
 0x67a   :  { %v13306_v13 = vpop.f32.mrf.mxu3 }
 0x67e   :  { %v1574_v15 = vpop.f32.mrf.mxu0 }
 0x67f   :  { %v13328_v23 = vadd.f32 %v1574_v15, %v13272_v47 }
 0x681   :  { %v1657_v34 = vmul.f32 0.5, %v13328_v23 }
 0x682   :  { %v13315_v21 = vpop.f32.mrf.mxu3 }
 0x686   :  { %v1577_v19 = vpop.f32.mrf.mxu0 }
 0x687   :  { %v13331_v24 = vadd.f32 %v1577_v19, %v13266_v44  ;;  %v1647_v19 = vmul.f32 0.5, %v13351_v38 }
 0x689   :  { %v1659_v28 = vmul.f32 0.5, %v13331_v24 }
 0x68a   :  { %v1623_v31 = vpop.f32.mrf.mxu3 }
 0x68b   :  { %11225 = vtanh.f32 %v1659_v28  ;;  %v1641_v28 = vmul.f32 0.5, %v13354_v40  ;;  %v13393_v5 = vadd.f32 %v1623_v31, %v13272_v47  ;;  %v13408_v47 = vadd.f32 %v13315_v21, %v13280_v52 }
 0x68c   :  { %11227 = vtanh.f32 %v1655_v30  ;;  %v11224_v30 = vpop.eup %11223 }
 0x68d   :  { %11229 = vtanh.f32 %v1657_v34  ;;  %v13416_v58 = vadd.f32 1.0, %v11224_v30  ;;  %v1658_v52 = vmul.f32 0.5, %v13393_v5  ;;  %v13432_v30 = vadd.f32 %v13288_v60, %v13286_v59 }
 0x68e   :  { %v1579_v15 = vpop.f32.mrf.mxu0  ;;  %11231 = vtanh.f32 %v1639_v36  ;;  %v1643_v36 = vmul.f32 0.5, %v13368_v42 }
 0x68f   :  { %v13371_v50 = vadd.f32 %v1579_v15, %v13284_v54  ;;  %11233 = vtanh.f32 %v1651_v55  ;;  %v13404_v15 = vmul.f32 0.5, %v1699_v25  ;;  %v13419_v25 = vmul.f32 0.5, %v13384_v32 }
 0x690   :  { %11235 = vtanh.f32 %v1653_v11  ;;  %v13401_v11 = vmul.f32 0.5, %v13374_v57 }
 0x691   :  { %v1661_v45 = vmul.f32 0.5, %v13371_v50  ;;  %v11226_v34 = vpop.eup %11225 }
 0x692   :  { %v1626_v16 = vpop.f32.mrf.mxu3  ;;  %v11228_v39 = vpop.eup %11227 }
 0x693   :  { %11237 = vtanh.f32 %v1661_v45  ;;  %v13396_v55 = vadd.f32 %v1626_v16, %v13266_v44  ;;  %v11230_v7 = vpop.eup %11229  ;;  %v13414_v45 = vadd.f32 %v13306_v13, %v13290_v61  ;;  %v1723_v16 = vadd.f32 1.0, %v11226_v34 }
 0x694   :  { %11239 = vtanh.f32 %v1647_v19  ;;  %v11232_v31 = vpop.eup %11231  ;;  %v1721_v4 = vadd.f32 1.0, %v11230_v7  ;;  %v13428_v13 = vadd.f32 %v13264_v43, %v13304_v10  ;;  %v1656_v34 = vmul.f32 0.5, %v13408_v47 }
 0x695   :  { %11241 = vtanh.f32 %v1641_v28  ;;  %v1660_v44 = vmul.f32 0.5, %v13396_v55  ;;  %v11234_v19 = vpop.eup %11233  ;;  %v13424_v28 = vadd.f32 %v13262_v41, %v13313_v20  ;;  %v1654_v41 = vmul.f32 0.5, %v13414_v45 }
 0x696   :  { %11243 = vtanh.f32 %v1649_v37  ;;  %v11236_v21 = vpop.eup %11235  ;;  %v1719_v37 = vadd.f32 1.0, %v11228_v39  ;;  %v1755_v20 = vmul.f32 0.5, %v1723_v16  ;;  %v1715_v33 = vadd.f32 1.0, %v11234_v19 }
 0x697   :  { %11245 = vtanh.f32 %v1643_v36  ;;  %v13438_v43 = vadd.f32 %v13294_v0, %v13298_v2  ;;  %v1717_v10 = vadd.f32 1.0, %v11236_v21  ;;  %v1753_v57 = vmul.f32 0.5, %v1721_v4 }
 0x698   :  { %11247 = vtanh.f32 %v1645_v51  ;;  %v13445_v16 = vadd.f32 %v13282_v53, %v13296_v62  ;;  %v1648_v2 = vmul.f32 0.5, %v13432_v30  ;;  %v1703_v1 = vadd.f32 1.0, %v11232_v31 }
 0x699   :  { %v11238_v61 = vpop.eup %11237  ;;  %11249 = vtanh.f32 %v1660_v44  ;;  %v1751_v44 = vmul.f32 0.5, %v1719_v37  ;;  %v1747_v37 = vmul.f32 0.5, %v1715_v33  ;;  %v1749_v53 = vmul.f32 0.5, %v1717_v10 }
 0x69a   :  { %v11240_v36 = vpop.eup %11239  ;;  %11251 = vtanh.f32 %v1652_v22  ;;  %v1725_v51 = vadd.f32 1.0, %v11238_v61  ;;  %v1628_v39 = vpop.f32.mrf.mxu3  ;;  %v1650_v61 = vmul.f32 0.5, %v13438_v43  ;;  %v13461_v33 = vadd.f32 %v13276_v49, %v13292_v63 }
 0x69b   :  { %v11242_v7 = vpop.eup %11241  ;;  %11253 = vtanh.f32 %v1658_v52  ;;  %v13441_v59 = vadd.f32 %v1628_v39, %v13284_v54  ;;  %v1711_v14 = vadd.f32 1.0, %v11240_v36  ;;  %v1787_v54 = vmul.f32 %v1755_v20, %v13331_v24 }
 0x69c   :  { %v11244_v60 = vpop.eup %11243  ;;  %v1757_v22 = vmul.f32 0.5, %v1725_v51  ;;  %11255 = vtanh.f32 %v1656_v34  ;;  %v1783_v62 = vmul.f32 %v1751_v44, %v13324_v12  ;;  %v1785_v34 = vmul.f32 %v1753_v57, %v13328_v23 }
 0x69d   :  { %v11246_v32 = vpop.eup %11245  ;;  %v1662_v19 = vmul.f32 0.5, %v13441_v59  ;;  %11257 = vtanh.f32 %v1654_v41  ;;  %v1713_v4 = vadd.f32 1.0, %v11244_v60  ;;  %v1640_v41 = vmul.f32 0.5, %v13428_v13 }
 0x69e   :  { %v11248_v0 = vpop.eup %11247  ;;  %v1789_v52 = vmul.f32 %v1757_v22, %v13371_v50  ;;  %v13457_v24 = vadd.f32 %v13270_v46, %v13300_v6  ;;  %v1707_v50 = vadd.f32 1.0, %v11246_v32  ;;  %v1743_v23 = vmul.f32 0.5, %v1711_v14 }
 0x69f   :  { %v11250_v21 = vpop.eup %11249  ;;  %11259 = vtanh.f32 %v1662_v19  ;;  %v1709_v20 = vadd.f32 1.0, %v11248_v0  ;;  %v1646_v57 = vmul.f32 0.5, %v13445_v16  ;;  %v1745_v31 = vmul.f32 0.5, %v1713_v4 }
 0x6a0   :  { %v11252_v36 = vpop.eup %11251  ;;  %v1807_v51 = vpack.c.bf16 %v1789_v52, %v1787_v54  ;;  %11261 = vtanh.f32 %v1648_v2  ;;  %v1724_v60 = vadd.f32 1.0, %v11250_v21  ;;  %v1779_v44 = vmul.f32 %v1747_v37, %v13338_v27 }
 0x6a1   :  { %v11254_v39 = vpop.eup %11253  ;;  %11263 = vtanh.f32 %v1650_v61  ;;  %v1781_v46 = vmul.f32 %v1749_v53, %v13342_v29  ;;  %v1805_v22 = vpack.c.bf16 %v1785_v34, %v1783_v62  ;;  %v1705_v63 = vadd.f32 1.0, %v11242_v7 }
 0x6a2   :  { %1827 = vmatpush.bf16.msra.mxu1 %v1807_v51  ;;  %v11256_v12 = vpop.eup %11255  ;;  %v1722_v6 = vadd.f32 1.0, %v11254_v39  ;;  %11265 = vtanh.f32 %v1640_v41  ;;  %v1642_v32 = vmul.f32 0.5, %v13457_v24  ;;  %v1644_v19 = vmul.f32 0.5, %v13461_v33 }
 0x6a3   :  { %v11258_v10 = vpop.eup %11257  ;;  %v1739_v0 = vmul.f32 0.5, %v1707_v50  ;;  %v1720_v14 = vadd.f32 1.0, %v11256_v12  ;;  %v1756_v2 = vmul.f32 0.5, %v1724_v60  ;;  %v1741_v52 = vmul.f32 0.5, %v1709_v20 }
 0x6a4   :  { %v1775_v21 = vmul.f32 %v1743_v23, %v13351_v38  ;;  %11267 = vtanh.f32 %v1646_v57  ;;  %v1777_v27 = vmul.f32 %v1745_v31, %v13360_v35  ;;  %v1718_v4 = vadd.f32 1.0, %v11258_v10  ;;  %v10543_v10 = vld [vmem:[%s14426_s7 + $0x1cc] sm:$0xf] }
 0x6a5   :  { %v11260_v49 = vpop.eup %11259  ;;  %v1754_v37 = vmul.f32 0.5, %v1722_v6  ;;  %v1803_v61 = vpack.c.bf16 %v1781_v46, %v1779_v44  ;;  %v1735_v62 = vmul.f32 0.5, %v1703_v1  ;;  %v1638_v34 = vmul.f32 0.5, %v13424_v28  ;;  %v8293_v46 = vld [vmem:[%s14426_s7 + $0x1e8] sm:$0xf0] }
 0x6a6   :  { %v1726_v54 = vadd.f32 1.0, %v11260_v49  ;;  %1828 = vmatpush.bf16.msra.mxu1 %v1805_v22  ;;  %v11262_v29 = vpop.eup %11261  ;;  %11269 = vtanh.f32 %v1644_v19  ;;  %v1716_v51 = vadd.f32 1.0, %v11252_v36  ;;  %v1737_v39 = vmul.f32 0.5, %v1705_v63  ;;  %v8549_v6 = vld [vmem:[%s14426_s7 + $0x3e8] sm:$0xf0] }
 0x6a7   :  { %v11264_v53 = vpop.eup %11263  ;;  %v1752_v41 = vmul.f32 0.5, %v1720_v14  ;;  %v1788_v50 = vmul.f32 %v1756_v2, %v13396_v55  ;;  %v1771_v20 = vmul.f32 %v1739_v0, %v13368_v42  ;;  %11271 = vtanh.f32 %v1642_v32  ;;  %v10535_v32 = vld [vmem:[%s14426_s7 + $0x18c] sm:$0xf] }
 0x6a8   :  { %v1758_v7 = vmul.f32 0.5, %v1726_v54  ;;  %v11266_v35 = vpop.eup %11265  ;;  %v1773_v60 = vmul.f32 %v1741_v52, %v13378_v56  ;;  %v1801_v12 = vpack.c.bf16 %v1777_v27, %v1775_v21  ;;  %v1714_v1 = vadd.f32 1.0, %v11264_v53  ;;  %v8261_v14 = vld [vmem:[%s14426_s7 + $0x1a8] sm:$0xf0] }
 0x6a9   :  { %v1750_v23 = vmul.f32 0.5, %v1718_v4  ;;  %v1786_v36 = vmul.f32 %v1754_v37, %v13393_v5  ;;  %11273 = vtanh.f32 %v13419_v25  ;;  %v1712_v31 = vadd.f32 1.0, %v11262_v29  ;;  %v10607_v5 = vld [vmem:[%s14426_s7 + $0x3cc] sm:$0xf] }
 0x6aa   :  { %v1790_v38 = vmul.f32 %v1758_v7, %v13441_v59  ;;  %1829 = vmatpush.bf16.msra.mxu1 %v1803_v61  ;;  %v11268_v55 = vpop.eup %11267  ;;  %v1733_v59 = vmul.f32 0.5, %v13416_v58  ;;  %v1748_v42 = vmul.f32 0.5, %v1716_v51  ;;  %v1767_v56 = vmul.f32 %v1735_v62, %v13335_v26  ;;  %v8229_v4 = vld [vmem:[%s14426_s7 + $0x168] sm:$0xf0] }
 0x6ab   :  { %11275 = vtanh.f32 %v1638_v34  ;;  %v1784_v44 = vmul.f32 %v1752_v41, %v13408_v47  ;;  %v1769_v58 = vmul.f32 %v1737_v39, %v13354_v40  ;;  %v1799_v49 = vpack.c.bf16 %v1773_v60, %v1771_v20  ;;  %v10599_v34 = vld [vmem:[%s14426_s7 + $0x38c] sm:$0xf] }
 0x6ac   :  { %v1808_v57 = vpack.c.bf16 %v1790_v38, %v1788_v50  ;;  %v11270_v22 = vpop.eup %11269  ;;  %v8296_v25 = vor.u32 %v10543_v10, %v8293_v46  ;;  %v8552_v63 = vor.u32 %v10607_v5, %v8549_v6  ;;  %v1710_v19 = vadd.f32 1.0, %v11268_v55  ;;  %v8517_v51 = vld [vmem:[%s14426_s7 + $0x3a8] sm:$0xf0]  ;;  %v10546_v55 = vld [vmem:[%s14426_s7 + $0x1dc] sm:$0xf0] }
 0x6ad   :  { %v1746_v0 = vmul.f32 0.5, %v1714_v1  ;;  %v1782_v26 = vmul.f32 %v1750_v23, %v13414_v45  ;;  %v1806_v47 = vpack.c.bf16 %v1786_v36, %v1784_v44  ;;  %v11272_v2 = vpop.eup %11271  ;;  %v1729_v54 = vmul.f32 0.5, %v13398_v8  ;;  %v10527_v45 = vld [vmem:[%s14426_s7 + $0x14c] sm:$0xf] }
 0x6ae   :  { %1830 = vmatpush.bf16.msra.mxu1 %v1801_v12  ;;  %1841 = vmatpush.bf16.msrb.mxu2 %v1808_v57  ;;  %v1727_v52 = vmul.f32 0.5, %v13357_v9  ;;  %v8264_v40 = vor.u32 %v10535_v32, %v8261_v14  ;;  %11277 = vtanh.f32 %v13364_v18  ;;  %v1708_v21 = vadd.f32 1.0, %v11270_v22  ;;  %v14427_v38 = vld [vmem:[#allocation142_spill] sm:$0xff]  ;;  %v14428_v60 = vld [vmem:[#allocation141_spill] sm:$0xff]  ;;  %v8283_v57 = vld [vmem:[%s14426_s7 + $0x1c0] sm:$0xf] }
 0x6af   :  { %2727 = vmatpush.bf16.msra.mxu0 %v8296_v25  ;;  %2741 = vmatpush.bf16.msrb.mxu3 %v8552_v63  ;;  %v1744_v27 = vmul.f32 0.5, %v1712_v31  ;;  %v1780_v29 = vmul.f32 %v1748_v42, %v13389_v48  ;;  %v11274_v37 = vpop.eup %11273  ;;  %v1763_v8 = vmul.f32 %v13404_v15, %v13310_v17  ;;  %11279 = vtanh.f32 %v13401_v11  ;;  %v10519_v11 = vld [vmem:[%s14426_s7 + $0x10c] sm:$0xf] }
 0x6b0   :  { %v1765_v9 = vmul.f32 %v1733_v59, %v13321_v3  ;;  %v1797_v7 = vpack.c.bf16 %v1769_v58, %v1767_v56  ;;  %v1706_v61 = vadd.f32 1.0, %v11272_v2  ;;  %v1742_v53 = vmul.f32 0.5, %v1710_v19  ;;  %v8197_v15 = vld [vmem:[%s14426_s7 + $0x128] sm:$0xf0]  ;;  %v8251_v19 = vld [vmem:[%s14426_s7 + $0x180] sm:$0xf] }
 0x6b1   :  { %v11276_v18 = vpop.eup %11275  ;;  %v1778_v48 = vmul.f32 %v1746_v0, %v13438_v43  ;;  %v1804_v62 = vpack.c.bf16 %v1782_v26, %v1780_v29  ;;  %v1704_v39 = vadd.f32 1.0, %v11266_v35  ;;  %v8232_v41 = vor.u32 %v10527_v45, %v8229_v4  ;;  %v10591_v56 = vld [vmem:[%s14426_s7 + $0x34c] sm:$0xf] }
 0x6b2   :  { %1831 = vmatpush.bf16.msra.mxu1 %v1799_v49  ;;  %1842 = vmatpush.bf16.msrb.mxu2 %v1806_v47  ;;  %v8520_v50 = vor.u32 %v10599_v34, %v8517_v51  ;;  %v1740_v17 = vmul.f32 0.5, %v1708_v21  ;;  %v1776_v3 = vmul.f32 %v1744_v27, %v13432_v30  ;;  %v1761_v20 = vmul.f32 %v1729_v54, %v14427_v38  ;;  %v10511_v46 = vld [vmem:[%s14426_s7 + $0xcc] sm:$0xf]  ;;  %v13518_v47 = vld [vmem:[%s14429_s2] sm:$0xff] }
 0x6b3   :  { %2728 = vmatpush.bf16.msra.mxu0 %v8264_v40  ;;  %v1759_v43 = vmul.f32 %v1727_v52, %v14428_v60  ;;  %v1795_v12 = vpack.c.bf16 %v1765_v9, %v1763_v8  ;;  %v1702_v1 = vadd.f32 1.0, %v11276_v18  ;;  %v1738_v23 = vmul.f32 0.5, %v1706_v61  ;;  %v8165_v5 = vld [vmem:[%s14426_s7 + $0xe8] sm:$0xf0]  ;;  %v10530_v8 = vld [vmem:[%s14426_s7 + $0x15c] sm:$0xf0] }
 0x6b4   :  { %2742 = vmatpush.bf16.msrb.mxu3 %v8520_v50  ;;  %v11278_v35 = vpop.eup %11277  ;;  %v1774_v36 = vmul.f32 %v1742_v53, %v13445_v16  ;;  %v1802_v30 = vpack.c.bf16 %v1778_v48, %v1776_v3  ;;  %v1700_v31 = vadd.f32 1.0, %v11274_v37  ;;  %v1736_v42 = vmul.f32 0.5, %v1704_v39  ;;  %v8485_v16 = vld [vmem:[%s14426_s7 + $0x368] sm:$0xf0]  ;;  %v8219_v37 = vld [vmem:[%s14426_s7 + $0x140] sm:$0xf] }
 0x6b5   :  { %v11280_v59 = vpop.eup %11279  ;;  %v8200_v10 = vor.u32 %v10519_v11, %v8197_v15  ;;  %v1772_v44 = vmul.f32 %v1740_v17, %v13461_v33  ;;  %v1793_v6 = vpack.c.bf16 %v1761_v20, %v1759_v43  ;;  %v8284_v22 = vor.u32 %v10546_v55, %v8283_v57  ;;  %v10538_v33 = vld [vmem:[%s14426_s7 + $0x19c] sm:$0xf0]  ;;  %v10503_v2 = vld [vmem:[%s14426_s7 + $0x8c] sm:$0xf]  ;;  %v14432_v60 = vld [vmem:[#allocation143_spill] sm:$0xff] }
 0x6b6   :  { %1832 = vmatpush.bf16.msra.mxu1 %v1797_v7  ;;  %1843 = vmatpush.bf16.msrb.mxu2 %v1804_v62  ;;  %v8488_v58 = vor.u32 %v10591_v56, %v8485_v16  ;;  %v1698_v49 = vadd.f32 1.0, %v11280_v59  ;;  %v1734_v25 = vmul.f32 0.5, %v1702_v1  ;;  %v1770_v63 = vmul.f32 %v1738_v23, %v13457_v24  ;;  %v8133_v24 = vld [vmem:[%s14426_s7 + $0xa8] sm:$0xf0]  ;;  %v8187_v51 = vld [vmem:[%s14426_s7 + $0x100] sm:$0xf] }
 0x6b7   :  { %2729 = vmatpush.bf16.msra.mxu0 %v8232_v41  ;;  %v1800_v32 = vpack.c.bf16 %v1774_v36, %v1772_v44  ;;  %v1696_v0 = vadd.f32 1.0, %v11278_v35  ;;  %v1732_v26 = vmul.f32 0.5, %v1700_v31  ;;  %v8168_v14 = vor.u32 %v10511_v46, %v8165_v5  ;;  %v10583_v52 = vld [vmem:[%s14426_s7 + $0x30c] sm:$0xf]  ;;  %v14431_v39 = vld [vmem:[#allocation144_spill] sm:$0xff] }
 0x6b8   :  { %2743 = vmatpush.bf16.msrb.mxu3 %v8488_v58  ;;  %v1768_v54 = vmul.f32 %v1736_v42, %v13428_v13  ;;  %v8453_v40 = vld [vmem:[%s14426_s7 + $0x328] sm:$0xf0]  ;;  %v8252_v21 = vor.u32 %v10538_v33, %v8251_v19  ;;  %v1730_v29 = vmul.f32 0.5, %v1698_v49  ;;  %v1766_v45 = vmul.f32 %v1734_v25, %v13424_v28  ;;  %v10522_v17 = vld [vmem:[%s14426_s7 + $0x11c] sm:$0xf0] }
 0x6b9   :  { %v8456_v27 = vor.u32 %v10583_v52, %v8453_v40  ;;  %v8136_v13 = vor.u32 %v10503_v2, %v8133_v24  ;;  %v10575_v9 = vld [vmem:[%s14426_s7 + $0x2cc] sm:$0xf]  ;;  %v1728_v18 = vmul.f32 0.5, %v1696_v0  ;;  %v8220_v34 = vor.u32 %v10530_v8, %v8219_v37  ;;  %v8539_v3 = vld [vmem:[%s14426_s7 + $0x3c0] sm:$0xf] }
 0x6ba   :  { %1833 = vmatpush.bf16.msra.mxu1 %v1795_v12  ;;  %1844 = vmatpush.bf16.msrb.mxu2 %v1802_v30  ;;  %v1798_v4 = vpack.c.bf16 %v1770_v63, %v1768_v54  ;;  %v8421_v7 = vld [vmem:[%s14426_s7 + $0x2e8] sm:$0xf0]  ;;  %v1762_v41 = vmul.f32 %v1730_v29, %v14431_v39  ;;  %v10610_v11 = vld [vmem:[%s14426_s7 + $0x3dc] sm:$0xf0]  ;;  %v8188_v23 = vor.u32 %v10522_v17, %v8187_v51  ;;  %v10544_v57 = vld [vmem:[%s14426_s7 + $0x1d4] sm:$0xf] }
 0x6bb   :  { %2730 = vmatpush.bf16.msra.mxu0 %v8200_v10  ;;  %v14430_v61 = vld [vmem:[#allocation145_spill] sm:$0xff]  ;;  %v8424_v62 = vor.u32 %v10575_v9, %v8421_v7  ;;  %v1760_v43 = vmul.f32 %v1728_v18, %v14432_v60  ;;  %v8155_v36 = vld [vmem:[%s14426_s7 + $0xc0] sm:$0xf]  ;;  %v8540_v30 = vor.u32 %v10610_v11, %v8539_v3  ;;  %v8301_v55 = vld [vmem:[%s14426_s7 + $0x1f0] sm:$0xf0] }
 0x6bc   :  { %v1764_v53 = vmul.f32 %v1732_v26, %v14430_v61  ;;  %v10495_v28 = vld [vmem:[%s14426_s7 + $0x4c] sm:$0xf]  ;;  %2744 = vmatpush.bf16.msrb.mxu3 %v8456_v27  ;;  %v10514_v31 = vld [vmem:[%s14426_s7 + $0xdc] sm:$0xf0]  ;;  %v8304_v5 = vor.u32 %v10544_v57, %v8301_v55  ;;  %v10536_v49 = vld [vmem:[%s14426_s7 + $0x194] sm:$0xf] }
 0x6bd   :  { %v8101_v48 = vld [vmem:[%s14426_s7 + $0x68] sm:$0xf0]  ;;  %v1794_v59 = vpack.c.bf16 %v1762_v41, %v1760_v43  ;;  %v8507_v42 = vld [vmem:[%s14426_s7 + $0x380] sm:$0xf]  ;;  %v8269_v25 = vld [vmem:[%s14426_s7 + $0x1b0] sm:$0xf0] }
 0x6be   :  { %1834 = vmatpush.bf16.msra.mxu1 %v1793_v6  ;;  %1845 = vmatpush.bf16.msrb.mxu2 %v1800_v32  ;;  %v1796_v50 = vpack.c.bf16 %v1766_v45, %v1764_v53  ;;  %v8104_v15 = vor.u32 %v10495_v28, %v8101_v48  ;;  %v10567_v38 = vld [vmem:[%s14426_s7 + $0x28c] sm:$0xf]  ;;  %v10602_v10 = vld [vmem:[%s14426_s7 + $0x39c] sm:$0xf0]  ;;  %v8156_v6 = vor.u32 %v10514_v31, %v8155_v36  ;;  %v10528_v2 = vld [vmem:[%s14426_s7 + $0x154] sm:$0xf] }
 0x6bf   :  { %2731 = vmatpush.bf16.msra.mxu0 %v8168_v14  ;;  %v8389_v20 = vld [vmem:[%s14426_s7 + $0x2a8] sm:$0xf0]  ;;  %v8508_v58 = vor.u32 %v10602_v10, %v8507_v42  ;;  %v10506_v63 = vld [vmem:[%s14426_s7 + $0x9c] sm:$0xf0]  ;;  %v8272_v33 = vor.u32 %v10536_v49, %v8269_v25  ;;  %v8237_v54 = vld [vmem:[%s14426_s7 + $0x170] sm:$0xf0] }
 0x6c0   :  { %v10487_v12 = vld [vmem:[%s14426_s7 + $0xc] sm:$0xf]  ;;  %2745 = vmatpush.bf16.msrb.mxu3 %v8424_v62  ;;  %v8392_v1 = vor.u32 %v10567_v38, %v8389_v20  ;;  %v8475_v32 = vld [vmem:[%s14426_s7 + $0x340] sm:$0xf]  ;;  %v8240_v40 = vor.u32 %v10528_v2, %v8237_v54  ;;  %v10520_v45 = vld [vmem:[%s14426_s7 + $0x114] sm:$0xf] }
 0x6c1   :  { %1835 = vmatmul.bf16.vlgmr.msra.gmra.mxu1 %v13518_v47  ;;  %v8069_v35 = vld [vmem:[%s14426_s7 + $0x28] sm:$0xf0]  ;;  %v10594_v19 = vld [vmem:[%s14426_s7 + $0x35c] sm:$0xf0]  ;;  %v10542_v9 = vld [vmem:[%s14426_s7 + $0x1c4] sm:$0xf] }
 0x6c2   :  { %2643 = vmatpush.bf16.msrb.mxu1 %v8284_v22  ;;  %1846 = vmatpush.bf16.msrb.mxu2 %v1798_v4  ;;  %v8072_v56 = vor.u32 %v10487_v12, %v8069_v35  ;;  %v10559_v44 = vld [vmem:[%s14426_s7 + $0x24c] sm:$0xf]  ;;  %v8123_v22 = vld [vmem:[%s14426_s7 + $0x80] sm:$0xf]  ;;  %v8476_v14 = vor.u32 %v10594_v19, %v8475_v32  ;;  %v8205_v4 = vld [vmem:[%s14426_s7 + $0x130] sm:$0xf0] }
 0x6c3   :  { %2732 = vmatpush.bf16.msra.mxu0 %v8136_v13  ;;  %v8357_v46 = vld [vmem:[%s14426_s7 + $0x268] sm:$0xf0]  ;;  %v8124_v0 = vor.u32 %v10506_v63, %v8123_v22  ;;  %v8091_v26 = vld [vmem:[%s14426_s7 + $0x40] sm:$0xf]  ;;  %v8285_v7 = vld [vmem:[%s14426_s7 + $0x1e0] sm:$0xf0]  ;;  %v8208_v18 = vor.u32 %v10520_v45, %v8205_v4 }
 0x6c4   :  { %2746 = vmatpush.bf16.msrb.mxu3 %v8392_v1  ;;  %v8360_v16 = vor.u32 %v10559_v44, %v8357_v46  ;;  %v10498_v24 = vld [vmem:[%s14426_s7 + $0x5c] sm:$0xf0]  ;;  %v8288_v28 = vor.u32 %v10542_v9, %v8285_v7  ;;  %v8253_v51 = vld [vmem:[%s14426_s7 + $0x1a0] sm:$0xf0]  ;;  %v8173_v55 = vld [vmem:[%s14426_s7 + $0xf0] sm:$0xf0] }
 0x6c5   :  { %v10586_v52 = vld [vmem:[%s14426_s7 + $0x31c] sm:$0xf0]  ;;  %v10526_v3 = vld [vmem:[%s14426_s7 + $0x144] sm:$0xf]  ;;  %v8325_v44 = vld [vmem:[%s14426_s7 + $0x228] sm:$0xf0] }
 0x6c6   :  { %2644 = vmatpush.bf16.msrb.mxu1 %v8252_v21  ;;  %1847 = vmatpush.bf16.msrb.mxu2 %v1796_v50  ;;  %v8092_v21 = vor.u32 %v10498_v24, %v8091_v26  ;;  %v8059_v27 = vld [vmem:[%s14426_s7] sm:$0xf]  ;;  %v8221_v11 = vld [vmem:[%s14426_s7 + $0x160] sm:$0xf0]  ;;  %v10608_v46 = vld [vmem:[%s14426_s7 + $0x3d4] sm:$0xf] }
 0x6c7   :  { %2733 = vmatpush.bf16.msra.mxu0 %v8104_v15  ;;  %v10490_v37 = vld [vmem:[%s14426_s7 + $0x1c] sm:$0xf0]  ;;  %v8224_v38 = vor.u32 %v10526_v3, %v8221_v11  ;;  %v10518_v20 = vld [vmem:[%s14426_s7 + $0x104] sm:$0xf]  ;;  %v10504_v25 = vld [vmem:[%s14426_s7 + $0x94] sm:$0xf] }
 0x6c8   :  { %2747 = vmatpush.bf16.msrb.mxu3 %v8360_v16  ;;  %v8411_v8 = vld [vmem:[%s14426_s7 + $0x2c0] sm:$0xf]  ;;  %v8060_v61 = vor.u32 %v10490_v37, %v8059_v27  ;;  %v8189_v60 = vld [vmem:[%s14426_s7 + $0x120] sm:$0xf0]  ;;  %v8557_v16 = vld [vmem:[%s14426_s7 + $0x3f0] sm:$0xf0] }
 0x6c9   :  { %v10578_v13 = vld [vmem:[%s14426_s7 + $0x2dc] sm:$0xf0]  ;;  %v8192_v43 = vor.u32 %v10518_v20, %v8189_v60  ;;  %v10510_v12 = vld [vmem:[%s14426_s7 + $0xc4] sm:$0xf]  ;;  %v8141_v63 = vld [vmem:[%s14426_s7 + $0xb0] sm:$0xf0] }
 0x6ca   :  { %2645 = vmatpush.bf16.msrb.mxu1 %v8220_v34  ;;  %1848 = vmatpush.bf16.msrb.mxu2 %v1794_v59  ;;  %v8412_v53 = vor.u32 %v10578_v13, %v8411_v8  ;;  %v8379_v48 = vld [vmem:[%s14426_s7 + $0x280] sm:$0xf]  ;;  %v10534_v34 = vld [vmem:[%s14426_s7 + $0x184] sm:$0xf]  ;;  %v8144_v19 = vor.u32 %v10504_v25, %v8141_v63  ;;  %v8525_v26 = vld [vmem:[%s14426_s7 + $0x3b0] sm:$0xf0] }
 0x6cb   :  { %2734 = vmatpush.bf16.msra.mxu0 %v8072_v56  ;;  %v10570_v62 = vld [vmem:[%s14426_s7 + $0x29c] sm:$0xf0]  ;;  %v8256_v41 = vor.u32 %v10534_v34, %v8253_v51  ;;  %v8157_v35 = vld [vmem:[%s14426_s7 + $0xe0] sm:$0xf0]  ;;  %v10551_v56 = vld [vmem:[%s14426_s7 + $0x20c] sm:$0xf] }
 0x6cc   :  { %v8380_v39 = vor.u32 %v10570_v62, %v8379_v48  ;;  %v8347_v50 = vld [vmem:[%s14426_s7 + $0x240] sm:$0xf]  ;;  %v8160_v1 = vor.u32 %v10510_v12, %v8157_v35  ;;  %v10606_v59 = vld [vmem:[%s14426_s7 + $0x3c4] sm:$0xf]  ;;  %v10592_v4 = vld [vmem:[%s14426_s7 + $0x354] sm:$0xf] }
 0x6cd   :  { %1849 = vmatmul.bf16.vlgmr.msrb.gmra.mxu2 %v13518_v47  ;;  %v8443_v47 = vld [vmem:[%s14426_s7 + $0x300] sm:$0xf]  ;;  %v8541_v31 = vld [vmem:[%s14426_s7 + $0x3e0] sm:$0xf0]  ;;  %v8493_v37 = vld [vmem:[%s14426_s7 + $0x370] sm:$0xf0] }
 0x6ce   :  { %2646 = vmatpush.bf16.msrb.mxu1 %v8188_v23  ;;  %2657 = vmatpush.bf16.msra.mxu2 %v8540_v30  ;;  %v8444_v29 = vor.u32 %v10586_v52, %v8443_v47  ;;  %v10562_v17 = vld [vmem:[%s14426_s7 + $0x25c] sm:$0xf0]  ;;  %v10512_v30 = vld [vmem:[%s14426_s7 + $0xd4] sm:$0xf]  ;;  %v8544_v10 = vor.u32 %v10606_v59, %v8541_v31  ;;  %v8125_v22 = vld [vmem:[%s14426_s7 + $0xa0] sm:$0xf0]  ;;  %v8496_v8 = vor.u32 %v10592_v4, %v8493_v37 }
 0x6cf   :  { %2783 = vmatpush.bf16.msrb.mxu0 %v8304_v5  ;;  %v8348_v15 = vor.u32 %v10562_v17, %v8347_v50  ;;  %v8315_v23 = vld [vmem:[%s14426_s7 + $0x200] sm:$0xf]  ;;  %v8176_v42 = vor.u32 %v10512_v30, %v8173_v55  ;;  %v8328_v5 = vor.u32 %v10551_v56, %v8325_v44  ;;  %v10598_v32 = vld [vmem:[%s14426_s7 + $0x384] sm:$0xf]  ;;  %v10496_v52 = vld [vmem:[%s14426_s7 + $0x54] sm:$0xf] }
 0x6d0   :  { %v10554_v36 = vld [vmem:[%s14426_s7 + $0x21c] sm:$0xf0]  ;;  %v10494_v54 = vld [vmem:[%s14426_s7 + $0x44] sm:$0xf]  ;;  %v10584_v34 = vld [vmem:[%s14426_s7 + $0x314] sm:$0xf] }
 0x6d1   :  { %v8316_v57 = vor.u32 %v10554_v36, %v8315_v23  ;;  %2748 = vmatpush.bf16.msrb.mxu3 %v8328_v5  ;;  %v8093_v24 = vld [vmem:[%s14426_s7 + $0x60] sm:$0xf0]  ;;  %v8461_v51 = vld [vmem:[%s14426_s7 + $0x330] sm:$0xf0]  ;;  %v8291_v5 = vld [vmem:[%s14426_s7 + $0x1c8] sm:$0xf] }
 0x6d2   :  { %2647 = vmatpush.bf16.msrb.mxu1 %v8156_v6  ;;  %2658 = vmatpush.bf16.msra.mxu2 %v8508_v58  ;;  %v10502_v6 = vld [vmem:[%s14426_s7 + $0x84] sm:$0xf]  ;;  %v8560_v58 = vor.u32 %v10608_v46, %v8557_v16  ;;  %v8096_v47 = vor.u32 %v10494_v54, %v8093_v24  ;;  %v10576_v3 = vld [vmem:[%s14426_s7 + $0x2d4] sm:$0xf]  ;;  %v1814_v16 = vpop.permute.xlu1 %1813  ;;  %v8277_v54 = vld [vmem:[%s14426_s7 + $0x1b8] sm:$0xf0] }
 0x6d3   :  { %2784 = vmatpush.bf16.msrb.mxu0 %v8272_v33  ;;  %v8128_v49 = vor.u32 %v10502_v6, %v8125_v22  ;;  %v8509_v33 = vld [vmem:[%s14426_s7 + $0x3a0] sm:$0xf0]  ;;  %v8429_v11 = vld [vmem:[%s14426_s7 + $0x2f0] sm:$0xf0]  ;;  %v10547_v6 = vld [vmem:[%s14426_s7 + $0x1e4] sm:$0xf0] }
 0x6d4   :  { %v10590_v27 = vld [vmem:[%s14426_s7 + $0x344] sm:$0xf]  ;;  %v8397_v12 = vld [vmem:[%s14426_s7 + $0x2b0] sm:$0xf0]  ;;  %v10545_v22 = vld [vmem:[%s14426_s7 + $0x1dc] sm:$0xf] }
 0x6d5   :  { %2797 = vmatpush.bf16.msra.mxu3 %v8560_v58  ;;  %v10486_v13 = vld [vmem:[%s14426_s7 + $0x4] sm:$0xf]  ;;  %v10560_v30 = vld [vmem:[%s14426_s7 + $0x254] sm:$0xf]  ;;  %v8309_v58 = vld [vmem:[%s14426_s7 + $0x1f8] sm:$0xf0] }
 0x6d6   :  { %2648 = vmatpush.bf16.msrb.mxu1 %v8124_v0  ;;  %2659 = vmatpush.bf16.msra.mxu2 %v8476_v14  ;;  %v10600_v0 = vld [vmem:[%s14426_s7 + $0x394] sm:$0xf]  ;;  %v8512_v14 = vor.u32 %v10598_v32, %v8509_v33  ;;  %v8061_v9 = vld [vmem:[%s14426_s7 + $0x20] sm:$0xf0]  ;;  %v8312_v33 = vor.u32 %v10545_v22, %v8309_v58  ;;  %v8195_v37 = vld [vmem:[%s14426_s7 + $0x108] sm:$0xf] }
 0x6d7   :  { %2785 = vmatpush.bf16.msrb.mxu0 %v8240_v40  ;;  %v8528_v2 = vor.u32 %v10600_v0, %v8525_v26  ;;  %v8109_v40 = vld [vmem:[%s14426_s7 + $0x70] sm:$0xf0]  ;;  %v8064_v7 = vor.u32 %v10486_v13, %v8061_v9  ;;  %v8445_v48 = vld [vmem:[%s14426_s7 + $0x320] sm:$0xf0]  ;;  %v8259_v0 = vld [vmem:[%s14426_s7 + $0x188] sm:$0xf] }
 0x6d8   :  { %v8413_v50 = vld [vmem:[%s14426_s7 + $0x2e0] sm:$0xf0]  ;;  %v8333_v56 = vld [vmem:[%s14426_s7 + $0x230] sm:$0xf0]  ;;  %v10521_v13 = vld [vmem:[%s14426_s7 + $0x11c] sm:$0xf] }
 0x6d9   :  { %2798 = vmatpush.bf16.msra.mxu3 %v8528_v2  ;;  %v8381_v20 = vld [vmem:[%s14426_s7 + $0x2a0] sm:$0xf0]  ;;  %v10537_v2 = vld [vmem:[%s14426_s7 + $0x19c] sm:$0xf] }
 0x6da   :  { %2649 = vmatpush.bf16.msrb.mxu1 %v8092_v21  ;;  %2660 = vmatpush.bf16.msra.mxu2 %v8444_v29  ;;  %v8112_v21 = vor.u32 %v10496_v52, %v8109_v40  ;;  %v8477_v29 = vld [vmem:[%s14426_s7 + $0x360] sm:$0xf0]  ;;  %v8227_v52 = vld [vmem:[%s14426_s7 + $0x148] sm:$0xf]  ;;  %v8213_v9 = vld [vmem:[%s14426_s7 + $0x138] sm:$0xf0] }
 0x6db   :  { %2786 = vmatpush.bf16.msrb.mxu0 %v8208_v18  ;;  %v8480_v45 = vor.u32 %v10590_v27, %v8477_v29  ;;  %v10488_v18 = vld [vmem:[%s14426_s7 + $0x14] sm:$0xf]  ;;  %v8349_v23 = vld [vmem:[%s14426_s7 + $0x260] sm:$0xf0]  ;;  %v10531_v40 = vld [vmem:[%s14426_s7 + $0x164] sm:$0xf0] }
 0x6dc   :  { %v10550_v59 = vld [vmem:[%s14426_s7 + $0x204] sm:$0xf]  ;;  %v8245_v27 = vld [vmem:[%s14426_s7 + $0x178] sm:$0xf0] }
 0x6dd   :  { %2799 = vmatpush.bf16.msra.mxu3 %v8496_v8  ;;  %v8317_v31 = vld [vmem:[%s14426_s7 + $0x220] sm:$0xf0]  ;;  %v10523_v8 = vld [vmem:[%s14426_s7 + $0x124] sm:$0xf0] }
 0x6de   :  { %2650 = vmatpush.bf16.msrb.mxu1 %v8060_v61  ;;  %2661 = vmatpush.bf16.msra.mxu2 %v8412_v53  ;;  %v8077_v61 = vld [vmem:[%s14426_s7 + $0x30] sm:$0xf0] }
 0x6df   :  { %2787 = vmatpush.bf16.msrb.mxu0 %v8176_v42  ;;  %v8080_v53 = vor.u32 %v10488_v18, %v8077_v61  ;;  %v8320_v42 = vor.u32 %v10550_v59, %v8317_v31  ;;  %v8216_v18 = vor.u32 %v10521_v13, %v8213_v9  ;;  %v8163_v61 = vld [vmem:[%s14426_s7 + $0xc8] sm:$0xf]  ;;  %v10577_v13 = vld [vmem:[%s14426_s7 + $0x2dc] sm:$0xf] }
 0x6e0   :  { %v8099_v59 = vld [vmem:[%s14426_s7 + $0x48] sm:$0xf]  ;;  %v8437_v9 = vld [vmem:[%s14426_s7 + $0x2f8] sm:$0xf0] }
 0x6e1   :  { %v10499_v31 = vld [vmem:[%s14426_s7 + $0x64] sm:$0xf0] }
 0x6e2   :  { %2671 = vmatpush.bf16.msra.mxu1 %v8288_v28  ;;  %2662 = vmatpush.bf16.msra.mxu2 %v8380_v39  ;;  %v10582_v28 = vld [vmem:[%s14426_s7 + $0x304] sm:$0xf]  ;;  %v8464_v39 = vor.u32 %v10584_v34, %v8461_v51  ;;  %v10611_v34 = vld [vmem:[%s14426_s7 + $0x3e4] sm:$0xf0]  ;;  %v10609_v51 = vld [vmem:[%s14426_s7 + $0x3dc] sm:$0xf]  ;;  %v8100_v22 = vor.u32 %v10499_v31, %v8099_v59 }
 0x6e3   :  { %2788 = vmatpush.bf16.msrb.mxu0 %v8144_v19  ;;  %v8448_v62 = vor.u32 %v10582_v28, %v8445_v48  ;;  %v8292_v19 = vor.u32 %v10547_v6, %v8291_v5  ;;  %v10513_v28 = vld [vmem:[%s14426_s7 + $0xdc] sm:$0xf]  ;;  %v10595_v5 = vld [vmem:[%s14426_s7 + $0x364] sm:$0xf0] }
 0x6e4   :  { %2800 = vmatpush.bf16.msra.mxu3 %v8464_v39  ;;  %v8181_v48 = vld [vmem:[%s14426_s7 + $0xf8] sm:$0xf0] }
 0x6e5   :  { %v8565_v39 = vld [vmem:[%s14426_s7 + $0x3f8] sm:$0xf0] }
 0x6e6   :  { %2672 = vmatpush.bf16.msra.mxu1 %v8256_v41  ;;  %2663 = vmatpush.bf16.msra.mxu2 %v8348_v15  ;;  %v10574_v41 = vld [vmem:[%s14426_s7 + $0x2c4] sm:$0xf]  ;;  %v8432_v15 = vor.u32 %v10576_v3, %v8429_v11  ;;  %v8131_v3 = vld [vmem:[%s14426_s7 + $0x88] sm:$0xf]  ;;  %v8501_v6 = vld [vmem:[%s14426_s7 + $0x378] sm:$0xf0] }
 0x6e7   :  { %2789 = vmatpush.bf16.msrb.mxu0 %v8112_v21  ;;  %v8416_v17 = vor.u32 %v10574_v41, %v8413_v50  ;;  %v10529_v21 = vld [vmem:[%s14426_s7 + $0x15c] sm:$0xf] }
 0x6e8   :  { %2801 = vmatpush.bf16.msra.mxu3 %v8432_v15  ;;  %v8248_v4 = vor.u32 %v10529_v21, %v8245_v27  ;;  %v10553_v59 = vld [vmem:[%s14426_s7 + $0x21c] sm:$0xf] }
 0x6e9   :  { %v8341_v31 = vld [vmem:[%s14426_s7 + $0x238] sm:$0xf0] }
 0x6ea   :  { %2673 = vmatpush.bf16.msra.mxu1 %v8224_v38  ;;  %2664 = vmatpush.bf16.msra.mxu2 %v8316_v57  ;;  %v10566_v38 = vld [vmem:[%s14426_s7 + $0x284] sm:$0xf]  ;;  %v8365_v57 = vld [vmem:[%s14426_s7 + $0x270] sm:$0xf0] }
 0x6eb   :  { %2790 = vmatpush.bf16.msrb.mxu0 %v8080_v53  ;;  %v8384_v60 = vor.u32 %v10566_v38, %v8381_v20  ;;  %v8368_v55 = vor.u32 %v10560_v30, %v8365_v57  ;;  %v10515_v53 = vld [vmem:[%s14426_s7 + $0xe4] sm:$0xf0]  ;;  %v10505_v20 = vld [vmem:[%s14426_s7 + $0x9c] sm:$0xf] }
 0x6ec   :  { %v8164_v50 = vor.u32 %v10515_v53, %v8163_v61  ;;  %v10507_v38 = vld [vmem:[%s14426_s7 + $0xa4] sm:$0xf0]  ;;  %v8533_v30 = vld [vmem:[%s14426_s7 + $0x3b8] sm:$0xf0]  ;;  %v8235_v61 = vld [vmem:[%s14426_s7 + $0x150] sm:$0xf] }
 0x6ed   :  { %v8132_v57 = vor.u32 %v10507_v38, %v8131_v3  ;;  %v10532_v53 = vld [vmem:[%s14426_s7 + $0x16c] sm:$0xf0]  ;;  %v10561_v38 = vld [vmem:[%s14426_s7 + $0x25c] sm:$0xf] }
 0x6ee   :  { %2674 = vmatpush.bf16.msra.mxu1 %v8192_v43  ;;  %2685 = vmatpush.bf16.msrb.mxu2 %v8544_v10  ;;  %v10568_v43 = vld [vmem:[%s14426_s7 + $0x294] sm:$0xf] }
 0x6ef   :  { %v8400_v35 = vor.u32 %v10568_v43, %v8397_v12  ;;  %v10552_v10 = vld [vmem:[%s14426_s7 + $0x214] sm:$0xf]  ;;  %v8568_v12 = vor.u32 %v10609_v51, %v8565_v39  ;;  %v8405_v51 = vld [vmem:[%s14426_s7 + $0x2b8] sm:$0xf0]  ;;  %v8236_v39 = vor.u32 %v10532_v53, %v8235_v61 }
 0x6f0   :  { %v8336_v44 = vor.u32 %v10552_v10, %v8333_v56  ;;  %v8117_v10 = vld [vmem:[%s14426_s7 + $0x78] sm:$0xf0] }
 0x6f1   :  { %2802 = vmatpush.bf16.msra.mxu3 %v8400_v35  ;;  %v8515_v35 = vld [vmem:[%s14426_s7 + $0x388] sm:$0xf] }
 0x6f2   :  { %2675 = vmatpush.bf16.msra.mxu1 %v8160_v1  ;;  %2686 = vmatpush.bf16.msrb.mxu2 %v8512_v14  ;;  %v10558_v1 = vld [vmem:[%s14426_s7 + $0x244] sm:$0xf]  ;;  %v10539_v14 = vld [vmem:[%s14426_s7 + $0x1a4] sm:$0xf0] }
 0x6f3   :  { %v8352_v36 = vor.u32 %v10558_v1, %v8349_v23  ;;  %v8260_v24 = vor.u32 %v10539_v14, %v8259_v0  ;;  %v10603_v23 = vld [vmem:[%s14426_s7 + $0x3a4] sm:$0xf0]  ;;  %v8299_v0 = vld [vmem:[%s14426_s7 + $0x1d0] sm:$0xf] }
 0x6f4   :  { %v8516_v56 = vor.u32 %v10603_v23, %v8515_v35  ;;  %v10548_v14 = vld [vmem:[%s14426_s7 + $0x1ec] sm:$0xf0] }
 0x6f5   :  { %2803 = vmatpush.bf16.msra.mxu3 %v8368_v55  ;;  %v8300_v21 = vor.u32 %v10548_v14, %v8299_v0  ;;  %v10516_v35 = vld [vmem:[%s14426_s7 + $0xec] sm:$0xf0] }
 0x6f6   :  { %2676 = vmatpush.bf16.msra.mxu1 %v8128_v49  ;;  %2687 = vmatpush.bf16.msrb.mxu2 %v8480_v45  ;;  %v1819_v49 = vpop.permute.xlu0 %1818  ;;  %v8228_v45 = vor.u32 %v10531_v40, %v8227_v52  ;;  %v10492_v0 = vld [vmem:[%s14426_s7 + $0x2c] sm:$0xf0] }
 0x6f9   :  { %2804 = vmatpush.bf16.msra.mxu3 %v8336_v44 }
 0x6fa   :  { %2677 = vmatpush.bf16.msra.mxu1 %v8096_v47  ;;  %2688 = vmatpush.bf16.msrb.mxu2 %v8448_v62  ;;  %v8280_v47 = vor.u32 %v10537_v2, %v8277_v54  ;;  %v8547_v62 = vld [vmem:[%s14426_s7 + $0x3c8] sm:$0xf] }
 0x6fb   :  { %v8548_v43 = vor.u32 %v10611_v34, %v8547_v62  ;;  %v8451_v2 = vld [vmem:[%s14426_s7 + $0x308] sm:$0xf]  ;;  %v10569_v34 = vld [vmem:[%s14426_s7 + $0x29c] sm:$0xf] }
 0x6fc   :  { %v10587_v54 = vld [vmem:[%s14426_s7 + $0x324] sm:$0xf0]  ;;  %v8408_v3 = vor.u32 %v10569_v34, %v8405_v51  ;;  %v10564_v34 = vld [vmem:[%s14426_s7 + $0x26c] sm:$0xf0] }
 0x6fd   :  { %v8452_v27 = vor.u32 %v10587_v54, %v8451_v2  ;;  %v10571_v62 = vld [vmem:[%s14426_s7 + $0x2a4] sm:$0xf0]  ;;  %v8307_v2 = vld [vmem:[%s14426_s7 + $0x1d8] sm:$0xf] }
 0x6fe   :  { %2678 = vmatpush.bf16.msra.mxu1 %v8064_v7  ;;  %2689 = vmatpush.bf16.msrb.mxu2 %v8416_v17  ;;  %v8196_v7 = vor.u32 %v10523_v8, %v8195_v37  ;;  %v8184_v17 = vor.u32 %v10513_v28, %v8181_v48  ;;  %v8419_v37 = vld [vmem:[%s14426_s7 + $0x2c8] sm:$0xf]  ;;  %v8440_v28 = vor.u32 %v10577_v13, %v8437_v9  ;;  %v10549_v54 = vld [vmem:[%s14426_s7 + $0x1f4] sm:$0xf0] }
 0x6ff   :  { %v10579_v8 = vld [vmem:[%s14426_s7 + $0x2e4] sm:$0xf0]  ;;  %v8243_v13 = vld [vmem:[%s14426_s7 + $0x158] sm:$0xf] }
 0x700   :  { %v8387_v48 = vld [vmem:[%s14426_s7 + $0x288] sm:$0xf]  ;;  %v10533_v9 = vld [vmem:[%s14426_s7 + $0x174] sm:$0xf0] }
 0x701   :  { %v8244_v61 = vor.u32 %v10533_v9, %v8243_v13  ;;  %v10641_v13 = vld [vmem:[%s14433_s4 + $0xd8] sm:$0xff] }
 0x702   :  { %2690 = vmatpush.bf16.msrb.mxu2 %v8384_v60  ;;  %v8149_v60 = vld [vmem:[%s14426_s7 + $0xb8] sm:$0xf0] }
 0x703   :  { %v8152_v55 = vor.u32 %v10505_v20, %v8149_v60  ;;  %v8373_v20 = vld [vmem:[%s14426_s7 + $0x278] sm:$0xf0] }
 0x704   :  { %v8376_v23 = vor.u32 %v10561_v38, %v8373_v20  ;;  %v10625_v9 = vld [vmem:[%s14433_s4 + $0x58] sm:$0xff] }
 0x706   :  { %2691 = vmatpush.bf16.msrb.mxu2 %v8352_v36  ;;  %v10601_v36 = vld [vmem:[%s14426_s7 + $0x39c] sm:$0xf] }
 0x707   :  { %v8536_v44 = vor.u32 %v10601_v36, %v8533_v30  ;;  %v8323_v36 = vld [vmem:[%s14426_s7 + $0x208] sm:$0xf] }
 0x708   :  { %v10555_v30 = vld [vmem:[%s14426_s7 + $0x224] sm:$0xf0] }
 0x70a   :  { %2692 = vmatpush.bf16.msrb.mxu2 %v8320_v42  ;;  %v10497_v42 = vld [vmem:[%s14426_s7 + $0x5c] sm:$0xf] }
 0x70b   :  { %v8120_v58 = vor.u32 %v10497_v42, %v8117_v10  ;;  %v8324_v10 = vor.u32 %v10555_v30, %v8323_v36  ;;  %v8115_v30 = vld [vmem:[%s14426_s7 + $0x58] sm:$0xf] }
 0x73e   :  { %v1836_v46 = vpop.f32.mrf.mxu1 }
 0x73f   :  { %v1837_v63 = vadd.f32 %v1836_v46, %v1814_v16  ;;  %v8483_v46 = vld [vmem:[%s14426_s7 + $0x348] sm:$0xf] }
 0x746   :  { %v1838_v25 = vpop.f32.mrf.mxu1 }
 0x747   :  { %v1839_v32 = vadd.f32 %v1838_v25, %v1819_v49  ;;  %v10491_v25 = vld [vmem:[%s14426_s7 + $0x24] sm:$0xf0] }
 0x749   :  { %v13640_v26 = vpack.c.bf16 %v1839_v32, %v1837_v63  ;;  %v10489_v63 = vld [vmem:[%s14426_s7 + $0x1c] sm:$0xf] }
 0x74a   :  { %v8085_v32 = vld [vmem:[%s14426_s7 + $0x38] sm:$0xf0] }
 0x74b   :  { %2651 = vmatmul.bf16.vlgmr.msrb.gmra.mxu1 %v13640_v26  ;;  %2735 = vmatmul.bf16.vlgmr.msra.gmra.mxu0 %v13640_v26  ;;  %v8088_v40 = vor.u32 %v10489_v63, %v8085_v32  ;;  %v8491_v63 = vld [vmem:[%s14426_s7 + $0x350] sm:$0xf] }
 0x74c   :  { %2699 = vmatpush.bf16.msrb.mxu1 %v8292_v19  ;;  %2839 = vmatpush.bf16.msra.mxu0 %v8312_v33  ;;  %v8484_v19 = vor.u32 %v10595_v5, %v8483_v46  ;;  %v8344_v5 = vor.u32 %v10553_v59, %v8341_v31  ;;  %v10596_v32 = vld [vmem:[%s14426_s7 + $0x36c] sm:$0xf0]  ;;  %v8499_v59 = vld [vmem:[%s14426_s7 + $0x358] sm:$0xf] }
 0x74d   :  { %v8492_v14 = vor.u32 %v10596_v32, %v8491_v63  ;;  %v10597_v31 = vld [vmem:[%s14426_s7 + $0x374] sm:$0xf0] }
 0x74e   :  { %v10573_v63 = vld [vmem:[%s14426_s7 + $0x2b4] sm:$0xf0] }
 0x750   :  { %2700 = vmatpush.bf16.msrb.mxu1 %v8260_v24  ;;  %v1850_v29 = vpop.f32.mrf.mxu2  ;;  %2840 = vmatpush.bf16.msra.mxu0 %v8280_v47  ;;  %v10585_v24 = vld [vmem:[%s14426_s7 + $0x31c] sm:$0xf] }
 0x751   :  { %v1851_v11 = vadd.f32 %v1850_v29, %v1814_v16  ;;  %v10593_v16 = vld [vmem:[%s14426_s7 + $0x35c] sm:$0xf] }
 0x752   :  { %v8504_v33 = vor.u32 %v10593_v16, %v8501_v6  ;;  %v8469_v47 = vld [vmem:[%s14426_s7 + $0x338] sm:$0xf0]  ;;  %v8523_v16 = vld [vmem:[%s14426_s7 + $0x390] sm:$0xf] }
 0x753   :  { %v8472_v29 = vor.u32 %v10585_v24, %v8469_v47  ;;  %v10604_v6 = vld [vmem:[%s14426_s7 + $0x3ac] sm:$0xf0] }
 0x754   :  { %2701 = vmatpush.bf16.msrb.mxu1 %v8228_v45  ;;  %2841 = vmatpush.bf16.msra.mxu0 %v8248_v4  ;;  %v8267_v45 = vld [vmem:[%s14426_s7 + $0x190] sm:$0xf] }
 0x755   :  { %v10540_v4 = vld [vmem:[%s14426_s7 + $0x1ac] sm:$0xf0] }
 0x756   :  { %v8459_v24 = vld [vmem:[%s14426_s7 + $0x310] sm:$0xf] }
 0x757   :  { %v10588_v47 = vld [vmem:[%s14426_s7 + $0x32c] sm:$0xf0] }
 0x758   :  { %2702 = vmatpush.bf16.msrb.mxu1 %v8196_v7  ;;  %v1852_v41 = vpop.f32.mrf.mxu2  ;;  %2842 = vmatpush.bf16.msra.mxu0 %v8216_v18  ;;  %v8268_v7 = vor.u32 %v10540_v4, %v8267_v45  ;;  %v8420_v18 = vor.u32 %v10579_v8, %v8419_v37  ;;  %v8427_v45 = vld [vmem:[%s14426_s7 + $0x2d0] sm:$0xf] }
 0x759   :  { %v1853_v15 = vadd.f32 %v1852_v41, %v1819_v49  ;;  %v8067_v49 = vld [vmem:[%s14426_s7 + $0x8] sm:$0xf]  ;;  %v8388_v41 = vor.u32 %v10571_v62, %v8387_v48  ;;  %v10580_v4 = vld [vmem:[%s14426_s7 + $0x2ec] sm:$0xf0]  ;;  %v10525_v48 = vld [vmem:[%s14426_s7 + $0x134] sm:$0xf0] }
 0x75a   :  { %v8068_v52 = vor.u32 %v10491_v25, %v8067_v49  ;;  %v10500_v49 = vld [vmem:[%s14426_s7 + $0x6c] sm:$0xf0]  ;;  %v8524_v25 = vor.u32 %v10604_v6, %v8523_v16  ;;  %v8428_v8 = vor.u32 %v10580_v4, %v8427_v45  ;;  %v10618_v45 = vld [vmem:[%s14433_s4 + $0x20] sm:$0xff] }
 0x75b   :  { %v13668_v1 = vpack.c.bf16 %v1853_v15, %v1851_v11  ;;  %2679 = vmatmul.bf16.vlgmr.msra.gmra.mxu1 %v13640_v26  ;;  %2791 = vmatmul.bf16.vlgmr.msrb.gmra.mxu0 %v13640_v26  ;;  %v8355_v11 = vld [vmem:[%s14426_s7 + $0x248] sm:$0xf]  ;;  %v8363_v62 = vld [vmem:[%s14426_s7 + $0x250] sm:$0xf]  ;;  %v10642_v4 = vld [vmem:[%s14433_s4 + $0xe0] sm:$0xff] }
 0x75c   :  { %2703 = vmatpush.bf16.msrb.mxu1 %v8164_v50  ;;  %2843 = vmatpush.bf16.msra.mxu0 %v8184_v17  ;;  %v8203_v50 = vld [vmem:[%s14426_s7 + $0x110] sm:$0xf]  ;;  %v10563_v15 = vld [vmem:[%s14426_s7 + $0x264] sm:$0xf0] }
 0x75d   :  { %2665 = vmatmul.bf16.vlgmr.msra.gmra.mxu2 %v13668_v1  ;;  %2749 = vmatmul.bf16.vlgmr.msrb.gmra.mxu3 %v13668_v1  ;;  %v10524_v17 = vld [vmem:[%s14426_s7 + $0x12c] sm:$0xf0] }
 0x75e   :  { %2713 = vmatpush.bf16.msra.mxu2 %v8548_v43  ;;  %2853 = vmatpush.bf16.msrb.mxu3 %v8568_v12  ;;  %v8204_v60 = vor.u32 %v10524_v17, %v8203_v50  ;;  %v8356_v43 = vor.u32 %v10563_v15, %v8355_v11  ;;  %v8171_v12 = vld [vmem:[%s14426_s7 + $0xd0] sm:$0xf]  ;;  %v10517_v50 = vld [vmem:[%s14426_s7 + $0xf4] sm:$0xf0] }
 0x75f   :  { %v8172_v42 = vor.u32 %v10516_v35, %v8171_v12  ;;  %v8331_v17 = vld [vmem:[%s14426_s7 + $0x210] sm:$0xf]  ;;  %v8563_v11 = vld [vmem:[%s14426_s7 + $0x3d8] sm:$0xf] }
 0x760   :  { %2704 = vmatpush.bf16.msrb.mxu1 %v8132_v57  ;;  %2844 = vmatpush.bf16.msra.mxu0 %v8152_v55  ;;  %v8555_v57 = vld [vmem:[%s14426_s7 + $0x3d0] sm:$0xf]  ;;  %v10613_v15 = vld [vmem:[%s14426_s7 + $0x3f4] sm:$0xf0] }
 0x761   :  { %v10612_v55 = vld [vmem:[%s14426_s7 + $0x3ec] sm:$0xf0]  ;;  %v8564_v12 = vor.u32 %v10613_v15, %v8563_v11  ;;  %v8531_v35 = vld [vmem:[%s14426_s7 + $0x398] sm:$0xf] }
 0x762   :  { %2714 = vmatpush.bf16.msra.mxu2 %v8516_v56  ;;  %2854 = vmatpush.bf16.msrb.mxu3 %v8536_v44  ;;  %v8139_v56 = vld [vmem:[%s14426_s7 + $0x90] sm:$0xf]  ;;  %v8556_v46 = vor.u32 %v10612_v55, %v8555_v57  ;;  %v10501_v57 = vld [vmem:[%s14426_s7 + $0x74] sm:$0xf0] }
 0x763   :  { %v10508_v44 = vld [vmem:[%s14426_s7 + $0xac] sm:$0xf0]  ;;  %v10637_v15 = vld [vmem:[%s14433_s4 + $0xb8] sm:$0xff] }
 0x764   :  { %2705 = vmatpush.bf16.msrb.mxu1 %v8100_v22  ;;  %2845 = vmatpush.bf16.msra.mxu0 %v8120_v58  ;;  %v8140_v22 = vor.u32 %v10508_v44, %v8139_v56  ;;  %v8107_v58 = vld [vmem:[%s14426_s7 + $0x50] sm:$0xf]  ;;  %v10493_v56 = vld [vmem:[%s14426_s7 + $0x34] sm:$0xf0]  ;;  %v8500_v44 = vor.u32 %v10597_v31, %v8499_v59 }
 0x766   :  { %2715 = vmatpush.bf16.msra.mxu2 %v8484_v19  ;;  %2855 = vmatpush.bf16.msrb.mxu3 %v8504_v33  ;;  %v8108_v19 = vor.u32 %v10500_v49, %v8107_v58  ;;  %v8075_v33 = vld [vmem:[%s14426_s7 + $0x10] sm:$0xf]  ;;  %v10581_v58 = vld [vmem:[%s14426_s7 + $0x2f4] sm:$0xf0] }
 0x768   :  { %2706 = vmatpush.bf16.msrb.mxu1 %v8068_v52  ;;  %2846 = vmatpush.bf16.msra.mxu0 %v8088_v40  ;;  %v8076_v52 = vor.u32 %v10492_v0, %v8075_v33  ;;  %v8308_v40 = vor.u32 %v10549_v54, %v8307_v2  ;;  %v10565_v33 = vld [vmem:[%s14426_s7 + $0x274] sm:$0xf0] }
 0x769   :  { %v10557_v2 = vld [vmem:[%s14426_s7 + $0x234] sm:$0xf0] }
 0x76a   :  { %2716 = vmatpush.bf16.msra.mxu2 %v8452_v27  ;;  %2856 = vmatpush.bf16.msrb.mxu3 %v8472_v29  ;;  %v8275_v27 = vld [vmem:[%s14426_s7 + $0x198] sm:$0xf] }
 0x76b   :  { %2707 = vmatmul.bf16.vlgmr.msrb.gmra.mxu1 %v13640_v26  ;;  %2847 = vmatmul.bf16.vlgmr.msra.gmra.mxu0 %v13640_v26  ;;  %v10541_v29 = vld [vmem:[%s14426_s7 + $0x1b4] sm:$0xf0] }
 0x76c   :  { %2755 = vmatpush.bf16.msra.mxu1 %v8300_v21  ;;  %v8460_v21 = vor.u32 %v10588_v47, %v8459_v24  ;;  %v8276_v37 = vor.u32 %v10541_v29, %v8275_v27  ;;  %v10645_v24 = vld [vmem:[%s14433_s4 + $0xf8] sm:$0xff]  ;;  %v10619_v27 = vld [vmem:[%s14433_s4 + $0x28] sm:$0xff]  ;;  %3499 = vmatpush.bf16.msrb.mxu0 %v10637_v15 }
 0x76d   :  { %2693 = vmatmul.bf16.vlgmr.msrb.gmra.mxu2 %v13668_v1  ;;  %2805 = vmatmul.bf16.vlgmr.msra.gmra.mxu3 %v13668_v1  ;;  %v10629_v47 = vld [vmem:[%s14433_s4 + $0x78] sm:$0xff]  ;;  %v10643_v29 = vld [vmem:[%s14433_s4 + $0xe8] sm:$0xff] }
 0x76e   :  { %2717 = vmatpush.bf16.msra.mxu2 %v8420_v18  ;;  %2857 = vmatpush.bf16.msrb.mxu3 %v8440_v28  ;;  %v10572_v18 = vld [vmem:[%s14426_s7 + $0x2ac] sm:$0xf0]  ;;  %v8211_v28 = vld [vmem:[%s14426_s7 + $0x118] sm:$0xf] }
 0x76f   :  { %v8212_v51 = vor.u32 %v10525_v48, %v8211_v28  ;;  %v10624_v28 = vld [vmem:[%s14433_s4 + $0x50] sm:$0xff]  ;;  %v10615_v48 = vld [vmem:[%s14433_s4 + $0x8] sm:$0xff] }
 0x770   :  { %2756 = vmatpush.bf16.msra.mxu1 %v8268_v7  ;;  %v8395_v7 = vld [vmem:[%s14426_s7 + $0x290] sm:$0xf] }
 0x771   :  { %v8396_v53 = vor.u32 %v10572_v18, %v8395_v7  ;;  %v10616_v7 = vld [vmem:[%s14433_s4 + $0x10] sm:$0xff] }
 0x772   :  { %2718 = vmatpush.bf16.msra.mxu2 %v8388_v41  ;;  %2858 = vmatpush.bf16.msrb.mxu3 %v8408_v3  ;;  %v8179_v41 = vld [vmem:[%s14426_s7 + $0xd8] sm:$0xf]  ;;  %v10556_v3 = vld [vmem:[%s14426_s7 + $0x22c] sm:$0xf0] }
 0x773   :  { %v8180_v38 = vor.u32 %v10517_v50, %v8179_v41  ;;  %v8332_v20 = vor.u32 %v10556_v3, %v8331_v17  ;;  %v10640_v18 = vld [vmem:[%s14433_s4 + $0xd0] sm:$0xff]  ;;  %v10638_v41 = vld [vmem:[%s14433_s4 + $0xc0] sm:$0xff] }
 0x774   :  { %2757 = vmatpush.bf16.msra.mxu1 %v8236_v39  ;;  %v8364_v39 = vor.u32 %v10564_v34, %v8363_v62  ;;  %v10639_v62 = vld [vmem:[%s14433_s4 + $0xc8] sm:$0xff]  ;;  %v10622_v17 = vld [vmem:[%s14433_s4 + $0x40] sm:$0xff] }
 0x775   :  { %v10623_v34 = vld [vmem:[%s14433_s4 + $0x48] sm:$0xff] }
 0x776   :  { %2719 = vmatpush.bf16.msra.mxu2 %v8356_v43  ;;  %2859 = vmatpush.bf16.msrb.mxu3 %v8376_v23  ;;  %v10509_v43 = vld [vmem:[%s14426_s7 + $0xb4] sm:$0xf0] }
 0x777   :  { %v10605_v23 = vld [vmem:[%s14426_s7 + $0x3b4] sm:$0xf0] }
 0x778   :  { %2758 = vmatpush.bf16.msra.mxu1 %v8204_v60  ;;  %v8147_v60 = vld [vmem:[%s14426_s7 + $0x98] sm:$0xf]  ;;  %v8532_v55 = vor.u32 %v10605_v23, %v8531_v35  ;;  %v10636_v23 = vld [vmem:[%s14433_s4 + $0xb0] sm:$0xff] }
 0x779   :  { %v8148_v36 = vor.u32 %v10509_v43, %v8147_v60  ;;  %3500 = vmatpush.bf16.msrb.mxu0 %v10636_v23 }
 0x77a   :  { %2720 = vmatpush.bf16.msra.mxu2 %v8324_v10  ;;  %2860 = vmatpush.bf16.msrb.mxu3 %v8344_v5  ;;  %v8083_v10 = vld [vmem:[%s14426_s7 + $0x18] sm:$0xf] }
 0x77b   :  { %v10589_v5 = vld [vmem:[%s14426_s7 + $0x334] sm:$0xf0]  ;;  %v8084_v16 = vor.u32 %v10493_v56, %v8083_v10  ;;  %v10635_v10 = vld [vmem:[%s14433_s4 + $0xa8] sm:$0xff] }
 0x77c   :  { %2759 = vmatpush.bf16.msra.mxu1 %v8172_v42  ;;  %v8116_v42 = vor.u32 %v10501_v57, %v8115_v30  ;;  %v10676_v30 = vld [vmem:[%s14433_s4 + $0x1f0] sm:$0xff]  ;;  %v10659_v56 = vld [vmem:[%s14433_s4 + $0x168] sm:$0xff] }
 0x77d   :  { %2721 = vmatmul.bf16.vlgmr.msra.gmra.mxu2 %v13668_v1  ;;  %2861 = vmatmul.bf16.vlgmr.msrb.gmra.mxu3 %v13668_v1 }
 0x77e   :  { %2769 = vmatpush.bf16.msrb.mxu2 %v8556_v46  ;;  %v8467_v46 = vld [vmem:[%s14426_s7 + $0x318] sm:$0xf]  ;;  %3513 = vmatpush.bf16.msra.mxu3 %v10645_v24 }
 0x77f   :  { %v8468_v6 = vor.u32 %v10589_v5, %v8467_v46  ;;  %3501 = vmatpush.bf16.msrb.mxu0 %v10635_v10 }
 0x780   :  { %2760 = vmatpush.bf16.msra.mxu1 %v8140_v22  ;;  %v8435_v22 = vld [vmem:[%s14426_s7 + $0x2d8] sm:$0xf] }
 0x781   :  { %v8436_v49 = vor.u32 %v10581_v58, %v8435_v22  ;;  %v10634_v58 = vld [vmem:[%s14433_s4 + $0xa0] sm:$0xff] }
 0x782   :  { %2770 = vmatpush.bf16.msrb.mxu2 %v8524_v25  ;;  %v8403_v25 = vld [vmem:[%s14426_s7 + $0x298] sm:$0xf] }
 0x783   :  { %v8404_v32 = vor.u32 %v10573_v63, %v8403_v25  ;;  %v10674_v25 = vld [vmem:[%s14433_s4 + $0x1e0] sm:$0xff]  ;;  %3502 = vmatpush.bf16.msrb.mxu0 %v10634_v58 }
 0x784   :  { %2761 = vmatpush.bf16.msra.mxu1 %v8108_v19  ;;  %v8371_v19 = vld [vmem:[%s14426_s7 + $0x258] sm:$0xf] }
 0x785   :  { %v8372_v0 = vor.u32 %v10565_v33, %v8371_v19 }
 0x786   :  { %2771 = vmatpush.bf16.msrb.mxu2 %v8492_v14  ;;  %v8339_v14 = vld [vmem:[%s14426_s7 + $0x218] sm:$0xf] }
 0x787   :  { %v8340_v54 = vor.u32 %v10557_v2, %v8339_v14  ;;  %v10633_v2 = vld [vmem:[%s14433_s4 + $0x98] sm:$0xff] }
 0x788   :  { %2762 = vmatpush.bf16.msra.mxu1 %v8076_v52  ;;  %v10620_v52 = vld [vmem:[%s14433_s4 + $0x30] sm:$0xff]  ;;  %3503 = vmatpush.bf16.msrb.mxu0 %v10633_v2 }
 0x78a   :  { %2772 = vmatpush.bf16.msrb.mxu2 %v8460_v21  ;;  %v10628_v21 = vld [vmem:[%s14433_s4 + $0x70] sm:$0xff] }
 0x78b   :  { %2763 = vmatmul.bf16.vlgmr.msra.gmra.mxu1 %v13640_v26 }
 0x78c   :  { %2811 = vmatpush.bf16.msrb.mxu1 %v8308_v40  ;;  %v10644_v40 = vld [vmem:[%s14433_s4 + $0xf0] sm:$0xff] }
 0x78d   :  { %3514 = vmatpush.bf16.msra.mxu3 %v10644_v40 }
 0x78e   :  { %2773 = vmatpush.bf16.msrb.mxu2 %v8428_v8  ;;  %v10617_v8 = vld [vmem:[%s14433_s4 + $0x18] sm:$0xff] }
 0x790   :  { %2812 = vmatpush.bf16.msrb.mxu1 %v8276_v37  ;;  %v10626_v37 = vld [vmem:[%s14433_s4 + $0x60] sm:$0xff] }
 0x791   :  { %3515 = vmatpush.bf16.msra.mxu3 %v10643_v29  ;;  %v10632_v29 = vld [vmem:[%s14433_s4 + $0x90] sm:$0xff] }
 0x792   :  { %2774 = vmatpush.bf16.msrb.mxu2 %v8396_v53  ;;  %3504 = vmatpush.bf16.msrb.mxu0 %v10632_v29 }
 0x794   :  { %2813 = vmatpush.bf16.msrb.mxu1 %v8244_v61 }
 0x795   :  { %3516 = vmatpush.bf16.msra.mxu3 %v10642_v4 }
 0x796   :  { %2775 = vmatpush.bf16.msrb.mxu2 %v8364_v39  ;;  %v10614_v39 = vld [vmem:[%s14433_s4] sm:$0xff] }
 0x798   :  { %2814 = vmatpush.bf16.msrb.mxu1 %v8212_v51  ;;  %v13805_v51 = vld [vmem:[%s14434_s13] sm:$0xff] }
 0x799   :  { %3517 = vmatpush.bf16.msra.mxu3 %v10641_v13  ;;  %v1987_v50 = vperm.slane %v13805_v51, 0  ;;  %v1990_v3 = vperm.slane %v13805_v51, 3  ;;  %v1988_v33 = vperm.slane %v13805_v51, 1  ;;  %v1989_v10 = vperm.slane %v13805_v51, 2 }
 0x79a   :  { %2776 = vmatpush.bf16.msrb.mxu2 %v8332_v20  ;;  %v10677_v20 = vld [vmem:[%s14433_s4 + $0x1f8] sm:$0xff] }
 0x79c   :  { %2815 = vmatpush.bf16.msrb.mxu1 %v8180_v38  ;;  %v10661_v38 = vld [vmem:[%s14433_s4 + $0x178] sm:$0xff] }
 0x79d   :  { %2777 = vmatmul.bf16.vlgmr.msrb.gmra.mxu2 %v13668_v1  ;;  %3518 = vmatpush.bf16.msra.mxu3 %v10640_v18 }
 0x79e   :  { %2825 = vmatpush.bf16.msra.mxu2 %v8564_v12 }
 0x7a0   :  { %2816 = vmatpush.bf16.msrb.mxu1 %v8148_v36  ;;  %v10660_v36 = vld [vmem:[%s14433_s4 + $0x170] sm:$0xff] }
 0x7a1   :  { %3519 = vmatpush.bf16.msra.mxu3 %v10639_v62  ;;  %v10671_v62 = vld [vmem:[%s14433_s4 + $0x1c8] sm:$0xff] }
 0x7a2   :  { %2826 = vmatpush.bf16.msra.mxu2 %v8532_v55 }
 0x7a4   :  { %2817 = vmatpush.bf16.msrb.mxu1 %v8116_v42 }
 0x7a5   :  { %3520 = vmatpush.bf16.msra.mxu3 %v10638_v41 }
 0x7a6   :  { %2827 = vmatpush.bf16.msra.mxu2 %v8500_v44  ;;  %v10675_v44 = vld [vmem:[%s14433_s4 + $0x1e8] sm:$0xff] }
 0x7a8   :  { %2818 = vmatpush.bf16.msrb.mxu1 %v8084_v16 }
 0x7a9   :  { %3569 = vmatpush.bf16.msrb.mxu3 %v10677_v20  ;;  %v10630_v20 = vld [vmem:[%s14433_s4 + $0x80] sm:$0xff] }
 0x7aa   :  { %2828 = vmatpush.bf16.msra.mxu2 %v8468_v6 }
 0x7ab   :  { %2819 = vmatmul.bf16.vlgmr.msrb.gmra.mxu1 %v13640_v26  ;;  %v10621_v26 = vld [vmem:[%s14433_s4 + $0x38] sm:$0xff] }
 0x7ac   :  { %3471 = vmatpush.bf16.msra.mxu1 %v10621_v26  ;;  %v10673_v26 = vld [vmem:[%s14433_s4 + $0x1d8] sm:$0xff] }
 0x7ad   :  { %3570 = vmatpush.bf16.msrb.mxu3 %v10676_v30  ;;  %v10670_v30 = vld [vmem:[%s14433_s4 + $0x1c0] sm:$0xff] }
 0x7ae   :  { %2829 = vmatpush.bf16.msra.mxu2 %v8436_v49  ;;  %v10658_v49 = vld [vmem:[%s14433_s4 + $0x160] sm:$0xff] }
 0x7b0   :  { %3472 = vmatpush.bf16.msra.mxu1 %v10620_v52 }
 0x7b1   :  { %3571 = vmatpush.bf16.msrb.mxu3 %v10675_v44 }
 0x7b2   :  { %2830 = vmatpush.bf16.msra.mxu2 %v8404_v32 }
 0x7b4   :  { %3473 = vmatpush.bf16.msra.mxu1 %v10619_v27 }
 0x7b5   :  { %3572 = vmatpush.bf16.msrb.mxu3 %v10674_v25 }
 0x7b6   :  { %2831 = vmatpush.bf16.msra.mxu2 %v8372_v0 }
 0x7b8   :  { %3474 = vmatpush.bf16.msra.mxu1 %v10618_v45  ;;  %v10672_v45 = vld [vmem:[%s14433_s4 + $0x1d0] sm:$0xff] }
 0x7b9   :  { %3573 = vmatpush.bf16.msrb.mxu3 %v10673_v26 }
 0x7ba   :  { %2832 = vmatpush.bf16.msra.mxu2 %v8340_v54  ;;  %v10657_v54 = vld [vmem:[%s14433_s4 + $0x158] sm:$0xff] }
 0x7bc   :  { %3475 = vmatpush.bf16.msra.mxu1 %v10617_v8 }
 0x7bd   :  { %2833 = vmatmul.bf16.vlgmr.msra.gmra.mxu2 %v13668_v1  ;;  %v10627_v1 = vld [vmem:[%s14433_s4 + $0x68] sm:$0xff]  ;;  %3574 = vmatpush.bf16.msrb.mxu3 %v10672_v45 }
 0x7be   :  { %3485 = vmatpush.bf16.msrb.mxu2 %v10629_v47 }
 0x7c0   :  { %3476 = vmatpush.bf16.msra.mxu1 %v10616_v7 }
 0x7c1   :  { %3575 = vmatpush.bf16.msrb.mxu3 %v10671_v62 }
 0x7c2   :  { %3486 = vmatpush.bf16.msrb.mxu2 %v10628_v21 }
 0x7c4   :  { %3477 = vmatpush.bf16.msra.mxu1 %v10615_v48  ;;  %v10655_v48 = vld [vmem:[%s14433_s4 + $0x148] sm:$0xff] }
 0x7c5   :  { %3576 = vmatpush.bf16.msrb.mxu3 %v10670_v30 }
 0x7c6   :  { %3487 = vmatpush.bf16.msrb.mxu2 %v10627_v1  ;;  %v10656_v1 = vld [vmem:[%s14433_s4 + $0x150] sm:$0xff] }
 0x7c8   :  { %v2652_v61 = vpop.f32.mrf.mxu1  ;;  %v2736_v53 = vpop.f32.mrf.mxu0  ;;  %3478 = vmatpush.bf16.msra.mxu1 %v10614_v39 }
 0x7c9   :  { %v2653_v43 = vadd.f32 %v2652_v61, %v1987_v50  ;;  %v2737_v12 = vadd.f32 %v2736_v53, %v1990_v3 }
 0x7ca   :  { %3488 = vmatpush.bf16.msrb.mxu2 %v10626_v37 }
 0x7ce   :  { %3489 = vmatpush.bf16.msrb.mxu2 %v10625_v9 }
 0x7d0   :  { %v2654_v11 = vpop.f32.mrf.mxu1  ;;  %v2738_v60 = vpop.f32.mrf.mxu0 }
 0x7d1   :  { %v2655_v5 = vadd.f32 %v2654_v11, %v1987_v50  ;;  %v2739_v6 = vadd.f32 %v2738_v60, %v1990_v3  ;;  %v1992_v3 = vperm.slane %v13805_v51, 5  ;;  %v10653_v60 = vld [vmem:[%s14433_s4 + $0x138] sm:$0xff] }
 0x7d2   :  { %3490 = vmatpush.bf16.msrb.mxu2 %v10624_v28  ;;  %v10631_v28 = vld [vmem:[%s14433_s4 + $0x88] sm:$0xff]  ;;  %3527 = vmatpush.bf16.msrb.mxu1 %v10653_v60 }
 0x7d3   :  { %3505 = vmatpush.bf16.msrb.mxu0 %v10631_v28 }
 0x7d6   :  { %3491 = vmatpush.bf16.msrb.mxu2 %v10623_v34 }
 0x7d7   :  { %3506 = vmatpush.bf16.msrb.mxu0 %v10630_v20 }
 0x7d8   :  { %v2680_v46 = vpop.f32.mrf.mxu1  ;;  %v13827_v16 = vpop.f32.mrf.mxu0 }
 0x7d9   :  { %v2681_v52 = vadd.f32 %v2680_v46, %v1988_v33  ;;  %v1994_v46 = vperm.slane %v13805_v51, 7 }
 0x7da   :  { %3492 = vmatpush.bf16.msrb.mxu2 %v10622_v17 }
 0x7de   :  { %3541 = vmatpush.bf16.msra.mxu2 %v10661_v38 }
 0x7e0   :  { %v2666_v35 = vpop.f32.mrf.mxu2  ;;  %v2750_v55 = vpop.f32.mrf.mxu3 }
 0x7e1   :  { %v13818_v57 = vadd.f32 %v2666_v35, %v2653_v43  ;;  %v13820_v59 = vadd.f32 %v2750_v55, %v2737_v12  ;;  %v2682_v21 = vpop.f32.mrf.mxu1  ;;  %v2794_v37 = vpop.f32.mrf.mxu0  ;;  %v10654_v43 = vld [vmem:[%s14433_s4 + $0x140] sm:$0xff] }
 0x7e2   :  { %3542 = vmatpush.bf16.msra.mxu2 %v10660_v36  ;;  %v2683_v50 = vadd.f32 %v2682_v21, %v1988_v33  ;;  %v10650_v21 = vld [vmem:[%s14433_s4 + $0x120] sm:$0xff] }
 0x7e3   :  { %v2867_v31 = vmul.f32 0.5, %v13818_v57  ;;  %v2870_v42 = vmul.f32 0.5, %v13820_v59 }
 0x7e5   :  { %11281 = vtanh.f32 %v2867_v31 }
 0x7e6   :  { %3543 = vmatpush.bf16.msra.mxu2 %v10659_v56  ;;  %11283 = vtanh.f32 %v2870_v42  ;;  %v2795_v42 = vadd.f32 %v2794_v37, %v1992_v3 }
 0x7e8   :  { %v2668_v22 = vpop.f32.mrf.mxu2  ;;  %v2752_v32 = vpop.f32.mrf.mxu3 }
 0x7e9   :  { %v2669_v63 = vadd.f32 %v2668_v22, %v2655_v5  ;;  %v2753_v19 = vadd.f32 %v2752_v32, %v2739_v6  ;;  %v2708_v31 = vpop.f32.mrf.mxu1  ;;  %v2848_v56 = vpop.f32.mrf.mxu0  ;;  %v10652_v5 = vld [vmem:[%s14433_s4 + $0x130] sm:$0xff] }
 0x7ea   :  { %3544 = vmatpush.bf16.msra.mxu2 %v10658_v49  ;;  %3528 = vmatpush.bf16.msrb.mxu1 %v10652_v5  ;;  %v2709_v49 = vadd.f32 %v2708_v31, %v1989_v10  ;;  %v2849_v25 = vadd.f32 %v2848_v56, %v1994_v46 }
 0x7eb   :  { %v2875_v0 = vmul.f32 0.5, %v2669_v63  ;;  %v2878_v14 = vmul.f32 0.5, %v2753_v19  ;;  %v11282_v24 = vpop.eup %11281 }
 0x7ec   :  { %v11284_v47 = vpop.eup %11283  ;;  %v2899_v40 = vadd.f32 1.0, %v11282_v24 }
 0x7ed   :  { %11285 = vtanh.f32 %v2875_v0  ;;  %v2902_v4 = vadd.f32 1.0, %v11284_v47 }
 0x7ee   :  { %11287 = vtanh.f32 %v2878_v14  ;;  %3545 = vmatpush.bf16.msra.mxu2 %v10657_v54  ;;  %v2915_v61 = vmul.f32 0.5, %v2899_v40 }
 0x7ef   :  { %v2918_v34 = vmul.f32 0.5, %v2902_v4 }
 0x7f0   :  { %v2694_v27 = vpop.f32.mrf.mxu2  ;;  %v2806_v13 = vpop.f32.mrf.mxu3  ;;  %v2931_v11 = vmul.f32 %v2915_v61, %v13818_v57 }
 0x7f1   :  { %v13839_v8 = vadd.f32 %v2694_v27, %v2681_v52  ;;  %v2934_v12 = vmul.f32 %v2918_v34, %v13820_v59  ;;  %v2793_v59 = vadd.f32 %v13827_v16, %v1992_v3  ;;  %v2710_v47 = vpop.f32.mrf.mxu1  ;;  %v2850_v27 = vpop.f32.mrf.mxu0 }
 0x7f2   :  { %3546 = vmatpush.bf16.msra.mxu2 %v10656_v1  ;;  %v2711_v1 = vadd.f32 %v2710_v47, %v1989_v10  ;;  %v2851_v4 = vadd.f32 %v2850_v27, %v1994_v46  ;;  %v10663_v27 = vld [vmem:[%s14433_s4 + $0x188] sm:$0xff] }
 0x7f3   :  { %v11286_v9 = vpop.eup %11285  ;;  %v2868_v7 = vmul.f32 0.5, %v13839_v8  ;;  %v13858_v58 = vadd.f32 %v2806_v13, %v2793_v59  ;;  %v1991_v59 = vperm.slane %v13805_v51, 4 }
 0x7f4   :  { %v11288_v18 = vpop.eup %11287  ;;  %v2907_v53 = vadd.f32 1.0, %v11286_v9  ;;  %v10649_v9 = vld [vmem:[%s14433_s4 + $0x118] sm:$0xff] }
 0x7f5   :  { %v2910_v39 = vadd.f32 1.0, %v11288_v18  ;;  %11289 = vtanh.f32 %v2868_v7  ;;  %v2872_v14 = vmul.f32 0.5, %v13858_v58 }
 0x7f6   :  { %v2923_v41 = vmul.f32 0.5, %v2907_v53  ;;  %3547 = vmatpush.bf16.msra.mxu2 %v10655_v48 }
 0x7f7   :  { %v2926_v17 = vmul.f32 0.5, %v2910_v39  ;;  %v10648_v39 = vld [vmem:[%s14433_s4 + $0x110] sm:$0xff] }
 0x7f8   :  { %v2939_v15 = vmul.f32 %v2923_v41, %v2669_v63  ;;  %v2696_v38 = vpop.f32.mrf.mxu2  ;;  %v2808_v36 = vpop.f32.mrf.mxu3 }
 0x7f9   :  { %v2942_v35 = vmul.f32 %v2926_v17, %v2753_v19  ;;  %v2697_v23 = vadd.f32 %v2696_v38, %v2683_v50  ;;  %v13856_v22 = vadd.f32 %v2808_v36, %v2795_v42  ;;  %v10651_v19 = vld [vmem:[%s14433_s4 + $0x128] sm:$0xff] }
 0x7fa   :  { %v2947_v55 = vpack.c.bf16 %v2939_v15, %v2931_v11  ;;  %3548 = vmatpush.bf16.msra.mxu2 %v10654_v43  ;;  %3529 = vmatpush.bf16.msrb.mxu1 %v10651_v19  ;;  %v10647_v11 = vld [vmem:[%s14433_s4 + $0x108] sm:$0xff] }
 0x7fb   :  { %v2950_v57 = vpack.c.bf16 %v2942_v35, %v2934_v12  ;;  %v2876_v44 = vmul.f32 0.5, %v2697_v23  ;;  %v11290_v6 = vpop.eup %11289  ;;  %v2880_v16 = vmul.f32 0.5, %v13856_v22  ;;  %v10667_v19 = vld [vmem:[%s14433_s4 + $0x1a8] sm:$0xff] }
 0x7fc   :  { %3479 = vmatmul.bf16.vlgmr.msra.gmra.mxu1 %v2947_v55  ;;  %v2900_v63 = vadd.f32 1.0, %v11290_v6  ;;  %v10669_v55 = vld [vmem:[%s14433_s4 + $0x1b8] sm:$0xff] }
 0x7fd   :  { %11291 = vtanh.f32 %v2876_v44  ;;  %3521 = vmatmul.bf16.vlgmr.msra.gmra.mxu3 %v2950_v57  ;;  %3555 = vmatpush.bf16.msra.mxu0 %v10669_v55  ;;  %v8947_v55 = vld [vmem:[#allocation14 + $0xe8] sm:$0xf] }
 0x7fe   :  { %v2916_v24 = vmul.f32 0.5, %v2900_v63  ;;  %11293 = vtanh.f32 %v2880_v16  ;;  %3530 = vmatpush.bf16.msrb.mxu1 %v10650_v21 }
 0x7ff   :  { %11295 = vtanh.f32 %v2872_v14  ;;  %v10666_v14 = vld [vmem:[%s14433_s4 + $0x1a0] sm:$0xff] }
 0x800   :  { %v2722_v32 = vpop.f32.mrf.mxu2  ;;  %v2862_v0 = vpop.f32.mrf.mxu3  ;;  %v2932_v45 = vmul.f32 %v2916_v24, %v13839_v8 }
 0x801   :  { %v13862_v33 = vadd.f32 %v2722_v32, %v2709_v49  ;;  %v13865_v2 = vadd.f32 %v2862_v0, %v2849_v25  ;;  %v10668_v49 = vld [vmem:[%s14433_s4 + $0x1b0] sm:$0xff] }
 0x802   :  { %3531 = vmatpush.bf16.msrb.mxu1 %v10649_v9  ;;  %3556 = vmatpush.bf16.msra.mxu0 %v10668_v49 }
 0x803   :  { %v11292_v54 = vpop.eup %11291  ;;  %v2869_v26 = vmul.f32 0.5, %v13862_v33  ;;  %v2874_v40 = vmul.f32 0.5, %v13865_v2 }
 0x804   :  { %v2908_v52 = vadd.f32 1.0, %v11292_v54  ;;  %v11294_v28 = vpop.eup %11293 }
 0x805   :  { %11297 = vtanh.f32 %v2869_v26  ;;  %v11296_v62 = vpop.eup %11295  ;;  %v2912_v50 = vadd.f32 1.0, %v11294_v28  ;;  %v10665_v26 = vld [vmem:[%s14433_s4 + $0x198] sm:$0xff] }
 0x806   :  { %v2924_v29 = vmul.f32 0.5, %v2908_v52  ;;  %11299 = vtanh.f32 %v2874_v40  ;;  %3532 = vmatpush.bf16.msrb.mxu1 %v10648_v39  ;;  %v2904_v17 = vadd.f32 1.0, %v11296_v62  ;;  %3557 = vmatpush.bf16.msra.mxu0 %v10667_v19  ;;  %v10664_v52 = vld [vmem:[%s14433_s4 + $0x190] sm:$0xff] }
 0x807   :  { %v2928_v38 = vmul.f32 0.5, %v2912_v50  ;;  %v8933_v19 = vld [vmem:[#allocation14 + $0xd8] sm:$0xf0] }
 0x808   :  { %v2940_v37 = vmul.f32 %v2924_v29, %v2697_v23  ;;  %v2724_v13 = vpop.f32.mrf.mxu2  ;;  %v2864_v18 = vpop.f32.mrf.mxu3  ;;  %v2920_v43 = vmul.f32 0.5, %v2904_v17  ;;  %v10646_v23 = vld [vmem:[%s14433_s4 + $0x100] sm:$0xff] }
 0x809   :  { %v2725_v7 = vadd.f32 %v2724_v13, %v2711_v1  ;;  %v2865_v53 = vadd.f32 %v2864_v18, %v2851_v4  ;;  %v2944_v31 = vmul.f32 %v2928_v38, %v13856_v22  ;;  %v2764_v10 = vpop.f32.mrf.mxu1  ;;  %v10662_v4 = vld [vmem:[%s14433_s4 + $0x180] sm:$0xff] }
 0x80a   :  { %v2948_v61 = vpack.c.bf16 %v2940_v37, %v2932_v45  ;;  %3533 = vmatpush.bf16.msrb.mxu1 %v10647_v11  ;;  %v2936_v56 = vmul.f32 %v2920_v43, %v13858_v58  ;;  %v2765_v32 = vadd.f32 %v2764_v10, %v1991_v59  ;;  %3558 = vmatpush.bf16.msra.mxu0 %v10666_v14  ;;  %v10698_v14 = vld [vmem:[#allocation14 + $0xa4] sm:$0xf] }
 0x80b   :  { %v2877_v48 = vmul.f32 0.5, %v2725_v7  ;;  %v2882_v34 = vmul.f32 0.5, %v2865_v53  ;;  %v11298_v41 = vpop.eup %11297 }
 0x80c   :  { %3493 = vmatmul.bf16.vlgmr.msrb.gmra.mxu2 %v2948_v61  ;;  %v11300_v8 = vpop.eup %11299  ;;  %v2901_v3 = vadd.f32 1.0, %v11298_v41  ;;  %v2952_v25 = vpack.c.bf16 %v2944_v31, %v2936_v56  ;;  %v10709_v31 = vld [vmem:[#allocation14 + $0xf4] sm:$0xf0]  ;;  %v8949_v56 = vld [vmem:[#allocation14 + $0xf8] sm:$0xf0] }
 0x80d   :  { %11301 = vtanh.f32 %v2877_v48  ;;  %v2906_v15 = vadd.f32 1.0, %v11300_v8  ;;  %v8948_v10 = vor.u32 %v10709_v31, %v8947_v55  ;;  %v10687_v55 = vld [vmem:[#allocation14 + $0x4c] sm:$0xf]  ;;  %v8869_v31 = vld [vmem:[#allocation14 + $0x58] sm:$0xf0] }
 0x80e   :  { %11303 = vtanh.f32 %v2882_v34  ;;  %v2917_v12 = vmul.f32 0.5, %v2901_v3  ;;  %3534 = vmatpush.bf16.msrb.mxu1 %v10646_v23  ;;  %3559 = vmatpush.bf16.msra.mxu0 %v10665_v26  ;;  %v10706_v23 = vld [vmem:[#allocation14 + $0xe4] sm:$0xf] }
 0x80f   :  { %v2922_v36 = vmul.f32 0.5, %v2906_v15 }
 0x810   :  { %v2933_v44 = vmul.f32 %v2917_v12, %v13862_v33  ;;  %v8939_v12 = vld [vmem:[#allocation14 + $0xe0] sm:$0xf] }
 0x811   :  { %v2938_v5 = vmul.f32 %v2922_v36, %v13865_v2  ;;  %v2766_v0 = vpop.f32.mrf.mxu1 }
 0x812   :  { %v2767_v2 = vadd.f32 %v2766_v0, %v1991_v59  ;;  %3560 = vmatpush.bf16.msra.mxu0 %v10664_v52  ;;  %v8917_v52 = vld [vmem:[#allocation14 + $0xb8] sm:$0xf0] }
 0x813   :  { %v11302_v20 = vpop.eup %11301 }
 0x814   :  { %v11304_v60 = vpop.eup %11303  ;;  %v2909_v35 = vadd.f32 1.0, %v11302_v20 }
 0x815   :  { %v2914_v30 = vadd.f32 1.0, %v11304_v60 }
 0x816   :  { %v2925_v42 = vmul.f32 0.5, %v2909_v35  ;;  %3561 = vmatpush.bf16.msra.mxu0 %v10663_v27  ;;  %v10708_v35 = vld [vmem:[#allocation14 + $0xec] sm:$0xf0]  ;;  %v8891_v27 = vld [vmem:[#allocation14 + $0x80] sm:$0xf] }
 0x817   :  { %v2930_v57 = vmul.f32 0.5, %v2914_v30  ;;  %v8940_v36 = vor.u32 %v10708_v35, %v8939_v12  ;;  %v8941_v30 = vld [vmem:[#allocation14 + $0xf0] sm:$0xf0]  ;;  %v8867_v35 = vld [vmem:[#allocation14 + $0x48] sm:$0xf] }
 0x818   :  { %v2941_v46 = vmul.f32 %v2925_v42, %v2725_v7  ;;  %v1993_v7 = vperm.slane %v13805_v51, 6  ;;  %v8944_v42 = vor.u32 %v10706_v23, %v8941_v30  ;;  %v8861_v12 = vld [vmem:[#allocation14 + $0x50] sm:$0xf0]  ;;  %v10689_v23 = vld [vmem:[#allocation14 + $0x54] sm:$0xf0] }
 0x819   :  { %v2946_v6 = vmul.f32 %v2930_v57, %v2865_v53  ;;  %v10707_v57 = vld [vmem:[#allocation14 + $0xec] sm:$0xf]  ;;  %3786 = vmatpush.bf16.msra.mxu1 %v8940_v36  ;;  %v8868_v30 = vor.u32 %v10689_v23, %v8867_v35 }
 0x81a   :  { %v2949_v22 = vpack.c.bf16 %v2941_v46, %v2933_v44  ;;  %3562 = vmatpush.bf16.msra.mxu0 %v10662_v4  ;;  %v8923_v44 = vld [vmem:[#allocation14 + $0xc0] sm:$0xf]  ;;  %v8952_v59 = vor.u32 %v10707_v57, %v8949_v56  ;;  %v10704_v46 = vld [vmem:[#allocation14 + $0xcc] sm:$0xf0]  ;;  %3800 = vmatpush.bf16.msrb.mxu2 %v8944_v42  ;;  %v8893_v4 = vld [vmem:[#allocation14 + $0x90] sm:$0xf0] }
 0x81b   :  { %v2954_v63 = vpack.c.bf16 %v2946_v6, %v2938_v5  ;;  %v10702_v5 = vld [vmem:[#allocation14 + $0xc4] sm:$0xf]  ;;  %v8925_v6 = vld [vmem:[#allocation14 + $0xd0] sm:$0xf0]  ;;  %v8924_v49 = vor.u32 %v10704_v46, %v8923_v44  ;;  %v8843_v57 = vld [vmem:[#allocation14 + $0x20] sm:$0xf] }
 0x81c   :  { %3507 = vmatmul.bf16.vlgmr.msrb.gmra.mxu0 %v2949_v22  ;;  %3549 = vmatmul.bf16.vlgmr.msra.gmra.mxu2 %v2952_v25  ;;  %v8928_v25 = vor.u32 %v10702_v5, %v8925_v6  ;;  %v8931_v22 = vld [vmem:[#allocation14 + $0xc8] sm:$0xf]  ;;  %v10684_v56 = vld [vmem:[#allocation14 + $0x2c] sm:$0xf0]  ;;  %v10682_v44 = vld [vmem:[#allocation14 + $0x24] sm:$0xf] }
 0x81d   :  { %3577 = vmatmul.bf16.vlgmr.msrb.gmra.mxu3 %v2954_v63  ;;  %v10705_v63 = vld [vmem:[#allocation14 + $0xd4] sm:$0xf0]  ;;  %3787 = vmatpush.bf16.msra.mxu1 %v8924_v49  ;;  %v8845_v46 = vld [vmem:[#allocation14 + $0x30] sm:$0xf0]  ;;  %v8851_v5 = vld [vmem:[#allocation14 + $0x28] sm:$0xf] }
 0x81e   :  { %3814 = vmatpush.bf16.msrb.mxu0 %v8948_v10  ;;  %3828 = vmatpush.bf16.msra.mxu3 %v8952_v59  ;;  %v8872_v10 = vor.u32 %v10687_v55, %v8869_v31  ;;  %v8844_v59 = vor.u32 %v10684_v56, %v8843_v57  ;;  %v10685_v6 = vld [vmem:[#allocation14 + $0x34] sm:$0xf0]  ;;  %v8848_v49 = vor.u32 %v10682_v44, %v8845_v46  ;;  %v10732_v55 = vld [vmem:[%s14435_s17 + $0xb0] sm:$0xff]  ;;  %v10725_v31 = vld [vmem:[%s14435_s17 + $0x78] sm:$0xff] }
 0x81f   :  { %3801 = vmatpush.bf16.msrb.mxu2 %v8928_v25  ;;  %v8852_v25 = vor.u32 %v10685_v6, %v8851_v5  ;;  %v10731_v57 = vld [vmem:[%s14435_s17 + $0xa8] sm:$0xff]  ;;  %v10724_v56 = vld [vmem:[%s14435_s17 + $0x70] sm:$0xff]  ;;  %v10730_v46 = vld [vmem:[%s14435_s17 + $0xa0] sm:$0xff] }
 0x820   :  { %v2778_v58 = vpop.f32.mrf.mxu2  ;;  %v10740_v44 = vld [vmem:[%s14435_s17 + $0xf0] sm:$0xff]  ;;  %v10723_v5 = vld [vmem:[%s14435_s17 + $0x68] sm:$0xff] }
 0x821   :  { %v2779_v16 = vadd.f32 %v2778_v58, %v2765_v32  ;;  %v10703_v32 = vld [vmem:[#allocation14 + $0xcc] sm:$0xf]  ;;  %v8932_v58 = vor.u32 %v10705_v63, %v8931_v22  ;;  %v8853_v63 = vld [vmem:[#allocation14 + $0x38] sm:$0xf0] }
 0x822   :  { %v8936_v0 = vor.u32 %v10703_v32, %v8933_v19  ;;  %v10683_v22 = vld [vmem:[#allocation14 + $0x2c] sm:$0xf]  ;;  %v8827_v19 = vld [vmem:[#allocation14] sm:$0xf]  ;;  %v10739_v6 = vld [vmem:[%s14435_s17 + $0xe8] sm:$0xff] }
 0x823   :  { %v2871_v33 = vmul.f32 0.5, %v2779_v16  ;;  %3815 = vmatpush.bf16.msrb.mxu0 %v8932_v58  ;;  %v8856_v58 = vor.u32 %v10683_v22, %v8853_v63  ;;  %v10722_v22 = vld [vmem:[%s14435_s17 + $0x60] sm:$0xff] }
 0x824   :  { %3829 = vmatpush.bf16.msra.mxu3 %v8936_v0  ;;  %v10738_v63 = vld [vmem:[%s14435_s17 + $0xe0] sm:$0xff] }
 0x825   :  { %11305 = vtanh.f32 %v2871_v33  ;;  %v10700_v33 = vld [vmem:[#allocation14 + $0xac] sm:$0xf0] }
 0x828   :  { %v2780_v54 = vpop.f32.mrf.mxu2  ;;  %v2820_v13 = vpop.f32.mrf.mxu1 }
 0x829   :  { %v2781_v24 = vadd.f32 %v2780_v54, %v2767_v2  ;;  %v2821_v53 = vadd.f32 %v2820_v13, %v1993_v7  ;;  %v8909_v2 = vld [vmem:[#allocation14 + $0xb0] sm:$0xf0]  ;;  %v8915_v54 = vld [vmem:[#allocation14 + $0xa8] sm:$0xf]  ;;  %v10697_v13 = vld [vmem:[#allocation14 + $0x94] sm:$0xf0] }
 0x82b   :  { %v2879_v47 = vmul.f32 0.5, %v2781_v24  ;;  %v11306_v40 = vpop.eup %11305 }
 0x82c   :  { %v2903_v21 = vadd.f32 1.0, %v11306_v40  ;;  %v8912_v40 = vor.u32 %v10698_v14, %v8909_v2  ;;  %v8829_v14 = vld [vmem:[#allocation14 + $0x10] sm:$0xf0]  ;;  %v8835_v2 = vld [vmem:[#allocation14 + $0x8] sm:$0xf] }
 0x82d   :  { %11307 = vtanh.f32 %v2879_v47  ;;  %v10699_v47 = vld [vmem:[#allocation14 + $0xac] sm:$0xf] }
 0x82e   :  { %v2919_v1 = vmul.f32 0.5, %v2903_v21  ;;  %3802 = vmatpush.bf16.msrb.mxu2 %v8912_v40 }
 0x830   :  { %v2935_v9 = vmul.f32 %v2919_v1, %v2779_v16  ;;  %v2822_v34 = vpop.f32.mrf.mxu1  ;;  %v8907_v16 = vld [vmem:[#allocation14 + $0xa0] sm:$0xf]  ;;  %v10694_v1 = vld [vmem:[#allocation14 + $0x84] sm:$0xf] }
 0x831   :  { %v2823_v39 = vadd.f32 %v2822_v34, %v1993_v7  ;;  %v8908_v26 = vor.u32 %v10700_v33, %v8907_v16  ;;  %v8901_v7 = vld [vmem:[#allocation14 + $0x98] sm:$0xf0]  ;;  %v10690_v34 = vld [vmem:[#allocation14 + $0x64] sm:$0xf]  ;;  %v10680_v16 = vld [vmem:[#allocation14 + $0xc] sm:$0xf0] }
 0x832   :  { %v10678_v33 = vld [vmem:[#allocation14 + $0x4] sm:$0xf]  ;;  %v8828_v0 = vor.u32 %v10680_v16, %v8827_v19 }
 0x833   :  { %v11308_v29 = vpop.eup %11307  ;;  %3788 = vmatpush.bf16.msra.mxu1 %v8908_v26  ;;  %v8832_v26 = vor.u32 %v10678_v33, %v8829_v14  ;;  %v10721_v19 = vld [vmem:[%s14435_s17 + $0x58] sm:$0xff]  ;;  %v10711_v33 = vld [vmem:[%s14435_s17 + $0x8] sm:$0xff]  ;;  %v10720_v14 = vld [vmem:[%s14435_s17 + $0x50] sm:$0xff] }
 0x834   :  { %v2911_v45 = vadd.f32 1.0, %v11308_v29  ;;  %v10696_v29 = vld [vmem:[#allocation14 + $0x8c] sm:$0xf0]  ;;  %v10737_v16 = vld [vmem:[%s14435_s17 + $0xd8] sm:$0xff] }
 0x836   :  { %v2927_v37 = vmul.f32 0.5, %v2911_v45  ;;  %v8920_v45 = vor.u32 %v10699_v47, %v8917_v52  ;;  %v10679_v47 = vld [vmem:[#allocation14 + $0xc] sm:$0xf]  ;;  %v8837_v52 = vld [vmem:[#allocation14 + $0x18] sm:$0xf0] }
 0x837   :  { %v8840_v40 = vor.u32 %v10679_v47, %v8837_v52  ;;  %v10719_v47 = vld [vmem:[%s14435_s17 + $0x48] sm:$0xff] }
 0x838   :  { %v2943_v18 = vmul.f32 %v2927_v37, %v2781_v24  ;;  %v10701_v24 = vld [vmem:[#allocation14 + $0xb4] sm:$0xf0]  ;;  %v8899_v37 = vld [vmem:[#allocation14 + $0x88] sm:$0xf]  ;;  %3830 = vmatpush.bf16.msra.mxu3 %v8920_v45 }
 0x839   :  { %v8916_v21 = vor.u32 %v10701_v24, %v8915_v54  ;;  %v10681_v54 = vld [vmem:[#allocation14 + $0x14] sm:$0xf0]  ;;  %v10733_v45 = vld [vmem:[%s14435_s17 + $0xb8] sm:$0xff] }
 0x83a   :  { %v2951_v61 = vpack.c.bf16 %v2943_v18, %v2935_v9  ;;  %v10695_v9 = vld [vmem:[#allocation14 + $0x8c] sm:$0xf]  ;;  %v8892_v18 = vor.u32 %v10696_v29, %v8891_v27  ;;  %v8836_v24 = vor.u32 %v10681_v54, %v8835_v2  ;;  %v10736_v2 = vld [vmem:[%s14435_s17 + $0xd0] sm:$0xff]  ;;  %v10735_v52 = vld [vmem:[%s14435_s17 + $0xc8] sm:$0xff] }
 0x83b   :  { %3816 = vmatpush.bf16.msrb.mxu0 %v8916_v21  ;;  %v10710_v54 = vld [vmem:[%s14435_s17] sm:$0xff] }
 0x83c   :  { %3535 = vmatmul.bf16.vlgmr.msrb.gmra.mxu1 %v2951_v61  ;;  %v8896_v61 = vor.u32 %v10694_v1, %v8893_v4  ;;  %v10717_v1 = vld [vmem:[%s14435_s17 + $0x38] sm:$0xff] }
 0x83d   :  { %3789 = vmatpush.bf16.msra.mxu1 %v8892_v18 }
 0x83e   :  { %3803 = vmatpush.bf16.msrb.mxu2 %v8896_v61 }
 0x840   :  { %v2834_v28 = vpop.f32.mrf.mxu2 }
 0x841   :  { %v2835_v48 = vadd.f32 %v2834_v28, %v2821_v53  ;;  %v8900_v53 = vor.u32 %v10697_v13, %v8899_v37  ;;  %v8904_v28 = vor.u32 %v10695_v9, %v8901_v7  ;;  %v11203_v37 = vld [vmem:[%s14436_s27] ss:$0 sm:$0xff] }
 0x843   :  { %v2873_v62 = vmul.f32 0.5, %v2835_v48  ;;  %3817 = vmatpush.bf16.msrb.mxu0 %v8900_v53  ;;  %3831 = vmatpush.bf16.msra.mxu3 %v8904_v28 }
 0x845   :  { %11309 = vtanh.f32 %v2873_v62  ;;  %v10692_v62 = vld [vmem:[#allocation14 + $0x6c] sm:$0xf0] }
 0x848   :  { %v2836_v41 = vpop.f32.mrf.mxu2 }
 0x849   :  { %v2837_v8 = vadd.f32 %v2836_v41, %v2823_v39  ;;  %v8877_v41 = vld [vmem:[#allocation14 + $0x70] sm:$0xf0] }
 0x84b   :  { %v2881_v50 = vmul.f32 0.5, %v2837_v8  ;;  %v11310_v17 = vpop.eup %11309 }
 0x84c   :  { %v2905_v3 = vadd.f32 1.0, %v11310_v17  ;;  %v8880_v17 = vor.u32 %v10690_v34, %v8877_v41 }
 0x84d   :  { %11311 = vtanh.f32 %v2881_v50  ;;  %v10693_v50 = vld [vmem:[#allocation14 + $0x74] sm:$0xf0] }
 0x84e   :  { %v2921_v15 = vmul.f32 0.5, %v2905_v3  ;;  %3804 = vmatpush.bf16.msrb.mxu2 %v8880_v17 }
 0x850   :  { %v2937_v20 = vmul.f32 %v2921_v15, %v2835_v48  ;;  %v8875_v48 = vld [vmem:[#allocation14 + $0x60] sm:$0xf]  ;;  %v8885_v15 = vld [vmem:[#allocation14 + $0x78] sm:$0xf0] }
 0x851   :  { %v8876_v39 = vor.u32 %v10692_v62, %v8875_v48 }
 0x853   :  { %v11312_v11 = vpop.eup %11311  ;;  %3790 = vmatpush.bf16.msra.mxu1 %v8876_v39 }
 0x854   :  { %v2913_v38 = vadd.f32 1.0, %v11312_v11  ;;  %v10691_v11 = vld [vmem:[#allocation14 + $0x6c] sm:$0xf] }
 0x856   :  { %v2929_v51 = vmul.f32 0.5, %v2913_v38  ;;  %v8888_v38 = vor.u32 %v10691_v11, %v8885_v15 }
 0x858   :  { %v2945_v60 = vmul.f32 %v2929_v51, %v2837_v8  ;;  %v8883_v8 = vld [vmem:[#allocation14 + $0x68] sm:$0xf]  ;;  %v8859_v51 = vld [vmem:[#allocation14 + $0x40] sm:$0xf]  ;;  %3832 = vmatpush.bf16.msra.mxu3 %v8888_v38 }
 0x859   :  { %v8884_v3 = vor.u32 %v10693_v50, %v8883_v8 }
 0x85a   :  { %v2953_v43 = vpack.c.bf16 %v2945_v60, %v2937_v20  ;;  %v10688_v20 = vld [vmem:[#allocation14 + $0x4c] sm:$0xf0]  ;;  %v10686_v60 = vld [vmem:[#allocation14 + $0x44] sm:$0xf] }
 0x85b   :  { %3818 = vmatpush.bf16.msrb.mxu0 %v8884_v3  ;;  %v8864_v36 = vor.u32 %v10686_v60, %v8861_v12 }
 0x85c   :  { %3563 = vmatmul.bf16.vlgmr.msra.gmra.mxu0 %v2953_v43  ;;  %v8860_v43 = vor.u32 %v10688_v20, %v8859_v51  ;;  %3833 = vmatpush.bf16.msra.mxu3 %v8872_v10  ;;  %v10715_v10 = vld [vmem:[%s14435_s17 + $0x28] sm:$0xff] }
 0x85d   :  { %3805 = vmatpush.bf16.msrb.mxu2 %v8864_v36 }
 0x85e   :  { %3791 = vmatpush.bf16.msra.mxu1 %v8860_v43 }
 0x85f   :  { %3819 = vmatpush.bf16.msrb.mxu0 %v8868_v30  ;;  %v10716_v30 = vld [vmem:[%s14435_s17 + $0x30] sm:$0xff] }
 0x860   :  { %3834 = vmatpush.bf16.msra.mxu3 %v8856_v58  ;;  %v10728_v58 = vld [vmem:[%s14435_s17 + $0x90] sm:$0xff] }
 0x861   :  { %3806 = vmatpush.bf16.msrb.mxu2 %v8848_v49  ;;  %v10713_v49 = vld [vmem:[%s14435_s17 + $0x18] sm:$0xff] }
 0x862   :  { %3792 = vmatpush.bf16.msra.mxu1 %v8844_v59  ;;  %v10714_v59 = vld [vmem:[%s14435_s17 + $0x20] sm:$0xff] }
 0x863   :  { %3820 = vmatpush.bf16.msrb.mxu0 %v8852_v25  ;;  %v10729_v25 = vld [vmem:[%s14435_s17 + $0x98] sm:$0xff] }
 0x864   :  { %3835 = vmatpush.bf16.msra.mxu3 %v8840_v40 }
 0x865   :  { %3807 = vmatpush.bf16.msrb.mxu2 %v8832_v26  ;;  %v10726_v26 = vld [vmem:[%s14435_s17 + $0x80] sm:$0xff] }
 0x866   :  { %3793 = vmatpush.bf16.msra.mxu1 %v8828_v0  ;;  %v10727_v0 = vld [vmem:[%s14435_s17 + $0x88] sm:$0xff] }
 0x867   :  { %3821 = vmatpush.bf16.msrb.mxu0 %v8836_v24  ;;  %v3616_v24 = vld [vmem:[%s14437_s26] sm:$0xf] }
 0x868   :  { %v3618_v40 = vperm.slane %v3616_v24, 0 }
 0x869   :  { %4160 = vmatpush.bf16.msra.mxu2 %v10725_v31 }
 0x86a   :  { %4146 = vmatpush.bf16.msrb.mxu1 %v10717_v1 }
 0x86b   :  { %4174 = vmatpush.bf16.msra.mxu0 %v10733_v45 }
 0x86d   :  { %4161 = vmatpush.bf16.msra.mxu2 %v10724_v56 }
 0x86e   :  { %4147 = vmatpush.bf16.msrb.mxu1 %v10716_v30 }
 0x86f   :  { %4175 = vmatpush.bf16.msra.mxu0 %v10732_v55 }
 0x871   :  { %4162 = vmatpush.bf16.msra.mxu2 %v10723_v5 }
 0x872   :  { %4148 = vmatpush.bf16.msrb.mxu1 %v10715_v10 }
 0x873   :  { %4176 = vmatpush.bf16.msra.mxu0 %v10731_v57 }
 0x875   :  { %4163 = vmatpush.bf16.msra.mxu2 %v10722_v22 }
 0x876   :  { %4149 = vmatpush.bf16.msrb.mxu1 %v10714_v59 }
 0x877   :  { %4177 = vmatpush.bf16.msra.mxu0 %v10730_v46 }
 0x879   :  { %v3480_v42 = vpop.f32.mrf.mxu1  ;;  %4164 = vmatpush.bf16.msra.mxu2 %v10721_v19 }
 0x87a   :  { %v3481_v9 = vadd.f32 %v11203_v37, %v3480_v42  ;;  %v10741_v42 = vld [vmem:[%s14435_s17 + $0xf8] sm:$0xff]  ;;  %4150 = vmatpush.bf16.msrb.mxu1 %v10713_v49 }
 0x87b   :  { %4188 = vmatpush.bf16.msrb.mxu3 %v10741_v42  ;;  %4178 = vmatpush.bf16.msra.mxu0 %v10729_v25 }
 0x87d   :  { %4165 = vmatpush.bf16.msra.mxu2 %v10720_v14 }
 0x87f   :  { %4189 = vmatpush.bf16.msrb.mxu3 %v10740_v44  ;;  %4179 = vmatpush.bf16.msra.mxu0 %v10728_v58 }
 0x880   :  { %v3522_v21 = vpop.f32.mrf.mxu3 }
 0x881   :  { %v3482_v27 = vpop.f32.mrf.mxu1  ;;  %4166 = vmatpush.bf16.msra.mxu2 %v10719_v47 }
 0x882   :  { %v3483_v61 = vadd.f32 %v11203_v37, %v3482_v27  ;;  %v10718_v27 = vld [vmem:[%s14435_s17 + $0x40] sm:$0xff] }
 0x883   :  { %4190 = vmatpush.bf16.msrb.mxu3 %v10739_v6  ;;  %4180 = vmatpush.bf16.msra.mxu0 %v10727_v0 }
 0x885   :  { %4167 = vmatpush.bf16.msra.mxu2 %v10718_v27  ;;  %v9107_v27 = vld [vmem:[#allocation55 + $0x30] sm:$0xf] }
 0x887   :  { %4191 = vmatpush.bf16.msrb.mxu3 %v10738_v63  ;;  %4181 = vmatpush.bf16.msra.mxu0 %v10726_v26 }
 0x888   :  { %v3524_v7 = vpop.f32.mrf.mxu3 }
 0x88b   :  { %4192 = vmatpush.bf16.msrb.mxu3 %v10737_v16 }
 0x88f   :  { %v3494_v32 = vpop.f32.mrf.mxu2  ;;  %4193 = vmatpush.bf16.msrb.mxu3 %v10736_v2 }
 0x890   :  { %v3495_v53 = vadd.f32 %v3494_v32, %v3481_v9  ;;  %v10712_v32 = vld [vmem:[%s14435_s17 + $0x10] sm:$0xff]  ;;  %v3619_v9 = vperm.slane %v3616_v24, 1 }
 0x891   :  { %4151 = vmatpush.bf16.msrb.mxu1 %v10712_v32 }
 0x893   :  { %4194 = vmatpush.bf16.msrb.mxu3 %v10735_v52 }
 0x895   :  { %4152 = vmatpush.bf16.msrb.mxu1 %v10711_v33 }
 0x897   :  { %v3496_v4 = vpop.f32.mrf.mxu2 }
 0x898   :  { %v3497_v28 = vadd.f32 %v3496_v4, %v3483_v61 }
 0x899   :  { %v3508_v29 = vpop.f32.mrf.mxu0  ;;  %4153 = vmatpush.bf16.msrb.mxu1 %v10710_v54 }
 0x89a   :  { %v3509_v48 = vadd.f32 %v3508_v29, %v3495_v53  ;;  %v10734_v29 = vld [vmem:[%s14435_s17 + $0xc0] sm:$0xff] }
 0x89b   :  { %4195 = vmatpush.bf16.msrb.mxu3 %v10734_v29  ;;  %v10749_v29 = vld [vmem:[#allocation55 + $0x34] sm:$0xf0] }
 0x89c   :  { %v3523_v41 = vadd.f32 %v3522_v21, %v3509_v48  ;;  %v3620_v21 = vperm.slane %v3616_v24, 2 }
 0x89f   :  { %v3550_v62 = vpop.f32.mrf.mxu2 }
 0x8a0   :  { %v3578_v39 = vpop.f32.mrf.mxu3 }
 0x8a1   :  { %v3510_v18 = vpop.f32.mrf.mxu0 }
 0x8a2   :  { %v3511_v34 = vadd.f32 %v3510_v18, %v3497_v28  ;;  %v3621_v18 = vperm.slane %v3616_v24, 3 }
 0x8a4   :  { %v3525_v3 = vadd.f32 %v3524_v7, %v3511_v34 }
 0x8a7   :  { %v3552_v38 = vpop.f32.mrf.mxu2 }
 0x8a8   :  { %v3580_v12 = vpop.f32.mrf.mxu3 }
 0x8b9   :  { %v3536_v13 = vpop.f32.mrf.mxu1 }
 0x8ba   :  { %v3537_v17 = vadd.f32 %v3536_v13, %v3523_v41 }
 0x8bc   :  { %v3551_v15 = vadd.f32 %v3550_v62, %v3537_v17 }
 0x8c1   :  { %v3538_v8 = vpop.f32.mrf.mxu1 }
 0x8c2   :  { %v3539_v11 = vadd.f32 %v3538_v8, %v3525_v3 }
 0x8c4   :  { %v3553_v20 = vadd.f32 %v3552_v38, %v3539_v11 }
 0x8d9   :  { %v3564_v50 = vpop.f32.mrf.mxu0 }
 0x8da   :  { %v3565_v51 = vadd.f32 %v3564_v50, %v3551_v15 }
 0x8dc   :  { %v3579_v35 = vadd.f32 %v3578_v39, %v3565_v51 }
 0x8e1   :  { %v3566_v60 = vpop.f32.mrf.mxu0 }
 0x8e2   :  { %v3567_v43 = vadd.f32 %v3566_v60, %v3553_v20 }
 0x8e4   :  { %v3581_v23 = vadd.f32 %v3580_v12, %v3567_v43 }
 0x8e6   :  { %v3583_v36 = vpack.c.bf16 %v3581_v23, %v3579_v35 }
 0x8e8   :  { %3794 = vmatmul.bf16.vlgmr.msra.gmra.mxu1 %v3583_v36  ;;  %3808 = vmatmul.bf16.vlgmr.msrb.gmra.mxu2 %v3583_v36 }
 0x8e9   :  { %3822 = vmatmul.bf16.vlgmr.msrb.gmra.mxu0 %v3583_v36  ;;  %3836 = vmatmul.bf16.vlgmr.msra.gmra.mxu3 %v3583_v36 }
 0x965   :  { %v3795_v1 = vpop.f32.mrf.mxu1 }
 0x966   :  { %v3796_v45 = vadd.f32 %v3795_v1, %v3618_v40  ;;  %v3823_v4 = vpop.f32.mrf.mxu0  ;;  %v10748_v1 = vld [vmem:[#allocation55 + $0x34] sm:$0xf] }
 0x967   :  { %v3824_v37 = vadd.f32 %v3823_v4, %v3620_v21  ;;  %v9109_v4 = vld [vmem:[#allocation55 + $0x38] sm:$0xf0] }
 0x968   :  { %v3842_v13 = vmul.f32 0.5, %v3796_v45 }
 0x969   :  { %v3844_v7 = vmul.f32 0.5, %v3824_v37 }
 0x96a   :  { %11313 = vtanh.f32 %v3842_v13  ;;  %v10756_v13 = vld [vmem:[#allocation55 + $0x74] sm:$0xf] }
 0x96b   :  { %v3809_v61 = vpop.f32.mrf.mxu2  ;;  %11315 = vtanh.f32 %v3844_v7 }
 0x96c   :  { %v3810_v53 = vadd.f32 %v3809_v61, %v3619_v9  ;;  %v3837_v28 = vpop.f32.mrf.mxu3  ;;  %v10747_v61 = vld [vmem:[#allocation55 + $0x24] sm:$0xf0] }
 0x96d   :  { %v3838_v48 = vadd.f32 %v3837_v28, %v3621_v18  ;;  %v3797_v62 = vpop.f32.mrf.mxu1 }
 0x96e   :  { %v3843_v34 = vmul.f32 0.5, %v3810_v53  ;;  %v3798_v39 = vadd.f32 %v3797_v62, %v3618_v40  ;;  %v3825_v41 = vpop.f32.mrf.mxu0 }
 0x96f   :  { %v3845_v8 = vmul.f32 0.5, %v3838_v48  ;;  %v3826_v50 = vadd.f32 %v3825_v41, %v3620_v21 }
 0x970   :  { %11317 = vtanh.f32 %v3843_v34  ;;  %v3846_v17 = vmul.f32 0.5, %v3798_v39  ;;  %v11314_v11 = vpop.eup %11313  ;;  %v10754_v34 = vld [vmem:[#allocation55 + $0x64] sm:$0xf] }
 0x971   :  { %11319 = vtanh.f32 %v3845_v8  ;;  %v3848_v3 = vmul.f32 0.5, %v3826_v50  ;;  %v11316_v15 = vpop.eup %11315  ;;  %v3858_v60 = vadd.f32 1.0, %v11314_v11  ;;  %v9091_v8 = vld [vmem:[#allocation55 + $0x10] sm:$0xf]  ;;  %v9093_v11 = vld [vmem:[#allocation55 + $0x18] sm:$0xf0] }
 0x972   :  { %11321 = vtanh.f32 %v3846_v17  ;;  %v3860_v35 = vadd.f32 1.0, %v11316_v15  ;;  %v10744_v17 = vld [vmem:[#allocation55 + $0x14] sm:$0xf] }
 0x973   :  { %11323 = vtanh.f32 %v3848_v3  ;;  %v3811_v38 = vpop.f32.mrf.mxu2  ;;  %v3866_v42 = vmul.f32 0.5, %v3858_v60  ;;  %v10780_v15 = vld [vmem:[#allocation55 + $0x134] sm:$0xf] }
 0x974   :  { %v3812_v51 = vadd.f32 %v3811_v38, %v3619_v9  ;;  %v3839_v20 = vpop.f32.mrf.mxu3  ;;  %v3868_v57 = vmul.f32 0.5, %v3860_v35  ;;  %v9143_v9 = vld [vmem:[#allocation55 + $0x78] sm:$0xf0]  ;;  %v10752_v60 = vld [vmem:[#allocation55 + $0x54] sm:$0xf] }
 0x975   :  { %v3840_v43 = vadd.f32 %v3839_v20, %v3621_v18  ;;  %v3874_v6 = vmul.f32 %v3866_v42, %v3796_v45  ;;  %v9108_v45 = vor.u32 %v10749_v29, %v9107_v27  ;;  %v9146_v7 = vor.u32 %v10756_v13, %v9143_v9  ;;  %v9099_v18 = vld [vmem:[#allocation55 + $0x20] sm:$0xf]  ;;  %v9245_v38 = vld [vmem:[#allocation55 + $0x138] sm:$0xf0]  ;;  %v9237_v42 = vld [vmem:[#allocation55 + $0x128] sm:$0xf0] }
 0x976   :  { %v11318_v12 = vpop.eup %11317  ;;  %v3847_v23 = vmul.f32 0.5, %v3812_v51  ;;  %v3876_v22 = vmul.f32 %v3868_v57, %v3824_v37  ;;  %v9112_v37 = vor.u32 %v10748_v1, %v9109_v4  ;;  %v9100_v28 = vor.u32 %v10747_v61, %v9099_v18  ;;  %v9083_v35 = vld [vmem:[#allocation55] sm:$0xf]  ;;  %v9203_v27 = vld [vmem:[#allocation55 + $0xe8] sm:$0xf0] }
 0x977   :  { %v11320_v36 = vpop.eup %11319  ;;  %v3849_v30 = vmul.f32 0.5, %v3840_v43  ;;  %v3859_v44 = vadd.f32 1.0, %v11318_v12  ;;  %4260 = vmatpush.bf16.msra.mxu1 %v9108_v45  ;;  %4360 = vmatpush.bf16.msrb.mxu0 %v9146_v7  ;;  %v9248_v20 = vor.u32 %v10780_v15, %v9245_v38  ;;  %v9125_v1 = vld [vmem:[#allocation55 + $0x50] sm:$0xf]  ;;  %v10753_v45 = vld [vmem:[#allocation55 + $0x54] sm:$0xf0] }
 0x978   :  { %v11322_v55 = vpop.eup %11321  ;;  %11325 = vtanh.f32 %v3847_v23  ;;  %v3861_v46 = vadd.f32 1.0, %v11320_v36  ;;  %4273 = vmatpush.bf16.msrb.mxu2 %v9112_v37  ;;  %v10743_v23 = vld [vmem:[#allocation55 + $0x4] sm:$0xf0]  ;;  %v10742_v36 = vld [vmem:[#allocation55 + $0x4] sm:$0xf]  ;;  %v9126_v37 = vor.u32 %v10753_v45, %v9125_v1 }
 0x979   :  { %v11324_v31 = vpop.eup %11323  ;;  %v3862_v10 = vadd.f32 1.0, %v11322_v55  ;;  %11327 = vtanh.f32 %v3849_v30  ;;  %v3867_v58 = vmul.f32 0.5, %v3859_v44  ;;  %4603 = vmatpush.bf16.msra.mxu3 %v9248_v20  ;;  %v9084_v30 = vor.u32 %v10743_v23, %v9083_v35  ;;  %v9085_v55 = vld [vmem:[#allocation55 + $0x8] sm:$0xf0]  ;;  %v9159_v4 = vld [vmem:[#allocation55 + $0x90] sm:$0xf] }
 0x97a   :  { %v3864_v56 = vadd.f32 1.0, %v11324_v31  ;;  %v3869_v33 = vmul.f32 0.5, %v3861_v46  ;;  %v10778_v31 = vld [vmem:[#allocation55 + $0x124] sm:$0xf]  ;;  %v9119_v44 = vld [vmem:[#allocation55 + $0x48] sm:$0xf0] }
 0x97b   :  { %v3870_v59 = vmul.f32 0.5, %v3862_v10  ;;  %v3875_v26 = vmul.f32 %v3867_v58, %v3810_v53  ;;  %v10746_v53 = vld [vmem:[#allocation55 + $0x24] sm:$0xf]  ;;  %4261 = vmatpush.bf16.msra.mxu1 %v9100_v28  ;;  %v9088_v10 = vor.u32 %v10742_v36, %v9085_v55  ;;  %v9240_v57 = vor.u32 %v10778_v31, %v9237_v42  ;;  %v9141_v46 = vld [vmem:[#allocation55 + $0x70] sm:$0xf] }
 0x97c   :  { %v3872_v5 = vmul.f32 0.5, %v3864_v56  ;;  %v3877_v47 = vmul.f32 %v3869_v33, %v3838_v48  ;;  %v9101_v48 = vld [vmem:[#allocation55 + $0x28] sm:$0xf0]  ;;  %v10750_v56 = vld [vmem:[#allocation55 + $0x44] sm:$0xf] }
 0x97d   :  { %v3878_v49 = vmul.f32 %v3870_v59, %v3798_v39  ;;  %v9104_v62 = vor.u32 %v10746_v53, %v9101_v48  ;;  %v9135_v39 = vld [vmem:[#allocation55 + $0x68] sm:$0xf0]  ;;  %v9122_v59 = vor.u32 %v10750_v56, %v9119_v44  ;;  %4604 = vmatpush.bf16.msra.mxu3 %v9240_v57  ;;  %v10772_v58 = vld [vmem:[#allocation55 + $0xf4] sm:$0xf]  ;;  %v10761_v13 = vld [vmem:[#allocation55 + $0x94] sm:$0xf0] }
 0x97e   :  { %v11326_v25 = vpop.eup %11325  ;;  %v3880_v63 = vmul.f32 %v3872_v5, %v3826_v50  ;;  %v9138_v41 = vor.u32 %v10754_v34, %v9135_v39  ;;  %v10745_v50 = vld [vmem:[#allocation55 + $0x14] sm:$0xf0]  ;;  %v10796_v9 = vld [vmem:[#allocation55 + $0x1b4] sm:$0xf]  ;;  %v9313_v7 = vld [vmem:[#allocation55 + $0x1b8] sm:$0xf0]  ;;  %v9160_v18 = vor.u32 %v10761_v13, %v9159_v4 }
 0x97f   :  { %v11328_v32 = vpop.eup %11327  ;;  %v3882_v19 = vpack.c.bf16 %v3878_v49, %v3874_v6  ;;  %v3863_v16 = vadd.f32 1.0, %v11326_v25  ;;  %4274 = vmatpush.bf16.msrb.mxu2 %v9104_v62  ;;  %v9092_v3 = vor.u32 %v10745_v50, %v9091_v8  ;;  %v10757_v5 = vld [vmem:[#allocation55 + $0x74] sm:$0xf0]  ;;  %v9175_v6 = vld [vmem:[#allocation55 + $0xb0] sm:$0xf]  ;;  %v9316_v61 = vor.u32 %v10796_v9, %v9313_v7 }
 0x980   :  { %v3884_v0 = vpack.c.bf16 %v3880_v63, %v3876_v22  ;;  %v3865_v14 = vadd.f32 1.0, %v11328_v32  ;;  %4361 = vmatpush.bf16.msrb.mxu0 %v9138_v41  ;;  %v9142_v49 = vor.u32 %v10757_v5, %v9141_v46  ;;  %v10765_v25 = vld [vmem:[#allocation55 + $0xb4] sm:$0xf0]  ;;  %v10776_v22 = vld [vmem:[#allocation55 + $0x114] sm:$0xf] }
 0x981   :  { %v3871_v2 = vmul.f32 0.5, %v3863_v16  ;;  %4154 = vmatmul.bf16.vlgmr.msrb.gmra.mxu1 %v3882_v19  ;;  %v9176_v63 = vor.u32 %v10765_v25, %v9175_v6  ;;  %v9229_v32 = vld [vmem:[#allocation55 + $0x118] sm:$0xf0]  ;;  %v10768_v53 = vld [vmem:[#allocation55 + $0xd4] sm:$0xf] }
 0x982   :  { %v3873_v54 = vmul.f32 0.5, %v3865_v14  ;;  %4182 = vmatmul.bf16.vlgmr.msra.gmra.mxu0 %v3884_v0  ;;  %4262 = vmatpush.bf16.msra.mxu1 %v9092_v3  ;;  %v9211_v19 = vld [vmem:[#allocation55 + $0xf8] sm:$0xf0]  ;;  %v9232_v16 = vor.u32 %v10776_v22, %v9229_v32  ;;  %v9133_v0 = vld [vmem:[#allocation55 + $0x60] sm:$0xf] }
 0x983   :  { %v3879_v24 = vmul.f32 %v3871_v2, %v3812_v51  ;;  %v9096_v51 = vor.u32 %v10744_v17, %v9093_v11  ;;  %v9214_v33 = vor.u32 %v10772_v58, %v9211_v19  ;;  %v10755_v14 = vld [vmem:[#allocation55 + $0x64] sm:$0xf0]  ;;  %v9167_v2 = vld [vmem:[#allocation55 + $0xa0] sm:$0xf]  ;;  %v9195_v28 = vld [vmem:[#allocation55 + $0xd8] sm:$0xf0] }
 0x984   :  { %v3881_v52 = vmul.f32 %v3873_v54, %v3840_v43  ;;  %v9127_v43 = vld [vmem:[#allocation55 + $0x58] sm:$0xf0]  ;;  %4605 = vmatpush.bf16.msra.mxu3 %v9232_v16  ;;  %v9134_v54 = vor.u32 %v10755_v14, %v9133_v0  ;;  %v9117_v48 = vld [vmem:[#allocation55 + $0x40] sm:$0xf]  ;;  %v9198_v62 = vor.u32 %v10768_v53, %v9195_v28  ;;  %v10751_v34 = vld [vmem:[#allocation55 + $0x44] sm:$0xf0] }
 0x985   :  { %v3883_v40 = vpack.c.bf16 %v3879_v24, %v3875_v26  ;;  %v9130_v12 = vor.u32 %v10752_v60, %v9127_v43  ;;  %4275 = vmatpush.bf16.msrb.mxu2 %v9096_v51  ;;  %v10763_v26 = vld [vmem:[#allocation55 + $0xa4] sm:$0xf0]  ;;  %v10774_v24 = vld [vmem:[#allocation55 + $0x104] sm:$0xf]  ;;  %v9151_v39 = vld [vmem:[#allocation55 + $0x80] sm:$0xf]  ;;  %v9118_v8 = vor.u32 %v10751_v34, %v9117_v48 }
 0x986   :  { %v3885_v21 = vpack.c.bf16 %v3881_v52, %v3877_v47  ;;  %4263 = vmatpush.bf16.msra.mxu1 %v9084_v30  ;;  %v9221_v47 = vld [vmem:[#allocation55 + $0x108] sm:$0xf0]  ;;  %v9168_v52 = vor.u32 %v10763_v26, %v9167_v2  ;;  %v10759_v41 = vld [vmem:[#allocation55 + $0x84] sm:$0xf0]  ;;  %v10794_v17 = vld [vmem:[#allocation55 + $0x1a4] sm:$0xf] }
 0x987   :  { %4168 = vmatmul.bf16.vlgmr.msra.gmra.mxu2 %v3883_v40  ;;  %4362 = vmatpush.bf16.msrb.mxu0 %v9130_v12  ;;  %v9224_v40 = vor.u32 %v10774_v24, %v9221_v47  ;;  %v9152_v50 = vor.u32 %v10759_v41, %v9151_v39  ;;  %v9305_v3 = vld [vmem:[#allocation55 + $0x1a8] sm:$0xf0]  ;;  %v10766_v11 = vld [vmem:[#allocation55 + $0xc4] sm:$0xf]  ;;  %v10792_v20 = vld [vmem:[#allocation55 + $0x194] sm:$0xf] }
 0x988   :  { %4196 = vmatmul.bf16.vlgmr.msrb.gmra.mxu3 %v3885_v21  ;;  %v10770_v21 = vld [vmem:[#allocation55 + $0xe4] sm:$0xf]  ;;  %v9308_v15 = vor.u32 %v10794_v17, %v9305_v3  ;;  %v9187_v38 = vld [vmem:[#allocation55 + $0xc8] sm:$0xf0]  ;;  %v9297_v60 = vld [vmem:[#allocation55 + $0x198] sm:$0xf0] }
 0x989   :  { %4276 = vmatpush.bf16.msrb.mxu2 %v9088_v10  ;;  %v9206_v29 = vor.u32 %v10770_v21, %v9203_v27  ;;  %4606 = vmatpush.bf16.msra.mxu3 %v9224_v40  ;;  %v9190_v51 = vor.u32 %v10766_v11, %v9187_v38  ;;  %v9300_v12 = vor.u32 %v10792_v20, %v9297_v60  ;;  %v11204_v35 = vld [vmem:[#allocation16] ss:$0 sm:$0xff]  ;;  %v10790_v23 = vld [vmem:[#allocation55 + $0x184] sm:$0xf]  ;;  %v9289_v36 = vld [vmem:[#allocation55 + $0x188] sm:$0xf0] }
 0x98a   :  { %4347 = vmatpush.bf16.msrb.mxu1 %v9142_v49  ;;  %v9292_v30 = vor.u32 %v10790_v23, %v9289_v36  ;;  %v10764_v56 = vld [vmem:[#allocation55 + $0xb4] sm:$0xf]  ;;  %v9243_v46 = vld [vmem:[#allocation55 + $0x130] sm:$0xf]  ;;  %v10781_v5 = vld [vmem:[#allocation55 + $0x134] sm:$0xf0] }
 0x98b   :  { %4363 = vmatpush.bf16.msrb.mxu0 %v9122_v59  ;;  %v9177_v59 = vld [vmem:[#allocation55 + $0xb8] sm:$0xf0]  ;;  %v10788_v25 = vld [vmem:[#allocation55 + $0x174] sm:$0xf]  ;;  %v9244_v32 = vor.u32 %v10781_v5, %v9243_v46  ;;  %v10762_v58 = vld [vmem:[#allocation55 + $0xa4] sm:$0xf] }
 0x98c   :  { %v9279_v22 = vld [vmem:[#allocation55 + $0x178] sm:$0xf0]  ;;  %v9235_v0 = vld [vmem:[#allocation55 + $0x120] sm:$0xf]  ;;  %v10779_v14 = vld [vmem:[#allocation55 + $0x124] sm:$0xf0] }
 0x98d   :  { %4428 = vmatpush.bf16.msra.mxu2 %v9176_v63  ;;  %4766 = vmatpush.bf16.msrb.mxu3 %v9316_v61  ;;  %v9180_v63 = vor.u32 %v10764_v56, %v9177_v59  ;;  %v10786_v47 = vld [vmem:[#allocation55 + $0x164] sm:$0xf]  ;;  %v9236_v27 = vor.u32 %v10779_v14, %v9235_v0  ;;  %v9161_v45 = vld [vmem:[#allocation55 + $0x98] sm:$0xf0]  ;;  %v9227_v4 = vld [vmem:[#allocation55 + $0x110] sm:$0xf] }
 0x98e   :  { %4348 = vmatpush.bf16.msrb.mxu1 %v9134_v54  ;;  %v9282_v54 = vor.u32 %v10788_v25, %v9279_v22  ;;  %v9263_v61 = vld [vmem:[#allocation55 + $0x158] sm:$0xf0]  ;;  %v10758_v48 = vld [vmem:[#allocation55 + $0x84] sm:$0xf]  ;;  %v9153_v34 = vld [vmem:[#allocation55 + $0x88] sm:$0xf0] }
 0x98f   :  { %4522 = vmatpush.bf16.msra.mxu0 %v9214_v33  ;;  %v9169_v33 = vld [vmem:[#allocation55 + $0xa8] sm:$0xf0]  ;;  %v9219_v39 = vld [vmem:[#allocation55 + $0x100] sm:$0xf]  ;;  %v10775_v41 = vld [vmem:[#allocation55 + $0x104] sm:$0xf0]  ;;  %v9156_v3 = vor.u32 %v10758_v48, %v9153_v34 }
 0x990   :  { %v9172_v21 = vor.u32 %v10762_v58, %v9169_v33  ;;  %v9255_v17 = vld [vmem:[#allocation55 + $0x148] sm:$0xf0]  ;;  %v9220_v11 = vor.u32 %v10775_v41, %v9219_v39  ;;  %v10773_v38 = vld [vmem:[#allocation55 + $0xf4] sm:$0xf0]  ;;  %v10802_v56 = vld [vmem:[#allocation55 + $0x1e4] sm:$0xf] }
 0x991   :  { %4429 = vmatpush.bf16.msra.mxu2 %v9168_v52  ;;  %4767 = vmatpush.bf16.msrb.mxu3 %v9308_v15  ;;  %v9271_v52 = vld [vmem:[#allocation55 + $0x168] sm:$0xf0]  ;;  %v9209_v15 = vld [vmem:[#allocation55 + $0xf0] sm:$0xf]  ;;  %v10797_v20 = vld [vmem:[#allocation55 + $0x1b4] sm:$0xf0] }
 0x992   :  { %4349 = vmatpush.bf16.msrb.mxu1 %v9126_v37  ;;  %v10777_v37 = vld [vmem:[#allocation55 + $0x114] sm:$0xf0]  ;;  %v9274_v9 = vor.u32 %v10786_v47, %v9271_v52  ;;  %v9210_v23 = vor.u32 %v10773_v38, %v9209_v15  ;;  %v9193_v5 = vld [vmem:[#allocation55 + $0xd0] sm:$0xf]  ;;  %v9185_v33 = vld [vmem:[#allocation55 + $0xc0] sm:$0xf] }
 0x993   :  { %4523 = vmatpush.bf16.msra.mxu0 %v9206_v29  ;;  %v10760_v29 = vld [vmem:[#allocation55 + $0x94] sm:$0xf]  ;;  %v9228_v28 = vor.u32 %v10777_v37, %v9227_v4  ;;  %v10793_v25 = vld [vmem:[#allocation55 + $0x194] sm:$0xf0]  ;;  %v10767_v0 = vld [vmem:[#allocation55 + $0xc4] sm:$0xf0] }
 0x994   :  { %v9164_v53 = vor.u32 %v10760_v29, %v9161_v45  ;;  %v9323_v47 = vld [vmem:[#allocation55 + $0x1c8] sm:$0xf0]  ;;  %v9186_v52 = vor.u32 %v10767_v0, %v9185_v33  ;;  %v9269_v45 = vld [vmem:[#allocation55 + $0x160] sm:$0xf]  ;;  %v10787_v4 = vld [vmem:[#allocation55 + $0x164] sm:$0xf0] }
 0x995   :  { %4430 = vmatpush.bf16.msra.mxu2 %v9160_v18  ;;  %4768 = vmatpush.bf16.msrb.mxu3 %v9300_v12  ;;  %v10784_v18 = vld [vmem:[#allocation55 + $0x154] sm:$0xf]  ;;  %v9347_v12 = vld [vmem:[#allocation55 + $0x1f8] sm:$0xf0]  ;;  %v9345_v48 = vld [vmem:[#allocation55 + $0x1f0] sm:$0xf] }
 0x996   :  { %4350 = vmatpush.bf16.msrb.mxu1 %v9118_v8  ;;  %v9266_v8 = vor.u32 %v10784_v18, %v9263_v61  ;;  %v9253_v61 = vld [vmem:[#allocation55 + $0x140] sm:$0xf]  ;;  %v10805_v34 = vld [vmem:[#allocation55 + $0x1f4] sm:$0xf0]  ;;  %v10831_v33 = vld [vmem:[#allocation56 + $0xc4] sm:$0xf0] }
 0x997   :  { %4524 = vmatpush.bf16.msra.mxu0 %v9198_v62  ;;  %v9346_v39 = vor.u32 %v10805_v34, %v9345_v48  ;;  %v9337_v41 = vld [vmem:[#allocation55 + $0x1e0] sm:$0xf]  ;;  %v10830_v0 = vld [vmem:[#allocation56 + $0xc4] sm:$0xf]  ;;  %v9427_v34 = vld [vmem:[#allocation56 + $0x90] sm:$0xf] }
 0x998   :  { %v9321_v38 = vld [vmem:[#allocation55 + $0x1c0] sm:$0xf] }
 0x999   :  { %4431 = vmatpush.bf16.msra.mxu2 %v9152_v50  ;;  %4769 = vmatpush.bf16.msrb.mxu3 %v9292_v30  ;;  %v10782_v50 = vld [vmem:[#allocation55 + $0x144] sm:$0xf]  ;;  %v9201_v30 = vld [vmem:[#allocation55 + $0xe0] sm:$0xf] }
 0x99a   :  { %v9258_v60 = vor.u32 %v10782_v50, %v9255_v17 }
 0x99b   :  { %4525 = vmatpush.bf16.msra.mxu0 %v9190_v51  ;;  %v9311_v51 = vld [vmem:[#allocation55 + $0x1b0] sm:$0xf] }
 0x99c   :  { %v9312_v36 = vor.u32 %v10797_v20, %v9311_v51  ;;  %v10799_v51 = vld [vmem:[#allocation55 + $0x1c4] sm:$0xf0] }
 0x99d   :  { %v9322_v20 = vor.u32 %v10799_v51, %v9321_v38 }
 0x9fe   :  { %v4155_v43 = vpop.f32.mrf.mxu1 }
 0x9ff   :  { %v4156_v55 = vadd.f32 %v11204_v35, %v4155_v43  ;;  %v4183_v31 = vpop.f32.mrf.mxu0  ;;  %v10804_v43 = vld [vmem:[#allocation55 + $0x1f4] sm:$0xf] }
 0xa06   :  { %v4157_v6 = vpop.f32.mrf.mxu1 }
 0xa07   :  { %v4158_v19 = vadd.f32 %v11204_v35, %v4157_v6  ;;  %v4185_v40 = vpop.f32.mrf.mxu0  ;;  %v10769_v6 = vld [vmem:[#allocation55 + $0xd4] sm:$0xf0] }
 0xa08   :  { %v9194_v58 = vor.u32 %v10769_v6, %v9193_v5  ;;  %v10833_v5 = vld [vmem:[#allocation56 + $0xd4] sm:$0xf0]  ;;  %v10832_v6 = vld [vmem:[#allocation56 + $0xd4] sm:$0xf] }
 0xa0a   :  { %v4169_v42 = vpop.f32.mrf.mxu2 }
 0xa0b   :  { %v4170_v10 = vadd.f32 %v4169_v42, %v4156_v55  ;;  %v4197_v57 = vpop.f32.mrf.mxu3  ;;  %v10771_v55 = vld [vmem:[#allocation55 + $0xe4] sm:$0xf0] }
 0xa0c   :  { %v10795_v42 = vld [vmem:[#allocation55 + $0x1a4] sm:$0xf0]  ;;  %v9202_v59 = vor.u32 %v10771_v55, %v9201_v30 }
 0xa0d   :  { %v4184_v44 = vadd.f32 %v4183_v31, %v4170_v10  ;;  %v9303_v31 = vld [vmem:[#allocation55 + $0x1a0] sm:$0xf]  ;;  %v9350_v10 = vor.u32 %v10804_v43, %v9347_v12  ;;  %v10837_v43 = vld [vmem:[#allocation56 + $0xf4] sm:$0xf0]  ;;  %v10836_v12 = vld [vmem:[#allocation56 + $0xf4] sm:$0xf] }
 0xa0e   :  { %v9304_v46 = vor.u32 %v10795_v42, %v9303_v31  ;;  %v9467_v31 = vld [vmem:[#allocation56 + $0xe0] sm:$0xf]  ;;  %v10835_v42 = vld [vmem:[#allocation56 + $0xe4] sm:$0xf0] }
 0xa0f   :  { %v4198_v49 = vadd.f32 %v4197_v57, %v4184_v44  ;;  %v9339_v44 = vld [vmem:[#allocation55 + $0x1e8] sm:$0xf0] }
 0xa10   :  { %v9342_v22 = vor.u32 %v10802_v56, %v9339_v44  ;;  %v9468_v56 = vor.u32 %v10835_v42, %v9467_v31  ;;  %v9469_v44 = vld [vmem:[#allocation56 + $0xe8] sm:$0xf0]  ;;  %v10820_v31 = vld [vmem:[#allocation56 + $0x74] sm:$0xf] }
 0xa11   :  { %v13923_v16 = vpack.c.bf16 %v4198_v49, %v4198_v49  ;;  %v9295_v49 = vld [vmem:[#allocation55 + $0x190] sm:$0xf] }
 0xa12   :  { %v4171_v2 = vpop.f32.mrf.mxu2 }
 0xa13   :  { %v4299_v26 = vrot.slane %v13923_v16, 1  ;;  %v4172_v24 = vadd.f32 %v4171_v2, %v4158_v19  ;;  %9113 = vmatmul.msk.bf16.vlgmr.msra.gmra.mxu1 %vm4252_vm6, %v13923_v16  ;;  %9114 = vmatmul.msk.bf16.vlgmr.msrb.gmra.mxu2 %vm4252_vm6, %v13923_v16  ;;  %v4199_v13 = vpop.f32.mrf.mxu3  ;;  %v4380_v35 = vrot.slane %v13923_v16, 2  ;;  %v4461_v57 = vrot.slane %v13923_v16, 3  ;;  %v9287_v2 = vld [vmem:[#allocation55 + $0x180] sm:$0xf] }
 0xa14   :  { %4441 = vmatpush.bf16.msra.mxu1 %v9180_v63  ;;  %4590 = vmatpush.bf16.msrb.mxu2 %v9244_v32  ;;  %v10800_v63 = vld [vmem:[#allocation55 + $0x1d4] sm:$0xf]  ;;  %v9331_v32 = vld [vmem:[#allocation55 + $0x1d8] sm:$0xf0]  ;;  %v9296_v19 = vor.u32 %v10793_v25, %v9295_v49 }
 0xa15   :  { %v4186_v1 = vadd.f32 %v4185_v40, %v4172_v24  ;;  %9148 = vmatmul.msk.bf16.vlgmr.msrb.gmra.mxu0 %vm4252_vm6, %v4299_v26  ;;  %v10798_v24 = vld [vmem:[#allocation55 + $0x1c4] sm:$0xf] }
 0xa16   :  { %4685 = vmatpush.bf16.msrb.mxu0 %v9282_v54  ;;  %v10791_v54 = vld [vmem:[#allocation55 + $0x184] sm:$0xf0]  ;;  %v9326_v29 = vor.u32 %v10798_v24, %v9323_v47  ;;  %v9443_v24 = vld [vmem:[#allocation56 + $0xb0] sm:$0xf]  ;;  %v10829_v47 = vld [vmem:[#allocation56 + $0xb4] sm:$0xf0] }
 0xa17   :  { %v4200_v7 = vadd.f32 %v4199_v13, %v4186_v1  ;;  %v9288_v40 = vor.u32 %v10791_v54, %v9287_v2  ;;  %v9270_v13 = vor.u32 %v10787_v4, %v9269_v45  ;;  %v9453_v54 = vld [vmem:[#allocation56 + $0xc8] sm:$0xf0] }
 0xa18   :  { %4442 = vmatpush.bf16.msra.mxu1 %v9172_v21  ;;  %4591 = vmatpush.bf16.msrb.mxu2 %v9236_v27  ;;  %v9277_v21 = vld [vmem:[#allocation55 + $0x170] sm:$0xf]  ;;  %v10789_v27 = vld [vmem:[#allocation55 + $0x174] sm:$0xf0] }
 0xa19   :  { %v13931_v62 = vpack.c.bf16 %v4200_v7, %v4200_v7  ;;  %v9278_v1 = vor.u32 %v10789_v27, %v9277_v21  ;;  %v10785_v7 = vld [vmem:[#allocation55 + $0x154] sm:$0xf0] }
 0xa1a   :  { %4686 = vmatpush.bf16.msrb.mxu0 %v9274_v9  ;;  %v9261_v9 = vld [vmem:[#allocation55 + $0x150] sm:$0xf] }
 0xa1b   :  { %9250 = vmatmul.msk.bf16.vlgmr.msra.gmra.mxu3 %vm4252_vm6, %v13931_v62  ;;  %v4705_v14 = vrot.slane %v13931_v62, 2  ;;  %v4624_v37 = vrot.slane %v13931_v62, 1  ;;  %v9262_v18 = vor.u32 %v10785_v7, %v9261_v9  ;;  %v4786_v50 = vrot.slane %v13931_v62, 3  ;;  %v10827_v9 = vld [vmem:[#allocation56 + $0xa4] sm:$0xf0] }
 0xa1c   :  { %4443 = vmatpush.bf16.msra.mxu1 %v9164_v53  ;;  %4592 = vmatpush.bf16.msrb.mxu2 %v9228_v28  ;;  %v10783_v53 = vld [vmem:[#allocation55 + $0x144] sm:$0xf0]  ;;  %v10826_v7 = vld [vmem:[#allocation56 + $0xa4] sm:$0xf] }
 0xa1d   :  { %v9254_v28 = vor.u32 %v10783_v53, %v9253_v61  ;;  %v9437_v53 = vld [vmem:[#allocation56 + $0xa8] sm:$0xf0] }
 0xa1e   :  { %4687 = vmatpush.bf16.msrb.mxu0 %v9266_v8  ;;  %v10803_v8 = vld [vmem:[#allocation55 + $0x1e4] sm:$0xf0]  ;;  %v9440_v48 = vor.u32 %v10826_v7, %v9437_v53  ;;  %v9379_v7 = vld [vmem:[#allocation56 + $0x30] sm:$0xf] }
 0xa1f   :  { %v9338_v17 = vor.u32 %v10803_v8, %v9337_v41  ;;  %v10824_v41 = vld [vmem:[#allocation56 + $0x94] sm:$0xf] }
 0xa20   :  { %4444 = vmatpush.bf16.msra.mxu1 %v9156_v3  ;;  %4593 = vmatpush.bf16.msrb.mxu2 %v9220_v11  ;;  %v9329_v3 = vld [vmem:[#allocation55 + $0x1d0] sm:$0xf]  ;;  %v10801_v11 = vld [vmem:[#allocation55 + $0x1d4] sm:$0xf0] }
 0xa21   :  { %v9330_v15 = vor.u32 %v10801_v11, %v9329_v3  ;;  %v9429_v3 = vld [vmem:[#allocation56 + $0x98] sm:$0xf0] }
 0xa22   :  { %4688 = vmatpush.bf16.msrb.mxu0 %v9258_v60  ;;  %v9475_v60 = vld [vmem:[#allocation56 + $0xf0] sm:$0xf] }
 0xa23   :  { %9147 = vmatmul.msk.bf16.vlgmr.msrb.gmra.mxu1 %vm4252_vm6, %v4299_v26  ;;  %9181 = vmatmul.msk.bf16.vlgmr.msra.gmra.mxu2 %vm4252_vm6, %v4380_v35  ;;  %v9334_v26 = vor.u32 %v10800_v63, %v9331_v32  ;;  %v9461_v63 = vld [vmem:[#allocation56 + $0xd8] sm:$0xf0] }
 0xa24   :  { %4509 = vmatpush.bf16.msrb.mxu1 %v9210_v23  ;;  %4753 = vmatpush.bf16.msra.mxu2 %v9312_v36  ;;  %v9476_v23 = vor.u32 %v10837_v43, %v9475_v60  ;;  %v9477_v36 = vld [vmem:[#allocation56 + $0xf8] sm:$0xf0]  ;;  %v9464_v32 = vor.u32 %v10832_v6, %v9461_v63  ;;  %v10823_v60 = vld [vmem:[#allocation56 + $0x84] sm:$0xf0]  ;;  %v10822_v43 = vld [vmem:[#allocation56 + $0x84] sm:$0xf] }
 0xa25   :  { %9216 = vmatmul.msk.bf16.vlgmr.msra.gmra.mxu0 %vm4252_vm6, %v4461_v57  ;;  %v9480_v30 = vor.u32 %v10836_v12, %v9477_v36  ;;  %v9395_v63 = vld [vmem:[#allocation56 + $0x50] sm:$0xf] }
 0xa26   :  { %4847 = vmatpush.bf16.msra.mxu0 %v9350_v10  ;;  %5081 = vmatpush.bf16.msra.mxu3 %v9476_v23  ;;  %v10834_v10 = vld [vmem:[#allocation56 + $0xe4] sm:$0xf]  ;;  %v9421_v23 = vld [vmem:[#allocation56 + $0x88] sm:$0xf0] }
 0xa27   :  { %v9424_v36 = vor.u32 %v10822_v43, %v9421_v23 }
 0xa28   :  { %4510 = vmatpush.bf16.msrb.mxu1 %v9202_v59  ;;  %4754 = vmatpush.bf16.msra.mxu2 %v9304_v46  ;;  %v9472_v59 = vor.u32 %v10834_v10, %v9469_v44  ;;  %v9459_v46 = vld [vmem:[#allocation56 + $0xd0] sm:$0xf]  ;;  %v9413_v10 = vld [vmem:[#allocation56 + $0x78] sm:$0xf0] }
 0xa2a   :  { %4848 = vmatpush.bf16.msra.mxu0 %v9342_v22  ;;  %5082 = vmatpush.bf16.msra.mxu3 %v9468_v56  ;;  %v9460_v22 = vor.u32 %v10833_v5, %v9459_v46  ;;  %v10819_v46 = vld [vmem:[#allocation56 + $0x64] sm:$0xf0]  ;;  %v10818_v5 = vld [vmem:[#allocation56 + $0x64] sm:$0xf] }
 0xa2b   :  { %9318 = vmatmul.msk.bf16.vlgmr.msrb.gmra.mxu3 %vm4252_vm6, %v4705_v14 }
 0xa2c   :  { %4511 = vmatpush.bf16.msrb.mxu1 %v9194_v58  ;;  %4755 = vmatpush.bf16.msra.mxu2 %v9296_v19  ;;  %v9451_v19 = vld [vmem:[#allocation56 + $0xc0] sm:$0xf] }
 0xa2d   :  { %v9452_v2 = vor.u32 %v10831_v33, %v9451_v19 }
 0xa2e   :  { %4849 = vmatpush.bf16.msra.mxu0 %v9334_v26  ;;  %5083 = vmatpush.bf16.msra.mxu3 %v9460_v22  ;;  %v9456_v26 = vor.u32 %v10830_v0, %v9453_v54  ;;  %v9405_v22 = vld [vmem:[#allocation56 + $0x68] sm:$0xf0]  ;;  %v10816_v0 = vld [vmem:[#allocation56 + $0x54] sm:$0xf] }
 0xa2f   :  { %v9408_v33 = vor.u32 %v10818_v5, %v9405_v22  ;;  %v10806_v22 = vld [vmem:[#allocation56 + $0x4] sm:$0xf] }
 0xa30   :  { %4512 = vmatpush.bf16.msrb.mxu1 %v9186_v52  ;;  %4756 = vmatpush.bf16.msra.mxu2 %v9288_v40  ;;  %v10828_v52 = vld [vmem:[#allocation56 + $0xb4] sm:$0xf]  ;;  %v13965_v40 = vld [vmem:[#allocation50] sm:$0x3] }
 0xa31   :  { %v4284_v45 = vperm.slane %v13965_v40, 1 }
 0xa32   :  { %4850 = vmatpush.bf16.msra.mxu0 %v9326_v29  ;;  %5084 = vmatpush.bf16.msra.mxu3 %v9452_v2  ;;  %v9444_v29 = vor.u32 %v10829_v47, %v9443_v24 }
 0xa33   :  { %9182 = vmatmul.msk.bf16.vlgmr.msra.gmra.mxu1 %vm4252_vm6, %v4380_v35  ;;  %9249 = vmatmul.msk.bf16.vlgmr.msrb.gmra.mxu2 %vm4252_vm6, %v13931_v62 }
 0xa34   :  { %4672 = vmatpush.bf16.msra.mxu1 %v9278_v1  ;;  %v9445_v1 = vld [vmem:[#allocation56 + $0xb8] sm:$0xf0] }
 0xa35   :  { %9284 = vmatmul.msk.bf16.vlgmr.msrb.gmra.mxu0 %vm4252_vm6, %v4624_v37  ;;  %v9448_v4 = vor.u32 %v10828_v52, %v9445_v1  ;;  %v9387_v52 = vld [vmem:[#allocation56 + $0x40] sm:$0xf] }
 0xa36   :  { %5107 = vmatpush.bf16.msrb.mxu0 %v9480_v30  ;;  %5085 = vmatpush.bf16.msra.mxu3 %v9444_v29  ;;  %v9411_v30 = vld [vmem:[#allocation56 + $0x70] sm:$0xf]  ;;  %v10814_v29 = vld [vmem:[#allocation56 + $0x44] sm:$0xf] }
 0xa38   :  { %4673 = vmatpush.bf16.msra.mxu1 %v9270_v13  ;;  %v9435_v13 = vld [vmem:[#allocation56 + $0xa0] sm:$0xf] }
 0xa39   :  { %v9436_v61 = vor.u32 %v10827_v9, %v9435_v13 }
 0xa3a   :  { %5108 = vmatpush.bf16.msrb.mxu0 %v9472_v59  ;;  %v9403_v59 = vld [vmem:[#allocation56 + $0x60] sm:$0xf] }
 0xa3b   :  { %5086 = vmatpush.bf16.msra.mxu3 %v9436_v61  ;;  %v10812_v61 = vld [vmem:[#allocation56 + $0x34] sm:$0xf] }
 0xa3c   :  { %4674 = vmatpush.bf16.msra.mxu1 %v9262_v18 }
 0xa3e   :  { %5109 = vmatpush.bf16.msrb.mxu0 %v9464_v32  ;;  %v10817_v32 = vld [vmem:[#allocation56 + $0x54] sm:$0xf0] }
 0xa3f   :  { %v9396_v54 = vor.u32 %v10817_v32, %v9395_v63 }
 0xa40   :  { %4675 = vmatpush.bf16.msra.mxu1 %v9254_v28 }
 0xa42   :  { %5110 = vmatpush.bf16.msrb.mxu0 %v9456_v26 }
 0xa43   :  { %9215 = vmatmul.msk.bf16.vlgmr.msrb.gmra.mxu1 %vm4252_vm6, %v4461_v57  ;;  %9317 = vmatmul.msk.bf16.vlgmr.msra.gmra.mxu2 %vm4252_vm6, %v4705_v14 }
 0xa44   :  { %4834 = vmatpush.bf16.msrb.mxu1 %v9346_v39  ;;  %v10825_v39 = vld [vmem:[#allocation56 + $0x94] sm:$0xf0] }
 0xa45   :  { %9352 = vmatmul.msk.bf16.vlgmr.msra.gmra.mxu0 %vm4252_vm6, %v4786_v50 }
 0xa46   :  { %5111 = vmatpush.bf16.msrb.mxu0 %v9448_v4  ;;  %v9389_v4 = vld [vmem:[#allocation56 + $0x48] sm:$0xf0] }
 0xa48   :  { %4835 = vmatpush.bf16.msrb.mxu1 %v9338_v17  ;;  %v9428_v17 = vor.u32 %v10825_v39, %v9427_v34  ;;  %v9565_v34 = vld [vmem:[#allocation19 + $0x28] sm:$0xf0] }
 0xa4a   :  { %5112 = vmatpush.bf16.msrb.mxu0 %v9440_v48  ;;  %5087 = vmatpush.bf16.msra.mxu3 %v9428_v17  ;;  %v10858_v48 = vld [vmem:[#allocation19 + $0x24] sm:$0xf] }
 0xa4c   :  { %4836 = vmatpush.bf16.msrb.mxu1 %v9330_v15  ;;  %v9432_v15 = vor.u32 %v10824_v41, %v9429_v3  ;;  %v10811_v3 = vld [vmem:[#allocation56 + $0x24] sm:$0xf0] }
 0xa4e   :  { %5113 = vmatpush.bf16.msrb.mxu0 %v9432_v15 }
 0xa50   :  { %4837 = vmatpush.bf16.msrb.mxu1 %v9322_v20  ;;  %v9419_v20 = vld [vmem:[#allocation56 + $0x80] sm:$0xf] }
 0xa52   :  { %5114 = vmatpush.bf16.msrb.mxu0 %v9424_v36  ;;  %v9363_v36 = vld [vmem:[#allocation56 + $0x10] sm:$0xf] }
 0xa53   :  { %9283 = vmatmul.msk.bf16.vlgmr.msra.gmra.mxu1 %vm4252_vm6, %v4624_v37 }
 0xa63   :  { %9351 = vmatmul.msk.bf16.vlgmr.msrb.gmra.mxu1 %vm4252_vm6, %v4786_v50 }
 0xa90   :  { %v13957_v16 = vpop.f32.mrf.mxu1 }
 0xa92   :  { %v13959_v62 = vpop.f32.mrf.mxu0 }
 0xa96   :  { %v4278_v35 = vpop.f32.mrf.mxu2 }
 0xa97   :  { %v4288_v28 = vadd.f32 %v4284_v45, %v4278_v35  ;;  %v9420_v35 = vor.u32 %v10823_v60, %v9419_v20  ;;  %v10856_v20 = vld [vmem:[#allocation19 + $0x14] sm:$0xf]  ;;  %v9557_v60 = vld [vmem:[#allocation19 + $0x18] sm:$0xf0] }
 0xa98   :  { %v4267_v55 = vpop.f32.mrf.mxu1 }
 0xa99   :  { %v4370_v11 = vadd.f32 %v13959_v62, %v4288_v28  ;;  %v10821_v55 = vld [vmem:[#allocation56 + $0x74] sm:$0xf0]  ;;  %5088 = vmatpush.bf16.msra.mxu3 %v9420_v35  ;;  %v9416_v62 = vor.u32 %v10820_v31, %v9413_v10  ;;  %v9381_v28 = vld [vmem:[#allocation56 + $0x38] sm:$0xf0]  ;;  %v4283_v35 = vperm.slane %v13965_v40, 0 }
 0xa9a   :  { %v4367_v57 = vpop.f32.mrf.mxu0  ;;  %v9412_v42 = vor.u32 %v10821_v55, %v9411_v30  ;;  %v9384_v41 = vor.u32 %v10812_v61, %v9381_v28  ;;  %v10809_v30 = vld [vmem:[#allocation56 + $0x14] sm:$0xf0]  ;;  %v10808_v55 = vld [vmem:[#allocation56 + $0x14] sm:$0xf]  ;;  %v10854_v10 = vld [vmem:[#allocation19 + $0x4] sm:$0xf] }
 0xa9b   :  { %5094 = vmatpush.bf16.msra.mxu1 %v9416_v62  ;;  %v9364_v31 = vor.u32 %v10809_v30, %v9363_v36  ;;  %v9355_v40 = vld [vmem:[#allocation56] sm:$0xf] }
 0xa9c   :  { %5068 = vmatpush.bf16.msrb.mxu2 %v9412_v42  ;;  %v9365_v42 = vld [vmem:[#allocation56 + $0x18] sm:$0xf0] }
 0xa9d   :  { %v10866_v36 = vld [vmem:[%s14440_s29 + $0x30] sm:$0xff] }
 0xa9e   :  { %v4280_v49 = vpop.f32.mrf.mxu2  ;;  %v13961_v25 = vpop.f32.mrf.mxu3 }
 0xa9f   :  { %v9404_v49 = vor.u32 %v10819_v46, %v9403_v59  ;;  %5095 = vmatpush.bf16.msra.mxu1 %v9408_v33  ;;  %v9357_v33 = vld [vmem:[#allocation56 + $0x8] sm:$0xf0] }
 0xaa0   :  { %v13963_v58 = vpop.f32.mrf.mxu1 }
 0xaa1   :  { %5069 = vmatpush.bf16.msrb.mxu2 %v9404_v49  ;;  %v10807_v49 = vld [vmem:[#allocation56 + $0x4] sm:$0xf0] }
 0xaa2   :  { %v4527_v14 = vpop.f32.mrf.mxu0 }
 0xaa5   :  { %5070 = vmatpush.bf16.msrb.mxu2 %v9396_v54 }
 0xaa6   :  { %v13967_v21 = vpop.f32.mrf.mxu2  ;;  %v4610_v27 = vpop.f32.mrf.mxu3 }
 0xaa7   :  { %v10815_v27 = vld [vmem:[#allocation56 + $0x44] sm:$0xf0] }
 0xaa8   :  { %v4354_v37 = vpop.f32.mrf.mxu1  ;;  %v9388_v45 = vor.u32 %v10815_v27, %v9387_v52 }
 0xaa9   :  { %v9392_v37 = vor.u32 %v10814_v29, %v9389_v4  ;;  %v10857_v29 = vld [vmem:[#allocation19 + $0x14] sm:$0xf0]  ;;  %v9547_v4 = vld [vmem:[#allocation19] sm:$0xf] }
 0xaaa   :  { %v4529_v18 = vpop.f32.mrf.mxu0  ;;  %5071 = vmatpush.bf16.msrb.mxu2 %v9388_v45 }
 0xaab   :  { %v10813_v18 = vld [vmem:[#allocation56 + $0x34] sm:$0xf0] }
 0xaac   :  { %v9380_v53 = vor.u32 %v10813_v18, %v9379_v7 }
 0xaae   :  { %v4435_v8 = vpop.f32.mrf.mxu2  ;;  %v4771_v50 = vpop.f32.mrf.mxu3  ;;  %5072 = vmatpush.bf16.msrb.mxu2 %v9380_v53 }
 0xaaf   :  { %v9568_v8 = vor.u32 %v10858_v48, %v9565_v34 }
 0xab0   :  { %v4446_v38 = vpop.f32.mrf.mxu1 }
 0xab1   :  { %v4451_v51 = vadd.f32 %v4446_v38, %v4370_v11  ;;  %5364 = vmatpush.bf16.msra.mxu0 %v9568_v8  ;;  %v10810_v11 = vld [vmem:[#allocation56 + $0x24] sm:$0xf] }
 0xab2   :  { %v4690_v12 = vpop.f32.mrf.mxu0 }
 0xab3   :  { %v4532_v57 = vadd.f32 %v4527_v14, %v4451_v51  ;;  %v9397_v14 = vld [vmem:[#allocation56 + $0x58] sm:$0xf0]  ;;  %v9373_v51 = vld [vmem:[#allocation56 + $0x28] sm:$0xf0] }
 0xab4   :  { %v9400_v26 = vor.u32 %v10816_v0, %v9397_v14  ;;  %v9376_v43 = vor.u32 %v10810_v11, %v9373_v51  ;;  %v9360_v14 = vor.u32 %v10806_v22, %v9357_v33  ;;  %v10852_v11 = vld [vmem:[#allocation58 + $0x70] sm:$0xff]  ;;  %v10839_v22 = vld [vmem:[#allocation58 + $0x8] sm:$0xff]  ;;  %v10862_v33 = vld [vmem:[%s14440_s29 + $0x10] sm:$0xff] }
 0xab5   :  { %v4613_v19 = vadd.f32 %v13961_v25, %v4532_v57  ;;  %v9549_v57 = vld [vmem:[#allocation19 + $0x8] sm:$0xf0] }
 0xab6   :  { %v13971_v56 = vpop.f32.mrf.mxu2  ;;  %v4773_v44 = vpop.f32.mrf.mxu3  ;;  %5096 = vmatpush.bf16.msra.mxu1 %v9400_v26  ;;  %v9552_v59 = vor.u32 %v10854_v10, %v9549_v57  ;;  %v10865_v10 = vld [vmem:[%s14440_s29 + $0x28] sm:$0xff]  ;;  %v10868_v57 = vld [vmem:[%s14440_s29 + $0x40] sm:$0xff] }
 0xab7   :  { %v4695_v24 = vadd.f32 %v4690_v12, %v4613_v19  ;;  %v9560_v12 = vor.u32 %v10856_v20, %v9557_v60  ;;  %v9368_v44 = vor.u32 %v10808_v55, %v9365_v42  ;;  %v9356_v19 = vor.u32 %v10807_v49, %v9355_v40  ;;  %v10850_v20 = vld [vmem:[#allocation58 + $0x60] sm:$0xff]  ;;  %v10843_v60 = vld [vmem:[#allocation58 + $0x28] sm:$0xff]  ;;  %v10848_v55 = vld [vmem:[#allocation58 + $0x50] sm:$0xff] }
 0xab8   :  { %v4448_v6 = vpop.f32.mrf.mxu1  ;;  %v10841_v42 = vld [vmem:[#allocation58 + $0x18] sm:$0xff]  ;;  %v10846_v40 = vld [vmem:[#allocation58 + $0x40] sm:$0xff] }
 0xab9   :  { %v4776_v25 = vadd.f32 %v4771_v50, %v4695_v24  ;;  %v9371_v50 = vld [vmem:[#allocation56 + $0x20] sm:$0xf]  ;;  %5365 = vmatpush.bf16.msra.mxu0 %v9560_v12  ;;  %v4287_v6 = vadd.f32 %v4283_v35, %v13957_v16  ;;  %v10859_v24 = vld [vmem:[#allocation19 + $0x24] sm:$0xf0]  ;;  %v10849_v12 = vld [vmem:[#allocation58 + $0x58] sm:$0xff] }
 0xaba   :  { %v4692_v2 = vpop.f32.mrf.mxu0  ;;  %5097 = vmatpush.bf16.msra.mxu1 %v9392_v37  ;;  %v9372_v38 = vor.u32 %v10811_v3, %v9371_v50  ;;  %v9563_v16 = vld [vmem:[#allocation19 + $0x20] sm:$0xf]  ;;  %v11205_v37 = vld [vmem:[%s14438_s9] ss:$0 sm:$0xff]  ;;  %v10845_v3 = vld [vmem:[#allocation58 + $0x38] sm:$0xff] }
 0xabb   :  { %v4369_v0 = vadd.f32 %v13963_v58, %v4287_v6  ;;  %v9564_v27 = vor.u32 %v10859_v24, %v9563_v16 }
 0xabc   :  { %5073 = vmatpush.bf16.msrb.mxu2 %v9372_v38  ;;  %v10844_v38 = vld [vmem:[#allocation58 + $0x30] sm:$0xff] }
 0xabd   :  { %5366 = vmatpush.bf16.msra.mxu0 %v9552_v59  ;;  %v4450_v54 = vadd.f32 %v13967_v21, %v4369_v0  ;;  %v4902_v0 = vld [vmem:[#allocation52] sm:$0x3] }
 0xabe   :  { %v4597_v47 = vpop.f32.mrf.mxu2  ;;  %5098 = vmatpush.bf16.msra.mxu1 %v9384_v41 }
 0xabf   :  { %v9555_v47 = vld [vmem:[#allocation19 + $0x10] sm:$0xf] }
 0xac0   :  { %v13974_v1 = vpop.f32.mrf.mxu1  ;;  %5074 = vmatpush.bf16.msrb.mxu2 %v9364_v31  ;;  %v9556_v58 = vor.u32 %v10857_v29, %v9555_v47  ;;  %v13991_v31 = vld [vmem:[#allocation17] sm:$0x3] }
 0xac1   :  { %v4531_v52 = vadd.f32 %v13974_v1, %v4450_v54 }
 0xac2   :  { %v4852_v13 = vpop.f32.mrf.mxu0  ;;  %5099 = vmatpush.bf16.msra.mxu1 %v9376_v43  ;;  %v10867_v43 = vld [vmem:[%s14440_s29 + $0x38] sm:$0xff] }
 0xac3   :  { %v4857_v9 = vadd.f32 %v4852_v13, %v4776_v25  ;;  %v10855_v25 = vld [vmem:[#allocation19 + $0x4] sm:$0xf0]  ;;  %v4612_v21 = vadd.f32 %v13971_v56, %v4531_v52 }
 0xac4   :  { %5075 = vmatpush.bf16.msrb.mxu2 %v9356_v19  ;;  %v9548_v7 = vor.u32 %v10855_v25, %v9547_v4  ;;  %v10838_v19 = vld [vmem:[#allocation58] sm:$0xff]  ;;  %v10860_v52 = vld [vmem:[%s14440_s29] sm:$0xff] }
 0xac5   :  { %v4859_v39 = vmul.f32 0.5, %v4857_v9 }
 0xac6   :  { %v13976_v17 = vpop.f32.mrf.mxu2  ;;  %5100 = vmatpush.bf16.msra.mxu1 %v9368_v44  ;;  %v5310_v44 = vperm.slane %v13991_v31, 1 }
 0xac7   :  { %11329 = vtanh.f32 %v4859_v39 }
 0xac8   :  { %v4516_v15 = vpop.f32.mrf.mxu1  ;;  %5264 = vmatpush.bf16.msra.mxu2 %v10845_v3 }
 0xac9   :  { %v10851_v15 = vld [vmem:[#allocation58 + $0x68] sm:$0xff] }
 0xaca   :  { %v4854_v23 = vpop.f32.mrf.mxu0  ;;  %5101 = vmatpush.bf16.msra.mxu1 %v9360_v14 }
 0xacb   :  { %v10842_v23 = vld [vmem:[#allocation58 + $0x20] sm:$0xff] }
 0xacc   :  { %5265 = vmatpush.bf16.msra.mxu2 %v10844_v38 }
 0xacd   :  { %v11330_v62 = vpop.eup %11329 }
 0xace   :  { %v4863_v46 = vadd.f32 1.0, %v11330_v62  ;;  %v4760_v5 = vpop.f32.mrf.mxu2  ;;  %5351 = vmatpush.bf16.msrb.mxu1 %v9564_v27  ;;  %v10847_v62 = vld [vmem:[#allocation58 + $0x48] sm:$0xff] }
 0xacf   :  { %v10864_v5 = vld [vmem:[%s14440_s29 + $0x20] sm:$0xff] }
 0xad0   :  { %v4865_v63 = vmul.f32 0.5, %v4863_v46  ;;  %v4677_v32 = vpop.f32.mrf.mxu1  ;;  %5266 = vmatpush.bf16.msra.mxu2 %v10843_v60  ;;  %v10840_v46 = vld [vmem:[#allocation58 + $0x10] sm:$0xff] }
 0xad1   :  { %v4694_v13 = vadd.f32 %v4677_v32, %v4612_v21 }
 0xad2   :  { %v4867_v2 = vmul.f32 %v4865_v63, %v4857_v9  ;;  %v5294_v9 = vld [vmem:[%s14439_s18] sm:$0x3]  ;;  %5352 = vmatpush.bf16.msrb.mxu1 %v9556_v58  ;;  %v10863_v63 = vld [vmem:[%s14440_s29 + $0x18] sm:$0xff] }
 0xad3   :  { %v5299_v18 = vmul.f32 %v11205_v37, %v5294_v9  ;;  %v4775_v61 = vadd.f32 %v13976_v17, %v4694_v13  ;;  %v10853_v17 = vld [vmem:[#allocation58 + $0x78] sm:$0xff] }
 0xad4   :  { %v4869_v26 = vpack.c.bf16 %v4867_v2, %v4867_v2  ;;  %5277 = vmatpush.bf16.msrb.mxu3 %v10853_v17  ;;  %5267 = vmatpush.bf16.msra.mxu2 %v10842_v23  ;;  %v10861_v2 = vld [vmem:[%s14440_s29 + $0x8] sm:$0xff]  ;;  %v10873_v23 = vld [vmem:[%s14441_s1 + $0x20] sm:$0xff] }
 0xad5   :  { %v5300_v28 = vpack.c.bf16 %v5299_v18, %v5299_v18 }
 0xad6   :  { %5089 = vmatmul.bf16.vlgmr.msra.gmra.mxu3 %v4869_v26  ;;  %5115 = vmatmul.bf16.vlgmr.msrb.gmra.mxu0 %v4869_v26  ;;  %v4905_v26 = vperm.slane %v4902_v0, 1 }
 0xad7   :  { %5353 = vmatpush.bf16.msrb.mxu1 %v9548_v7  ;;  %5484 = vmatpush.bf16.msrb.mxu0 %v10868_v57  ;;  %v11206_v57 = vld [vmem:[#allocation53] ss:$0 sm:$0xff] }
 0xad8   :  { %v4679_v45 = vpop.f32.mrf.mxu1  ;;  %5278 = vmatpush.bf16.msrb.mxu3 %v10852_v11  ;;  %5268 = vmatpush.bf16.msra.mxu2 %v10841_v42  ;;  %v10869_v42 = vld [vmem:[%s14441_s1] sm:$0xff] }
 0xad9   :  { %v4904_v45 = vperm.slane %v4902_v0, 0 }
 0xadc   :  { %5279 = vmatpush.bf16.msrb.mxu3 %v10851_v15  ;;  %5269 = vmatpush.bf16.msra.mxu2 %v10840_v46 }
 0xae0   :  { %v4839_v1 = vpop.f32.mrf.mxu1  ;;  %5280 = vmatpush.bf16.msrb.mxu3 %v10850_v20  ;;  %5270 = vmatpush.bf16.msra.mxu2 %v10839_v22 }
 0xae1   :  { %v4856_v53 = vadd.f32 %v4839_v1, %v4775_v61  ;;  %v5309_v61 = vperm.slane %v13991_v31, 0  ;;  %v10870_v31 = vld [vmem:[%s14441_s1 + $0x8] sm:$0xff] }
 0xae3   :  { %v4858_v48 = vmul.f32 0.5, %v4856_v53 }
 0xae4   :  { %5281 = vmatpush.bf16.msrb.mxu3 %v10849_v12  ;;  %5271 = vmatpush.bf16.msra.mxu2 %v10838_v19  ;;  %v10874_v12 = vld [vmem:[%s14441_s1 + $0x28] sm:$0xff] }
 0xae5   :  { %11331 = vtanh.f32 %v4858_v48 }
 0xae6   :  { %9570 = vmatmul.msk.bf16.vlgmr.msra.gmra.mxu0 %vm955_vm2, %v5300_v28 }
 0xae8   :  { %v4841_v34 = vpop.f32.mrf.mxu1  ;;  %5282 = vmatpush.bf16.msrb.mxu3 %v10848_v55  ;;  %v10871_v55 = vld [vmem:[%s14441_s1 + $0x10] sm:$0xff] }
 0xaeb   :  { %v11332_v39 = vpop.eup %11331 }
 0xaec   :  { %v4862_v41 = vadd.f32 1.0, %v11332_v39  ;;  %5283 = vmatpush.bf16.msrb.mxu3 %v10847_v62  ;;  %v11207_v62 = vld [vmem:[#allocation20] ss:$0 sm:$0xff] }
 0xaee   :  { %v4864_v56 = vmul.f32 0.5, %v4862_v41 }
 0xaf0   :  { %v4866_v8 = vmul.f32 %v4864_v56, %v4856_v53  ;;  %5284 = vmatpush.bf16.msrb.mxu3 %v10846_v40 }
 0xaf2   :  { %v4868_v50 = vpack.c.bf16 %v4866_v8, %v4866_v8 }
 0xaf4   :  { %5076 = vmatmul.bf16.vlgmr.msrb.gmra.mxu2 %v4868_v50  ;;  %5102 = vmatmul.bf16.vlgmr.msra.gmra.mxu1 %v4868_v50 }
 0xaf5   :  { %5464 = vmatpush.bf16.msra.mxu1 %v10867_v43  ;;  %5553 = vmatpush.bf16.msrb.mxu2 %v10874_v12 }
 0xaf9   :  { %5465 = vmatpush.bf16.msra.mxu1 %v10866_v36  ;;  %5554 = vmatpush.bf16.msrb.mxu2 %v10873_v23  ;;  %v10872_v36 = vld [vmem:[%s14441_s1 + $0x18] sm:$0xff] }
 0xafa   :  { %v9719_v23 = vld [vmem:[#allocation38 + $0x70] sm:$0xf] }
 0xafd   :  { %5466 = vmatpush.bf16.msra.mxu1 %v10865_v10  ;;  %5555 = vmatpush.bf16.msrb.mxu2 %v10872_v36  ;;  %v10896_v36 = vld [vmem:[#allocation38 + $0x74] sm:$0xf0] }
 0xb01   :  { %5467 = vmatpush.bf16.msra.mxu1 %v10864_v5  ;;  %5556 = vmatpush.bf16.msrb.mxu2 %v10871_v55  ;;  %v9720_v55 = vor.u32 %v10896_v36, %v9719_v23 }
 0xb04   :  { %9569 = vmatmul.msk.bf16.vlgmr.msrb.gmra.mxu1 %vm955_vm2, %v5300_v28 }
 0xb05   :  { %5468 = vmatpush.bf16.msra.mxu1 %v10863_v63  ;;  %5557 = vmatpush.bf16.msrb.mxu2 %v10870_v31  ;;  %v10895_v31 = vld [vmem:[#allocation38 + $0x74] sm:$0xf] }
 0xb09   :  { %5469 = vmatpush.bf16.msra.mxu1 %v10862_v33  ;;  %5558 = vmatpush.bf16.msrb.mxu2 %v10869_v42  ;;  %v9721_v42 = vld [vmem:[#allocation38 + $0x78] sm:$0xf0] }
 0xb0d   :  { %5470 = vmatpush.bf16.msra.mxu1 %v10861_v2 }
 0xb11   :  { %5471 = vmatpush.bf16.msra.mxu1 %v10860_v52  ;;  %v10880_v52 = vld [vmem:[#allocation25 + $0x24] sm:$0xf0] }
 0xb53   :  { %v5116_v51 = vpop.f32.mrf.mxu0 }
 0xb59   :  { %v5090_v35 = vpop.f32.mrf.mxu3 }
 0xb5b   :  { %v5118_v30 = vpop.f32.mrf.mxu0 }
 0xb61   :  { %v5092_v59 = vpop.f32.mrf.mxu3 }
 0xb63   :  { %v5368_v6 = vpop.f32.mrf.mxu0 }
 0xb64   :  { %v5369_v49 = vadd.f32 %v5368_v6, %v5310_v44 }
 0xb66   :  { %v5373_v32 = vmul.f32 0.5, %v5369_v49 }
 0xb68   :  { %11333 = vtanh.f32 %v5373_v32 }
 0xb6b   :  { %v5370_v14 = vpop.f32.mrf.mxu0 }
 0xb6e   :  { %v11334_v54 = vpop.eup %11333 }
 0xb6f   :  { %v5377_v16 = vadd.f32 1.0, %v11334_v54 }
 0xb71   :  { %v5379_v24 = vmul.f32 0.5, %v5377_v16  ;;  %v5103_v47 = vpop.f32.mrf.mxu1 }
 0xb72   :  { %v5104_v27 = vadd.f32 %v5103_v47, %v4905_v26  ;;  %v9651_v47 = vld [vmem:[#allocation25 + $0x20] sm:$0xf] }
 0xb73   :  { %v5381_v29 = vmul.f32 %v5379_v24, %v5369_v49 }
 0xb74   :  { %v5117_v58 = vadd.f32 %v5116_v51, %v5104_v27  ;;  %v10879_v27 = vld [vmem:[#allocation25 + $0x24] sm:$0xf] }
 0xb75   :  { %v5383_v4 = vpack.c.bf16 %v5381_v29, %v5381_v29  ;;  %v9652_v29 = vor.u32 %v10880_v52, %v9651_v47  ;;  %v10892_v47 = vld [vmem:[#allocation38 + $0x54] sm:$0xf0] }
 0xb76   :  { %v5121_v25 = vmul.f32 0.5, %v5117_v58 }
 0xb77   :  { %v5077_v21 = vpop.f32.mrf.mxu2  ;;  %9607 = vmatmul.msk.bf16.vlgmr.msrb.gmra.mxu0 %vm5460_vm7, %v5383_v4  ;;  %5620 = vmatpush.bf16.msra.mxu3 %v9652_v29  ;;  %v9643_v4 = vld [vmem:[#allocation25 + $0x10] sm:$0xf] }
 0xb78   :  { %11335 = vtanh.f32 %v5121_v25  ;;  %v5078_v37 = vadd.f32 %v5077_v21, %v4904_v45  ;;  %v10878_v25 = vld [vmem:[#allocation25 + $0x14] sm:$0xf0]  ;;  %v10877_v21 = vld [vmem:[#allocation25 + $0x14] sm:$0xf]  ;;  %v10891_v29 = vld [vmem:[#allocation38 + $0x54] sm:$0xf] }
 0xb79   :  { %v5105_v13 = vpop.f32.mrf.mxu1 }
 0xb7a   :  { %v5091_v9 = vadd.f32 %v5090_v35, %v5078_v37  ;;  %v9644_v37 = vor.u32 %v10878_v25, %v9643_v4  ;;  %v9645_v13 = vld [vmem:[#allocation25 + $0x18] sm:$0xf0]  ;;  %v9735_v25 = vld [vmem:[#allocation38 + $0x90] sm:$0xf] }
 0xb7c   :  { %v5120_v7 = vmul.f32 0.5, %v5091_v9  ;;  %5621 = vmatpush.bf16.msra.mxu3 %v9644_v37  ;;  %v10899_v37 = vld [vmem:[#allocation38 + $0x94] sm:$0xf] }
 0xb7e   :  { %v11336_v18 = vpop.eup %11335  ;;  %11337 = vtanh.f32 %v5120_v7  ;;  %v9635_v7 = vld [vmem:[#allocation25] sm:$0xf] }
 0xb7f   :  { %v5125_v1 = vadd.f32 1.0, %v11336_v18  ;;  %v5079_v53 = vpop.f32.mrf.mxu2  ;;  %v10876_v18 = vld [vmem:[#allocation25 + $0x4] sm:$0xf0] }
 0xb80   :  { %v9637_v53 = vld [vmem:[#allocation25 + $0x8] sm:$0xf0] }
 0xb81   :  { %v5127_v28 = vmul.f32 0.5, %v5125_v1  ;;  %v5355_v48 = vpop.f32.mrf.mxu1  ;;  %v9636_v1 = vor.u32 %v10876_v18, %v9635_v7  ;;  %v9737_v7 = vld [vmem:[#allocation38 + $0x98] sm:$0xf0]  ;;  %v9695_v18 = vld [vmem:[#allocation38 + $0x40] sm:$0xf] }
 0xb82   :  { %v5356_v34 = vadd.f32 %v5355_v48, %v5309_v61  ;;  %v10875_v61 = vld [vmem:[#allocation25 + $0x4] sm:$0xf]  ;;  %v5641_v48 = vld [vmem:[%s14442_s8] sm:$0xf] }
 0xb83   :  { %v5129_v39 = vmul.f32 %v5127_v28, %v5117_v58  ;;  %v9653_v58 = vld [vmem:[#allocation25 + $0x28] sm:$0xf0]  ;;  %v9640_v28 = vor.u32 %v10875_v61, %v9637_v53  ;;  %5622 = vmatpush.bf16.msra.mxu3 %v9636_v1  ;;  %5649 = vst [vmem:[#allocation1] ss:$4 sm:$0xff] %v5641_v48  ;;  %v10890_v61 = vld [vmem:[#allocation38 + $0x44] sm:$0xf0]  ;;  %v9740_v53 = vor.u32 %v10899_v37, %v9737_v7 }
 0xb84   :  { %v11338_v41 = vpop.eup %11337  ;;  %v5372_v56 = vmul.f32 0.5, %v5356_v34  ;;  %v9656_v45 = vor.u32 %v10879_v27, %v9653_v58  ;;  %v9705_v58 = vld [vmem:[#allocation38 + $0x58] sm:$0xf0]  ;;  %v10889_v48 = vld [vmem:[#allocation38 + $0x44] sm:$0xf] }
 0xb85   :  { %v5131_v8 = vpack.c.bf16 %v5129_v39, %v5129_v39  ;;  %v5124_v50 = vadd.f32 1.0, %v11338_v41  ;;  %v10918_v7 = vld [vmem:[#allocation40 + $0x64] sm:$0xf0] }
 0xb86   :  { %11339 = vtanh.f32 %v5372_v56  ;;  %5633 = vmatpush.bf16.msra.mxu0 %v9656_v45  ;;  %v9708_v45 = vor.u32 %v10891_v29, %v9705_v58 }
 0xb87   :  { %v5126_v17 = vmul.f32 0.5, %v5124_v50  ;;  %5285 = vmatmul.bf16.vlgmr.msrb.gmra.mxu3 %v5131_v8  ;;  %v11208_v50 = vld [vmem:[#allocation22] ss:$0 sm:$0xff] }
 0xb89   :  { %v5128_v3 = vmul.f32 %v5126_v17, %v5091_v9  ;;  %v5357_v11 = vpop.f32.mrf.mxu1  ;;  %v9648_v9 = vor.u32 %v10877_v21, %v9645_v13  ;;  %v14443_v17 = vld [vmem:[#allocation140_spill] sm:$0xff] }
 0xb8a   :  { %v5650_v39 = vld.sshfl [vmem:[#allocation1] sm:$0xff pattern:$0x73625140]  ;;  %v5651_v41 = vld.sshfl [vmem:[#allocation1 + $0x8] sm:$0xff pattern:$0x73625140] }
 0xb8b   :  { %v5130_v15 = vpack.c.bf16 %v5128_v3, %v5128_v3  ;;  %5634 = vmatpush.bf16.msra.mxu0 %v9648_v9  ;;  %v5652_v56 = vsel %vm904_vm0, %v5650_v39, 0  ;;  %v5654_v8 = vsel %vm904_vm0, %v5651_v41, 0  ;;  %v10900_v21 = vld [vmem:[#allocation38 + $0x94] sm:$0xf0] }
 0xb8c   :  { %v11340_v38 = vpop.eup %11339  ;;  %5663 = vmatpush.bf16.msrb.mxu3 %v5652_v56  ;;  %5676 = vmatpush.bf16.msrb.mxu1 %v5654_v8  ;;  %v9736_v9 = vor.u32 %v10900_v21, %v9735_v25  ;;  %v9727_v56 = vld [vmem:[#allocation38 + $0x80] sm:$0xf]  ;;  %v10898_v8 = vld [vmem:[#allocation38 + $0x84] sm:$0xf0]  ;;  %v10920_v25 = vld [vmem:[#allocation40 + $0x74] sm:$0xf0] }
 0xb8d   :  { %v5376_v51 = vadd.f32 1.0, %v11340_v38  ;;  %5272 = vmatmul.bf16.vlgmr.msra.gmra.mxu2 %v5130_v15  ;;  %v10919_v21 = vld [vmem:[#allocation40 + $0x74] sm:$0xf] }
 0xb8e   :  { %5847 = vmatpush.bf16.msra.mxu2 %v9720_v55  ;;  %v10886_v55 = vld [vmem:[#allocation38 + $0x24] sm:$0xf0] }
 0xb8f   :  { %v5378_v20 = vmul.f32 0.5, %v5376_v51  ;;  %5635 = vmatpush.bf16.msra.mxu0 %v9640_v28  ;;  %v9696_v28 = vor.u32 %v10890_v61, %v9695_v18  ;;  %v10917_v18 = vld [vmem:[#allocation40 + $0x64] sm:$0xf]  ;;  %v9811_v61 = vld [vmem:[#allocation40 + $0x68] sm:$0xf0] }
 0xb91   :  { %v5380_v60 = vmul.f32 %v5378_v20, %v5356_v34  ;;  %v6116_v34 = vld [vmem:[#allocation46] sm:$0xf] }
 0xb92   :  { %6124 = vst [vmem:[#allocation1] ss:$4 sm:$0xff] %v6116_v34  ;;  %v9697_v34 = vld [vmem:[#allocation38 + $0x48] sm:$0xf0] }
 0xb93   :  { %v5382_v43 = vpack.c.bf16 %v5380_v60, %v5380_v60  ;;  %v9700_v39 = vor.u32 %v10889_v48, %v9697_v34  ;;  %v10916_v48 = vld [vmem:[#allocation40 + $0x54] sm:$0xf0]  ;;  %v10915_v34 = vld [vmem:[#allocation40 + $0x54] sm:$0xf] }
 0xb95   :  { %5472 = vmatmul.bf16.vlgmr.msra.gmra.mxu1 %v5382_v43 }
 0xba5   :  { %9660 = vmatmul.msk.bf16.vlgmr.msrb.gmra.mxu1 %vm900_vm1, %v14443_v17 }
 0xbf4   :  { %v5486_v35 = vpop.f32.mrf.mxu0 }
 0xbfc   :  { %v5488_v30 = vpop.f32.mrf.mxu0 }
 0xc0a   :  { %v5286_v10 = vpop.f32.mrf.mxu3 }
 0xc10   :  { %v5273_v44 = vpop.f32.mrf.mxu2 }
 0xc11   :  { %v5274_v59 = vadd.f32 %v11206_v57, %v5273_v44  ;;  %v9724_v57 = vor.u32 %v10895_v31, %v9721_v42  ;;  %v9751_v44 = vld [vmem:[#allocation38 + $0xb0] sm:$0xf]  ;;  %v10885_v31 = vld [vmem:[#allocation38 + $0x24] sm:$0xf] }
 0xc12   :  { %v5288_v46 = vpop.f32.mrf.mxu3  ;;  %v5473_v5 = vpop.f32.mrf.mxu1 }
 0xc13   :  { %v5287_v6 = vadd.f32 %v5286_v10, %v5274_v59  ;;  %v5474_v40 = vadd.f32 %v11207_v62, %v5473_v5  ;;  %v10904_v59 = vld [vmem:[#allocation38 + $0xb4] sm:$0xf0]  ;;  %v10903_v46 = vld [vmem:[#allocation38 + $0xb4] sm:$0xf] }
 0xc15   :  { %v5290_v49 = vmul.f32 0.5, %v5287_v6  ;;  %v5487_v22 = vadd.f32 %v5486_v35, %v5474_v40  ;;  %v14019_v35 = vld [vmem:[#allocation34] sm:$0x3]  ;;  %v9752_v6 = vor.u32 %v10904_v59, %v9751_v44  ;;  %v9753_v40 = vld [vmem:[#allocation38 + $0xb8] sm:$0xf0] }
 0xc16   :  { %v5645_v30 = vperm.slane %v14019_v35, 1  ;;  %v9671_v44 = vld [vmem:[#allocation38 + $0x10] sm:$0xf]  ;;  %v10884_v59 = vld [vmem:[#allocation38 + $0x14] sm:$0xf0] }
 0xc17   :  { %11341 = vtanh.f32 %v5290_v49  ;;  %v5490_v63 = vmul.f32 0.5, %v5487_v22  ;;  %v9711_v49 = vld [vmem:[#allocation38 + $0x60] sm:$0xf]  ;;  %5864 = vmatpush.bf16.msrb.mxu0 %v9752_v6  ;;  %v9673_v6 = vld [vmem:[#allocation38 + $0x18] sm:$0xf0] }
 0xc18   :  { %v5275_v32 = vpop.f32.mrf.mxu2 }
 0xc19   :  { %11343 = vtanh.f32 %v5490_v63  ;;  %v10894_v63 = vld [vmem:[#allocation38 + $0x64] sm:$0xf0]  ;;  %v10893_v32 = vld [vmem:[#allocation38 + $0x64] sm:$0xf] }
 0xc1a   :  { %v5475_v19 = vpop.f32.mrf.mxu1 }
 0xc1b   :  { %v9713_v19 = vld [vmem:[#allocation38 + $0x68] sm:$0xf0] }
 0xc1d   :  { %v11342_v33 = vpop.eup %11341 }
 0xc1e   :  { %v5292_v0 = vadd.f32 1.0, %v11342_v33  ;;  %v9712_v33 = vor.u32 %v10894_v63, %v9711_v49  ;;  %v9663_v49 = vld [vmem:[#allocation38] sm:$0xf]  ;;  %v10881_v63 = vld [vmem:[#allocation38 + $0x4] sm:$0xf] }
 0xc1f   :  { %v11344_v14 = vpop.eup %11343 }
 0xc20   :  { %v5293_v2 = vmul.f32 0.5, %v5292_v0  ;;  %v5492_v54 = vadd.f32 1.0, %v11344_v14  ;;  %v9716_v0 = vor.u32 %v10893_v32, %v9713_v19  ;;  %v9743_v14 = vld [vmem:[#allocation38 + $0xa0] sm:$0xf]  ;;  %5848 = vmatpush.bf16.msra.mxu2 %v9712_v33  ;;  %v9665_v33 = vld [vmem:[#allocation38 + $0x8] sm:$0xf0] }
 0xc22   :  { %7845 = vst [vmem:[%s12910_s20] sm:$0x3] %v5293_v2  ;;  %v5493_v26 = vmul.f32 0.5, %v5492_v54  ;;  %v5678_v10 = vpop.f32.mrf.mxu1  ;;  %v10902_v2 = vld [vmem:[#allocation38 + $0xa4] sm:$0xf0]  ;;  %v10901_v54 = vld [vmem:[#allocation38 + $0xa4] sm:$0xf] }
 0xc23   :  { %v14022_v62 = vadd.f32 %v5678_v10, %v5645_v30  ;;  %v9679_v30 = vld [vmem:[#allocation38 + $0x20] sm:$0xf]  ;;  %v9681_v10 = vld [vmem:[#allocation38 + $0x28] sm:$0xf0] }
 0xc24   :  { %v5494_v16 = vmul.f32 %v5493_v26, %v5487_v22  ;;  %v9756_v22 = vor.u32 %v10903_v46, %v9753_v40  ;;  %v9744_v26 = vor.u32 %v10902_v2, %v9743_v14  ;;  %v9680_v42 = vor.u32 %v10886_v55, %v9679_v30  ;;  %v10883_v46 = vld [vmem:[#allocation38 + $0x14] sm:$0xf]  ;;  %v10912_v55 = vld [vmem:[#allocation40 + $0x34] sm:$0xf0] }
 0xc25   :  { %v5683_v5 = vmul.f32 0.5, %v14022_v62  ;;  %v9676_v40 = vor.u32 %v10883_v46, %v9673_v6  ;;  %v10926_v6 = vld [vmem:[#allocation40 + $0xa4] sm:$0xf0] }
 0xc26   :  { %v5495_v24 = vpack.c.bf16 %v5494_v16, %v5494_v16  ;;  %5890 = vmatpush.bf16.msra.mxu1 %v9756_v22  ;;  %v9745_v16 = vld [vmem:[#allocation38 + $0xa8] sm:$0xf0]  ;;  %5865 = vmatpush.bf16.msrb.mxu0 %v9744_v26  ;;  %v10882_v22 = vld [vmem:[#allocation38 + $0x4] sm:$0xf0] }
 0xc27   :  { %v9748_v52 = vor.u32 %v10901_v54, %v9745_v16  ;;  %v9664_v19 = vor.u32 %v10882_v22, %v9663_v49  ;;  %v5644_v54 = vperm.slane %v14019_v35, 0  ;;  %v10910_v22 = vld [vmem:[#allocation40 + $0x24] sm:$0xf0] }
 0xc28   :  { %9632 = vmatmul.msk.bf16.vlgmr.msrb.gmra.mxu2 %vm1030_vm3, %v5495_v24  ;;  %v9703_v24 = vld [vmem:[#allocation38 + $0x50] sm:$0xf] }
 0xc29   :  { %v9704_v27 = vor.u32 %v10892_v47, %v9703_v24 }
 0xc2a   :  { %v5680_v4 = vpop.f32.mrf.mxu1  ;;  %5891 = vmatpush.bf16.msra.mxu1 %v9748_v52  ;;  %5866 = vmatpush.bf16.msrb.mxu0 %v9736_v9  ;;  %v9809_v9 = vld [vmem:[#allocation40 + $0x60] sm:$0xf] }
 0xc2b   :  { %5849 = vmatpush.bf16.msra.mxu2 %v9704_v27  ;;  %v9817_v4 = vld [vmem:[#allocation40 + $0x70] sm:$0xf] }
 0xc2c   :  { %v9818_v37 = vor.u32 %v10920_v25, %v9817_v4  ;;  %v10923_v4 = vld [vmem:[#allocation40 + $0x94] sm:$0xf]  ;;  %v9835_v25 = vld [vmem:[#allocation40 + $0x98] sm:$0xf0] }
 0xc2e   :  { %5892 = vmatpush.bf16.msra.mxu1 %v9740_v53  ;;  %v9814_v53 = vor.u32 %v10917_v18, %v9811_v61  ;;  %v10905_v18 = vld [vmem:[#allocation40 + $0x4] sm:$0xf]  ;;  %v9763_v61 = vld [vmem:[#allocation40 + $0x8] sm:$0xf0] }
 0xc2f   :  { %5850 = vmatpush.bf16.msra.mxu2 %v9696_v28  ;;  %v9801_v28 = vld [vmem:[#allocation40 + $0x50] sm:$0xf] }
 0xcab   :  { %v5560_v3 = vpop.f32.mrf.mxu2 }
 0xcac   :  { %v5561_v11 = vadd.f32 %v11208_v50, %v5560_v3  ;;  %v9728_v50 = vor.u32 %v10898_v8, %v9727_v56  ;;  %v10897_v3 = vld [vmem:[#allocation38 + $0x84] sm:$0xf] }
 0xcae   :  { %v5564_v15 = vmul.f32 0.5, %v5561_v11  ;;  %5867 = vmatpush.bf16.msrb.mxu0 %v9728_v50 }
 0xcb0   :  { %11345 = vtanh.f32 %v5564_v15  ;;  %v9687_v15 = vld [vmem:[#allocation38 + $0x30] sm:$0xf] }
 0xcb1   :  { %11347 = vtanh.f32 %v5683_v5  ;;  %v9672_v5 = vor.u32 %v10884_v59, %v9671_v44  ;;  %v10927_v44 = vld [vmem:[#allocation40 + $0xb4] sm:$0xf]  ;;  %v9851_v59 = vld [vmem:[#allocation40 + $0xb8] sm:$0xf0] }
 0xcb2   :  { %v9854_v46 = vor.u32 %v10927_v44, %v9851_v59 }
 0xcb3   :  { %v5562_v38 = vpop.f32.mrf.mxu2 }
 0xcb6   :  { %v11346_v51 = vpop.eup %11345 }
 0xcb7   :  { %v5566_v20 = vadd.f32 1.0, %v11346_v51  ;;  %v11348_v13 = vpop.eup %11347 }
 0xcb8   :  { %v5687_v1 = vadd.f32 1.0, %v11348_v13  ;;  %v9819_v13 = vld [vmem:[#allocation40 + $0x78] sm:$0xf0] }
 0xcb9   :  { %v5567_v60 = vmul.f32 0.5, %v5566_v20  ;;  %v10888_v20 = vld [vmem:[#allocation38 + $0x34] sm:$0xf0]  ;;  %v9822_v35 = vor.u32 %v10919_v21, %v9819_v13  ;;  %v9838_v21 = vor.u32 %v10923_v4, %v9835_v25  ;;  %v10922_v13 = vld [vmem:[#allocation40 + $0x84] sm:$0xf0] }
 0xcba   :  { %v5689_v41 = vmul.f32 0.5, %v5687_v1  ;;  %v9810_v1 = vor.u32 %v10918_v7, %v9809_v9  ;;  %v9761_v9 = vld [vmem:[#allocation40] sm:$0xf]  ;;  %v10938_v4 = vld [vmem:[#allocation47 + $0x44] sm:$0xf0] }
 0xcbb   :  { %v5568_v43 = vmul.f32 %v5567_v60, %v5561_v11  ;;  %v9729_v11 = vld [vmem:[#allocation38 + $0x88] sm:$0xf0]  ;;  %v10887_v60 = vld [vmem:[#allocation38 + $0x34] sm:$0xf] }
 0xcbc   :  { %v5691_v38 = vmul.f32 %v5689_v41, %v14022_v62  ;;  %v9732_v51 = vor.u32 %v10897_v3, %v9729_v11  ;;  %v9802_v41 = vor.u32 %v10916_v48, %v9801_v28  ;;  %v10921_v28 = vld [vmem:[#allocation40 + $0x84] sm:$0xf]  ;;  %v9827_v48 = vld [vmem:[#allocation40 + $0x88] sm:$0xf0] }
 0xcbd   :  { %v5569_v12 = vpack.c.bf16 %v5568_v43, %v5568_v43  ;;  %v9689_v43 = vld [vmem:[#allocation38 + $0x38] sm:$0xf0] }
 0xcbe   :  { %v9692_v23 = vor.u32 %v10887_v60, %v9689_v43  ;;  %v5693_v36 = vpack.c.bf16 %v5691_v38, %v5691_v38  ;;  %5893 = vmatpush.bf16.msra.mxu1 %v9732_v51  ;;  %v10914_v38 = vld [vmem:[#allocation40 + $0x44] sm:$0xf0]  ;;  %v10913_v51 = vld [vmem:[#allocation40 + $0x44] sm:$0xf]  ;;  %v9795_v60 = vld [vmem:[#allocation40 + $0x48] sm:$0xf0] }
 0xcbf   :  { %9657 = vmatmul.msk.bf16.vlgmr.msra.gmra.mxu3 %vm955_vm2, %v5569_v12  ;;  %9658 = vmatmul.msk.bf16.vlgmr.msra.gmra.mxu0 %vm955_vm2, %v5569_v12  ;;  %v9688_v12 = vor.u32 %v10888_v20, %v9687_v15  ;;  %v9793_v15 = vld [vmem:[#allocation40 + $0x40] sm:$0xf]  ;;  %v9798_v43 = vor.u32 %v10913_v51, %v9795_v60 }
 0xcc0   :  { %5873 = vmatpush.bf16.msra.mxu3 %v9724_v57  ;;  %v9684_v57 = vor.u32 %v10885_v31, %v9681_v10  ;;  %6064 = vmatpush.bf16.msra.mxu0 %v9818_v37  ;;  %v9794_v20 = vor.u32 %v10914_v38, %v9793_v15  ;;  %v10911_v31 = vld [vmem:[#allocation40 + $0x34] sm:$0xf]  ;;  %v9825_v37 = vld [vmem:[#allocation40 + $0x80] sm:$0xf] }
 0xcc1   :  { %5851 = vmatpush.bf16.msra.mxu2 %v9688_v12  ;;  %9758 = vmatmul.msk.bf16.vlgmr.msra.gmra.mxu1 %vm4252_vm6, %v5693_v36  ;;  %v9849_v12 = vld [vmem:[#allocation40 + $0xb0] sm:$0xf]  ;;  %v9826_v7 = vor.u32 %v10922_v13, %v9825_v37  ;;  %v9895_v37 = vld [vmem:[#allocation47 + $0x48] sm:$0xf0] }
 0xcc4   :  { %5874 = vmatpush.bf16.msra.mxu3 %v9716_v0  ;;  %v9668_v0 = vor.u32 %v10881_v63, %v9665_v33  ;;  %6065 = vmatpush.bf16.msra.mxu0 %v9810_v1  ;;  %v10909_v63 = vld [vmem:[#allocation40 + $0x24] sm:$0xf] }
 0xcc5   :  { %5852 = vmatpush.bf16.msra.mxu2 %v9680_v42  ;;  %v9787_v42 = vld [vmem:[#allocation40 + $0x38] sm:$0xf0] }
 0xcc8   :  { %5875 = vmatpush.bf16.msra.mxu3 %v9708_v45  ;;  %6066 = vmatpush.bf16.msra.mxu0 %v9802_v41  ;;  %v6126_v41 = vld.sshfl [vmem:[#allocation1 + $0x8] sm:$0xff pattern:$0x73625140] }
 0xcc9   :  { %5853 = vmatpush.bf16.msra.mxu2 %v9672_v5  ;;  %v9841_v5 = vld [vmem:[#allocation40 + $0xa0] sm:$0xf] }
 0xcca   :  { %v9842_v49 = vor.u32 %v10926_v6, %v9841_v5 }
 0xccc   :  { %5876 = vmatpush.bf16.msra.mxu3 %v9700_v39  ;;  %v9803_v39 = vld [vmem:[#allocation40 + $0x58] sm:$0xf0]  ;;  %6067 = vmatpush.bf16.msra.mxu0 %v9794_v20 }
 0xccd   :  { %5854 = vmatpush.bf16.msra.mxu2 %v9664_v19  ;;  %v9806_v56 = vor.u32 %v10915_v34, %v9803_v39  ;;  %v9779_v19 = vld [vmem:[#allocation40 + $0x28] sm:$0xf0]  ;;  %v9830_v34 = vor.u32 %v10921_v28, %v9827_v48  ;;  %v6125_v39 = vld.sshfl [vmem:[#allocation1] sm:$0xff pattern:$0x73625140] }
 0xccf   :  { %9659 = vmatmul.msk.bf16.vlgmr.msrb.gmra.mxu3 %vm900_vm1, %v14443_v17  ;;  %9757 = vmatmul.msk.bf16.vlgmr.msrb.gmra.mxu0 %vm4252_vm6, %v5693_v36  ;;  %v9785_v36 = vld [vmem:[#allocation40 + $0x30] sm:$0xf] }
 0xcd0   :  { %5877 = vmatpush.bf16.msra.mxu3 %v9692_v23  ;;  %v10928_v23 = vld [vmem:[#allocation40 + $0xb4] sm:$0xf0]  ;;  %v9786_v10 = vor.u32 %v10912_v55, %v9785_v36 }
 0xcd1   :  { %6090 = vmatpush.bf16.msrb.mxu2 %v9822_v35  ;;  %v9850_v30 = vor.u32 %v10928_v23, %v9849_v12  ;;  %v10906_v35 = vld [vmem:[#allocation40 + $0x4] sm:$0xf0] }
 0xcd2   :  { %6068 = vmatpush.bf16.msra.mxu0 %v9786_v10  ;;  %v9762_v1 = vor.u32 %v10906_v35, %v9761_v9  ;;  %v9885_v9 = vld [vmem:[#allocation47 + $0x30] sm:$0xf] }
 0xcd3   :  { %6081 = vmatpush.bf16.msrb.mxu1 %v9850_v30  ;;  %v9949_v35 = vld [vmem:[#allocation47 + $0xb0] sm:$0xf] }
 0xcd4   :  { %5878 = vmatpush.bf16.msra.mxu3 %v9684_v57  ;;  %v9790_v57 = vor.u32 %v10911_v31, %v9787_v42 }
 0xcd5   :  { %6091 = vmatpush.bf16.msrb.mxu2 %v9814_v53  ;;  %v9766_v53 = vor.u32 %v10905_v18, %v9763_v61  ;;  %v10952_v61 = vld [vmem:[#allocation47 + $0xb4] sm:$0xf0] }
 0xcd6   :  { %v9950_v28 = vor.u32 %v10952_v61, %v9949_v35 }
 0xcd7   :  { %6082 = vmatpush.bf16.msrb.mxu1 %v9842_v49 }
 0xcd8   :  { %5879 = vmatpush.bf16.msra.mxu3 %v9676_v40  ;;  %v9777_v40 = vld [vmem:[#allocation40 + $0x20] sm:$0xf] }
 0xcd9   :  { %6092 = vmatpush.bf16.msrb.mxu2 %v9806_v56  ;;  %v9778_v33 = vor.u32 %v10910_v22, %v9777_v40  ;;  %v6127_v56 = vsel %vm904_vm0, %v6125_v39, 0  ;;  %v10943_v22 = vld [vmem:[#allocation47 + $0x74] sm:$0xf]  ;;  %v9951_v39 = vld [vmem:[#allocation47 + $0xb8] sm:$0xf0] }
 0xcdb   :  { %6069 = vmatpush.bf16.msra.mxu0 %v9778_v33 }
 0xcdc   :  { %5880 = vmatpush.bf16.msra.mxu3 %v9668_v0  ;;  %v9782_v0 = vor.u32 %v10909_v63, %v9779_v19  ;;  %v9919_v19 = vld [vmem:[#allocation47 + $0x78] sm:$0xf0] }
 0xcdd   :  { %6093 = vmatpush.bf16.msrb.mxu2 %v9798_v43  ;;  %v9922_v33 = vor.u32 %v10943_v22, %v9919_v19  ;;  %v10930_v22 = vld [vmem:[#allocation47 + $0x4] sm:$0xf0] }
 0xce0   :  { %6107 = vmatpush.bf16.msrb.mxu3 %v9854_v46 }
 0xce1   :  { %6094 = vmatpush.bf16.msrb.mxu2 %v9790_v57 }
 0xce5   :  { %6095 = vmatpush.bf16.msrb.mxu2 %v9782_v0  ;;  %v9909_v0 = vld [vmem:[#allocation47 + $0x60] sm:$0xf] }
 0xd3c   :  { %v14028_v62 = vpop.f32.mrf.mxu0 }
 0xd3e   :  { %v14035_v50 = vpop.f32.mrf.mxu1 }
 0xd42   :  { %v14030_v32 = vpop.f32.mrf.mxu3 }
 0xd44   :  { %v5639_v14 = vpop.f32.mrf.mxu0 }
 0xd45   :  { %v10925_v14 = vld [vmem:[#allocation40 + $0xa4] sm:$0xf] }
 0xd46   :  { %v5897_v11 = vpop.f32.mrf.mxu1 }
 0xd47   :  { %v5718_v11 = vld [vmem:[#allocation35] sm:$0x3] }
 0xd48   :  { %v5720_v15 = vperm.slane %v5718_v11, 0  ;;  %v5721_v38 = vperm.slane %v5718_v11, 1  ;;  %v9941_v11 = vld [vmem:[#allocation47 + $0xa0] sm:$0xf] }
 0xd4a   :  { %v5626_v2 = vpop.f32.mrf.mxu3 }
 0xd4b   :  { %v9843_v2 = vld [vmem:[#allocation40 + $0xa8] sm:$0xf0] }
 0xd4c   :  { %v14033_v8 = vpop.f32.mrf.mxu0 }
 0xd52   :  { %v5665_v26 = vpop.f32.mrf.mxu3 }
 0xd53   :  { %v5666_v16 = vadd.f32 %v5665_v26, %v5644_v54  ;;  %v9846_v54 = vor.u32 %v10925_v14, %v9843_v2  ;;  %v9833_v26 = vld [vmem:[#allocation40 + $0x90] sm:$0xf] }
 0xd54   :  { %v5871_v3 = vpop.f32.mrf.mxu0  ;;  %v10942_v14 = vld [vmem:[#allocation47 + $0x64] sm:$0xf0]  ;;  %v10941_v2 = vld [vmem:[#allocation47 + $0x64] sm:$0xf] }
 0xd55   :  { %v5682_v24 = vmul.f32 0.5, %v5666_v16  ;;  %6108 = vmatpush.bf16.msrb.mxu3 %v9846_v54  ;;  %v6129_v3 = vsel %vm904_vm0, %v6126_v41, 0  ;;  %v9910_v54 = vor.u32 %v10942_v14, %v9909_v0  ;;  %v10946_v0 = vld [vmem:[#allocation47 + $0x84] sm:$0xf0]  ;;  %v10929_v14 = vld [vmem:[#allocation47 + $0x4] sm:$0xf] }
 0xd57   :  { %11349 = vtanh.f32 %v5682_v24  ;;  %v9769_v24 = vld [vmem:[#allocation40 + $0x10] sm:$0xf] }
 0xd59   :  { %6109 = vmatpush.bf16.msrb.mxu3 %v9838_v21  ;;  %v10937_v21 = vld [vmem:[#allocation47 + $0x44] sm:$0xf] }
 0xd5a   :  { %v5667_v47 = vpop.f32.mrf.mxu3  ;;  %v9898_v13 = vor.u32 %v10937_v21, %v9895_v37 }
 0xd5d   :  { %v11350_v52 = vpop.eup %11349  ;;  %6110 = vmatpush.bf16.msrb.mxu3 %v9830_v34  ;;  %v10951_v34 = vld [vmem:[#allocation47 + $0xb4] sm:$0xf] }
 0xd5e   :  { %v5686_v27 = vadd.f32 1.0, %v11350_v52  ;;  %v10908_v52 = vld [vmem:[#allocation40 + $0x14] sm:$0xf0]  ;;  %v9954_v41 = vor.u32 %v10951_v34, %v9951_v39 }
 0xd60   :  { %v5688_v29 = vmul.f32 0.5, %v5686_v27  ;;  %v10907_v27 = vld [vmem:[#allocation40 + $0x14] sm:$0xf] }
 0xd62   :  { %v5690_v58 = vmul.f32 %v5688_v29, %v5666_v16  ;;  %v10924_v16 = vld [vmem:[#allocation40 + $0x94] sm:$0xf0]  ;;  %v9771_v29 = vld [vmem:[#allocation40 + $0x18] sm:$0xf0] }
 0xd63   :  { %v9834_v47 = vor.u32 %v10924_v16, %v9833_v26  ;;  %v9911_v26 = vld [vmem:[#allocation47 + $0x68] sm:$0xf0] }
 0xd64   :  { %v5692_v45 = vpack.c.bf16 %v5690_v58, %v5690_v58  ;;  %v9770_v58 = vor.u32 %v10908_v52, %v9769_v24  ;;  %v9914_v16 = vor.u32 %v10941_v2, %v9911_v26  ;;  %v9901_v24 = vld [vmem:[#allocation47 + $0x50] sm:$0xf]  ;;  %v10939_v52 = vld [vmem:[#allocation47 + $0x54] sm:$0xf]  ;;  %v9863_v2 = vld [vmem:[#allocation47 + $0x8] sm:$0xf0] }
 0xd65   :  { %6083 = vmatpush.bf16.msrb.mxu1 %v9834_v47  ;;  %v10940_v47 = vld [vmem:[#allocation47 + $0x54] sm:$0xf0] }
 0xd66   :  { %5855 = vmatmul.bf16.vlgmr.msra.gmra.mxu2 %v5692_v45  ;;  %5881 = vmatmul.bf16.vlgmr.msra.gmra.mxu3 %v5692_v45  ;;  %v9774_v45 = vor.u32 %v10907_v27, %v9771_v29  ;;  %v9902_v27 = vor.u32 %v10940_v47, %v9901_v24  ;;  %v9903_v29 = vld [vmem:[#allocation47 + $0x58] sm:$0xf0]  ;;  %v9866_v24 = vor.u32 %v10929_v14, %v9863_v2  ;;  %v10945_v47 = vld [vmem:[#allocation47 + $0x84] sm:$0xf]  ;;  %v9993_v2 = vld [vmem:[#allocation49 + $0x48] sm:$0xf0] }
 0xd67   :  { %6070 = vmatpush.bf16.msra.mxu0 %v9770_v58  ;;  %v9906_v58 = vor.u32 %v10939_v52, %v9903_v29  ;;  %v9927_v52 = vld [vmem:[#allocation47 + $0x88] sm:$0xf0] }
 0xd68   :  { %6096 = vmatpush.bf16.msrb.mxu2 %v9774_v45  ;;  %v9893_v45 = vld [vmem:[#allocation47 + $0x40] sm:$0xf] }
 0xd69   :  { %6084 = vmatpush.bf16.msrb.mxu1 %v9826_v7  ;;  %v9894_v25 = vor.u32 %v10938_v4, %v9893_v45  ;;  %v10936_v7 = vld [vmem:[#allocation47 + $0x34] sm:$0xf0]  ;;  %v10015_v45 = vld [vmem:[#allocation49 + $0x70] sm:$0xf] }
 0xd6a   :  { %v9886_v18 = vor.u32 %v10936_v7, %v9885_v9  ;;  %v10968_v4 = vld [vmem:[#allocation49 + $0x74] sm:$0xf0] }
 0xd6b   :  { %6071 = vmatpush.bf16.msra.mxu0 %v9762_v1  ;;  %v10935_v1 = vld [vmem:[#allocation47 + $0x34] sm:$0xf]  ;;  %v10016_v37 = vor.u32 %v10968_v4, %v10015_v45 }
 0xd6c   :  { %6097 = vmatpush.bf16.msrb.mxu2 %v9766_v53  ;;  %v9887_v53 = vld [vmem:[#allocation47 + $0x38] sm:$0xf0] }
 0xd6d   :  { %6138 = vmatpush.bf16.msra.mxu1 %v6127_v56  ;;  %v9890_v48 = vor.u32 %v10935_v1, %v9887_v53  ;;  %v9877_v56 = vld [vmem:[#allocation47 + $0x20] sm:$0xf]  ;;  %v6117_v53 = vld [vmem:[#allocation41] sm:$0x3] }
 0xd6e   :  { %v6119_v34 = vperm.slane %v6117_v53, 0 }
 0xd6f   :  { %6151 = vmatpush.bf16.msrb.mxu0 %v6129_v3  ;;  %v10934_v3 = vld [vmem:[#allocation47 + $0x24] sm:$0xf0] }
 0xd70   :  { %6348 = vmatpush.bf16.msra.mxu2 %v9922_v33 }
 0xd74   :  { %6349 = vmatpush.bf16.msra.mxu2 %v9914_v16 }
 0xd78   :  { %6350 = vmatpush.bf16.msra.mxu2 %v9906_v58 }
 0xd7c   :  { %6351 = vmatpush.bf16.msra.mxu2 %v9898_v13  ;;  %v10017_v13 = vld [vmem:[#allocation49 + $0x78] sm:$0xf0] }
 0xd80   :  { %6352 = vmatpush.bf16.msra.mxu2 %v9890_v48 }
 0xde9   :  { %v5856_v51 = vpop.f32.mrf.mxu2  ;;  %v5882_v20 = vpop.f32.mrf.mxu3 }
 0xdea   :  { %v5857_v60 = vadd.f32 %v5856_v51, %v5720_v15  ;;  %v5883_v43 = vadd.f32 %v5882_v20, %v5721_v38  ;;  %v9878_v15 = vor.u32 %v10934_v3, %v9877_v56  ;;  %v10950_v38 = vld [vmem:[#allocation47 + $0xa4] sm:$0xf0]  ;;  %v10933_v51 = vld [vmem:[#allocation47 + $0x24] sm:$0xf]  ;;  %v9879_v20 = vld [vmem:[#allocation47 + $0x28] sm:$0xf0] }
 0xdec   :  { %v5870_v12 = vadd.f32 %v14033_v8, %v5857_v60  ;;  %v5896_v23 = vadd.f32 %v14035_v50, %v5883_v43  ;;  %v9917_v8 = vld [vmem:[#allocation47 + $0x70] sm:$0xf]  ;;  %v10944_v50 = vld [vmem:[#allocation47 + $0x74] sm:$0xf0]  ;;  %v9942_v60 = vor.u32 %v10950_v38, %v9941_v11  ;;  %v9882_v43 = vor.u32 %v10933_v51, %v9879_v20 }
 0xded   :  { %v9918_v63 = vor.u32 %v10944_v50, %v9917_v8  ;;  %v9861_v50 = vld [vmem:[#allocation47] sm:$0xf] }
 0xdee   :  { %v5899_v36 = vmul.f32 0.5, %v5870_v12  ;;  %v5900_v30 = vmul.f32 0.5, %v5896_v23  ;;  %6353 = vmatpush.bf16.msra.mxu2 %v9882_v43  ;;  %v9862_v33 = vor.u32 %v10930_v22, %v9861_v50  ;;  %v10001_v50 = vld [vmem:[#allocation49 + $0x58] sm:$0xf0] }
 0xdef   :  { %6322 = vmatpush.bf16.msra.mxu3 %v9918_v63  ;;  %v9925_v63 = vld [vmem:[#allocation47 + $0x80] sm:$0xf] }
 0xdf0   :  { %11351 = vtanh.f32 %v5899_v36  ;;  %v5935_v36 = vld [vmem:[#allocation37] sm:$0x3]  ;;  %v9926_v16 = vor.u32 %v10946_v0, %v9925_v63  ;;  %v10961_v0 = vld [vmem:[#allocation49 + $0x44] sm:$0xf] }
 0xdf1   :  { %11353 = vtanh.f32 %v5900_v30  ;;  %v5858_v55 = vpop.f32.mrf.mxu2  ;;  %v5884_v31 = vpop.f32.mrf.mxu3  ;;  %v5938_v58 = vperm.slane %v5935_v36, 1 }
 0xdf2   :  { %v9869_v55 = vld [vmem:[#allocation47 + $0x10] sm:$0xf]  ;;  %v10932_v31 = vld [vmem:[#allocation47 + $0x14] sm:$0xf0] }
 0xdf3   :  { %6323 = vmatpush.bf16.msra.mxu3 %v9910_v54 }
 0xdf6   :  { %v11352_v42 = vpop.eup %11351 }
 0xdf7   :  { %v11354_v10 = vpop.eup %11353  ;;  %v5903_v57 = vadd.f32 1.0, %v11352_v42  ;;  %6324 = vmatpush.bf16.msra.mxu3 %v9902_v27  ;;  %v9933_v42 = vld [vmem:[#allocation47 + $0x90] sm:$0xf]  ;;  %v9930_v27 = vor.u32 %v10945_v47, %v9927_v52  ;;  %v10976_v52 = vld [vmem:[#allocation49 + $0xb4] sm:$0xf0] }
 0xdf8   :  { %v5904_v44 = vadd.f32 1.0, %v11354_v10  ;;  %v9870_v10 = vor.u32 %v10932_v31, %v9869_v55 }
 0xdf9   :  { %v5905_v59 = vmul.f32 0.5, %v5903_v57  ;;  %v10948_v57 = vld [vmem:[#allocation47 + $0x94] sm:$0xf0] }
 0xdfa   :  { %v5906_v46 = vmul.f32 0.5, %v5904_v44  ;;  %v10931_v44 = vld [vmem:[#allocation47 + $0x14] sm:$0xf] }
 0xdfb   :  { %v5907_v5 = vmul.f32 %v5905_v59, %v5870_v12  ;;  %6325 = vmatpush.bf16.msra.mxu3 %v9894_v25  ;;  %v10949_v12 = vld [vmem:[#allocation47 + $0xa4] sm:$0xf]  ;;  %v9871_v59 = vld [vmem:[#allocation47 + $0x18] sm:$0xf0]  ;;  %v10967_v25 = vld [vmem:[#allocation49 + $0x74] sm:$0xf] }
 0xdfc   :  { %v5908_v6 = vmul.f32 %v5906_v46, %v5896_v23  ;;  %v9943_v23 = vld [vmem:[#allocation47 + $0xa8] sm:$0xf0]  ;;  %v5937_v46 = vperm.slane %v5935_v36, 0  ;;  %v10020_v35 = vor.u32 %v10967_v25, %v10017_v13  ;;  %v10975_v25 = vld [vmem:[#allocation49 + $0xb4] sm:$0xf] }
 0xdfd   :  { %v5909_v40 = vpack.c.bf16 %v5907_v5, %v5907_v5  ;;  %v9946_v30 = vor.u32 %v10949_v12, %v9943_v23  ;;  %v9934_v5 = vor.u32 %v10948_v57, %v9933_v42  ;;  %v10007_v57 = vld [vmem:[#allocation49 + $0x60] sm:$0xf] }
 0xdfe   :  { %v5910_v49 = vpack.c.bf16 %v5908_v6, %v5908_v6  ;;  %v9874_v6 = vor.u32 %v10931_v44, %v9871_v59  ;;  %v10966_v44 = vld [vmem:[#allocation49 + $0x64] sm:$0xf0]  ;;  %v10965_v59 = vld [vmem:[#allocation49 + $0x64] sm:$0xf]  ;;  %v9975_v13 = vld [vmem:[#allocation49 + $0x20] sm:$0xf] }
 0xdff   :  { %6072 = vmatmul.bf16.vlgmr.msra.gmra.mxu0 %v5909_v40  ;;  %6098 = vmatmul.bf16.vlgmr.msrb.gmra.mxu2 %v5909_v40  ;;  %v10947_v40 = vld [vmem:[#allocation47 + $0x94] sm:$0xf] }
 0xe00   :  { %9855 = vmatmul.msk.bf16.vlgmr.msrb.gmra.mxu1 %vm4252_vm6, %v5910_v49  ;;  %9856 = vmatmul.msk.bf16.vlgmr.msrb.gmra.mxu3 %vm4252_vm6, %v5910_v49  ;;  %v9935_v49 = vld [vmem:[#allocation47 + $0x98] sm:$0xf0] }
 0xe01   :  { %6326 = vmatpush.bf16.msra.mxu3 %v9886_v18  ;;  %6339 = vmatpush.bf16.msrb.mxu1 %v9950_v28  ;;  %v9938_v8 = vor.u32 %v10947_v40, %v9935_v49  ;;  %v6120_v28 = vperm.slane %v6117_v53, 1  ;;  %v10964_v40 = vld [vmem:[#allocation49 + $0x54] sm:$0xf0]  ;;  %v9977_v53 = vld [vmem:[#allocation49 + $0x28] sm:$0xf0] }
 0xe02   :  { %6365 = vmatpush.bf16.msra.mxu0 %v9954_v41  ;;  %6354 = vmatpush.bf16.msra.mxu2 %v9874_v6  ;;  %v9999_v6 = vld [vmem:[#allocation49 + $0x50] sm:$0xf] }
 0xe03   :  { %v10000_v22 = vor.u32 %v10964_v40, %v9999_v6  ;;  %v10025_v6 = vld [vmem:[#allocation49 + $0x88] sm:$0xf0] }
 0xe05   :  { %6327 = vmatpush.bf16.msra.mxu3 %v9878_v15  ;;  %6340 = vmatpush.bf16.msrb.mxu1 %v9942_v60 }
 0xe06   :  { %6366 = vmatpush.bf16.msra.mxu0 %v9946_v30  ;;  %6355 = vmatpush.bf16.msra.mxu2 %v9866_v24  ;;  %v10047_v24 = vld [vmem:[#allocation49 + $0xb0] sm:$0xf] }
 0xe07   :  { %v10048_v45 = vor.u32 %v10976_v52, %v10047_v24  ;;  %v14084_v24 = vld [vmem:[%s14444_s5 + $0xb0] sm:$0xff]  ;;  %v14092_v52 = vld [vmem:[%s14444_s5 + $0xa0] sm:$0xff] }
 0xe09   :  { %6328 = vmatpush.bf16.msra.mxu3 %v9870_v10  ;;  %6341 = vmatpush.bf16.msrb.mxu1 %v9934_v5  ;;  %v10009_v5 = vld [vmem:[#allocation49 + $0x68] sm:$0xf0] }
 0xe0a   :  { %6367 = vmatpush.bf16.msra.mxu0 %v9938_v8  ;;  %v10012_v49 = vor.u32 %v10965_v59, %v10009_v5  ;;  %v10963_v8 = vld [vmem:[#allocation49 + $0x54] sm:$0xf]  ;;  %v10969_v5 = vld [vmem:[#allocation49 + $0x84] sm:$0xf] }
 0xe0b   :  { %v10004_v63 = vor.u32 %v10963_v8, %v10001_v50  ;;  %v10028_v40 = vor.u32 %v10969_v5, %v10025_v6  ;;  %v14057_v8 = vld [vmem:[%s14444_s5 + $0xf8] sm:$0xff]  ;;  %v14060_v50 = vld [vmem:[%s14444_s5 + $0xe0] sm:$0xff] }
 0xe0c   :  { %v14160_v5 = vld [vmem:[%s14444_s5 + $0x38] sm:$0xff] }
 0xe0d   :  { %6329 = vmatpush.bf16.msra.mxu3 %v9862_v33  ;;  %6342 = vmatpush.bf16.msrb.mxu1 %v9926_v16  ;;  %v10962_v33 = vld [vmem:[#allocation49 + $0x44] sm:$0xf0]  ;;  %v10960_v16 = vld [vmem:[#allocation49 + $0x34] sm:$0xf0] }
 0xe0e   :  { %6368 = vmatpush.bf16.msra.mxu0 %v9930_v27  ;;  %v10959_v27 = vld [vmem:[#allocation49 + $0x34] sm:$0xf]  ;;  %v6640_v6 = vld [vmem:[%s14444_s5 + $0x158] sm:$0xff] }
 0xe0f   :  { %9858 = vmatmul.msk.bf16.vlgmr.msrb.gmra.mxu0 %vm900_vm1, %v14443_v17 }
 0xe10   :  { %9857 = vmatmul.msk.bf16.vlgmr.msra.gmra.mxu1 %vm900_vm1, %v14443_v17 }
 0xe11   :  { %6539 = vmatpush.bf16.msra.mxu1 %v10016_v37  ;;  %6565 = vmatpush.bf16.msrb.mxu3 %v10020_v35 }
 0xe12   :  { %6556 = vmatpush.bf16.msrb.mxu0 %v10048_v45 }
 0xe15   :  { %6566 = vmatpush.bf16.msrb.mxu3 %v10012_v49  ;;  %v14054_v49 = vld [vmem:[%s14444_s5 + $0xf0] sm:$0xff] }
 0xe19   :  { %6567 = vmatpush.bf16.msrb.mxu3 %v10004_v63 }
 0xe7c   :  { %v6073_v19 = vpop.f32.mrf.mxu0 }
 0xe7d   :  { %v6074_v54 = vadd.f32 %v6073_v19, %v5937_v46  ;;  %v6086_v26 = vpop.f32.mrf.mxu1  ;;  %v10008_v46 = vor.u32 %v10966_v44, %v10007_v57  ;;  %v9991_v19 = vld [vmem:[#allocation49 + $0x40] sm:$0xf]  ;;  %v10953_v57 = vld [vmem:[#allocation49 + $0x4] sm:$0xf]  ;;  %v9961_v44 = vld [vmem:[#allocation49 + $0x8] sm:$0xf0] }
 0xe7e   :  { %v9992_v14 = vor.u32 %v10962_v33, %v9991_v19  ;;  %v14068_v33 = vld [vmem:[%s14444_s5 + $0xd0] sm:$0xff] }
 0xe7f   :  { %v14047_v29 = vadd.f32 %v6086_v26, %v6074_v54  ;;  %6540 = vmatpush.bf16.msra.mxu1 %v10008_v46  ;;  %v9996_v54 = vor.u32 %v10961_v0, %v9993_v2  ;;  %v9983_v26 = vld [vmem:[#allocation49 + $0x30] sm:$0xf]  ;;  %v9964_v46 = vor.u32 %v10953_v57, %v9961_v44  ;;  %v14150_v57 = vld [vmem:[%s14444_s5 + $0x48] sm:$0xff] }
 0xe80   :  { %v9984_v47 = vor.u32 %v10960_v16, %v9983_v26  ;;  %v14071_v0 = vld [vmem:[%s14444_s5 + $0xd8] sm:$0xff]  ;;  %v14076_v2 = vld [vmem:[%s14444_s5 + $0xc0] sm:$0xff]  ;;  %v6642_v44 = vld [vmem:[%s14444_s5 + $0x168] sm:$0xff] }
 0xe81   :  { %6568 = vmatpush.bf16.msrb.mxu3 %v9996_v54  ;;  %v14079_v54 = vld [vmem:[%s14444_s5 + $0xc8] sm:$0xff] }
 0xe82   :  { %v6099_v21 = vpop.f32.mrf.mxu2 }
 0xe83   :  { %v6100_v9 = vadd.f32 %v6099_v21, %v5938_v58  ;;  %v6112_v7 = vpop.f32.mrf.mxu3  ;;  %6541 = vmatpush.bf16.msra.mxu1 %v10000_v22  ;;  %v9985_v58 = vld [vmem:[#allocation49 + $0x38] sm:$0xf0] }
 0xe84   :  { %v6075_v18 = vpop.f32.mrf.mxu0  ;;  %v9988_v4 = vor.u32 %v10959_v27, %v9985_v58  ;;  %v10049_v21 = vld [vmem:[#allocation49 + $0xb8] sm:$0xf0] }
 0xe85   :  { %v14049_v61 = vadd.f32 %v6112_v7, %v6100_v9  ;;  %v6088_v1 = vpop.f32.mrf.mxu1  ;;  %v10052_v37 = vor.u32 %v10975_v25, %v10049_v21  ;;  %v10958_v9 = vld [vmem:[#allocation49 + $0x24] sm:$0xf0]  ;;  %v10039_v7 = vld [vmem:[#allocation49 + $0xa0] sm:$0xf] }
 0xe86   :  { %6569 = vmatpush.bf16.msrb.mxu3 %v9988_v4  ;;  %v9976_v35 = vor.u32 %v10958_v9, %v9975_v13  ;;  %v10974_v18 = vld [vmem:[#allocation49 + $0xa4] sm:$0xf0]  ;;  %v10957_v1 = vld [vmem:[#allocation49 + $0x24] sm:$0xf]  ;;  %v14065_v22 = vld [vmem:[%s14444_s5 + $0xe8] sm:$0xff] }
 0xe87   :  { %6542 = vmatpush.bf16.msra.mxu1 %v9992_v14  ;;  %6582 = vmatpush.bf16.msrb.mxu2 %v10052_v37  ;;  %v6193_v14 = vld [vmem:[#allocation43] sm:$0x3]  ;;  %v14100_v13 = vld [vmem:[%s14444_s5 + $0x90] sm:$0xff]  ;;  %v14103_v9 = vld [vmem:[%s14444_s5 + $0x98] sm:$0xff] }
 0xe88   :  { %v6195_v26 = vperm.slane %v6193_v14, 0  ;;  %v6196_v16 = vperm.slane %v6193_v14, 1  ;;  %v14095_v27 = vld [vmem:[%s14444_s5 + $0xa8] sm:$0xff] }
 0xe89   :  { %v6638_v14 = vld [vmem:[%s14444_s5 + $0x148] sm:$0xff] }
 0xe8a   :  { %v6101_v48 = vpop.f32.mrf.mxu2 }
 0xe8b   :  { %v6114_v39 = vpop.f32.mrf.mxu3  ;;  %6543 = vmatpush.bf16.msra.mxu1 %v9984_v47  ;;  %v9980_v48 = vor.u32 %v10957_v1, %v9977_v53  ;;  %v14087_v47 = vld [vmem:[%s14444_s5 + $0xb8] sm:$0xff]  ;;  %v14111_v1 = vld [vmem:[%s14444_s5 + $0x88] sm:$0xff] }
 0xe8c   :  { %v6153_v41 = vpop.f32.mrf.mxu0  ;;  %v10041_v39 = vld [vmem:[#allocation49 + $0xa8] sm:$0xf0] }
 0xe8d   :  { %v6140_v56 = vpop.f32.mrf.mxu1  ;;  %v6154_v3 = vadd.f32 %v6153_v41, %v6120_v28  ;;  %v10040_v28 = vor.u32 %v10974_v18, %v10039_v7  ;;  %6570 = vmatpush.bf16.msrb.mxu3 %v9980_v48  ;;  %v14108_v18 = vld [vmem:[%s14444_s5 + $0x80] sm:$0xff]  ;;  %v14116_v48 = vld [vmem:[%s14444_s5 + $0x70] sm:$0xff] }
 0xe8e   :  { %v6141_v11 = vadd.f32 %v6140_v56, %v6119_v34  ;;  %v10973_v34 = vld [vmem:[#allocation49 + $0xa4] sm:$0xf]  ;;  %v9967_v56 = vld [vmem:[#allocation49 + $0x10] sm:$0xf] }
 0xe8f   :  { %v6158_v15 = vmul.f32 0.5, %v6154_v3  ;;  %6544 = vmatpush.bf16.msra.mxu1 %v9976_v35  ;;  %v10044_v41 = vor.u32 %v10973_v34, %v10041_v39  ;;  %6557 = vmatpush.bf16.msrb.mxu0 %v10040_v28  ;;  %v14119_v34 = vld [vmem:[%s14444_s5 + $0x78] sm:$0xff]  ;;  %v14124_v39 = vld [vmem:[%s14444_s5 + $0x60] sm:$0xff] }
 0xe90   :  { %v6157_v38 = vmul.f32 0.5, %v6141_v11 }
 0xe91   :  { %11355 = vtanh.f32 %v6158_v15  ;;  %6583 = vmatpush.bf16.msrb.mxu2 %v10044_v41  ;;  %v14127_v41 = vld [vmem:[%s14444_s5 + $0x68] sm:$0xff] }
 0xe92   :  { %11357 = vtanh.f32 %v6157_v38  ;;  %v10972_v38 = vld [vmem:[#allocation49 + $0x94] sm:$0xf0] }
 0xe94   :  { %v6155_v51 = vpop.f32.mrf.mxu0 }
 0xe95   :  { %v6142_v20 = vpop.f32.mrf.mxu1  ;;  %v10955_v51 = vld [vmem:[#allocation49 + $0x14] sm:$0xf] }
 0xe96   :  { %v9969_v20 = vld [vmem:[#allocation49 + $0x18] sm:$0xf0] }
 0xe97   :  { %v11356_v60 = vpop.eup %11355 }
 0xe98   :  { %v11358_v43 = vpop.eup %11357  ;;  %v6162_v12 = vadd.f32 1.0, %v11356_v60 }
 0xe99   :  { %v6161_v23 = vadd.f32 1.0, %v11358_v43  ;;  %v9972_v43 = vor.u32 %v10955_v51, %v9969_v20 }
 0xe9a   :  { %v6164_v36 = vmul.f32 0.5, %v6162_v12  ;;  %v10971_v12 = vld [vmem:[#allocation49 + $0x94] sm:$0xf] }
 0xe9b   :  { %v6163_v30 = vmul.f32 0.5, %v6161_v23  ;;  %v10033_v23 = vld [vmem:[#allocation49 + $0x98] sm:$0xf0]  ;;  %6571 = vmatpush.bf16.msrb.mxu3 %v9972_v43 }
 0xe9c   :  { %v6166_v55 = vmul.f32 %v6164_v36, %v6154_v3  ;;  %v10956_v3 = vld [vmem:[#allocation49 + $0x14] sm:$0xf0]  ;;  %v10036_v36 = vor.u32 %v10971_v12, %v10033_v23 }
 0xe9d   :  { %v6165_v31 = vmul.f32 %v6163_v30, %v6141_v11  ;;  %v10031_v11 = vld [vmem:[#allocation49 + $0x90] sm:$0xf]  ;;  %v9968_v15 = vor.u32 %v10956_v3, %v9967_v56  ;;  %v9959_v30 = vld [vmem:[#allocation49] sm:$0xf] }
 0xe9e   :  { %v6168_v42 = vpack.c.bf16 %v6166_v55, %v6166_v55  ;;  %v10032_v60 = vor.u32 %v10972_v38, %v10031_v11  ;;  %v10954_v55 = vld [vmem:[#allocation49 + $0x4] sm:$0xf0]  ;;  %6584 = vmatpush.bf16.msrb.mxu2 %v10036_v36 }
 0xe9f   :  { %v6167_v10 = vpack.c.bf16 %v6165_v31, %v6165_v31  ;;  %6545 = vmatpush.bf16.msra.mxu1 %v9968_v15  ;;  %v10023_v31 = vld [vmem:[#allocation49 + $0x80] sm:$0xf]  ;;  %6572 = vmatpush.bf16.msrb.mxu3 %v9964_v46  ;;  %v6641_v46 = vld [vmem:[%s14444_s5 + $0x160] sm:$0xff] }
 0xea0   :  { %9955 = vmatmul.msk.bf16.vlgmr.msrb.gmra.mxu1 %vm4252_vm6, %v6168_v42  ;;  %9956 = vmatmul.msk.bf16.vlgmr.msra.gmra.mxu0 %vm4252_vm6, %v6168_v42  ;;  %v9960_v42 = vor.u32 %v10954_v55, %v9959_v30  ;;  %v14136_v30 = vld [vmem:[%s14444_s5 + $0x50] sm:$0xff]  ;;  %v14139_v55 = vld [vmem:[%s14444_s5 + $0x58] sm:$0xff] }
 0xea1   :  { %6330 = vmatmul.bf16.vlgmr.msra.gmra.mxu3 %v6167_v10  ;;  %6356 = vmatmul.bf16.vlgmr.msra.gmra.mxu2 %v6167_v10  ;;  %v10970_v10 = vld [vmem:[#allocation49 + $0x84] sm:$0xf0] }
 0xea2   :  { %6558 = vmatpush.bf16.msrb.mxu0 %v10032_v60  ;;  %v10024_v59 = vor.u32 %v10970_v10, %v10023_v31  ;;  %6585 = vmatpush.bf16.msrb.mxu2 %v10028_v40  ;;  %v6644_v31 = vld [vmem:[%s14444_s5 + $0x178] sm:$0xff]  ;;  %v6643_v10 = vld [vmem:[%s14444_s5 + $0x170] sm:$0xff]  ;;  %v14165_v40 = vld [vmem:[%s14444_s5 + $0x20] sm:$0xff] }
 0xea3   :  { %6546 = vmatpush.bf16.msra.mxu1 %v9960_v42  ;;  %v14145_v42 = vld [vmem:[%s14444_s5 + $0x40] sm:$0xff]  ;;  %6716 = vmatpush.msra.mxu3 %v6644_v31 }
 0xea5   :  { %6717 = vmatpush.msra.mxu3 %v6642_v44 }
 0xea6   :  { %6559 = vmatpush.bf16.msrb.mxu0 %v10024_v59  ;;  %6688 = vmatpush.msra.mxu2 %v14057_v8  ;;  %v14155_v59 = vld [vmem:[%s14444_s5 + $0x30] sm:$0xff] }
 0xea7   :  { %6676 = vmatpush.msrb.mxu1 %v6643_v10  ;;  %6718 = vmatpush.msra.mxu3 %v6640_v6 }
 0xea8   :  { %6689 = vmatpush.msra.mxu2 %v14065_v22 }
 0xea9   :  { %6677 = vmatpush.msrb.mxu1 %v6641_v46  ;;  %6719 = vmatpush.msra.mxu3 %v6638_v14 }
 0xeaa   :  { %6648 = vmatpush.msra.mxu0 %v14054_v49  ;;  %6690 = vmatpush.msra.mxu2 %v14071_v0 }
 0xeac   :  { %6649 = vmatpush.msra.mxu0 %v14060_v50  ;;  %6691 = vmatpush.msra.mxu2 %v14079_v54 }
 0xeae   :  { %6650 = vmatpush.msra.mxu0 %v14068_v33  ;;  %6692 = vmatpush.msra.mxu2 %v14087_v47 }
 0xeb0   :  { %6651 = vmatpush.msra.mxu0 %v14076_v2  ;;  %6693 = vmatpush.msra.mxu2 %v14095_v27 }
 0xeb2   :  { %6652 = vmatpush.msra.mxu0 %v14084_v24  ;;  %6694 = vmatpush.msra.mxu2 %v14103_v9 }
 0xeb4   :  { %6653 = vmatpush.msra.mxu0 %v14092_v52  ;;  %6695 = vmatpush.msra.mxu2 %v14111_v1 }
 0xeb6   :  { %6654 = vmatpush.msra.mxu0 %v14100_v13  ;;  %6696 = vmatpush.msra.mxu2 %v14119_v34 }
 0xeb8   :  { %6655 = vmatpush.msra.mxu0 %v14108_v18  ;;  %6697 = vmatpush.msra.mxu2 %v14127_v41 }
 0xeba   :  { %6656 = vmatpush.msra.mxu0 %v14116_v48  ;;  %6698 = vmatpush.msra.mxu2 %v14139_v55 }
 0xebc   :  { %6657 = vmatpush.msra.mxu0 %v14124_v39  ;;  %6699 = vmatpush.msra.mxu2 %v14150_v57 }
 0xebe   :  { %6658 = vmatpush.msra.mxu0 %v14136_v30  ;;  %6700 = vmatpush.msra.mxu2 %v14160_v5 }
 0xec0   :  { %6659 = vmatpush.msra.mxu0 %v14145_v42 }
 0xec2   :  { %6660 = vmatpush.msra.mxu0 %v14155_v59 }
 0xec4   :  { %6661 = vmatpush.msra.mxu0 %v14165_v40 }
 0xf1d   :  { %v6344_v63 = vpop.f32.mrf.mxu1  ;;  %v6370_v19 = vpop.f32.mrf.mxu0 }
 0xf24   :  { %v6331_v58 = vpop.f32.mrf.mxu3  ;;  %v6357_v45 = vpop.f32.mrf.mxu2 }
 0xf25   :  { %v6332_v4 = vadd.f32 %v6331_v58, %v6195_v26  ;;  %v6358_v25 = vadd.f32 %v6357_v45, %v6196_v16  ;;  %v6346_v21 = vpop.f32.mrf.mxu1  ;;  %v6372_v37 = vpop.f32.mrf.mxu0  ;;  %v14175_v26 = vld [vmem:[%s14444_s5 + $0x10] sm:$0xff]  ;;  %v6637_v16 = vld [vmem:[%s14444_s5 + $0x140] sm:$0xff]  ;;  %v14180_v58 = vld [vmem:[%s14444_s5 + $0x18] sm:$0xff] }
 0xf26   :  { %6662 = vmatpush.msra.mxu0 %v14175_v26  ;;  %v6636_v45 = vld [vmem:[%s14444_s5 + $0x138] sm:$0xff]  ;;  %v14190_v21 = vld [vmem:[%s14444_s5 + $0x8] sm:$0xff] }
 0xf27   :  { %v6345_v7 = vadd.f32 %v6344_v63, %v6332_v4  ;;  %v6371_v35 = vadd.f32 %v6370_v19, %v6358_v25  ;;  %v6639_v63 = vld [vmem:[%s14444_s5 + $0x150] sm:$0xff]  ;;  %v14170_v19 = vld [vmem:[%s14444_s5 + $0x28] sm:$0xff]  ;;  %v14185_v4 = vld [vmem:[%s14444_s5] sm:$0xff]  ;;  %6720 = vmatpush.msra.mxu3 %v6636_v45 }
 0xf28   :  { %6678 = vmatpush.msrb.mxu1 %v6639_v63  ;;  %6701 = vmatpush.msra.mxu2 %v14170_v19  ;;  %v6635_v25 = vld [vmem:[%s14444_s5 + $0x130] sm:$0xff]  ;;  %v6634_v37 = vld [vmem:[%s14444_s5 + $0x128] sm:$0xff] }
 0xf29   :  { %v6374_v53 = vmul.f32 0.5, %v6345_v7  ;;  %v6375_v28 = vmul.f32 0.5, %v6371_v35  ;;  %6663 = vmatpush.msra.mxu0 %v14185_v4  ;;  %6721 = vmatpush.msra.mxu3 %v6634_v37 }
 0xf2a   :  { %6679 = vmatpush.msrb.mxu1 %v6637_v16  ;;  %6702 = vmatpush.msra.mxu2 %v14180_v58 }
 0xf2b   :  { %11359 = vtanh.f32 %v6374_v53  ;;  %v6631_v53 = vld [vmem:[%s14444_s5 + $0x110] sm:$0xff] }
 0xf2c   :  { %11361 = vtanh.f32 %v6375_v28  ;;  %v6333_v56 = vpop.f32.mrf.mxu3  ;;  %v6359_v3 = vpop.f32.mrf.mxu2  ;;  %6680 = vmatpush.msrb.mxu1 %v6635_v25  ;;  %6703 = vmatpush.msra.mxu2 %v14190_v21  ;;  %v6630_v28 = vld [vmem:[%s14444_s5 + $0x108] sm:$0xff] }
 0xf2d   :  { %v6629_v56 = vld [vmem:[%s14444_s5 + $0x100] sm:$0xff] }
 0xf31   :  { %v11360_v11 = vpop.eup %11359 }
 0xf32   :  { %v11362_v15 = vpop.eup %11361  ;;  %v6378_v38 = vadd.f32 1.0, %v11360_v11 }
 0xf33   :  { %v6379_v51 = vadd.f32 1.0, %v11362_v15 }
 0xf34   :  { %v6380_v20 = vmul.f32 0.5, %v6378_v38 }
 0xf35   :  { %v6381_v60 = vmul.f32 0.5, %v6379_v51 }
 0xf36   :  { %v6382_v43 = vmul.f32 %v6380_v20, %v6345_v7  ;;  %v6633_v7 = vld [vmem:[%s14444_s5 + $0x120] sm:$0xff] }
 0xf37   :  { %v6383_v12 = vmul.f32 %v6381_v60, %v6371_v35  ;;  %6681 = vmatpush.msrb.mxu1 %v6633_v7  ;;  %v6632_v35 = vld [vmem:[%s14444_s5 + $0x118] sm:$0xff] }
 0xf38   :  { %v6384_v23 = vpack.c.bf16 %v6382_v43, %v6382_v43  ;;  %6722 = vmatpush.msra.mxu3 %v6632_v35 }
 0xf39   :  { %v6385_v36 = vpack.c.bf16 %v6383_v12, %v6383_v12  ;;  %6682 = vmatpush.msrb.mxu1 %v6631_v53 }
 0xf3a   :  { %6547 = vmatmul.bf16.vlgmr.msra.gmra.mxu1 %v6384_v23  ;;  %6573 = vmatmul.bf16.vlgmr.msrb.gmra.mxu3 %v6384_v23 }
 0xf3b   :  { %10053 = vmatmul.msk.bf16.vlgmr.msrb.gmra.mxu0 %vm4252_vm6, %v6385_v36  ;;  %10054 = vmatmul.msk.bf16.vlgmr.msrb.gmra.mxu2 %vm4252_vm6, %v6385_v36 }
 0xf3c   :  { %6763 = vmatpush.msrb.mxu0 %v6643_v10  ;;  %6803 = vmatpush.msrb.mxu2 %v6644_v31  ;;  %v10992_v31 = vld [vmem:[#allocation29 + $0x74] sm:$0xf0] }
 0xf3d   :  { %6723 = vmatpush.msra.mxu3 %v6630_v28  ;;  %6683 = vmatpush.msrb.mxu1 %v6629_v56 }
 0xf3e   :  { %6764 = vmatpush.msrb.mxu0 %v6641_v46  ;;  %6804 = vmatpush.msrb.mxu2 %v6642_v44  ;;  %v10990_v46 = vld [vmem:[#allocation29 + $0x64] sm:$0xf0] }
 0xf3f   :  { %6775 = vmatpush.msrb.mxu3 %v14057_v8  ;;  %6735 = vmatpush.msra.mxu1 %v14054_v49  ;;  %v6410_v49 = vld [vmem:[#allocation44] sm:$0x3] }
 0xf40   :  { %6765 = vmatpush.msrb.mxu0 %v6639_v63  ;;  %6805 = vmatpush.msrb.mxu2 %v6640_v6  ;;  %v6412_v8 = vperm.slane %v6410_v49, 0 }
 0xf41   :  { %6776 = vmatpush.msrb.mxu3 %v14065_v22  ;;  %6736 = vmatpush.msra.mxu1 %v14060_v50  ;;  %v5576_v50 = vld [vmem:[#allocation23] sm:$0x3] }
 0xf42   :  { %6766 = vmatpush.msrb.mxu0 %v6637_v16  ;;  %6806 = vmatpush.msrb.mxu2 %v6638_v14  ;;  %v10988_v14 = vld [vmem:[#allocation29 + $0x54] sm:$0xf0] }
 0xf43   :  { %6777 = vmatpush.msrb.mxu3 %v14071_v0  ;;  %6737 = vmatpush.msra.mxu1 %v14068_v33  ;;  %v5578_v33 = vperm.slane %v5576_v50, 0 }
 0xf44   :  { %6767 = vmatpush.msrb.mxu0 %v6635_v25  ;;  %6807 = vmatpush.msrb.mxu2 %v6636_v45  ;;  %v10986_v25 = vld [vmem:[#allocation29 + $0x44] sm:$0xf0] }
 0xf45   :  { %6778 = vmatpush.msrb.mxu3 %v14079_v54  ;;  %6738 = vmatpush.msra.mxu1 %v14076_v2 }
 0xf46   :  { %6768 = vmatpush.msrb.mxu0 %v6633_v7  ;;  %6808 = vmatpush.msrb.mxu2 %v6634_v37  ;;  %v10095_v7 = vld [vmem:[#allocation29 + $0x48] sm:$0xf0] }
 0xf47   :  { %6779 = vmatpush.msrb.mxu3 %v14087_v47  ;;  %6739 = vmatpush.msra.mxu1 %v14084_v24  ;;  %v6413_v24 = vperm.slane %v6410_v49, 1  ;;  %v5625_v47 = vadd.f32 %v14030_v32, %v5578_v33  ;;  %v10982_v33 = vld [vmem:[#allocation29 + $0x24] sm:$0xf0] }
 0xf48   :  { %6769 = vmatpush.msrb.mxu0 %v6631_v53  ;;  %6809 = vmatpush.msrb.mxu2 %v6632_v35  ;;  %v10085_v53 = vld [vmem:[#allocation29 + $0x30] sm:$0xf] }
 0xf49   :  { %6780 = vmatpush.msrb.mxu3 %v14095_v27  ;;  %6740 = vmatpush.msra.mxu1 %v14092_v52 }
 0xf4a   :  { %6770 = vmatpush.msrb.mxu0 %v6629_v56  ;;  %6810 = vmatpush.msrb.mxu2 %v6630_v28  ;;  %v10984_v28 = vld [vmem:[#allocation29 + $0x34] sm:$0xf0]  ;;  %v10983_v56 = vld [vmem:[#allocation29 + $0x34] sm:$0xf] }
 0xf4b   :  { %6781 = vmatpush.msrb.mxu3 %v14103_v9  ;;  %6741 = vmatpush.msra.mxu1 %v14100_v13  ;;  %v5579_v13 = vperm.slane %v5576_v50, 1  ;;  %v10086_v49 = vor.u32 %v10984_v28, %v10085_v53  ;;  %v10209_v53 = vld [vmem:[#allocation32 + $0x68] sm:$0xf0] }
 0xf4d   :  { %6782 = vmatpush.msrb.mxu3 %v14111_v1  ;;  %6742 = vmatpush.msra.mxu1 %v14108_v18  ;;  %v5638_v32 = vadd.f32 %v14028_v62, %v5579_v13 }
 0xf4f   :  { %6783 = vmatpush.msrb.mxu3 %v14119_v34  ;;  %6743 = vmatpush.msra.mxu1 %v14116_v48 }
 0xf51   :  { %6784 = vmatpush.msrb.mxu3 %v14127_v41  ;;  %6744 = vmatpush.msra.mxu1 %v14124_v39 }
 0xf53   :  { %6785 = vmatpush.msrb.mxu3 %v14139_v55  ;;  %6745 = vmatpush.msra.mxu1 %v14136_v30  ;;  %v10117_v55 = vld [vmem:[#allocation29 + $0x70] sm:$0xf] }
 0xf54   :  { %v10118_v10 = vor.u32 %v10992_v31, %v10117_v55  ;;  %v10996_v55 = vld [vmem:[#allocation29 + $0x94] sm:$0xf0]  ;;  %v10995_v31 = vld [vmem:[#allocation29 + $0x94] sm:$0xf] }
 0xf55   :  { %6786 = vmatpush.msrb.mxu3 %v14150_v57  ;;  %6746 = vmatpush.msra.mxu1 %v14145_v42  ;;  %v10991_v42 = vld [vmem:[#allocation29 + $0x74] sm:$0xf]  ;;  %v10119_v57 = vld [vmem:[#allocation29 + $0x78] sm:$0xf0] }
 0xf56   :  { %v10122_v44 = vor.u32 %v10991_v42, %v10119_v57 }
 0xf57   :  { %6787 = vmatpush.msrb.mxu3 %v14160_v5  ;;  %6747 = vmatpush.msra.mxu1 %v14155_v59  ;;  %v10109_v59 = vld [vmem:[#allocation29 + $0x60] sm:$0xf]  ;;  %v10989_v5 = vld [vmem:[#allocation29 + $0x64] sm:$0xf] }
 0xf58   :  { %v10110_v6 = vor.u32 %v10990_v46, %v10109_v59  ;;  %v10994_v59 = vld [vmem:[#allocation29 + $0x84] sm:$0xf0]  ;;  %v10993_v46 = vld [vmem:[#allocation29 + $0x84] sm:$0xf] }
 0xf59   :  { %6788 = vmatpush.msrb.mxu3 %v14170_v19  ;;  %6748 = vmatpush.msra.mxu1 %v14165_v40  ;;  %v10111_v40 = vld [vmem:[#allocation29 + $0x68] sm:$0xf0]  ;;  %v10101_v19 = vld [vmem:[#allocation29 + $0x50] sm:$0xf] }
 0xf5a   :  { %v10114_v63 = vor.u32 %v10989_v5, %v10111_v40  ;;  %v10102_v16 = vor.u32 %v10988_v14, %v10101_v19  ;;  %v10127_v40 = vld [vmem:[#allocation29 + $0x88] sm:$0xf0]  ;;  %v10215_v14 = vld [vmem:[#allocation32 + $0x70] sm:$0xf] }
 0xf5b   :  { %6789 = vmatpush.msrb.mxu3 %v14180_v58  ;;  %6749 = vmatpush.msra.mxu1 %v14175_v26  ;;  %v10987_v26 = vld [vmem:[#allocation29 + $0x54] sm:$0xf]  ;;  %v10103_v58 = vld [vmem:[#allocation29 + $0x58] sm:$0xf0] }
 0xf5c   :  { %v10106_v45 = vor.u32 %v10987_v26, %v10103_v58  ;;  %v11016_v26 = vld [vmem:[#allocation32 + $0x74] sm:$0xf0] }
 0xf5d   :  { %6790 = vmatpush.msrb.mxu3 %v14190_v21  ;;  %6750 = vmatpush.msra.mxu1 %v14185_v4  ;;  %v10093_v4 = vld [vmem:[#allocation29 + $0x40] sm:$0xf]  ;;  %v10985_v21 = vld [vmem:[#allocation29 + $0x44] sm:$0xf] }
 0xf5e   :  { %v10094_v37 = vor.u32 %v10986_v25, %v10093_v4  ;;  %v10098_v35 = vor.u32 %v10985_v21, %v10095_v7  ;;  %v10217_v4 = vld [vmem:[#allocation32 + $0x78] sm:$0xf0]  ;;  %v10207_v25 = vld [vmem:[#allocation32 + $0x60] sm:$0xf]  ;;  %v11014_v21 = vld [vmem:[#allocation32 + $0x64] sm:$0xf0] }
 0xfb7   :  { %v6548_v22 = vpop.f32.mrf.mxu1 }
 0xfb8   :  { %v6549_v0 = vadd.f32 %v6548_v22, %v6412_v8  ;;  %v6561_v2 = vpop.f32.mrf.mxu0  ;;  %v10087_v8 = vld [vmem:[#allocation29 + $0x38] sm:$0xf0]  ;;  %v10077_v22 = vld [vmem:[#allocation29 + $0x20] sm:$0xf] }
 0xfb9   :  { %v10090_v50 = vor.u32 %v10983_v56, %v10087_v8  ;;  %v10208_v56 = vor.u32 %v11014_v21, %v10207_v25  ;;  %v10169_v21 = vld [vmem:[#allocation32 + $0x18] sm:$0xf0] }
 0xfba   :  { %v6562_v54 = vadd.f32 %v6561_v2, %v6549_v0  ;;  %v10981_v0 = vld [vmem:[#allocation29 + $0x24] sm:$0xf]  ;;  %v10078_v2 = vor.u32 %v10982_v33, %v10077_v22 }
 0xfbc   :  { %v6591_v52 = vadd.f32 1.0, %v6562_v54  ;;  %v10079_v54 = vld [vmem:[#allocation29 + $0x28] sm:$0xf0] }
 0xfbd   :  { %v6574_v27 = vpop.f32.mrf.mxu3 }
 0xfbe   :  { %v6593_v9 = vmul.f32 %v6591_v52, %v5625_v47  ;;  %v6575_v1 = vadd.f32 %v6574_v27, %v6413_v24  ;;  %v6587_v18 = vpop.f32.mrf.mxu2  ;;  %v10082_v24 = vor.u32 %v10981_v0, %v10079_v54  ;;  %v10149_v47 = vld [vmem:[#allocation29 + $0xb0] sm:$0xf]  ;;  %v11000_v52 = vld [vmem:[#allocation29 + $0xb4] sm:$0xf0]  ;;  %v10999_v27 = vld [vmem:[#allocation29 + $0xb4] sm:$0xf] }
 0xfbf   :  { %v6550_v34 = vpop.f32.mrf.mxu1  ;;  %v10150_v13 = vor.u32 %v11000_v52, %v10149_v47 }
 0xfc0   :  { %v6595_v48 = vadd.f32 %v6593_v9, %v14047_v29  ;;  %v6588_v41 = vadd.f32 %v6587_v18, %v6575_v1  ;;  %v6563_v3 = vpop.f32.mrf.mxu0  ;;  %v10151_v9 = vld [vmem:[#allocation29 + $0xb8] sm:$0xf0]  ;;  %v10069_v18 = vld [vmem:[#allocation29 + $0x10] sm:$0xf]  ;;  %v10980_v34 = vld [vmem:[#allocation29 + $0x14] sm:$0xf0] }
 0xfc1   :  { %v10154_v1 = vor.u32 %v10999_v27, %v10151_v9  ;;  %v10071_v3 = vld [vmem:[#allocation29 + $0x18] sm:$0xf0] }
 0xfc2   :  { %v6592_v39 = vadd.f32 1.0, %v6588_v41  ;;  %6664 = vmatmul.f32.vlgmr.msra.gmra.mxu0 %v6595_v48  ;;  %6704 = vmatmul.f32.vlgmr.msra.gmra.mxu2 %v6595_v48  ;;  %v10070_v41 = vor.u32 %v10980_v34, %v10069_v18 }
 0xfc3   :  { %6992 = vmatpush.bf16.msra.mxu0 %v10118_v10  ;;  %7018 = vmatpush.bf16.msra.mxu2 %v10122_v44  ;;  %v10135_v10 = vld [vmem:[#allocation29 + $0x98] sm:$0xf0]  ;;  %v10125_v44 = vld [vmem:[#allocation29 + $0x80] sm:$0xf] }
 0xfc4   :  { %v6594_v11 = vmul.f32 %v6592_v39, %v5638_v32  ;;  %v10141_v39 = vld [vmem:[#allocation29 + $0xa0] sm:$0xf]  ;;  %v10138_v57 = vor.u32 %v10995_v31, %v10135_v10 }
 0xfc5   :  { %v6576_v15 = vpop.f32.mrf.mxu3 }
 0xfc6   :  { %v6596_v29 = vadd.f32 %v6594_v11, %v14049_v61  ;;  %v6589_v38 = vpop.f32.mrf.mxu2  ;;  %v10998_v11 = vld [vmem:[#allocation29 + $0xa4] sm:$0xf0]  ;;  %v10997_v15 = vld [vmem:[#allocation29 + $0xa4] sm:$0xf] }
 0xfc7   :  { %6993 = vmatpush.bf16.msra.mxu0 %v10110_v6  ;;  %7019 = vmatpush.bf16.msra.mxu2 %v10114_v63  ;;  %v10143_v38 = vld [vmem:[#allocation29 + $0xa8] sm:$0xf0]  ;;  %v10126_v6 = vor.u32 %v10994_v59, %v10125_v44  ;;  %v10130_v63 = vor.u32 %v10993_v46, %v10127_v40  ;;  %v11005_v59 = vld [vmem:[#allocation32 + $0x24] sm:$0xf]  ;;  %v11023_v40 = vld [vmem:[#allocation32 + $0xb4] sm:$0xf] }
 0xfc8   :  { %10055 = vmatmul.msk.f32.vlgmr.msrb.gmra.mxu1 %vm4252_vm6, %v6596_v29  ;;  %10056 = vmatmul.msk.f32.vlgmr.msra.gmra.mxu3 %vm4252_vm6, %v6596_v29  ;;  %v11006_v44 = vld [vmem:[#allocation32 + $0x24] sm:$0xf0] }
 0xfc9   :  { %7009 = vmatpush.bf16.msrb.mxu1 %v10150_v13  ;;  %7035 = vmatpush.bf16.msra.mxu3 %v10154_v1 }
 0xfcb   :  { %6994 = vmatpush.bf16.msra.mxu0 %v10102_v16  ;;  %7020 = vmatpush.bf16.msra.mxu2 %v10106_v45  ;;  %v11015_v16 = vld [vmem:[#allocation32 + $0x74] sm:$0xf]  ;;  %v10216_v45 = vor.u32 %v11016_v26, %v10215_v14  ;;  %v11024_v26 = vld [vmem:[#allocation32 + $0xb4] sm:$0xf0] }
 0xfcc   :  { %v10220_v7 = vor.u32 %v11015_v16, %v10217_v4  ;;  %v11003_v4 = vld [vmem:[#allocation32 + $0x14] sm:$0xf] }
 0xfcf   :  { %6995 = vmatpush.bf16.msra.mxu0 %v10094_v37  ;;  %7021 = vmatpush.bf16.msra.mxu2 %v10098_v35  ;;  %v11013_v35 = vld [vmem:[#allocation32 + $0x64] sm:$0xf] }
 0xfd3   :  { %6996 = vmatpush.bf16.msra.mxu0 %v10086_v49  ;;  %7022 = vmatpush.bf16.msra.mxu2 %v10090_v50  ;;  %v10212_v49 = vor.u32 %v11013_v35, %v10209_v53  ;;  %v10241_v35 = vld [vmem:[#allocation32 + $0xa8] sm:$0xf0]  ;;  %v10239_v53 = vld [vmem:[#allocation32 + $0xa0] sm:$0xf] }
 0xfd7   :  { %6997 = vmatpush.bf16.msra.mxu0 %v10078_v2  ;;  %7023 = vmatpush.bf16.msra.mxu2 %v10082_v24 }
 0xfdb   :  { %6998 = vmatpush.bf16.msra.mxu0 %v10070_v41 }
0x103f   :  { %v6665_v62 = vpop.f32.mrf.mxu0 }
0x1045   :  { %v6685_v51 = vpop.f32.mrf.mxu1  ;;  %v6705_v61 = vpop.f32.mrf.mxu2 }
0x1046   :  { %v6686_v20 = vadd.f32 %v6685_v51, %v6665_v62  ;;  %v10146_v62 = vor.u32 %v10997_v15, %v10143_v38  ;;  %v10061_v51 = vld [vmem:[#allocation29] sm:$0xf]  ;;  %v11012_v15 = vld [vmem:[#allocation32 + $0x54] sm:$0xf0] }
0x1047   :  { %v10201_v38 = vld [vmem:[#allocation32 + $0x58] sm:$0xf0] }
0x1048   :  { %v14237_v60 = vsub.f32 %v6595_v48, %v6686_v20  ;;  %v10979_v48 = vld [vmem:[#allocation29 + $0x14] sm:$0xf]  ;;  %v10978_v20 = vld [vmem:[#allocation29 + $0x4] sm:$0xf0]  ;;  %7036 = vmatpush.bf16.msra.mxu3 %v10146_v62 }
0x1049   :  { %v10074_v32 = vor.u32 %v10979_v48, %v10071_v3 }
0x104a   :  { %v6730_v43 = vmul.f32 %v14237_v60, %v14237_v60 }
0x104b   :  { %v6725_v12 = vpop.f32.mrf.mxu3  ;;  %7024 = vmatpush.bf16.msra.mxu2 %v10074_v32 }
0x104c   :  { %v6726_v23 = vadd.f32 %v6725_v12, %v6705_v61  ;;  %6751 = vmatmul.f32.vlgmr.msra.gmra.mxu1 %v6730_v43  ;;  %6791 = vmatmul.f32.vlgmr.msrb.gmra.mxu3 %v6730_v43  ;;  %v10977_v43 = vld [vmem:[#allocation29 + $0x4] sm:$0xf]  ;;  %v10062_v61 = vor.u32 %v10978_v20, %v10061_v51  ;;  %v10063_v12 = vld [vmem:[#allocation29 + $0x8] sm:$0xf0] }
0x104d   :  { %7037 = vmatpush.bf16.msra.mxu3 %v10138_v57  ;;  %v10191_v51 = vld [vmem:[#allocation32 + $0x40] sm:$0xf]  ;;  %v11010_v20 = vld [vmem:[#allocation32 + $0x44] sm:$0xf0] }
0x104e   :  { %v14241_v36 = vsub.f32 %v6596_v29, %v6726_v23  ;;  %v10142_v29 = vor.u32 %v10998_v11, %v10141_v39  ;;  %v10066_v23 = vor.u32 %v10977_v43, %v10063_v12  ;;  %6999 = vmatpush.bf16.msra.mxu0 %v10062_v61  ;;  %v10199_v11 = vld [vmem:[#allocation32 + $0x50] sm:$0xf]  ;;  %v11009_v43 = vld [vmem:[#allocation32 + $0x44] sm:$0xf]  ;;  %v10192_v61 = vor.u32 %v11010_v20, %v10191_v51  ;;  %v10193_v12 = vld [vmem:[#allocation32 + $0x48] sm:$0xf0] }
0x104f   :  { %v10175_v57 = vld [vmem:[#allocation32 + $0x20] sm:$0xf]  ;;  %v11044_v51 = vld [vmem:[#allocation26 + $0x98] sm:$0xf0] }
0x1050   :  { %v6731_v30 = vmul.f32 %v14241_v36, %v14241_v36  ;;  %7010 = vmatpush.bf16.msrb.mxu1 %v10142_v29  ;;  %7025 = vmatpush.bf16.msra.mxu2 %v10066_v23  ;;  %v11011_v29 = vld [vmem:[#allocation32 + $0x54] sm:$0xf]  ;;  %v10196_v23 = vor.u32 %v11009_v43, %v10193_v12  ;;  %v10176_v46 = vor.u32 %v11006_v44, %v10175_v57  ;;  %v11043_v43 = vld [vmem:[#allocation26 + $0x94] sm:$0xf] }
0x1051   :  { %7038 = vmatpush.bf16.msra.mxu3 %v10130_v63  ;;  %v10204_v62 = vor.u32 %v11011_v29, %v10201_v38  ;;  %v10249_v63 = vld [vmem:[#allocation32 + $0xb8] sm:$0xf0]  ;;  %v11046_v29 = vld [vmem:[#allocation26 + $0xac] sm:$0xf]  ;;  %v10343_v38 = vld [vmem:[#allocation26 + $0xb4] sm:$0xf0] }
0x1052   :  { %10057 = vmatmul.msk.f32.vlgmr.msrb.gmra.mxu0 %vm4252_vm6, %v6731_v30  ;;  %10058 = vmatmul.msk.f32.vlgmr.msrb.gmra.mxu2 %vm4252_vm6, %v6731_v30  ;;  %v10133_v30 = vld [vmem:[#allocation29 + $0x90] sm:$0xf]  ;;  %v10252_v14 = vor.u32 %v11023_v40, %v10249_v63  ;;  %v10346_v20 = vor.u32 %v11046_v29, %v10343_v38  ;;  %v10283_v38 = vld [vmem:[#allocation26 + $0x3c] sm:$0xf0] }
0x1053   :  { %v10134_v42 = vor.u32 %v10996_v55, %v10133_v30  ;;  %v11008_v30 = vld [vmem:[#allocation32 + $0x34] sm:$0xf0]  ;;  %v11007_v55 = vld [vmem:[#allocation32 + $0x34] sm:$0xf]  ;;  %v11031_v29 = vld [vmem:[#allocation26 + $0x34] sm:$0xf] }
0x1054   :  { %7252 = vmatpush.bf16.msrb.mxu2 %v10252_v14 }
0x1055   :  { %7011 = vmatpush.bf16.msrb.mxu1 %v10134_v42  ;;  %7235 = vmatpush.bf16.msrb.mxu3 %v10220_v7  ;;  %v10185_v42 = vld [vmem:[#allocation32 + $0x38] sm:$0xf0]  ;;  %v11021_v7 = vld [vmem:[#allocation32 + $0xa4] sm:$0xf] }
0x1056   :  { %v10188_v10 = vor.u32 %v11007_v55, %v10185_v42 }
0x1059   :  { %7012 = vmatpush.bf16.msrb.mxu1 %v10126_v6  ;;  %7236 = vmatpush.bf16.msrb.mxu3 %v10212_v49 }
0x105d   :  { %7209 = vmatpush.bf16.msra.mxu1 %v10216_v45  ;;  %7237 = vmatpush.bf16.msrb.mxu3 %v10204_v62  ;;  %v11004_v45 = vld [vmem:[#allocation32 + $0x14] sm:$0xf0]  ;;  %v10329_v62 = vld [vmem:[#allocation26 + $0x90] sm:$0xf] }
0x105e   :  { %v10330_v12 = vor.u32 %v11044_v51, %v10329_v62  ;;  %v10353_v62 = vld [vmem:[#allocation26 + $0xc0] sm:$0xf]  ;;  %v11050_v51 = vld [vmem:[#allocation26 + $0xc8] sm:$0xf0] }
0x1061   :  { %7210 = vmatpush.bf16.msra.mxu1 %v10208_v56  ;;  %7238 = vmatpush.bf16.msrb.mxu3 %v10196_v23  ;;  %v11022_v56 = vld [vmem:[#allocation32 + $0xa4] sm:$0xf0] }
0x1062   :  { %v10240_v49 = vor.u32 %v11022_v56, %v10239_v53  ;;  %v11040_v53 = vld [vmem:[#allocation26 + $0x7c] sm:$0xf]  ;;  %v10319_v56 = vld [vmem:[#allocation26 + $0x84] sm:$0xf0] }
0x1065   :  { %7239 = vmatpush.bf16.msrb.mxu3 %v10188_v10 }
0x10c9   :  { %v6752_v5 = vpop.f32.mrf.mxu1 }
0x10ca   :  { %v6753_v19 = vadd.f32 1e-05, %v6752_v5  ;;  %v10177_v5 = vld [vmem:[#allocation32 + $0x28] sm:$0xf0] }
0x10cb   :  { %v10180_v6 = vor.u32 %v11005_v59, %v10177_v5 }
0x10cd   :  { %7240 = vmatpush.bf16.msrb.mxu3 %v10180_v6 }
0x10cf   :  { %v6772_v58 = vpop.f32.mrf.mxu0  ;;  %v6792_v28 = vpop.f32.mrf.mxu3 }
0x10d0   :  { %v6773_v37 = vadd.f32 %v6772_v58, %v6753_v19  ;;  %v6793_v8 = vadd.f32 1e-05, %v6792_v28  ;;  %v10247_v19 = vld [vmem:[#allocation32 + $0xb0] sm:$0xf]  ;;  %v10244_v28 = vor.u32 %v11021_v7, %v10241_v35  ;;  %v10317_v7 = vld [vmem:[#allocation26 + $0x78] sm:$0xf] }
0x10d1   :  { %v10248_v16 = vor.u32 %v11024_v26, %v10247_v19  ;;  %v10167_v58 = vld [vmem:[#allocation32 + $0x10] sm:$0xf]  ;;  %v11041_v35 = vld [vmem:[#allocation26 + $0x80] sm:$0xf0] }
0x10d2   :  { %11363 = vrsqrt.f32 %v6773_v37  ;;  %vm6821_vm9 = vweird.f32 %v6773_v37  ;;  %v10168_v25 = vor.u32 %v11004_v45, %v10167_v58  ;;  %7253 = vmatpush.bf16.msrb.mxu2 %v10244_v28  ;;  %v10318_v28 = vor.u32 %v11041_v35, %v10317_v7  ;;  %v11042_v35 = vld [vmem:[#allocation26 + $0x88] sm:$0xf0] }
0x10d3   :  { %7226 = vmatpush.bf16.msrb.mxu0 %v10248_v16 }
0x10d5   :  { %v6812_v50 = vpop.f32.mrf.mxu2 }
0x10d6   :  { %v6813_v22 = vadd.f32 %v6812_v50, %v6793_v8  ;;  %v10159_v8 = vld [vmem:[#allocation32] sm:$0xf]  ;;  %v11002_v50 = vld [vmem:[#allocation32 + $0x4] sm:$0xf0] }
0x10d7   :  { %7227 = vmatpush.bf16.msrb.mxu0 %v10240_v49  ;;  %v10389_v49 = vld [vmem:[#allocation26 + $0x108] sm:$0xf] }
0x10d8   :  { %v11364_v33 = vpop.eup %11363  ;;  %11365 = vrsqrt.f32 %v6813_v22  ;;  %vm6831_vm12 = vweird.f32 %v6813_v22 }
0x10d9   :  { %v6816_v0 = vmul.f32 %v11364_v33, %v6773_v37  ;;  %vm6822_vm8 = vweird.f32 %v11364_v33  ;;  %v10172_v37 = vor.u32 %v11003_v4, %v10169_v21 }
0x10da   :  { %vm6823_vm10 = vmor %vm6821_vm9, %vm6822_vm8 }
0x10db   :  { %v6817_v2 = vmul.f32 %v11364_v33, %v6816_v0  ;;  %7241 = vmatpush.bf16.msrb.mxu3 %v10172_v37  ;;  %v10161_v0 = vld [vmem:[#allocation32 + $0x8] sm:$0xf0] }
0x10dd   :  { %v6818_v54 = vmul.f32 0.5, %v6817_v2 }
0x10de   :  { %v11366_v24 = vpop.eup %11365 }
0x10df   :  { %v6819_v47 = vsub.f32 1.5, %v6818_v54  ;;  %v6826_v52 = vmul.f32 %v11366_v24, %v6813_v22  ;;  %vm6832_vm11 = vweird.f32 %v11366_v24  ;;  %v11001_v22 = vld [vmem:[#allocation32 + $0x4] sm:$0xf]  ;;  %v11019_v54 = vld [vmem:[#allocation32 + $0x94] sm:$0xf] }
0x10e0   :  { %vm6833_vm13 = vmor %vm6831_vm12, %vm6832_vm11  ;;  %v10164_v2 = vor.u32 %v11001_v22, %v10161_v0  ;;  %v11038_v0 = vld [vmem:[#allocation26 + $0x68] sm:$0xf0] }
0x10e1   :  { %v6820_v27 = vmul.f32 %v11364_v33, %v6819_v47  ;;  %v6827_v13 = vmul.f32 %v11366_v24, %v6826_v52  ;;  %v10231_v47 = vld [vmem:[#allocation32 + $0x90] sm:$0xf] }
0x10e2   :  { %7242 = vmatpush.bf16.msrb.mxu3 %v10164_v2  ;;  %v11037_v2 = vld [vmem:[#allocation26 + $0x64] sm:$0xf] }
0x10e3   :  { %v6824_v9 = vsel %vm6823_vm10, %v11364_v33, %v6820_v27  ;;  %v6828_v1 = vmul.f32 0.5, %v6827_v13  ;;  %v10160_v33 = vor.u32 %v11002_v50, %v10159_v8  ;;  %v11020_v27 = vld [vmem:[#allocation32 + $0x94] sm:$0xf0]  ;;  %v11059_v8 = vld [vmem:[#allocation26 + $0x110] sm:$0xf0]  ;;  %v10322_v50 = vor.u32 %v11040_v53, %v10319_v56 }
0x10e4   :  { %v6835_v18 = vmul.f32 %v6824_v9, %v14237_v60  ;;  %v10200_v60 = vor.u32 %v11012_v15, %v10199_v11  ;;  %v10232_v13 = vor.u32 %v11020_v27, %v10231_v47  ;;  %v11017_v9 = vld [vmem:[#allocation32 + $0x84] sm:$0xf]  ;;  %v11047_v15 = vld [vmem:[#allocation26 + $0xb0] sm:$0xf0]  ;;  %v10390_v22 = vor.u32 %v11059_v8, %v10389_v49  ;;  %v10377_v47 = vld [vmem:[#allocation26 + $0xf0] sm:$0xf] }
0x10e5   :  { %v6829_v34 = vsub.f32 1.5, %v6828_v1  ;;  %v10225_v1 = vld [vmem:[#allocation32 + $0x88] sm:$0xf0]  ;;  %v10341_v11 = vld [vmem:[#allocation26 + $0xa8] sm:$0xf] }
0x10e6   :  { %v6837_v48 = vpack.c.bf16 %v6835_v18, %v6835_v18  ;;  %7211 = vmatpush.bf16.msra.mxu1 %v10200_v60  ;;  %7228 = vmatpush.bf16.msrb.mxu0 %v10232_v13  ;;  %v10223_v18 = vld [vmem:[#allocation32 + $0x80] sm:$0xf]  ;;  %v10342_v60 = vor.u32 %v11047_v15, %v10341_v11  ;;  %v11056_v27 = vld [vmem:[#allocation26 + $0xf8] sm:$0xf0]  ;;  %v10281_v11 = vld [vmem:[#allocation26 + $0x30] sm:$0xf] }
0x10e7   :  { %v6830_v41 = vmul.f32 %v11366_v24, %v6829_v34  ;;  %v6863_v34 = vld [vmem:[#allocation28] sm:$0x3]  ;;  %v10378_v13 = vor.u32 %v11056_v27, %v10377_v47  ;;  %v11032_v15 = vld [vmem:[#allocation26 + $0x38] sm:$0xf0]  ;;  %v11049_v8 = vld [vmem:[#allocation26 + $0xc4] sm:$0xf] }
0x10e8   :  { %7000 = vmatmul.bf16.vlgmr.msra.gmra.mxu0 %v6837_v48  ;;  %7026 = vmatmul.bf16.vlgmr.msra.gmra.mxu2 %v6837_v48  ;;  %v10228_v48 = vor.u32 %v11017_v9, %v10225_v1  ;;  %v6866_v42 = vperm.slane %v6863_v34, 1  ;;  %v10293_v9 = vld [vmem:[#allocation26 + $0x48] sm:$0xf]  ;;  %v11035_v1 = vld [vmem:[#allocation26 + $0x50] sm:$0xf0]  ;;  %v14445_v47 = vmov 0  }
0x10e9   :  { %v6834_v3 = vsel %vm6833_vm13, %v11366_v24, %v6830_v41  ;;  %v10233_v24 = vld [vmem:[#allocation32 + $0x98] sm:$0xf0]  ;;  %v11018_v41 = vld [vmem:[#allocation32 + $0x84] sm:$0xf0]  ;;  %v11060_v56 = vld [vmem:[#allocation26 + $0x118] sm:$0xf0] }
0x10ea   :  { %v6836_v32 = vmul.f32 %v6834_v3, %v14241_v36  ;;  %7212 = vmatpush.bf16.msra.mxu1 %v10192_v61  ;;  %v10183_v36 = vld [vmem:[#allocation32 + $0x30] sm:$0xf]  ;;  %v10236_v52 = vor.u32 %v11019_v54, %v10233_v24  ;;  %v10224_v3 = vor.u32 %v11018_v41, %v10223_v18  ;;  %v10331_v61 = vld [vmem:[#allocation26 + $0x9c] sm:$0xf0]  ;;  %v10307_v24 = vld [vmem:[#allocation26 + $0x6c] sm:$0xf0] }
0x10eb   :  { %v10184_v31 = vor.u32 %v11008_v30, %v10183_v36  ;;  %v10334_v23 = vor.u32 %v11043_v43, %v10331_v61  ;;  %v11034_v18 = vld [vmem:[#allocation26 + $0x4c] sm:$0xf]  ;;  %v10365_v41 = vld [vmem:[#allocation26 + $0xd8] sm:$0xf]  ;;  %v10354_v43 = vor.u32 %v11050_v51, %v10353_v62  ;;  %v7080_v27 = vld [vmem:[#allocation31] sm:$0x3] }
0x10ec   :  { %v6838_v39 = vpack.c.bf16 %v6836_v32, %v6836_v32  ;;  %7254 = vmatpush.bf16.msrb.mxu2 %v10236_v52  ;;  %v6865_v32 = vperm.slane %v6863_v34, 0  ;;  %7229 = vmatpush.bf16.msrb.mxu0 %v10224_v3  ;;  %v10310_v52 = vor.u32 %v11037_v2, %v10307_v24  ;;  %v10294_v34 = vor.u32 %v11035_v1, %v10293_v9  ;;  %v11053_v3 = vld [vmem:[#allocation26 + $0xe0] sm:$0xf0]  ;;  %v11058_v61 = vld [vmem:[#allocation26 + $0x10c] sm:$0xf] }
0x10ed   :  { %v11057_v24 = vld [vmem:[#allocation26 + $0x100] sm:$0xf0]  ;;  %v10301_v9 = vld [vmem:[#allocation26 + $0x50] sm:$0xf]  ;;  %v11036_v1 = vld [vmem:[#allocation26 + $0x58] sm:$0xf0] }
0x10ee   :  { %10155 = vmatmul.msk.bf16.vlgmr.msrb.gmra.mxu1 %vm4252_vm6, %v6838_v39  ;;  %10156 = vmatmul.msk.bf16.vlgmr.msra.gmra.mxu3 %vm4252_vm6, %v6838_v39  ;;  %v10361_v62 = vld [vmem:[#allocation26 + $0xc8] sm:$0xf]  ;;  %v11051_v51 = vld [vmem:[#allocation26 + $0xd0] sm:$0xf0] }
0x10ef   :  { %7213 = vmatpush.bf16.msra.mxu1 %v10184_v31 }
0x10f0   :  { %7255 = vmatpush.bf16.msrb.mxu2 %v10228_v48  ;;  %7524 = vmatpush.bf16.msra.mxu0 %v10342_v60  ;;  %v10295_v48 = vld [vmem:[#allocation26 + $0x54] sm:$0xf0]  ;;  %v10282_v60 = vor.u32 %v11032_v15, %v10281_v11  ;;  %v11054_v15 = vld [vmem:[#allocation26 + $0xe8] sm:$0xf0] }
0x10f3   :  { %7214 = vmatpush.bf16.msra.mxu1 %v10176_v46 }
0x10f4   :  { %7550 = vmatpush.bf16.msra.mxu2 %v10346_v20  ;;  %7525 = vmatpush.bf16.msra.mxu0 %v10330_v12  ;;  %v10286_v20 = vor.u32 %v11031_v29, %v10283_v38  ;;  %v10391_v12 = vld [vmem:[#allocation26 + $0x114] sm:$0xf0]  ;;  %v11033_v38 = vld [vmem:[#allocation26 + $0x40] sm:$0xf0] }
0x10f5   :  { %v10289_v29 = vld [vmem:[#allocation26 + $0x38] sm:$0xf] }
0x10f7   :  { %7215 = vmatpush.bf16.msra.mxu1 %v10168_v25 }
0x10f8   :  { %7551 = vmatpush.bf16.msra.mxu2 %v10334_v23  ;;  %7526 = vmatpush.bf16.msra.mxu0 %v10318_v28  ;;  %v10349_v23 = vld [vmem:[#allocation26 + $0xb0] sm:$0xf] }
0x10f9   :  { %v10397_v28 = vld [vmem:[#allocation26 + $0x110] sm:$0xf] }
0x10fa   :  { %v10398_v49 = vor.u32 %v11060_v56, %v10397_v28  ;;  %v11209_v28 = vld [vmem:[#allocation2] ss:$0 sm:$0xff]  ;;  %v7614_v56 = vld [vmem:[%s12900_s23] sm:$0x3] }
0x10fb   :  { %7216 = vmatpush.bf16.msra.mxu1 %v10160_v33  ;;  %v10305_v33 = vld [vmem:[#allocation26 + $0x60] sm:$0xf] }
0x10fc   :  { %7552 = vmatpush.bf16.msra.mxu2 %v10322_v50  ;;  %v10306_v54 = vor.u32 %v11038_v0, %v10305_v33  ;;  %v10355_v50 = vld [vmem:[#allocation26 + $0xcc] sm:$0xf0]  ;;  %v11039_v0 = vld [vmem:[#allocation26 + $0x70] sm:$0xf0] }
0x10fd   :  { %v10358_v33 = vor.u32 %v11049_v8, %v10355_v50  ;;  %v11068_v50 = vld [vmem:[%s14446_s3 + $0x38] sm:$0xff] }
0x10fe   :  { %7527 = vmatpush.bf16.msra.mxu0 %v10306_v54  ;;  %v10385_v54 = vld [vmem:[#allocation26 + $0xf8] sm:$0xf] }
0x10ff   :  { %7541 = vmatpush.bf16.msrb.mxu1 %v10390_v22  ;;  %v10313_v22 = vld [vmem:[#allocation26 + $0x68] sm:$0xf] }
0x1100   :  { %7553 = vmatpush.bf16.msra.mxu2 %v10310_v52  ;;  %v10314_v2 = vor.u32 %v11039_v0, %v10313_v22  ;;  %v7645_v52 = vsel %vm7643_vm14, 65535, %v14445_v47  ;;  %v11067_v22 = vld [vmem:[%s14446_s3 + $0x30] sm:$0xff]  ;;  %v7321_v0 = vld [vmem:[%s14447_s21] sm:$0x7]  ;;  %v11064_v47 = vld [vmem:[%s14446_s3 + $0x18] sm:$0xff] }
0x1102   :  { %7528 = vmatpush.bf16.msra.mxu0 %v10294_v34  ;;  %v7622_v34 = vld [vmem:[#allocation64] sm:$0x3] }
0x1103   :  { %7542 = vmatpush.bf16.msrb.mxu1 %v10378_v13  ;;  %v10386_v13 = vor.u32 %v11057_v24, %v10385_v54  ;;  %v7323_v24 = vperm.slane %v7321_v0, 0 }
0x1106   :  { %7529 = vmatpush.bf16.msra.mxu0 %v10282_v60 }
0x1165   :  { %v7001_v39 = vpop.f32.mrf.mxu0 }
0x1166   :  { %v7002_v36 = vadd.f32 %v7001_v39, %v6865_v32  ;;  %v10298_v32 = vor.u32 %v11034_v18, %v10295_v48  ;;  %v10366_v39 = vor.u32 %v11053_v3, %v10365_v41  ;;  %v7621_v48 = vld [vmem:[#allocation65] sm:$0x1]  ;;  %v10302_v41 = vor.u32 %v11036_v1, %v10301_v9 }
0x1167   :  { %v10373_v3 = vld [vmem:[#allocation26 + $0xe0] sm:$0xf]  ;;  %v7647_v11 = vand.u32 %v7645_v52, %v7621_v48  ;;  %v7324_v1 = vperm.slane %v7321_v0, 1  ;;  %v11062_v48 = vld [vmem:[%s14446_s3 + $0x8] sm:$0xff] }
0x1168   :  { %7554 = vmatpush.bf16.msra.mxu2 %v10298_v32  ;;  %7543 = vmatpush.bf16.msrb.mxu1 %v10366_v39  ;;  %v7082_v32 = vperm.slane %v7080_v27, 0  ;;  %v7624_v39 = vsel %vm904_vm0, %v7622_v34, 0  ;;  %v10374_v60 = vor.u32 %v11054_v15, %v10373_v3  ;;  %v11061_v15 = vld [vmem:[%s14446_s3] sm:$0xff] }
0x116b   :  { %v7014_v30 = vpop.f32.mrf.mxu1  ;;  %v7027_v55 = vpop.f32.mrf.mxu2 }
0x116c   :  { %v7015_v31 = vadd.f32 %v7014_v30, %v7002_v36  ;;  %v7028_v44 = vadd.f32 %v7027_v55, %v6866_v42  ;;  %v10394_v36 = vor.u32 %v11058_v61, %v10391_v12  ;;  %v11048_v30 = vld [vmem:[#allocation26 + $0xb8] sm:$0xf0]  ;;  %7555 = vmatpush.bf16.msra.mxu2 %v10286_v20  ;;  %v11029_v42 = vld [vmem:[#allocation26 + $0x20] sm:$0xf0]  ;;  %7544 = vmatpush.bf16.msrb.mxu1 %v10354_v43  ;;  %v10277_v61 = vld [vmem:[#allocation26 + $0x20] sm:$0xf] }
0x116d   :  { %v7003_v10 = vpop.f32.mrf.mxu0  ;;  %v10350_v55 = vor.u32 %v11048_v30, %v10349_v23  ;;  %v10290_v20 = vor.u32 %v11033_v38, %v10289_v29  ;;  %v10362_v43 = vor.u32 %v11051_v51, %v10361_v62  ;;  %v11030_v12 = vld [vmem:[#allocation26 + $0x28] sm:$0xf0]  ;;  %v11076_v51 = vld [vmem:[%s12895_s16 + $0x38] sm:$0xff] }
0x116e   :  { %v7044_v57 = vmul.f32 0.5, %v7015_v31  ;;  %v11028_v10 = vld [vmem:[#allocation26 + $0x1c] sm:$0xf]  ;;  %7567 = vmatpush.bf16.msra.mxu3 %v10394_v36 }
0x1170   :  { %11367 = vtanh.f32 %v7044_v57 }
0x1171   :  { %v7040_v59 = vpop.f32.mrf.mxu3 }
0x1172   :  { %v7041_v46 = vadd.f32 %v7040_v59, %v7028_v44  ;;  %v10271_v44 = vld [vmem:[#allocation26 + $0x24] sm:$0xf0] }
0x1173   :  { %v7016_v5 = vpop.f32.mrf.mxu1  ;;  %v7029_v6 = vpop.f32.mrf.mxu2  ;;  %v10274_v59 = vor.u32 %v11028_v10, %v10271_v44  ;;  %v10265_v44 = vld [vmem:[#allocation26 + $0x8] sm:$0xf] }
0x1174   :  { %v7045_v40 = vmul.f32 0.5, %v7041_v46  ;;  %v10379_v5 = vld [vmem:[#allocation26 + $0xfc] sm:$0xf0]  ;;  %v10337_v6 = vld [vmem:[#allocation26 + $0x98] sm:$0xf] }
0x1175   :  { %7556 = vmatpush.bf16.msra.mxu2 %v10274_v59  ;;  %v11027_v59 = vld [vmem:[#allocation26 + $0x10] sm:$0xf0] }
0x1176   :  { %v11368_v63 = vpop.eup %11367  ;;  %11369 = vtanh.f32 %v7045_v40 }
0x1177   :  { %v7048_v19 = vadd.f32 1.0, %v11368_v63  ;;  %v11045_v63 = vld [vmem:[#allocation26 + $0xa0] sm:$0xf0] }
0x1179   :  { %v7050_v14 = vmul.f32 0.5, %v7048_v19  ;;  %v7042_v26 = vpop.f32.mrf.mxu3  ;;  %v10338_v19 = vor.u32 %v11045_v63, %v10337_v6 }
0x117a   :  { %v11026_v26 = vld [vmem:[#allocation26 + $0x8] sm:$0xf0] }
0x117b   :  { %v7052_v16 = vmul.f32 %v7050_v14, %v7015_v31  ;;  %v10269_v31 = vld [vmem:[#allocation26 + $0x18] sm:$0xf]  ;;  %v10257_v14 = vld [vmem:[#allocation26] sm:$0xf] }
0x117c   :  { %v11370_v58 = vpop.eup %11369  ;;  %v10270_v57 = vor.u32 %v11029_v42, %v10269_v31  ;;  %v7083_v31 = vperm.slane %v7080_v27, 1  ;;  %v10278_v42 = vor.u32 %v11030_v12, %v10277_v61  ;;  %v11075_v12 = vld [vmem:[%s12895_s16 + $0x30] sm:$0xff] }
0x117d   :  { %v7054_v45 = vpack.c.bf16 %v7052_v16, %v7052_v16  ;;  %v7049_v4 = vadd.f32 1.0, %v11370_v58  ;;  %v11025_v16 = vld [vmem:[#allocation26 + $0x4] sm:$0xf]  ;;  %v10258_v58 = vor.u32 %v11026_v26, %v10257_v14 }
0x117e   :  { %7530 = vmatpush.bf16.msra.mxu0 %v10270_v57 }
0x117f   :  { %v7051_v25 = vmul.f32 0.5, %v7049_v4  ;;  %7217 = vmatmul.bf16.vlgmr.msra.gmra.mxu1 %v7054_v45  ;;  %7243 = vmatmul.bf16.vlgmr.msrb.gmra.mxu3 %v7054_v45  ;;  %v10259_v45 = vld [vmem:[#allocation26 + $0xc] sm:$0xf0] }
0x1180   :  { %7576 = vmatpush.bf16.msra.mxu1 %v10350_v55  ;;  %v10262_v4 = vor.u32 %v11025_v16, %v10259_v45 }
0x1181   :  { %v7053_v21 = vmul.f32 %v7051_v25, %v7041_v46  ;;  %v11055_v46 = vld [vmem:[#allocation26 + $0xf4] sm:$0xf]  ;;  %v11052_v25 = vld [vmem:[#allocation26 + $0xdc] sm:$0xf] }
0x1182   :  { %v10382_v40 = vor.u32 %v11055_v46, %v10379_v5  ;;  %7531 = vmatpush.bf16.msra.mxu0 %v10258_v58  ;;  %7557 = vmatpush.bf16.msra.mxu2 %v10262_v4  ;;  %v10266_v5 = vor.u32 %v11027_v59, %v10265_v44 }
0x1183   :  { %v7055_v37 = vpack.c.bf16 %v7053_v21, %v7053_v21  ;;  %v10367_v21 = vld [vmem:[#allocation26 + $0xe4] sm:$0xf0] }
0x1184   :  { %7568 = vmatpush.bf16.msra.mxu3 %v10382_v40  ;;  %7577 = vmatpush.bf16.msra.mxu1 %v10338_v19  ;;  %v10370_v7 = vor.u32 %v11052_v25, %v10367_v21 }
0x1185   :  { %10253 = vmatmul.msk.bf16.vlgmr.msrb.gmra.mxu0 %vm4252_vm6, %v7055_v37  ;;  %10254 = vmatmul.msk.bf16.vlgmr.msrb.gmra.mxu2 %vm4252_vm6, %v7055_v37  ;;  %v10325_v37 = vld [vmem:[#allocation26 + $0x80] sm:$0xf] }
0x1186   :  { %v10326_v53 = vor.u32 %v11042_v35, %v10325_v37  ;;  %7593 = vmatpush.bf16.msrb.mxu0 %v10398_v49  ;;  %7656 = vmatpush.bf16.msrb.mxu2 %v7647_v11  ;;  %v7619_v49 = vmul.f32 %v11209_v28, %v7614_v56  ;;  %v11071_v28 = vld [vmem:[%s12895_s16 + $0x10] sm:$0xff]  ;;  %v11070_v56 = vld [vmem:[%s12895_s16 + $0x8] sm:$0xff] }
0x1188   :  { %7569 = vmatpush.bf16.msra.mxu3 %v10370_v7  ;;  %7578 = vmatpush.bf16.msra.mxu1 %v10326_v53  ;;  %v7620_v8 = vpack.c.bf16 %v7619_v49, %v7619_v49  ;;  %v11069_v49 = vld [vmem:[%s12895_s16] sm:$0xff] }
0x118a   :  { %7594 = vmatpush.bf16.msrb.mxu0 %v10386_v13 }
0x118c   :  { %7570 = vmatpush.bf16.msra.mxu3 %v10358_v33  ;;  %7579 = vmatpush.bf16.msra.mxu1 %v10314_v2  ;;  %v11066_v33 = vld [vmem:[%s14446_s3 + $0x28] sm:$0xff]  ;;  %v11065_v2 = vld [vmem:[%s14446_s3 + $0x20] sm:$0xff] }
0x118e   :  { %7595 = vmatpush.bf16.msrb.mxu0 %v10374_v60 }
0x1190   :  { %7633 = vmatpush.bf16.msrb.mxu3 %v7624_v39  ;;  %7580 = vmatpush.bf16.msra.mxu1 %v10302_v41 }
0x1192   :  { %7596 = vmatpush.bf16.msrb.mxu0 %v10362_v43 }
0x1194   :  { %7581 = vmatpush.bf16.msra.mxu1 %v10290_v20  ;;  %v7325_v20 = vperm.slane %v7321_v0, 2 }
0x1198   :  { %7582 = vmatpush.bf16.msra.mxu1 %v10278_v42 }
0x119c   :  { %7583 = vmatpush.bf16.msra.mxu1 %v10266_v5 }
0x11fc   :  { %v7218_v18 = vpop.f32.mrf.mxu1 }
0x11fd   :  { %v7219_v23 = vadd.f32 %v7218_v18, %v7082_v32 }
0x1202   :  { %v7231_v36 = vpop.f32.mrf.mxu0  ;;  %v7244_v30 = vpop.f32.mrf.mxu3 }
0x1203   :  { %v7232_v55 = vadd.f32 %v7231_v36, %v7219_v23  ;;  %v7245_v46 = vadd.f32 %v7244_v30, %v7083_v31 }
0x1204   :  { %v7220_v10 = vpop.f32.mrf.mxu1 }
0x1205   :  { %v7261_v57 = vmul.f32 0.5, %v7232_v55  ;;  %v11074_v10 = vld [vmem:[%s12895_s16 + $0x28] sm:$0xff] }
0x1207   :  { %11371 = vtanh.f32 %v7261_v57 }
0x1208   :  { %v7257_v6 = vpop.f32.mrf.mxu2 }
0x1209   :  { %v7258_v40 = vadd.f32 %v7257_v6, %v7245_v46  ;;  %v11210_v46 = vld [vmem:[#allocation59] ss:$0 sm:$0xff] }
0x120a   :  { %v7233_v63 = vpop.f32.mrf.mxu0  ;;  %v7246_v19 = vpop.f32.mrf.mxu3 }
0x120b   :  { %v7262_v14 = vmul.f32 0.5, %v7258_v40 }
0x120d   :  { %v11372_v26 = vpop.eup %11371  ;;  %11373 = vtanh.f32 %v7262_v14 }
0x120e   :  { %v7265_v16 = vadd.f32 1.0, %v11372_v26 }
0x1210   :  { %v7267_v58 = vmul.f32 0.5, %v7265_v16  ;;  %v7259_v45 = vpop.f32.mrf.mxu2 }
0x1212   :  { %v7269_v4 = vmul.f32 %v7267_v58, %v7232_v55 }
0x1213   :  { %v11374_v25 = vpop.eup %11373 }
0x1214   :  { %v7271_v21 = vpack.c.bf16 %v7269_v4, %v7269_v4  ;;  %v7266_v37 = vadd.f32 1.0, %v11374_v25 }
0x1216   :  { %v7268_v7 = vmul.f32 0.5, %v7266_v37  ;;  %7532 = vmatmul.bf16.vlgmr.msra.gmra.mxu0 %v7271_v21  ;;  %7558 = vmatmul.bf16.vlgmr.msra.gmra.mxu2 %v7271_v21 }
0x1217   :  { %7741 = vmatpush.bf16.msra.mxu0 %v11068_v50 }
0x1218   :  { %v7270_v35 = vmul.f32 %v7268_v7, %v7258_v40 }
0x121a   :  { %v7272_v53 = vpack.c.bf16 %v7270_v35, %v7270_v35  ;;  %v11073_v35 = vld [vmem:[%s12895_s16 + $0x20] sm:$0xff] }
0x121b   :  { %7742 = vmatpush.bf16.msra.mxu0 %v11067_v22 }
0x121c   :  { %10399 = vmatmul.msk.bf16.vlgmr.msrb.gmra.mxu1 %vm4252_vm6, %v7272_v53  ;;  %10400 = vmatmul.msk.bf16.vlgmr.msra.gmra.mxu3 %vm4252_vm6, %v7272_v53 }
0x121d   :  { %7828 = vmatpush.bf16.msra.mxu3 %v11076_v51 }
0x121f   :  { %7743 = vmatpush.bf16.msra.mxu0 %v11066_v33 }
0x1221   :  { %7829 = vmatpush.bf16.msra.mxu3 %v11075_v12 }
0x1223   :  { %7744 = vmatpush.bf16.msra.mxu0 %v11065_v2 }
0x1225   :  { %7830 = vmatpush.bf16.msra.mxu3 %v11074_v10 }
0x1226   :  { %10401 = vmatmul.msk.bf16.vlgmr.msrb.gmra.mxu0 %vm4252_vm6, %v7272_v53  ;;  %10403 = vmatmul.msk.bf16.vlgmr.msrb.gmra.mxu2 %vm7639_vm15, %v7620_v8  ;;  %v11072_v53 = vld [vmem:[%s12895_s16 + $0x18] sm:$0xff]  ;;  %v11211_v8 = vld [vmem:[#allocation61] ss:$0 sm:$0xff] }
0x1227   :  { %7745 = vmatpush.bf16.msra.mxu0 %v11064_v47 }
0x1229   :  { %7831 = vmatpush.bf16.msra.mxu3 %v11073_v35 }
0x122c   :  { %7584 = vmatmul.bf16.vlgmr.msra.gmra.mxu1 %v7271_v21  ;;  %10402 = vmatmul.msk.bf16.vlgmr.msrb.gmra.mxu3 %vm900_vm1, %v14443_v17  ;;  %v11063_v17 = vld [vmem:[%s14446_s3 + $0x10] sm:$0xff] }
0x122d   :  { %7746 = vmatpush.bf16.msra.mxu0 %v11063_v17  ;;  %7832 = vmatpush.bf16.msra.mxu3 %v11072_v53 }
0x1231   :  { %7747 = vmatpush.bf16.msra.mxu0 %v11062_v48  ;;  %7833 = vmatpush.bf16.msra.mxu3 %v11071_v28 }
0x1235   :  { %7748 = vmatpush.bf16.msra.mxu0 %v11061_v15  ;;  %7834 = vmatpush.bf16.msra.mxu3 %v11070_v56 }
0x1239   :  { %7835 = vmatpush.bf16.msra.mxu3 %v11069_v49 }
0x1293   :  { %v7533_v54 = vpop.f32.mrf.mxu0 }
0x1294   :  { %v7534_v52 = vadd.f32 %v7533_v54, %v7323_v24 }
0x1299   :  { %v7546_v27 = vpop.f32.mrf.mxu1  ;;  %v7559_v13 = vpop.f32.mrf.mxu2 }
0x129a   :  { %v7547_v9 = vadd.f32 %v7546_v27, %v7534_v52  ;;  %v7560_v41 = vadd.f32 %v7559_v13, %v7324_v1  ;;  %v11212_v27 = vld [vmem:[#allocation62] ss:$0 sm:$0xff] }
0x129b   :  { %v7535_v18 = vpop.f32.mrf.mxu0 }
0x129c   :  { %v7602_v34 = vmul.f32 0.5, %v7547_v9 }
0x129e   :  { %11375 = vtanh.f32 %v7602_v34 }
0x129f   :  { %v7572_v3 = vpop.f32.mrf.mxu3 }
0x12a0   :  { %v7573_v32 = vadd.f32 %v7572_v3, %v7560_v41 }
0x12a1   :  { %v7548_v39 = vpop.f32.mrf.mxu1  ;;  %v7561_v11 = vpop.f32.mrf.mxu2 }
0x12a2   :  { %v7603_v29 = vmul.f32 0.5, %v7573_v32 }
0x12a3   :  { %v7598_v60 = vpop.f32.mrf.mxu0 }
0x12a4   :  { %v11376_v38 = vpop.eup %11375  ;;  %11377 = vtanh.f32 %v7603_v29 }
0x12a5   :  { %v7608_v62 = vadd.f32 1.0, %v11376_v38 }
0x12a7   :  { %v7611_v43 = vmul.f32 0.5, %v7608_v62  ;;  %v7574_v61 = vpop.f32.mrf.mxu3 }
0x12a9   :  { %7846 = vst [vmem:[%s12910_s20 + $0x2] sm:$0x3] %v7611_v43  ;;  %v7585_v23 = vpop.f32.mrf.mxu1  ;;  %v7658_v36 = vpop.f32.mrf.mxu2 }
0x12aa   :  { %v11378_v30 = vpop.eup %11377  ;;  %v7586_v55 = vadd.f32 %v7585_v23, %v7325_v20 }
0x12ab   :  { %v7609_v31 = vadd.f32 1.0, %v11378_v30  ;;  %v7600_v42 = vpop.f32.mrf.mxu0 }
0x12ac   :  { %v7599_v57 = vadd.f32 %v7598_v60, %v7586_v55 }
0x12ad   :  { %v7612_v44 = vmul.f32 0.5, %v7609_v31 }
0x12ae   :  { %v7604_v59 = vmul.f32 0.5, %v7599_v57 }
0x12af   :  { %7847 = vst [vmem:[%s12910_s20 + $0x4] sm:$0x3] %v7612_v44  ;;  %v7635_v5 = vpop.f32.mrf.mxu3 }
0x12b0   :  { %11379 = vtanh.f32 %v7604_v59  ;;  %v7659_v6 = vadd.f32 %v7658_v36, %v7635_v5 }
0x12b1   :  { %v7587_v40 = vpop.f32.mrf.mxu1  ;;  %v7660_v63 = vpop.f32.mrf.mxu2 }
0x12b2   :  { %v7666_v19 = vadd.f32 %v11210_v46, %v7659_v6 }
0x12b4   :  { %v7667_v14 = vmul.f32 0.5, %v7666_v19 }
0x12b6   :  { %v11380_v26 = vpop.eup %11379  ;;  %11381 = vtanh.f32 %v7667_v14 }
0x12b7   :  { %v7610_v16 = vadd.f32 1.0, %v11380_v26  ;;  %v7637_v58 = vpop.f32.mrf.mxu3 }
0x12b9   :  { %v7613_v45 = vmul.f32 0.5, %v7610_v16 }
0x12bb   :  { %7848 = vst [vmem:[%s12910_s20 + $0x6] sm:$0x3] %v7613_v45 }
0x12bc   :  { %v11382_v4 = vpop.eup %11381 }
0x12bd   :  { %v7669_v25 = vadd.f32 1.0, %v11382_v4 }
0x12bf   :  { %v7670_v21 = vmul.f32 0.5, %v7669_v25 }
0x12c1   :  { %v7671_v37 = vmul.f32 %v7670_v21, %v7666_v19 }
0x12c3   :  { %v7672_v7 = vpack.c.bf16 %v7671_v37, %v7671_v37 }
0x12c5   :  { %7749 = vmatmul.bf16.vlgmr.msra.gmra.mxu0 %v7672_v7 }
0x1342   :  { %v7750_v50 = vpop.f32.mrf.mxu0 }
0x1343   :  { %v7751_v22 = vadd.f32 %v11211_v8, %v7750_v50 }
0x1345   :  { %v7754_v33 = vmul.f32 0.5, %v7751_v22 }
0x1347   :  { %11383 = vtanh.f32 %v7754_v33 }
0x134a   :  { %v7752_v0 = vpop.f32.mrf.mxu0 }
0x134d   :  { %v11384_v2 = vpop.eup %11383 }
0x134e   :  { %v7756_v54 = vadd.f32 1.0, %v11384_v2 }
0x1350   :  { %v7757_v24 = vmul.f32 0.5, %v7756_v54 }
0x1352   :  { %v7758_v47 = vmul.f32 %v7757_v24, %v7751_v22 }
0x1354   :  { %v7759_v52 = vpack.c.bf16 %v7758_v47, %v7758_v47 }
0x1356   :  { %7836 = vmatmul.bf16.vlgmr.msra.gmra.mxu3 %v7759_v52 }
0x13d9   :  { %v7837_v13 = vpop.f32.mrf.mxu3 }
0x13da   :  { %v7838_v17 = vadd.f32 %v11212_v27, %v7837_v13 }
0x13dc   :  { %v7841_v9 = vmul.f32 0.5, %v7838_v17 }
0x13de   :  { %11385 = vtanh.f32 %v7841_v9 }
0x13e1   :  { %v7839_v1 = vpop.f32.mrf.mxu3 }
0x13e4   :  { %v11386_v18 = vpop.eup %11385 }
0x13e5   :  { %v7843_v34 = vadd.f32 1.0, %v11386_v18 }
0x13e7   :  { %v7844_v48 = vmul.f32 0.5, %v7843_v34 }
0x13e9   :  { %7849 = vst [vmem:[%s12910_s20 + $0x8] sm:$0x3] %v7844_v48 }
0x13ea   :  { %7854 = vsyncpa [#allocation4], 1 }
0x13eb   :  { %7855 = vsyncpa [#allocation6], 1 }
0x13ec   :  { %7856 = vsyncpa [#allocation9], 1 }
0x13ed   :  { %7857 = vsyncpa [#allocation12], 1 }
0x13ee   :  { %7858 = vsyncpa [#allocation15], 1 }
0x13ef   :  { %7859 = vsyncpa [#allocation18], 1 }
0x13f0   :  { %7860 = vsyncpa [#allocation21], 1 }
0x13f1   :  { %7861 = vsyncpa [#allocation24], 1 }
0x13f2   :  { %7862 = vsyncpa [#allocation27], 1 }
0x13f3   :  { %7863 = vsyncpa [#allocation30], 1 }
0x13f4   :  { %7864 = vsyncpa [#allocation33], 1 }
0x13f5   :  { %7865 = vsyncpa [#allocation36], 1 }
0x13f6   :  { %7866 = vsyncpa [#allocation39], 1 }
0x13f7   :  { %7867 = vsyncpa [#allocation42], 1 }
0x13f8   :  { %7868 = vsyncpa [#allocation45], 1 }
0x13f9   :  { %7869 = vsyncpa [#allocation48], 1 }
0x13fa   :  { %7870 = vsyncpa [#allocation51], 1 }
0x13fb   :  { %7871 = vsyncpa [#allocation54], 1 }
0x13fc   :  { %7872 = vsyncpa [#allocation57], 1 }
0x13fd   :  { %7873 = vsyncpa [#allocation60], 1 }
0x13fe   :  { %7874 = vsyncpa [#allocation63], 1 }
0x13ff   :  { %7875 = vsyncpa [#allocation66], 1 }

</bundles_post_ra>
